<compile_context>
chip_gen: v7x
topology: tpu7x:2x2x1
jax: 0.10.0
libtpu: 0.0.40
codegen_flags: <defaults>
</compile_context>

<pallas_src>
import jax
import jax.numpy as jnp
import numpy as np
from jax.experimental import pallas as pl
from jax.experimental.pallas import tpu as pltpu


_VMEM_LIMIT = 48 * 1024 * 1024


# -----------------------------------------------------------------------------
# Pallas kernels
# -----------------------------------------------------------------------------

def conv1_lrelu_kernel(pat_ref, w_ref, b_ref, o_ref):
    """Paired conv1 tile: (tm, 96)bf16 @ blockdiag(w,w)(96,128)bf16 -> f32,
    + tiled bias, LeakyReLU(0.2).  Output is a full 128-lane slab."""
    acc = jnp.dot(pat_ref[...], w_ref[...], preferred_element_type=jnp.float32)
    acc = acc + b_ref[...]
    o_ref[...] = jnp.where(acc > 0, acc, 0.2 * acc).astype(o_ref.dtype)


def conv_bn_lrelu_kernel(pat_ref, w_ref, b_ref, g_ref, be_ref, o_ref):
    """Fused conv + bias + BatchNorm (biased batch stats over all rows) + LeakyReLU.

    Runs with grid=(1,) so the whole (M, C) conv output is resident and the
    mean/var reduction over axis 0 matches nn.BatchNorm2d's (N, H, W) reduction.
    """
    acc = jnp.dot(pat_ref[...], w_ref[...], preferred_element_type=jnp.float32)
    acc = acc + b_ref[...]
    mean = jnp.mean(acc, axis=0, keepdims=True)
    xc = acc - mean                                       # hoisted, reused twice
    var = jnp.mean(xc * xc, axis=0, keepdims=True)        # biased, as PyTorch
    y = xc * jax.lax.rsqrt(var + 1e-5) * g_ref[...] + be_ref[...]
    o_ref[...] = jnp.where(y > 0, y, 0.2 * y).astype(o_ref.dtype)


def conv_bn_lrelu_head_kernel(pat_ref, w_ref, b_ref, g_ref, be_ref,
                              wl_ref, bl_ref, o_ref):
    """Fused conv3 + BN + LeakyReLU + Linear(16384,1) + Sigmoid.

    Head is a lane-dense VPU multiply + reductions (no N=1 MXU matmul, no Python
    per-batch loop): wl_ref is (hw, C) in NHWC-flatten order; rows of the conv
    output are ordered (b, h, w), so reshape to (B, hw, C) and reduce.
    """
    acc = jnp.dot(pat_ref[...], w_ref[...], preferred_element_type=jnp.float32)
    acc = acc + b_ref[...]
    mean = jnp.mean(acc, axis=0, keepdims=True)
    xc = acc - mean
    var = jnp.mean(xc * xc, axis=0, keepdims=True)
    y = xc * jax.lax.rsqrt(var + 1e-5) * g_ref[...] + be_ref[...]
    y = jnp.where(y > 0, y, 0.2 * y)                      # (B*hw, C) f32

    batch = o_ref.shape[0]
    hw, c = wl_ref.shape
    z = y.reshape(batch, hw, c) * wl_ref[...]             # broadcast over batch
    s = jnp.sum(jnp.sum(z, axis=2, keepdims=True),        # lane reduce
                axis=1, keepdims=True)                    # sublane reduce -> (B,1,1)
    s = s + bl_ref[...]
    o_ref[...] = 1.0 / (1.0 + jnp.exp(-s))                # sigmoid


# -----------------------------------------------------------------------------
# Wrappers
# -----------------------------------------------------------------------------

def _im2col_nhwc(x, k=4, s=2, p=1):
    """NHWC patch extraction -> (B*Ho*Wo, k*k*C) with K ordered (kh, kw, Cin)."""
    B, H, W, C = x.shape
    xp = jnp.pad(x, ((0, 0), (p, p), (p, p), (0, 0)))
    Ho = (H + 2 * p - k) // s + 1
    Wo = (W + 2 * p - k) // s + 1
    slabs = [xp[:, i:i + s * Ho:s, j:j + s * Wo:s, :]
             for i in range(k) for j in range(k)]         # each (B, Ho, Wo, C)
    pat = jnp.stack(slabs, axis=3)                        # (B, Ho, Wo, k*k, C)
    return pat.reshape(B * Ho * Wo, k * k * C), Ho, Wo


def conv1_lrelu(pat_pair, w_bd, b2x):
    M2, K2 = pat_pair.shape                               # (B*512, 96)
    N2 = w_bd.shape[1]                                    # 128
    tm = min(512, M2)                                     # M2 = B*512 -> divides
    return pl.pallas_call(
        conv1_lrelu_kernel,
        out_shape=jax.ShapeDtypeStruct((M2, N2), jnp.bfloat16),
        grid=(M2 // tm,),
        in_specs=[
            pl.BlockSpec((tm, K2), lambda i: (i, 0)),
            pl.BlockSpec((K2, N2), lambda i: (0, 0)),
            pl.BlockSpec((1, N2), lambda i: (0, 0)),
        ],
        out_specs=pl.BlockSpec((tm, N2), lambda i: (i, 0)),
        compiler_params=pltpu.CompilerParams(
            dimension_semantics=("parallel",),
            vmem_limit_bytes=_VMEM_LIMIT),
    )(pat_pair, w_bd, b2x)


def conv_bn_lrelu(pat, w, b, g, be):
    M, K = pat.shape
    N = w.shape[1]
    return pl.pallas_call(
        conv_bn_lrelu_kernel,
        out_shape=jax.ShapeDtypeStruct((M, N), jnp.bfloat16),
        grid=(1,),
        in_specs=[
            pl.BlockSpec((M, K), lambda i: (0, 0)),
            pl.BlockSpec((K, N), lambda i: (0, 0)),
            pl.BlockSpec((1, N), lambda i: (0, 0)),
            pl.BlockSpec((1, N), lambda i: (0, 0)),
            pl.BlockSpec((1, N), lambda i: (0, 0)),
        ],
        out_specs=pl.BlockSpec((M, N), lambda i: (0, 0)),
        compiler_params=pltpu.CompilerParams(
            dimension_semantics=("arbitrary",),
            vmem_limit_bytes=_VMEM_LIMIT),
    )(pat, w, b, g, be)


def conv_bn_lrelu_head(pat, w, b, g, be, wl, bl, batch):
    M, K = pat.shape
    N = w.shape[1]
    hw = M // batch
    out = pl.pallas_call(
        conv_bn_lrelu_head_kernel,
        out_shape=jax.ShapeDtypeStruct((batch, 1, 1), jnp.float32),
        grid=(1,),
        in_specs=[
            pl.BlockSpec((M, K), lambda i: (0, 0)),
            pl.BlockSpec((K, N), lambda i: (0, 0)),
            pl.BlockSpec((1, N), lambda i: (0, 0)),
            pl.BlockSpec((1, N), lambda i: (0, 0)),
            pl.BlockSpec((1, N), lambda i: (0, 0)),
            pl.BlockSpec((hw, N), lambda i: (0, 0)),
            pl.BlockSpec((1, 1), lambda i: (0, 0)),
        ],
        out_specs=pl.BlockSpec((batch, 1, 1), lambda i: (0, 0, 0)),
        compiler_params=pltpu.CompilerParams(
            dimension_semantics=("arbitrary",),
            vmem_limit_bytes=_VMEM_LIMIT),
    )(pat, w, b, g, be, wl, bl)
    return out.reshape(batch, 1)


def pack_params(p):
    """One-time host-side repack.

    * conv weights OIHW -> (kh*kw*Cin, Cout) bf16 (K ordered (kh, kw, cin)).
    * conv1 weight duplicated into a block-diagonal (96, 128) so the kernel
      processes patch-row pairs and emits a full 128-lane output; bias tiled 2x.
    * Linear weight permuted to NHWC-flatten order (hw, C) f32; scalars -> (1, N).
    """
    def conv_w(w):
        return jnp.transpose(w, (2, 3, 1, 0)).reshape(-1, w.shape[0])

    w1 = conv_w(p["w1"])                                   # (48, 64) f32
    k1, n1 = w1.shape
    w1_bd = jnp.zeros((2 * k1, 2 * n1), jnp.float32)
    w1_bd = w1_bd.at[:k1, :n1].set(w1).at[k1:, n1:].set(w1)
    b1_2x = jnp.concatenate([p["b1"], p["b1"]]).reshape(1, 2 * n1)

    wl = jnp.transpose(p["wl"].reshape(256, 8, 8), (1, 2, 0)).reshape(64, 256)

    return {
        "w1": w1_bd.astype(jnp.bfloat16), "b1": b1_2x.astype(jnp.float32),
        "w2": conv_w(p["w2"]).astype(jnp.bfloat16), "b2": p["b2"].reshape(1, -1),
        "g2": p["g2"].reshape(1, -1), "be2": p["be2"].reshape(1, -1),
        "w3": conv_w(p["w3"]).astype(jnp.bfloat16), "b3": p["b3"].reshape(1, -1),
        "g3": p["g3"].reshape(1, -1), "be3": p["be3"].reshape(1, -1),
        "wl": wl.astype(jnp.float32), "bl": p["bl"].reshape(1, 1),
    }


def discriminator_forward(x, pp):
    """x: (B, 3, 64, 64) f32 NCHW -> (B, 1) sigmoid scores."""
    B = x.shape[0]
    # Single small layout fix-up + bf16 cast; NHWC (channels lane-dense) after.
    h = jnp.transpose(x, (0, 2, 3, 1)).astype(jnp.bfloat16)

    # Conv1 (3->64) + LeakyReLU; patch rows paired -> lane-dense (M/2, 128) out.
    pat, Ho, Wo = _im2col_nhwc(h)                          # (B*1024, 48)
    pat = pat.reshape(-1, 2 * pat.shape[1])                # (B*512, 96)
    y = conv1_lrelu(pat, pp["w1"], pp["b1"])               # (B*512, 128) bf16
    h = y.reshape(B, Ho, Wo, 64)                           # same bytes, no copy

    # Conv2 (64->128) + BN + LeakyReLU, fused.
    pat, Ho, Wo = _im2col_nhwc(h)                          # (B*256, 1024)
    y = conv_bn_lrelu(pat, pp["w2"], pp["b2"], pp["g2"], pp["be2"])
    h = y.reshape(B, Ho, Wo, 128)

    # Conv3 (128->256) + BN + LeakyReLU + Linear(16384,1) + Sigmoid, fused.
    pat, Ho, Wo = _im2col_nhwc(h)                          # (B*64, 2048)
    return conv_bn_lrelu_head(pat, pp["w3"], pp["b3"], pp["g3"], pp["be3"],
                              pp["wl"], pp["bl"], batch=B)


# -----------------------------------------------------------------------------
# Pure-JAX f32 reference (correctness check)
# -----------------------------------------------------------------------------

def reference_forward(x, p):
    def conv(x, w, b):
        y = jax.lax.conv_general_dilated(
            x, w, (2, 2), ((1, 1), (1, 1)),
            dimension_numbers=("NCHW", "OIHW", "NCHW"))
        return y + b[None, :, None, None]

    def lrelu(v):
        return jnp.where(v > 0, v, 0.2 * v)

    def bn(v, g, b):
        m = jnp.mean(v, axis=(0, 2, 3), keepdims=True)
        var = jnp.mean((v - m) ** 2, axis=(0, 2, 3), keepdims=True)
        return (v - m) * jax.lax.rsqrt(var + 1e-5) * g[None, :, None, None] \
            + b[None, :, None, None]

    h = lrelu(conv(x, p["w1"], p["b1"]))
    h = lrelu(bn(conv(h, p["w2"], p["b2"]), p["g2"], p["be2"]))
    h = lrelu(bn(conv(h, p["w3"], p["b3"]), p["g3"], p["be3"]))
    flat = h.reshape(x.shape[0], -1)
    return jax.nn.sigmoid(flat @ p["wl"].T + p["bl"])


# -----------------------------------------------------------------------------
# Main
# -----------------------------------------------------------------------------

def make_params(key):
    ks = jax.random.split(key, 10)
    std = 0.02
    f32 = jnp.float32
    return {
        "w1": jax.random.normal(ks[0], (64, 3, 4, 4), f32) * std,
        "b1": jax.random.normal(ks[1], (64,), f32) * 0.05,
        "w2": jax.random.normal(ks[2], (128, 64, 4, 4), f32) * std,
        "b2": jax.random.normal(ks[3], (128,), f32) * 0.05,
        "g2": 1.0 + jax.random.normal(ks[4], (128,), f32) * 0.1,
        "be2": jax.random.normal(ks[5], (128,), f32) * 0.1,
        "w3": jax.random.normal(ks[6], (256, 128, 4, 4), f32) * std,
        "b3": jnp.zeros((256,), f32),
        "g3": 1.0 + jax.random.normal(ks[7], (256,), f32) * 0.1,
        "be3": jax.random.normal(ks[8], (256,), f32) * 0.1,
        "wl": jax.random.normal(ks[9], (1, 256 * 8 * 8), f32) * std,
        "bl": jnp.full((1,), 0.1, f32),
    }


if __name__ == "__main__":
    key = jax.random.PRNGKey(0)
    pkey, xkey = jax.random.split(key)
    params = make_params(pkey)
    packed = pack_params(params)

    # Linear(256*8*8, 1) pins the spatial size: 64 -> 32 -> 16 -> 8; batch = 2.
    x = jax.random.normal(xkey, (2, 3, 64, 64), jnp.float32)

    out = jax.block_until_ready(jax.jit(discriminator_forward)(x, packed))
    ref = jax.block_until_ready(jax.jit(reference_forward)(x, params))

    # bf16 MXU inputs / bf16 inter-layer activations -> compare with a loose but
    # bug-catching tolerance against the f32 reference.
    np.testing.assert_allclose(np.asarray(out), np.asarray(ref), rtol=5e-2, atol=5e-2)
    assert out.shape == (2, 1)

    print("KERNEL_OK")
</pallas_src>

<mosaic_0001>
module attributes {stable_mosaic.version = 11 : i64} {
  func.func @conv1_lrelu_kernel(%arg0: i32, %arg1: memref<512x96xbf16, #tpu.memory_space<vmem>>, %arg2: memref<96x128xbf16, #tpu.memory_space<vmem>>, %arg3: memref<1x128xf32, #tpu.memory_space<vmem>>, %arg4: memref<512x128xbf16, #tpu.memory_space<vmem>>) attributes {dimension_semantics = [#tpu.dimension_semantics<parallel>], iteration_bounds = array<i64: 2>, scalar_prefetch = 0 : i64, scratch_operands = 0 : i64, tpu.core_type = #tpu.core_type<tc>, window_params = [{transform_indices = @transform_0, window_bounds = array<i64: 512, 96>}, {pipeline_mode = #tpu.pipeline_mode<synchronous>, transform_indices = @transform_1, window_bounds = array<i64: 96, 128>}, {pipeline_mode = #tpu.pipeline_mode<synchronous>, transform_indices = @transform_2, window_bounds = array<i64: 1, 128>}, {transform_indices = @transform_3, window_bounds = array<i64: 512, 128>}]} {
    %c0 = arith.constant 0 : index
    %c0_0 = arith.constant 0 : index
    %0 = vector.load %arg1[%c0, %c0_0] : memref<512x96xbf16, #tpu.memory_space<vmem>>, vector<512x96xbf16>
    %c0_1 = arith.constant 0 : index
    %c0_2 = arith.constant 0 : index
    %1 = vector.load %arg2[%c0_1, %c0_2] : memref<96x128xbf16, #tpu.memory_space<vmem>>, vector<96x128xbf16>
    %cst = arith.constant dense<0.000000e+00> : vector<512x128xf32>
    %2 = tpu.matmul %0, %1, %cst {dimension_numbers = #tpu.dot_dimension_numbers<[1], [0], [0], [1], [0, 0, 1, 1], [], []>} : vector<512x96xbf16>, vector<96x128xbf16>, vector<512x128xf32> -> vector<512x128xf32>
    %c0_3 = arith.constant 0 : index
    %c0_4 = arith.constant 0 : index
    %3 = vector.load %arg3[%c0_3, %c0_4] : memref<1x128xf32, #tpu.memory_space<vmem>>, vector<1x128xf32>
    %4 = vector.broadcast %3 : vector<1x128xf32> to vector<512x128xf32>
    %5 = arith.addf %2, %4 : vector<512x128xf32>
    %cst_5 = arith.constant 0.000000e+00 : f32
    %6 = vector.broadcast %cst_5 : f32 to vector<512x128xf32>
    %7 = arith.cmpf ogt, %5, %6 : vector<512x128xf32>
    %cst_6 = arith.constant 2.000000e-01 : f32
    %8 = vector.broadcast %cst_6 : f32 to vector<512x128xf32>
    %9 = arith.mulf %8, %5 : vector<512x128xf32>
    %10 = arith.select %7, %5, %9 : vector<512x128xi1>, vector<512x128xf32>
    %11 = arith.truncf %10 : vector<512x128xf32> to vector<512x128xbf16>
    %c0_7 = arith.constant 0 : index
    %c0_8 = arith.constant 0 : index
    %12 = vector.load %arg4[%c0_7, %c0_8] : memref<512x128xbf16, #tpu.memory_space<vmem>>, vector<512x128xbf16>
    tpu.vector_store %arg4[%c0_7, %c0_8], %11 {strides = array<i32>} : memref<512x128xbf16, #tpu.memory_space<vmem>>, vector<512x128xbf16>,
    return
  }
  func.func @transform_0(%arg0: i32) -> (i32, i32) {
    %c0_i32 = arith.constant 0 : i32
    %c0_i32_0 = arith.constant 0 : i32
    return %arg0, %c0_i32 : i32, i32
  }
  func.func @transform_1(%arg0: i32) -> (i32, i32) {
    %c0_i32 = arith.constant 0 : i32
    %c0_i32_0 = arith.constant 0 : i32
    %c0_i32_1 = arith.constant 0 : i32
    return %c0_i32, %c0_i32_0 : i32, i32
  }
  func.func @transform_2(%arg0: i32) -> (i32, i32) {
    %c0_i32 = arith.constant 0 : i32
    %c0_i32_0 = arith.constant 0 : i32
    %c0_i32_1 = arith.constant 0 : i32
    return %c0_i32, %c0_i32_0 : i32, i32
  }
  func.func @transform_3(%arg0: i32) -> (i32, i32) {
    %c0_i32 = arith.constant 0 : i32
    %c0_i32_0 = arith.constant 0 : i32
    return %arg0, %c0_i32 : i32, i32
  }
}

module attributes {stable_mosaic.version = 11 : i64} {
  func.func @conv_bn_lrelu_kernel(%arg0: i32, %arg1: memref<512x1024xbf16, #tpu.memory_space<vmem>>, %arg2: memref<1024x128xbf16, #tpu.memory_space<vmem>>, %arg3: memref<1x128xf32, #tpu.memory_space<vmem>>, %arg4: memref<1x128xf32, #tpu.memory_space<vmem>>, %arg5: memref<1x128xf32, #tpu.memory_space<vmem>>, %arg6: memref<512x128xbf16, #tpu.memory_space<vmem>>) attributes {dimension_semantics = [#tpu.dimension_semantics<arbitrary>], iteration_bounds = array<i64: 1>, scalar_prefetch = 0 : i64, scratch_operands = 0 : i64, tpu.core_type = #tpu.core_type<tc>, window_params = [{pipeline_mode = #tpu.pipeline_mode<synchronous>, transform_indices = @transform_0, window_bounds = array<i64: 512, 1024>}, {pipeline_mode = #tpu.pipeline_mode<synchronous>, transform_indices = @transform_1, window_bounds = array<i64: 1024, 128>}, {pipeline_mode = #tpu.pipeline_mode<synchronous>, transform_indices = @transform_2, window_bounds = array<i64: 1, 128>}, {pipeline_mode = #tpu.pipeline_mode<synchronous>, transform_indices = @transform_3, window_bounds = array<i64: 1, 128>}, {pipeline_mode = #tpu.pipeline_mode<synchronous>, transform_indices = @transform_4, window_bounds = array<i64: 1, 128>}, {pipeline_mode = #tpu.pipeline_mode<synchronous>, transform_indices = @transform_5, window_bounds = array<i64: 512, 128>}]} {
    %c0 = arith.constant 0 : index
    %c0_0 = arith.constant 0 : index
    %0 = vector.load %arg1[%c0, %c0_0] : memref<512x1024xbf16, #tpu.memory_space<vmem>>, vector<512x1024xbf16>
    %c0_1 = arith.constant 0 : index
    %c0_2 = arith.constant 0 : index
    %1 = vector.load %arg2[%c0_1, %c0_2] : memref<1024x128xbf16, #tpu.memory_space<vmem>>, vector<1024x128xbf16>
    %cst = arith.constant dense<0.000000e+00> : vector<512x128xf32>
    %2 = tpu.matmul %0, %1, %cst {dimension_numbers = #tpu.dot_dimension_numbers<[1], [0], [0], [1], [0, 0, 1, 1], [], []>} : vector<512x1024xbf16>, vector<1024x128xbf16>, vector<512x128xf32> -> vector<512x128xf32>
    %c0_3 = arith.constant 0 : index
    %c0_4 = arith.constant 0 : index
    %3 = vector.load %arg3[%c0_3, %c0_4] : memref<1x128xf32, #tpu.memory_space<vmem>>, vector<1x128xf32>
    %4 = vector.broadcast %3 : vector<1x128xf32> to vector<512x128xf32>
    %5 = arith.addf %2, %4 : vector<512x128xf32>
    %cst_5 = arith.constant dense<0.000000e+00> : vector<128xf32>
    %6 = vector.multi_reduction <add>, %5, %cst_5 [0] : vector<512x128xf32> to vector<128xf32>
    %7 = vector.shape_cast %6 : vector<128xf32> to vector<1x128xf32>
    %cst_6 = arith.constant 5.120000e+02 : f32
    %8 = vector.broadcast %cst_6 : f32 to vector<1x128xf32>
    %9 = arith.divf %7, %8 : vector<1x128xf32>
    %10 = vector.broadcast %9 : vector<1x128xf32> to vector<512x128xf32>
    %11 = arith.subf %5, %10 : vector<512x128xf32>
    %12 = arith.mulf %11, %11 : vector<512x128xf32>
    %cst_7 = arith.constant dense<0.000000e+00> : vector<128xf32>
    %13 = vector.multi_reduction <add>, %12, %cst_7 [0] : vector<512x128xf32> to vector<128xf32>
    %14 = vector.shape_cast %13 : vector<128xf32> to vector<1x128xf32>
    %cst_8 = arith.constant 5.120000e+02 : f32
    %15 = vector.broadcast %cst_8 : f32 to vector<1x128xf32>
    %16 = arith.divf %14, %15 : vector<1x128xf32>
    %cst_9 = arith.constant 9.99999974E-6 : f32
    %17 = vector.broadcast %cst_9 : f32 to vector<1x128xf32>
    %18 = arith.addf %16, %17 : vector<1x128xf32>
    %19 = math.rsqrt %18 : vector<1x128xf32>
    %20 = vector.broadcast %19 : vector<1x128xf32> to vector<512x128xf32>
    %21 = arith.mulf %11, %20 : vector<512x128xf32>
    %c0_10 = arith.constant 0 : index
    %c0_11 = arith.constant 0 : index
    %22 = vector.load %arg4[%c0_10, %c0_11] : memref<1x128xf32, #tpu.memory_space<vmem>>, vector<1x128xf32>
    %23 = vector.broadcast %22 : vector<1x128xf32> to vector<512x128xf32>
    %24 = arith.mulf %21, %23 : vector<512x128xf32>
    %c0_12 = arith.constant 0 : index
    %c0_13 = arith.constant 0 : index
    %25 = vector.load %arg5[%c0_12, %c0_13] : memref<1x128xf32, #tpu.memory_space<vmem>>, vector<1x128xf32>
    %26 = vector.broadcast %25 : vector<1x128xf32> to vector<512x128xf32>
    %27 = arith.addf %24, %26 : vector<512x128xf32>
    %cst_14 = arith.constant 0.000000e+00 : f32
    %28 = vector.broadcast %cst_14 : f32 to vector<512x128xf32>
    %29 = arith.cmpf ogt, %27, %28 : vector<512x128xf32>
    %cst_15 = arith.constant 2.000000e-01 : f32
    %30 = vector.broadcast %cst_15 : f32 to vector<512x128xf32>
    %31 = arith.mulf %30, %27 : vector<512x128xf32>
    %32 = arith.select %29, %27, %31 : vector<512x128xi1>, vector<512x128xf32>
    %33 = arith.truncf %32 : vector<512x128xf32> to vector<512x128xbf16>
    %c0_16 = arith.constant 0 : index
    %c0_17 = arith.constant 0 : index
    %34 = vector.load %arg6[%c0_16, %c0_17] : memref<512x128xbf16, #tpu.memory_space<vmem>>, vector<512x128xbf16>
    tpu.vector_store %arg6[%c0_16, %c0_17], %33 {strides = array<i32>} : memref<512x128xbf16, #tpu.memory_space<vmem>>, vector<512x128xbf16>,
    return
  }
  func.func @transform_0(%arg0: i32) -> (i32, i32) {
    %c0_i32 = arith.constant 0 : i32
    %c0_i32_0 = arith.constant 0 : i32
    %c0_i32_1 = arith.constant 0 : i32
    return %c0_i32, %c0_i32_0 : i32, i32
  }
  func.func @transform_1(%arg0: i32) -> (i32, i32) {
    %c0_i32 = arith.constant 0 : i32
    %c0_i32_0 = arith.constant 0 : i32
    %c0_i32_1 = arith.constant 0 : i32
    return %c0_i32, %c0_i32_0 : i32, i32
  }
  func.func @transform_2(%arg0: i32) -> (i32, i32) {
    %c0_i32 = arith.constant 0 : i32
    %c0_i32_0 = arith.constant 0 : i32
    %c0_i32_1 = arith.constant 0 : i32
    return %c0_i32, %c0_i32_0 : i32, i32
  }
  func.func @transform_3(%arg0: i32) -> (i32, i32) {
    %c0_i32 = arith.constant 0 : i32
    %c0_i32_0 = arith.constant 0 : i32
    %c0_i32_1 = arith.constant 0 : i32
    return %c0_i32, %c0_i32_0 : i32, i32
  }
  func.func @transform_4(%arg0: i32) -> (i32, i32) {
    %c0_i32 = arith.constant 0 : i32
    %c0_i32_0 = arith.constant 0 : i32
    %c0_i32_1 = arith.constant 0 : i32
    return %c0_i32, %c0_i32_0 : i32, i32
  }
  func.func @transform_5(%arg0: i32) -> (i32, i32) {
    %c0_i32 = arith.constant 0 : i32
    %c0_i32_0 = arith.constant 0 : i32
    %c0_i32_1 = arith.constant 0 : i32
    return %c0_i32, %c0_i32_0 : i32, i32
  }
}

module attributes {stable_mosaic.version = 11 : i64} {
  func.func @conv_bn_lrelu_head_kernel(%arg0: i32, %arg1: memref<128x2048xbf16, #tpu.memory_space<vmem>>, %arg2: memref<2048x256xbf16, #tpu.memory_space<vmem>>, %arg3: memref<1x256xf32, #tpu.memory_space<vmem>>, %arg4: memref<1x256xf32, #tpu.memory_space<vmem>>, %arg5: memref<1x256xf32, #tpu.memory_space<vmem>>, %arg6: memref<64x256xf32, #tpu.memory_space<vmem>>, %arg7: memref<1x1xf32, #tpu.memory_space<vmem>>, %arg8: memref<2x1x1xf32, #tpu.memory_space<vmem>>) attributes {dimension_semantics = [#tpu.dimension_semantics<arbitrary>], iteration_bounds = array<i64: 1>, scalar_prefetch = 0 : i64, scratch_operands = 0 : i64, tpu.core_type = #tpu.core_type<tc>, window_params = [{pipeline_mode = #tpu.pipeline_mode<synchronous>, transform_indices = @transform_0, window_bounds = array<i64: 128, 2048>}, {pipeline_mode = #tpu.pipeline_mode<synchronous>, transform_indices = @transform_1, window_bounds = array<i64: 2048, 256>}, {pipeline_mode = #tpu.pipeline_mode<synchronous>, transform_indices = @transform_2, window_bounds = array<i64: 1, 256>}, {pipeline_mode = #tpu.pipeline_mode<synchronous>, transform_indices = @transform_3, window_bounds = array<i64: 1, 256>}, {pipeline_mode = #tpu.pipeline_mode<synchronous>, transform_indices = @transform_4, window_bounds = array<i64: 1, 256>}, {pipeline_mode = #tpu.pipeline_mode<synchronous>, transform_indices = @transform_5, window_bounds = array<i64: 64, 256>}, {pipeline_mode = #tpu.pipeline_mode<synchronous>, transform_indices = @transform_6, window_bounds = array<i64: 1, 1>}, {pipeline_mode = #tpu.pipeline_mode<synchronous>, transform_indices = @transform_7, window_bounds = array<i64: 2, 1, 1>}]} {
    %c0 = arith.constant 0 : index
    %c0_0 = arith.constant 0 : index
    %0 = vector.load %arg1[%c0, %c0_0] : memref<128x2048xbf16, #tpu.memory_space<vmem>>, vector<128x2048xbf16>
    %c0_1 = arith.constant 0 : index
    %c0_2 = arith.constant 0 : index
    %1 = vector.load %arg2[%c0_1, %c0_2] : memref<2048x256xbf16, #tpu.memory_space<vmem>>, vector<2048x256xbf16>
    %cst = arith.constant dense<0.000000e+00> : vector<128x256xf32>
    %2 = tpu.matmul %0, %1, %cst {dimension_numbers = #tpu.dot_dimension_numbers<[1], [0], [0], [1], [0, 0, 1, 1], [], []>} : vector<128x2048xbf16>, vector<2048x256xbf16>, vector<128x256xf32> -> vector<128x256xf32>
    %c0_3 = arith.constant 0 : index
    %c0_4 = arith.constant 0 : index
    %3 = vector.load %arg3[%c0_3, %c0_4] : memref<1x256xf32, #tpu.memory_space<vmem>>, vector<1x256xf32>
    %4 = vector.broadcast %3 : vector<1x256xf32> to vector<128x256xf32>
    %5 = arith.addf %2, %4 : vector<128x256xf32>
    %cst_5 = arith.constant dense<0.000000e+00> : vector<256xf32>
    %6 = vector.multi_reduction <add>, %5, %cst_5 [0] : vector<128x256xf32> to vector<256xf32>
    %7 = vector.shape_cast %6 : vector<256xf32> to vector<1x256xf32>
    %cst_6 = arith.constant 1.280000e+02 : f32
    %8 = vector.broadcast %cst_6 : f32 to vector<1x256xf32>
    %9 = arith.divf %7, %8 : vector<1x256xf32>
    %10 = vector.broadcast %9 : vector<1x256xf32> to vector<128x256xf32>
    %11 = arith.subf %5, %10 : vector<128x256xf32>
    %12 = arith.mulf %11, %11 : vector<128x256xf32>
    %cst_7 = arith.constant dense<0.000000e+00> : vector<256xf32>
    %13 = vector.multi_reduction <add>, %12, %cst_7 [0] : vector<128x256xf32> to vector<256xf32>
    %14 = vector.shape_cast %13 : vector<256xf32> to vector<1x256xf32>
    %cst_8 = arith.constant 1.280000e+02 : f32
    %15 = vector.broadcast %cst_8 : f32 to vector<1x256xf32>
    %16 = arith.divf %14, %15 : vector<1x256xf32>
    %cst_9 = arith.constant 9.99999974E-6 : f32
    %17 = vector.broadcast %cst_9 : f32 to vector<1x256xf32>
    %18 = arith.addf %16, %17 : vector<1x256xf32>
    %19 = math.rsqrt %18 : vector<1x256xf32>
    %20 = vector.broadcast %19 : vector<1x256xf32> to vector<128x256xf32>
    %21 = arith.mulf %11, %20 : vector<128x256xf32>
    %c0_10 = arith.constant 0 : index
    %c0_11 = arith.constant 0 : index
    %22 = vector.load %arg4[%c0_10, %c0_11] : memref<1x256xf32, #tpu.memory_space<vmem>>, vector<1x256xf32>
    %23 = vector.broadcast %22 : vector<1x256xf32> to vector<128x256xf32>
    %24 = arith.mulf %21, %23 : vector<128x256xf32>
    %c0_12 = arith.constant 0 : index
    %c0_13 = arith.constant 0 : index
    %25 = vector.load %arg5[%c0_12, %c0_13] : memref<1x256xf32, #tpu.memory_space<vmem>>, vector<1x256xf32>
    %26 = vector.broadcast %25 : vector<1x256xf32> to vector<128x256xf32>
    %27 = arith.addf %24, %26 : vector<128x256xf32>
    %cst_14 = arith.constant 0.000000e+00 : f32
    %28 = vector.broadcast %cst_14 : f32 to vector<128x256xf32>
    %29 = arith.cmpf ogt, %27, %28 : vector<128x256xf32>
    %cst_15 = arith.constant 2.000000e-01 : f32
    %30 = vector.broadcast %cst_15 : f32 to vector<128x256xf32>
    %31 = arith.mulf %30, %27 : vector<128x256xf32>
    %32 = arith.select %29, %27, %31 : vector<128x256xi1>, vector<128x256xf32>
    %33 = vector.shape_cast %32 : vector<128x256xf32> to vector<2x64x256xf32>
    %c0_16 = arith.constant 0 : index
    %c0_17 = arith.constant 0 : index
    %34 = vector.load %arg6[%c0_16, %c0_17] : memref<64x256xf32, #tpu.memory_space<vmem>>, vector<64x256xf32>
    %35 = vector.shape_cast %34 : vector<64x256xf32> to vector<1x64x256xf32>
    %36 = vector.broadcast %35 : vector<1x64x256xf32> to vector<2x64x256xf32>
    %37 = arith.mulf %33, %36 : vector<2x64x256xf32>
    %cst_18 = arith.constant dense<0.000000e+00> : vector<2x64xf32>
    %38 = vector.multi_reduction <add>, %37, %cst_18 [2] : vector<2x64x256xf32> to vector<2x64xf32>
    %39 = vector.shape_cast %38 : vector<2x64xf32> to vector<2x64x1xf32>
    %cst_19 = arith.constant dense<0.000000e+00> : vector<2x1xf32>
    %40 = vector.multi_reduction <add>, %39, %cst_19 [1] : vector<2x64x1xf32> to vector<2x1xf32>
    %41 = vector.shape_cast %40 : vector<2x1xf32> to vector<2x1x1xf32>
    %c0_20 = arith.constant 0 : index
    %c0_21 = arith.constant 0 : index
    %42 = vector.load %arg7[%c0_20, %c0_21] : memref<1x1xf32, #tpu.memory_space<vmem>>, vector<1x1xf32>
    %43 = vector.shape_cast %42 : vector<1x1xf32> to vector<1x1x1xf32>
    %44 = vector.broadcast %43 : vector<1x1x1xf32> to vector<2x1x1xf32>
    %45 = arith.addf %41, %44 : vector<2x1x1xf32>
    %cst_22 = arith.constant 0.000000e+00 : f32
    %46 = vector.broadcast %cst_22 : f32 to vector<2x1x1xf32>
    %47 = arith.subf %46, %45 : vector<2x1x1xf32>
    %48 = math.exp %47 : vector<2x1x1xf32>
    %cst_23 = arith.constant 1.000000e+00 : f32
    %49 = vector.broadcast %cst_23 : f32 to vector<2x1x1xf32>
    %50 = arith.addf %49, %48 : vector<2x1x1xf32>
    %cst_24 = arith.constant 1.000000e+00 : f32
    %51 = vector.broadcast %cst_24 : f32 to vector<2x1x1xf32>
    %52 = arith.divf %51, %50 : vector<2x1x1xf32>
    %c0_25 = arith.constant 0 : index
    %c0_26 = arith.constant 0 : index
    %c0_27 = arith.constant 0 : index
    %53 = vector.load %arg8[%c0_25, %c0_26, %c0_27] : memref<2x1x1xf32, #tpu.memory_space<vmem>>, vector<2x1x1xf32>
    tpu.vector_store %arg8[%c0_25, %c0_26, %c0_27], %52 {strides = array<i32>} : memref<2x1x1xf32, #tpu.memory_space<vmem>>, vector<2x1x1xf32>,
    return
  }
  func.func @transform_0(%arg0: i32) -> (i32, i32) {
    %c0_i32 = arith.constant 0 : i32
    %c0_i32_0 = arith.constant 0 : i32
    %c0_i32_1 = arith.constant 0 : i32
    return %c0_i32, %c0_i32_0 : i32, i32
  }
  func.func @transform_1(%arg0: i32) -> (i32, i32) {
    %c0_i32 = arith.constant 0 : i32
    %c0_i32_0 = arith.constant 0 : i32
    %c0_i32_1 = arith.constant 0 : i32
    return %c0_i32, %c0_i32_0 : i32, i32
  }
  func.func @transform_2(%arg0: i32) -> (i32, i32) {
    %c0_i32 = arith.constant 0 : i32
    %c0_i32_0 = arith.constant 0 : i32
    %c0_i32_1 = arith.constant 0 : i32
    return %c0_i32, %c0_i32_0 : i32, i32
  }
  func.func @transform_3(%arg0: i32) -> (i32, i32) {
    %c0_i32 = arith.constant 0 : i32
    %c0_i32_0 = arith.constant 0 : i32
    %c0_i32_1 = arith.constant 0 : i32
    return %c0_i32, %c0_i32_0 : i32, i32
  }
  func.func @transform_4(%arg0: i32) -> (i32, i32) {
    %c0_i32 = arith.constant 0 : i32
    %c0_i32_0 = arith.constant 0 : i32
    %c0_i32_1 = arith.constant 0 : i32
    return %c0_i32, %c0_i32_0 : i32, i32
  }
  func.func @transform_5(%arg0: i32) -> (i32, i32) {
    %c0_i32 = arith.constant 0 : i32
    %c0_i32_0 = arith.constant 0 : i32
    %c0_i32_1 = arith.constant 0 : i32
    return %c0_i32, %c0_i32_0 : i32, i32
  }
  func.func @transform_6(%arg0: i32) -> (i32, i32) {
    %c0_i32 = arith.constant 0 : i32
    %c0_i32_0 = arith.constant 0 : i32
    %c0_i32_1 = arith.constant 0 : i32
    return %c0_i32, %c0_i32_0 : i32, i32
  }
  func.func @transform_7(%arg0: i32) -> (i32, i32, i32) {
    %c0_i32 = arith.constant 0 : i32
    %c0_i32_0 = arith.constant 0 : i32
    %c0_i32_1 = arith.constant 0 : i32
    %c0_i32_2 = arith.constant 0 : i32
    return %c0_i32, %c0_i32_0, %c0_i32_1 : i32, i32, i32
  }
}

</mosaic_0001>

<bundles_post_ra>
// kernel: discriminator_forward.3
= control target key start
LH: loop header
LB: loop body
LE: loop exit
PB: predicated region body
PF: predicated region fallthrough
CT: control target
= control target key end

     0   :  { %s2009_s12 = smov 0   ;;  %s2229_s0 = inlined_call_operand.vmem [shape: bf16[1024,96], index: 0, kind: input, shape index: {}]   ;;  %s2230_s1 = inlined_call_operand.vmem [shape: bf16[96,128], index: 1, kind: input, shape index: {}]   ;;  %s2231_s2 = inlined_call_operand.vmem [shape: f32[1,128], index: 2, kind: input, shape index: {}]   ;;  %s2232_s3 = inlined_call_operand.vmem [shape: bf16[1024,128], index: 3, kind: output, shape index: {}]  }
   0x1 LB: > { %s1408_s13 = sadd.s32 4294967295, %s1987_s12   ;;  %p1412_p0 = scmp.ge.s32.totalorder %s1987_s12, 1  ;;  %s1987_s12 = sphi %s2009_s12, %s13_s12  }
   0x2   : > { %p138_p1 = scmp.lt.s32.totalorder %s1987_s12, 3 }
   0x4   : > { %p139_p2 = pnand %p1412_p0, %p138_p1 }
   0x5   : > { %v1943_v0 = vld [vmem:[%s2230_s1] sm:$0xff] (!%p139_p2)   ;;  %s1413_s16 = sshll.u32 (!%p139_p2), %s1408_s13, 6  ;;  %v1944_v1 = vld [vmem:[%s2230_s1 + $0x8] sm:$0xff] (!%p139_p2)   ;;  %v1945_v2 = vld [vmem:[%s2230_s1 + $0x10] sm:$0xff] (!%p139_p2)   ;;  %vm454_vm0 = vcmask (!%p139_p2), 785408  }
   0x6   : > { %142 = sbr.rel (%p139_p2) target bundleno = 319 (0x13f), region = 32  ;;  %p163_p3 = scmp.lt.s32.totalorder (!%p139_p2), %s1413_s16, 127  ;;  %1847 = vmatprep.subr.bf16.mxu0 (!%p139_p2), %v1943_v0  ;;  %1923 = vmatprep.subr.bf16.mxu1 (!%p139_p2), %v1943_v0  ;;  %v1946_v3 = vld [vmem:[%s2230_s1 + $0x18] sm:$0xff] (!%p139_p2)   ;;  %v1947_v6 = vld [vmem:[%s2230_s1 + $0x20] sm:$0xff] (!%p139_p2)   ;;  %v1948_v7 = vld [vmem:[%s2230_s1 + $0x28] sm:$0xff] (!%p139_p2)  }
   0x7   : > { %1848 = vmatpush3.bf16.msra.mxu0 (!%p139_p2), %v1943_v0  ;;  %1929 = vmatpush3.bf16.msra.mxu1 (!%p139_p2), %v1943_v0  ;;  %v2112_v38 = vld [vmem:[%s2231_s2] ss:$0 sm:$0xff] (!%p139_p2) }
   0x8   : > { %1849 = vmatprep.subr.bf16.mxu0 (!%p139_p2), %v1944_v1  ;;  %1924 = vmatprep.subr.bf16.mxu1 (!%p139_p2), %v1944_v1 }
   0xb   : > { %1850 = vmatpush3.bf16.msra.mxu0 (!%p139_p2), %v1944_v1  ;;  %1930 = vmatpush3.bf16.msra.mxu1 (!%p139_p2), %v1944_v1 }
   0xc   : > { %1851 = vmatprep.subr.bf16.mxu0 (!%p139_p2), %v1945_v2  ;;  %1925 = vmatprep.subr.bf16.mxu1 (!%p139_p2), %v1945_v2 }
   0xd   : > { %s2234_s16 = smov (!%p163_p3, %s1413_s16), 127 }
   0xe   : > { %s1414_s21 = sshll.u32 %s2234_s16, 2 }
   0xf   : > { %s2037_s26 = scalar_lea.vmem %s2229_s0, %s1414_s21  ;;  %1852 = vmatpush3.bf16.msra.mxu0 %v1945_v2  ;;  %1931 = vmatpush3.bf16.msra.mxu1 %v1945_v2  ;;  %s2129_s8 = scalar_lea.vmem %s2232_s3, %s1414_s21 }
  0x10   : > { %v1949_v4 = vld [vmem:[%s2037_s26] sm:$0xff]   ;;  %1853 = vmatprep.subr.bf16.mxu0 %v1946_v3  ;;  %1926 = vmatprep.subr.bf16.mxu1 %v1946_v3  ;;  %v1951_v8 = vld [vmem:[%s2037_s26 + $0x8] sm:$0xff]   ;;  %v1953_v10 = vld [vmem:[%s2037_s26 + $0x10] sm:$0xff]  }
  0x11   : > { %v1950_v5 = vld [vmem:[%s2037_s26 + $0x80] sm:$0xff]   ;;  %1859 = vmatprep.mubr.msk.bf16.mxu0 %vm454_vm0, %v1949_v4  ;;  %v1952_v9 = vld [vmem:[%s2037_s26 + $0x88] sm:$0xff]   ;;  %v1954_v11 = vld [vmem:[%s2037_s26 + $0x90] sm:$0xff]  }
  0x12   : > { %1891 = vmatprep.mubr.msk.bf16.mxu1 %vm454_vm0, %v1950_v5  ;;  %v1955_v12 = vld [vmem:[%s2037_s26 + $0x18] sm:$0xff]   ;;  %v1957_v14 = vld [vmem:[%s2037_s26 + $0x20] sm:$0xff]   ;;  %v1959_v16 = vld [vmem:[%s2037_s26 + $0x28] sm:$0xff]  }
  0x13   : > { %1854 = vmatpush3.bf16.msra.mxu0 %v1946_v3  ;;  %1932 = vmatpush3.bf16.msra.mxu1 %v1946_v3  ;;  %v1956_v13 = vld [vmem:[%s2037_s26 + $0x98] sm:$0xff]   ;;  %v1958_v15 = vld [vmem:[%s2037_s26 + $0xa0] sm:$0xff]   ;;  %v1960_v17 = vld [vmem:[%s2037_s26 + $0xa8] sm:$0xff]  }
  0x14   : > { %1855 = vmatprep.subr.bf16.mxu0 %v1947_v6  ;;  %1927 = vmatprep.subr.bf16.mxu1 %v1947_v6  ;;  %v1961_v18 = vld [vmem:[%s2037_s26 + $0x30] sm:$0xff]   ;;  %v1963_v20 = vld [vmem:[%s2037_s26 + $0x38] sm:$0xff]   ;;  %v1965_v22 = vld [vmem:[%s2037_s26 + $0x40] sm:$0xff]  }
  0x15   : > { %v1962_v19 = vld [vmem:[%s2037_s26 + $0xb0] sm:$0xff]   ;;  %v1964_v21 = vld [vmem:[%s2037_s26 + $0xb8] sm:$0xff]   ;;  %v1966_v23 = vld [vmem:[%s2037_s26 + $0xc0] sm:$0xff]  }
  0x16   : > { %v1967_v24 = vld [vmem:[%s2037_s26 + $0x48] sm:$0xff]   ;;  %v1969_v26 = vld [vmem:[%s2037_s26 + $0x50] sm:$0xff]   ;;  %v1971_v28 = vld [vmem:[%s2037_s26 + $0x58] sm:$0xff]  }
  0x17   : > { %1856 = vmatpush3.bf16.msra.mxu0 %v1947_v6  ;;  %1933 = vmatpush3.bf16.msra.mxu1 %v1947_v6  ;;  %v1968_v25 = vld [vmem:[%s2037_s26 + $0xc8] sm:$0xff]   ;;  %v1970_v27 = vld [vmem:[%s2037_s26 + $0xd0] sm:$0xff]   ;;  %v1972_v29 = vld [vmem:[%s2037_s26 + $0xd8] sm:$0xff]  }
  0x18   : > { %1857 = vmatprep.subr.bf16.mxu0 %v1948_v7  ;;  %1928 = vmatprep.subr.bf16.mxu1 %v1948_v7  ;;  %v1973_v30 = vld [vmem:[%s2037_s26 + $0x60] sm:$0xff]   ;;  %v1975_v32 = vld [vmem:[%s2037_s26 + $0x68] sm:$0xff]   ;;  %v1977_v34 = vld [vmem:[%s2037_s26 + $0x70] sm:$0xff]  }
  0x19   : > { %v1974_v31 = vld [vmem:[%s2037_s26 + $0xe0] sm:$0xff]   ;;  %v1976_v33 = vld [vmem:[%s2037_s26 + $0xe8] sm:$0xff]   ;;  %v1978_v35 = vld [vmem:[%s2037_s26 + $0xf0] sm:$0xff]  }
  0x1a   : > { %v1979_v36 = vld [vmem:[%s2037_s26 + $0x78] sm:$0xff]  }
  0x1b   : > { %1858 = vmatpush3.bf16.msra.mxu0 %v1948_v7  ;;  %1934 = vmatpush3.bf16.msra.mxu1 %v1948_v7  ;;  %v1980_v37 = vld [vmem:[%s2037_s26 + $0xf8] sm:$0xff]  }
  0x1e   : > { %1860 = vmatmul.mubr.msk.bf16.vlgmr.msra.gmra.mrb[0].mxu0 %vm454_vm0, %v1951_v8  ;;  %1892 = vmatmul.mubr.msk.bf16.vlgmr.msra.gmra.mrb[0].mxu1 %vm454_vm0, %v1952_v9 }
  0x1f   : > { %1863 = vmatprep.mubr.msk.bf16.mxu0 %vm454_vm0, %v1953_v10  ;;  %1895 = vmatprep.mubr.msk.bf16.mxu1 %vm454_vm0, %v1954_v11 }
  0x26   : > { %1864 = vmatmul.mubr.msk.bf16.gmra.mrb[4].mxu0 %vm454_vm0, %v1955_v12  ;;  %1896 = vmatmul.mubr.msk.bf16.gmra.mrb[4].mxu1 %vm454_vm0, %v1956_v13 }
  0x27   : > { %1867 = vmatprep.mubr.msk.bf16.mxu0 %vm454_vm0, %v1957_v14  ;;  %1899 = vmatprep.mubr.msk.bf16.mxu1 %vm454_vm0, %v1958_v15 }
  0x2e   : > { %1868 = vmatmul.mubr.msk.bf16.gmra.mrb[8].mxu0 %vm454_vm0, %v1959_v16  ;;  %1900 = vmatmul.mubr.msk.bf16.gmra.mrb[8].mxu1 %vm454_vm0, %v1960_v17 }
  0x2f   : > { %1871 = vmatprep.mubr.msk.bf16.mxu0 %vm454_vm0, %v1961_v18  ;;  %1903 = vmatprep.mubr.msk.bf16.mxu1 %vm454_vm0, %v1962_v19 }
  0x36   : > { %1872 = vmatmul.mubr.msk.bf16.gmra.mrb[12].mxu0 %vm454_vm0, %v1963_v20  ;;  %1904 = vmatmul.mubr.msk.bf16.gmra.mrb[12].mxu1 %vm454_vm0, %v1964_v21 }
  0x37   : > { %1875 = vmatprep.mubr.msk.bf16.mxu0 %vm454_vm0, %v1965_v22  ;;  %1907 = vmatprep.mubr.msk.bf16.mxu1 %vm454_vm0, %v1966_v23 }
  0x3e   : > { %1876 = vmatmul.mubr.msk.bf16.gmra.mrb[16].mxu0 %vm454_vm0, %v1967_v24  ;;  %1908 = vmatmul.mubr.msk.bf16.gmra.mrb[16].mxu1 %vm454_vm0, %v1968_v25 }
  0x3f   : > { %1879 = vmatprep.mubr.msk.bf16.mxu0 %vm454_vm0, %v1969_v26  ;;  %1911 = vmatprep.mubr.msk.bf16.mxu1 %vm454_vm0, %v1970_v27 }
  0x46   : > { %1880 = vmatmul.mubr.msk.bf16.gmra.mrb[20].mxu0 %vm454_vm0, %v1971_v28  ;;  %1912 = vmatmul.mubr.msk.bf16.gmra.mrb[20].mxu1 %vm454_vm0, %v1972_v29 }
  0x47   : > { %1883 = vmatprep.mubr.msk.bf16.mxu0 %vm454_vm0, %v1973_v30  ;;  %1915 = vmatprep.mubr.msk.bf16.mxu1 %vm454_vm0, %v1974_v31 }
  0x4e   : > { %1884 = vmatmul.mubr.msk.bf16.gmra.mrb[24].mxu0 %vm454_vm0, %v1975_v32  ;;  %1916 = vmatmul.mubr.msk.bf16.gmra.mrb[24].mxu1 %vm454_vm0, %v1976_v33 }
  0x4f   : > { %1887 = vmatprep.mubr.msk.bf16.mxu0 %vm454_vm0, %v1977_v34  ;;  %1919 = vmatprep.mubr.msk.bf16.mxu1 %vm454_vm0, %v1978_v35 }
  0x56   : > { %1888 = vmatmul.mubr.msk.bf16.gmra.mrb[28].mxu0 %vm454_vm0, %v1979_v36  ;;  %1920 = vmatmul.mubr.msk.bf16.gmra.mrb[28].mxu1 %vm454_vm0, %v1980_v37 }
  0xf1   : > { %v1861_v39 = vpop.f32.mrb[0].mxu0  ;;  %v1893_v40 = vpop.f32.mrb[0].mxu1 }
  0xf2   : > { %v594_v41 = vadd.f32 %v1861_v39, %v2112_v38  ;;  %v722_v42 = vadd.f32 %v1893_v40, %v2112_v38  ;;  %v585_v43 = vpop.f32.mrb[1].mxu0  ;;  %v713_v44 = vpop.f32.mrb[1].mxu1 }
  0xf3   : > { %v586_v45 = vadd.f32 %v2112_v38, %v585_v43  ;;  %v714_v46 = vadd.f32 %v2112_v38, %v713_v44  ;;  %v1862_v47 = vpop.f32.mrb[2].mxu0  ;;  %v1894_v48 = vpop.f32.mrb[2].mxu1 }
  0xf4   : > { %vm842_vm1 = vcmp.gt.f32.partialorder %v594_v41, 0.0  ;;  %v906_v49 = vmul.f32 0.2, %v594_v41  ;;  %vm874_vm2 = vcmp.gt.f32.partialorder %v722_v42, 0.0  ;;  %v938_v50 = vmul.f32 0.2, %v722_v42 }
  0xf5   : > { %vm840_vm3 = vcmp.gt.f32.partialorder %v586_v45, 0.0  ;;  %v904_v51 = vmul.f32 0.2, %v586_v45  ;;  %vm872_vm4 = vcmp.gt.f32.partialorder %v714_v46, 0.0  ;;  %v936_v52 = vmul.f32 0.2, %v714_v46 }
  0xf6   : > { %v597_v53 = vadd.f32 %v1862_v47, %v2112_v38  ;;  %v725_v54 = vadd.f32 %v1894_v48, %v2112_v38  ;;  %v588_v55 = vpop.f32.mrb[3].mxu0  ;;  %v716_v56 = vpop.f32.mrb[3].mxu1  ;;  %v970_v57 = vsel %vm842_vm1, %v594_v41, %v906_v49  ;;  %v1002_v58 = vsel %vm874_vm2, %v722_v42, %v938_v50 }
  0xf7   : > { %v589_v59 = vadd.f32 %v2112_v38, %v588_v55  ;;  %v717_v60 = vadd.f32 %v2112_v38, %v716_v56  ;;  %v968_v1 = vsel %vm840_vm3, %v586_v45, %v904_v51  ;;  %v1000_v2 = vsel %vm872_vm4, %v714_v46, %v936_v52 }
  0xf8   : > { %vm843_vm5 = vcmp.gt.f32.partialorder %v597_v53, 0.0  ;;  %v907_v61 = vmul.f32 0.2, %v597_v53  ;;  %vm875_vm6 = vcmp.gt.f32.partialorder %v725_v54, 0.0  ;;  %v939_v62 = vmul.f32 0.2, %v725_v54 }
  0xf9   : > { %vm841_vm7 = vcmp.gt.f32.partialorder %v589_v59, 0.0  ;;  %v905_v63 = vmul.f32 0.2, %v589_v59  ;;  %vm873_vm8 = vcmp.gt.f32.partialorder %v717_v60, 0.0  ;;  %v937_v0 = vmul.f32 0.2, %v717_v60 }
  0xfa   : > { %v971_v3 = vsel %vm843_vm5, %v597_v53, %v907_v61  ;;  %v1003_v4 = vsel %vm875_vm6, %v725_v54, %v939_v62  ;;  %v1865_v5 = vpop.f32.mrb[4].mxu0  ;;  %v1897_v6 = vpop.f32.mrb[4].mxu1 }
  0xfb   : > { %v1626_v7 = vpack.c.bf16 %v971_v3, %v970_v57  ;;  %v1706_v8 = vpack.c.bf16 %v1003_v4, %v1002_v58  ;;  %v969_v9 = vsel %vm841_vm7, %v589_v59, %v905_v63  ;;  %v1001_v10 = vsel %vm873_vm8, %v717_v60, %v937_v0  ;;  %v601_v11 = vpop.f32.mrb[5].mxu0  ;;  %v729_v12 = vpop.f32.mrb[5].mxu1 }
  0xfc   : > { %v1621_v13 = vpack.c.bf16 %v969_v9, %v968_v1  ;;  %v1701_v14 = vpack.c.bf16 %v1001_v10, %v1000_v2  ;;  %v610_v15 = vadd.f32 %v1865_v5, %v2112_v38  ;;  %v738_v16 = vadd.f32 %v1897_v6, %v2112_v38  ;;  %v1866_v17 = vpop.f32.mrb[6].mxu0  ;;  %v1898_v18 = vpop.f32.mrb[6].mxu1 }
  0xfd   : > { %1778 = vst [vmem:[%s2129_s8 + $0x8] sm:$0xff] %v1626_v7   ;;  %1794 = vst [vmem:[%s2129_s8 + $0x88] sm:$0xff] %v1706_v8   ;;  %v602_v19 = vadd.f32 %v2112_v38, %v601_v11  ;;  %v730_v20 = vadd.f32 %v2112_v38, %v729_v12  ;;  %v613_v21 = vadd.f32 %v1866_v17, %v2112_v38  ;;  %v604_v23 = vpop.f32.mrb[7].mxu0  ;;  %v732_v24 = vpop.f32.mrb[7].mxu1 }
  0xfe   : > { %v741_v22 = vadd.f32 %v1898_v18, %v2112_v38  ;;  %1622 = vst [vmem:[%s2129_s8] sm:$0xff] %v1621_v13   ;;  %1793 = vst [vmem:[%s2129_s8 + $0x80] sm:$0xff] %v1701_v14   ;;  %vm846_vm9 = vcmp.gt.f32.partialorder %v610_v15, 0.0  ;;  %v910_v25 = vmul.f32 0.2, %v610_v15  ;;  %vm878_vm10 = vcmp.gt.f32.partialorder %v738_v16, 0.0 }
  0xff   : > { %v942_v26 = vmul.f32 0.2, %v738_v16  ;;  %vm844_vm11 = vcmp.gt.f32.partialorder %v602_v19, 0.0  ;;  %v908_v27 = vmul.f32 0.2, %v602_v19  ;;  %vm876_vm12 = vcmp.gt.f32.partialorder %v730_v20, 0.0 }
 0x100   : > { %v940_v28 = vmul.f32 0.2, %v730_v20  ;;  %v974_v29 = vsel %vm846_vm9, %v610_v15, %v910_v25  ;;  %vm847_vm13 = vcmp.gt.f32.partialorder %v613_v21, 0.0  ;;  %v911_v31 = vmul.f32 0.2, %v613_v21 }
 0x101   : > { %v1006_v30 = vsel %vm878_vm10, %v738_v16, %v942_v26  ;;  %v972_v32 = vsel %vm844_vm11, %v602_v19, %v908_v27  ;;  %vm879_vm14 = vcmp.gt.f32.partialorder %v741_v22, 0.0  ;;  %v943_v34 = vmul.f32 0.2, %v741_v22  ;;  %v1869_v35 = vpop.f32.mrb[8].mxu0  ;;  %v1901_v36 = vpop.f32.mrb[8].mxu1 }
 0x102   : > { %v1004_v33 = vsel %vm876_vm12, %v730_v20, %v940_v28  ;;  %v975_v37 = vsel %vm847_vm13, %v613_v21, %v911_v31  ;;  %v605_v39 = vadd.f32 %v2112_v38, %v604_v23  ;;  %v733_v40 = vadd.f32 %v2112_v38, %v732_v24  ;;  %v617_v42 = vpop.f32.mrb[9].mxu0  ;;  %v745_v43 = vpop.f32.mrb[9].mxu1 }
 0x103   : > { %v626_v41 = vadd.f32 %v1869_v35, %v2112_v38  ;;  %v1636_v44 = vpack.c.bf16 %v975_v37, %v974_v29  ;;  %v1007_v45 = vsel %vm879_vm14, %v741_v22, %v943_v34  ;;  %v754_v46 = vadd.f32 %v1901_v36, %v2112_v38  ;;  %v1870_v48 = vpop.f32.mrb[10].mxu0  ;;  %v1902_v49 = vpop.f32.mrb[10].mxu1 }
 0x104   : > { %v618_v47 = vadd.f32 %v2112_v38, %v617_v42  ;;  %v1716_v50 = vpack.c.bf16 %v1007_v45, %v1006_v30  ;;  %vm845_vm15 = vcmp.gt.f32.partialorder %v605_v39, 0.0  ;;  %v909_v51 = vmul.f32 0.2, %v605_v39  ;;  %v620_v52 = vpop.f32.mrb[11].mxu0  ;;  %v748_v53 = vpop.f32.mrb[11].mxu1 }
 0x105   : > { %vm877_vm0 = vcmp.gt.f32.partialorder %v733_v40, 0.0  ;;  %1780 = vst [vmem:[%s2129_s8 + $0x18] sm:$0xff] %v1636_v44   ;;  %v941_v54 = vmul.f32 0.2, %v733_v40  ;;  %vm850_vm1 = vcmp.gt.f32.partialorder %v626_v41, 0.0  ;;  %vm882_vm2 = vcmp.gt.f32.partialorder %v754_v46, 0.0 }
 0x106   : > { %v914_v55 = vmul.f32 0.2, %v626_v41  ;;  %1796 = vst [vmem:[%s2129_s8 + $0x98] sm:$0xff] %v1716_v50   ;;  %v973_v56 = vsel %vm845_vm15, %v605_v39, %v909_v51  ;;  %v946_v57 = vmul.f32 0.2, %v754_v46  ;;  %vm848_vm3 = vcmp.gt.f32.partialorder %v618_v47, 0.0 }
 0x107   : > { %v912_v58 = vmul.f32 0.2, %v618_v47  ;;  %v1631_v59 = vpack.c.bf16 %v973_v56, %v972_v32  ;;  %v1005_v60 = vsel %vm877_vm0, %v733_v40, %v941_v54  ;;  %v746_v62 = vadd.f32 %v2112_v38, %v745_v43 }
 0x108   : > { %v978_v61 = vsel %vm850_vm1, %v626_v41, %v914_v55  ;;  %v1711_v63 = vpack.c.bf16 %v1005_v60, %v1004_v33  ;;  %v1010_v0 = vsel %vm882_vm2, %v754_v46, %v946_v57  ;;  %v629_v2 = vadd.f32 %v1870_v48, %v2112_v38 }
 0x109   : > { %v976_v1 = vsel %vm848_vm3, %v618_v47, %v912_v58  ;;  %1779 = vst [vmem:[%s2129_s8 + $0x10] sm:$0xff] %v1631_v59   ;;  %vm880_vm4 = vcmp.gt.f32.partialorder %v746_v62, 0.0  ;;  %v944_v3 = vmul.f32 0.2, %v746_v62  ;;  %v757_v4 = vadd.f32 %v1902_v49, %v2112_v38  ;;  %v1873_v6 = vpop.f32.mrb[12].mxu0  ;;  %v1905_v7 = vpop.f32.mrb[12].mxu1 }
 0x10a   : > { %v621_v5 = vadd.f32 %v2112_v38, %v620_v52  ;;  %1795 = vst [vmem:[%s2129_s8 + $0x90] sm:$0xff] %v1711_v63   ;;  %vm851_vm5 = vcmp.gt.f32.partialorder %v629_v2, 0.0  ;;  %v915_v8 = vmul.f32 0.2, %v629_v2  ;;  %v749_v9 = vadd.f32 %v2112_v38, %v748_v53  ;;  %v633_v11 = vpop.f32.mrb[13].mxu0  ;;  %v761_v12 = vpop.f32.mrb[13].mxu1 }
 0x10b   : > { %v642_v10 = vadd.f32 %v1873_v6, %v2112_v38  ;;  %v1008_v13 = vsel %vm880_vm4, %v746_v62, %v944_v3  ;;  %vm883_vm6 = vcmp.gt.f32.partialorder %v757_v4, 0.0  ;;  %v947_v14 = vmul.f32 0.2, %v757_v4  ;;  %v1874_v15 = vpop.f32.mrb[14].mxu0  ;;  %v1906_v16 = vpop.f32.mrb[14].mxu1 }
 0x10c   : > { %vm849_vm7 = vcmp.gt.f32.partialorder %v621_v5, 0.0  ;;  %v979_v17 = vsel %vm851_vm5, %v629_v2, %v915_v8  ;;  %v913_v18 = vmul.f32 0.2, %v621_v5  ;;  %vm881_vm8 = vcmp.gt.f32.partialorder %v749_v9, 0.0  ;;  %v636_v20 = vpop.f32.mrb[15].mxu0  ;;  %v764_v24 = vpop.f32.mrb[15].mxu1 }
 0x10d   : > { %v945_v19 = vmul.f32 0.2, %v749_v9  ;;  %v1646_v21 = vpack.c.bf16 %v979_v17, %v978_v61  ;;  %v1011_v22 = vsel %vm883_vm6, %v757_v4, %v947_v14  ;;  %vm854_vm9 = vcmp.gt.f32.partialorder %v642_v10, 0.0 }
 0x10e   : > { %v918_v23 = vmul.f32 0.2, %v642_v10  ;;  %v1726_v25 = vpack.c.bf16 %v1011_v22, %v1010_v0  ;;  %v977_v26 = vsel %vm849_vm7, %v621_v5, %v913_v18  ;;  %v770_v28 = vadd.f32 %v1905_v7, %v2112_v38 }
 0x10f   : > { %v1009_v27 = vsel %vm881_vm8, %v749_v9, %v945_v19  ;;  %1782 = vst [vmem:[%s2129_s8 + $0x28] sm:$0xff] %v1646_v21   ;;  %v1641_v29 = vpack.c.bf16 %v977_v26, %v976_v1  ;;  %v634_v32 = vadd.f32 %v2112_v38, %v633_v11  ;;  %v762_v34 = vadd.f32 %v2112_v38, %v761_v12 }
 0x110   : > { %v1721_v30 = vpack.c.bf16 %v1009_v27, %v1008_v13  ;;  %v982_v31 = vsel %vm854_vm9, %v642_v10, %v918_v23  ;;  %1798 = vst [vmem:[%s2129_s8 + $0xa8] sm:$0xff] %v1726_v25   ;;  %vm886_vm10 = vcmp.gt.f32.partialorder %v770_v28, 0.0  ;;  %v950_v33 = vmul.f32 0.2, %v770_v28 }
 0x111   : > { %v645_v35 = vadd.f32 %v1874_v15, %v2112_v38  ;;  %1781 = vst [vmem:[%s2129_s8 + $0x20] sm:$0xff] %v1641_v29   ;;  %vm852_vm11 = vcmp.gt.f32.partialorder %v634_v32, 0.0  ;;  %v916_v36 = vmul.f32 0.2, %v634_v32  ;;  %v773_v37 = vadd.f32 %v1906_v16, %v2112_v38  ;;  %v1877_v40 = vpop.f32.mrb[16].mxu0  ;;  %v1909_v41 = vpop.f32.mrb[16].mxu1 }
 0x112   : > { %1797 = vst [vmem:[%s2129_s8 + $0xa0] sm:$0xff] %v1721_v30   ;;  %v637_v39 = vadd.f32 %v2112_v38, %v636_v20  ;;  %v1014_v42 = vsel %vm886_vm10, %v770_v28, %v950_v33  ;;  %vm884_vm12 = vcmp.gt.f32.partialorder %v762_v34, 0.0  ;;  %v948_v43 = vmul.f32 0.2, %v762_v34  ;;  %v649_v44 = vpop.f32.mrb[17].mxu0  ;;  %v777_v45 = vpop.f32.mrb[17].mxu1 }
 0x113   : > { %vm855_vm13 = vcmp.gt.f32.partialorder %v645_v35, 0.0  ;;  %v980_v46 = vsel %vm852_vm11, %v634_v32, %v916_v36  ;;  %v919_v47 = vmul.f32 0.2, %v645_v35  ;;  %vm887_vm14 = vcmp.gt.f32.partialorder %v773_v37, 0.0  ;;  %v1878_v49 = vpop.f32.mrb[18].mxu0  ;;  %v1910_v53 = vpop.f32.mrb[18].mxu1 }
 0x114   : > { %v951_v48 = vmul.f32 0.2, %v773_v37  ;;  %v1012_v50 = vsel %vm884_vm12, %v762_v34, %v948_v43  ;;  %vm853_vm15 = vcmp.gt.f32.partialorder %v637_v39, 0.0  ;;  %v917_v51 = vmul.f32 0.2, %v637_v39  ;;  %v652_v54 = vpop.f32.mrb[19].mxu0 }
 0x115   : > { %v765_v52 = vadd.f32 %v2112_v38, %v764_v24  ;;  %v983_v55 = vsel %vm855_vm13, %v645_v35, %v919_v47  ;;  %v658_v57 = vadd.f32 %v1877_v40, %v2112_v38  ;;  %v786_v58 = vadd.f32 %v1909_v41, %v2112_v38  ;;  %v780_v59 = vpop.f32.mrb[19].mxu1 }
 0x116   : > { %v1015_v56 = vsel %vm887_vm14, %v773_v37, %v951_v48  ;;  %v1656_v60 = vpack.c.bf16 %v983_v55, %v982_v31  ;;  %v981_v62 = vsel %vm853_vm15, %v637_v39, %v917_v51  ;;  %v650_v3 = vadd.f32 %v2112_v38, %v649_v44 }
 0x117   : > { %v1736_v61 = vpack.c.bf16 %v1015_v56, %v1014_v42  ;;  %vm885_vm0 = vcmp.gt.f32.partialorder %v765_v52, 0.0  ;;  %v1651_v63 = vpack.c.bf16 %v981_v62, %v980_v46  ;;  %v949_v0 = vmul.f32 0.2, %v765_v52 }
 0x118   : > { %vm858_vm1 = vcmp.gt.f32.partialorder %v658_v57, 0.0  ;;  %v922_v1 = vmul.f32 0.2, %v658_v57  ;;  %1784 = vst [vmem:[%s2129_s8 + $0x38] sm:$0xff] %v1656_v60   ;;  %vm890_vm2 = vcmp.gt.f32.partialorder %v786_v58, 0.0  ;;  %v778_v4 = vadd.f32 %v2112_v38, %v777_v45 }
 0x119   : > { %1800 = vst [vmem:[%s2129_s8 + $0xb8] sm:$0xff] %v1736_v61   ;;  %v954_v2 = vmul.f32 0.2, %v786_v58  ;;  %1783 = vst [vmem:[%s2129_s8 + $0x30] sm:$0xff] %v1651_v63   ;;  %v1013_v5 = vsel %vm885_vm0, %v765_v52, %v949_v0  ;;  %v661_v7 = vadd.f32 %v1878_v49, %v2112_v38  ;;  %v789_v8 = vadd.f32 %v1910_v53, %v2112_v38  ;;  %v1881_v9 = vpop.f32.mrb[20].mxu0  ;;  %v1913_v10 = vpop.f32.mrb[20].mxu1 }
 0x11a   : > { %v986_v6 = vsel %vm858_vm1, %v658_v57, %v922_v1  ;;  %v1731_v11 = vpack.c.bf16 %v1013_v5, %v1012_v50  ;;  %vm856_vm3 = vcmp.gt.f32.partialorder %v650_v3, 0.0  ;;  %v920_v13 = vmul.f32 0.2, %v650_v3  ;;  %v665_v14 = vpop.f32.mrb[21].mxu0  ;;  %v793_v15 = vpop.f32.mrb[21].mxu1 }
 0x11b   : > { %v1018_v12 = vsel %vm890_vm2, %v786_v58, %v954_v2  ;;  %vm888_vm4 = vcmp.gt.f32.partialorder %v778_v4, 0.0  ;;  %v952_v16 = vmul.f32 0.2, %v778_v4  ;;  %vm859_vm5 = vcmp.gt.f32.partialorder %v661_v7, 0.0  ;;  %v1882_v21 = vpop.f32.mrb[22].mxu0  ;;  %v1914_v22 = vpop.f32.mrb[22].mxu1 }
 0x11c   : > { %v923_v17 = vmul.f32 0.2, %v661_v7  ;;  %1799 = vst [vmem:[%s2129_s8 + $0xb0] sm:$0xff] %v1731_v11   ;;  %v984_v18 = vsel %vm856_vm3, %v650_v3, %v920_v13  ;;  %vm891_vm6 = vcmp.gt.f32.partialorder %v789_v8, 0.0  ;;  %v955_v19 = vmul.f32 0.2, %v789_v8 }
 0x11d   : > { %v653_v20 = vadd.f32 %v2112_v38, %v652_v54  ;;  %v1016_v23 = vsel %vm888_vm4, %v778_v4, %v952_v16  ;;  %v781_v25 = vadd.f32 %v2112_v38, %v780_v59  ;;  %v674_v26 = vadd.f32 %v1881_v9, %v2112_v38  ;;  %v668_v27 = vpop.f32.mrb[23].mxu0  ;;  %v796_v28 = vpop.f32.mrb[23].mxu1 }
 0x11e   : > { %v987_v24 = vsel %vm859_vm5, %v661_v7, %v923_v17  ;;  %v1019_v30 = vsel %vm891_vm6, %v789_v8, %v955_v19  ;;  %v802_v36 = vadd.f32 %v1913_v10, %v2112_v38  ;;  %v666_v37 = vadd.f32 %v2112_v38, %v665_v14 }
 0x11f   : > { %v1666_v29 = vpack.c.bf16 %v987_v24, %v986_v6  ;;  %vm857_vm7 = vcmp.gt.f32.partialorder %v653_v20, 0.0  ;;  %v921_v31 = vmul.f32 0.2, %v653_v20  ;;  %v1746_v32 = vpack.c.bf16 %v1019_v30, %v1018_v12 }
 0x120   : > { %vm889_vm8 = vcmp.gt.f32.partialorder %v781_v25, 0.0  ;;  %v953_v33 = vmul.f32 0.2, %v781_v25  ;;  %vm862_vm9 = vcmp.gt.f32.partialorder %v674_v26, 0.0  ;;  %v926_v35 = vmul.f32 0.2, %v674_v26 }
 0x121   : > { %1786 = vst [vmem:[%s2129_s8 + $0x48] sm:$0xff] %v1666_v29   ;;  %v985_v34 = vsel %vm857_vm7, %v653_v20, %v921_v31  ;;  %1802 = vst [vmem:[%s2129_s8 + $0xc8] sm:$0xff] %v1746_v32   ;;  %v794_v41 = vadd.f32 %v2112_v38, %v793_v15  ;;  %v677_v42 = vadd.f32 %v1882_v21, %v2112_v38  ;;  %v1885_v43 = vpop.f32.mrb[24].mxu0  ;;  %v1917_v44 = vpop.f32.mrb[24].mxu1  ;;  %vm894_vm10 = vcmp.gt.f32.partialorder %v802_v36, 0.0 }
 0x122   : > { %v1661_v39 = vpack.c.bf16 %v985_v34, %v984_v18  ;;  %v1017_v40 = vsel %vm889_vm8, %v781_v25, %v953_v33  ;;  %v958_v46 = vmul.f32 0.2, %v802_v36  ;;  %v681_v47 = vpop.f32.mrb[25].mxu0  ;;  %v809_v48 = vpop.f32.mrb[25].mxu1  ;;  %v990_v49 = vsel %vm862_vm9, %v674_v26, %v926_v35 }
 0x123   : > { %v1741_v45 = vpack.c.bf16 %v1017_v40, %v1016_v23  ;;  %vm860_vm11 = vcmp.gt.f32.partialorder %v666_v37, 0.0  ;;  %v924_v50 = vmul.f32 0.2, %v666_v37  ;;  %v956_v51 = vmul.f32 0.2, %v794_v41  ;;  %v1886_v54 = vpop.f32.mrb[26].mxu0 }
 0x124   : > { %1785 = vst [vmem:[%s2129_s8 + $0x40] sm:$0xff] %v1661_v39   ;;  %vm892_vm12 = vcmp.gt.f32.partialorder %v794_v41, 0.0  ;;  %vm863_vm13 = vcmp.gt.f32.partialorder %v677_v42, 0.0  ;;  %v927_v52 = vmul.f32 0.2, %v677_v42  ;;  %v805_v53 = vadd.f32 %v1914_v22, %v2112_v38  ;;  %v1918_v55 = vpop.f32.mrb[26].mxu1 }
 0x125   : > { %1801 = vst [vmem:[%s2129_s8 + $0xc0] sm:$0xff] %v1741_v45   ;;  %v1022_v56 = vsel %vm894_vm10, %v802_v36, %v958_v46  ;;  %v988_v57 = vsel %vm860_vm11, %v666_v37, %v924_v50  ;;  %v669_v58 = vadd.f32 %v2112_v38, %v668_v27  ;;  %v797_v59 = vadd.f32 %v2112_v38, %v796_v28  ;;  %v684_v60 = vpop.f32.mrb[27].mxu0  ;;  %v812_v61 = vpop.f32.mrb[27].mxu1 }
 0x126   : > { %v991_v62 = vsel %vm863_vm13, %v677_v42, %v927_v52  ;;  %vm895_vm14 = vcmp.gt.f32.partialorder %v805_v53, 0.0  ;;  %v959_v63 = vmul.f32 0.2, %v805_v53  ;;  %v690_v0 = vadd.f32 %v1885_v43, %v2112_v38 }
 0x127   : > { %v1676_v1 = vpack.c.bf16 %v991_v62, %v990_v49  ;;  %vm861_vm15 = vcmp.gt.f32.partialorder %v669_v58, 0.0  ;;  %v925_v2 = vmul.f32 0.2, %v669_v58  ;;  %vm893_vm0 = vcmp.gt.f32.partialorder %v797_v59, 0.0 }
 0x128   : > { %v1023_v3 = vsel %vm895_vm14, %v805_v53, %v959_v63  ;;  %v957_v4 = vmul.f32 0.2, %v797_v59  ;;  %vm866_vm1 = vcmp.gt.f32.partialorder %v690_v0, 0.0  ;;  %v930_v5 = vmul.f32 0.2, %v690_v0 }
 0x129   : > { %1788 = vst [vmem:[%s2129_s8 + $0x58] sm:$0xff] %v1676_v1   ;;  %v1756_v6 = vpack.c.bf16 %v1023_v3, %v1022_v56  ;;  %v989_v7 = vsel %vm861_vm15, %v669_v58, %v925_v2  ;;  %v818_v8 = vadd.f32 %v1917_v44, %v2112_v38  ;;  %v682_v9 = vadd.f32 %v2112_v38, %v681_v47  ;;  %v1889_v10 = vpop.f32.mrb[28].mxu0  ;;  %v1921_v11 = vpop.f32.mrb[28].mxu1 }
 0x12a   : > { %v1020_v12 = vsel %vm892_vm12, %v794_v41, %v956_v51  ;;  %v1671_v13 = vpack.c.bf16 %v989_v7, %v988_v57  ;;  %v1021_v14 = vsel %vm893_vm0, %v797_v59, %v957_v4  ;;  %v810_v15 = vadd.f32 %v2112_v38, %v809_v48  ;;  %v697_v16 = vpop.f32.mrb[29].mxu0  ;;  %v825_v17 = vpop.f32.mrb[29].mxu1 }
 0x12b   : > { %1804 = vst [vmem:[%s2129_s8 + $0xd8] sm:$0xff] %v1756_v6   ;;  %v1751_v18 = vpack.c.bf16 %v1021_v14, %v1020_v12  ;;  %vm898_vm2 = vcmp.gt.f32.partialorder %v818_v8, 0.0  ;;  %v962_v19 = vmul.f32 0.2, %v818_v8  ;;  %vm864_vm3 = vcmp.gt.f32.partialorder %v682_v9, 0.0  ;;  %v1890_v20 = vpop.f32.mrb[30].mxu0 }
 0x12c   : > { %v1922_v21 = vpop.f32.mrb[30].mxu1  ;;  %1787 = vst [vmem:[%s2129_s8 + $0x50] sm:$0xff] %v1671_v13   ;;  %v994_v22 = vsel %vm866_vm1, %v690_v0, %v930_v5  ;;  %v928_v23 = vmul.f32 0.2, %v682_v9  ;;  %vm896_vm4 = vcmp.gt.f32.partialorder %v810_v15, 0.0  ;;  %v693_v24 = vadd.f32 %v1886_v54, %v2112_v38  ;;  %v700_v25 = vpop.f32.mrb[31].mxu0 }
 0x12d   : > { %1803 = vst [vmem:[%s2129_s8 + $0xd0] sm:$0xff] %v1751_v18   ;;  %v960_v26 = vmul.f32 0.2, %v810_v15  ;;  %v821_v27 = vadd.f32 %v1918_v55, %v2112_v38  ;;  %v685_v28 = vadd.f32 %v2112_v38, %v684_v60  ;;  %v813_v29 = vadd.f32 %v2112_v38, %v812_v61  ;;  %v828_v30 = vpop.f32.mrb[31].mxu1 }
 0x12e   : > { %v1026_v31 = vsel %vm898_vm2, %v818_v8, %v962_v19  ;;  %v992_v32 = vsel %vm864_vm3, %v682_v9, %v928_v23  ;;  %vm867_vm5 = vcmp.gt.f32.partialorder %v693_v24, 0.0  ;;  %v931_v33 = vmul.f32 0.2, %v693_v24 }
 0x12f   : > { %vm899_vm6 = vcmp.gt.f32.partialorder %v821_v27, 0.0  ;;  %v963_v34 = vmul.f32 0.2, %v821_v27  ;;  %vm865_vm7 = vcmp.gt.f32.partialorder %v685_v28, 0.0  ;;  %v929_v35 = vmul.f32 0.2, %v685_v28 }
 0x130   : > { %v995_v36 = vsel %vm867_vm5, %v693_v24, %v931_v33  ;;  %vm897_vm8 = vcmp.gt.f32.partialorder %v813_v29, 0.0  ;;  %v961_v37 = vmul.f32 0.2, %v813_v29  ;;  %v706_v39 = vadd.f32 %v1889_v10, %v2112_v38 }
 0x131   : > { %v1686_v40 = vpack.c.bf16 %v995_v36, %v994_v22  ;;  %v1027_v41 = vsel %vm899_vm6, %v821_v27, %v963_v34  ;;  %v993_v42 = vsel %vm865_vm7, %v685_v28, %v929_v35  ;;  %v834_v43 = vadd.f32 %v1921_v11, %v2112_v38 }
 0x132   : > { %v1024_v44 = vsel %vm896_vm4, %v810_v15, %v960_v26  ;;  %v1766_v45 = vpack.c.bf16 %v1027_v41, %v1026_v31  ;;  %v1681_v46 = vpack.c.bf16 %v993_v42, %v992_v32  ;;  %v1025_v47 = vsel %vm897_vm8, %v813_v29, %v961_v37 }
 0x133   : > { %1790 = vst [vmem:[%s2129_s8 + $0x68] sm:$0xff] %v1686_v40   ;;  %v1761_v48 = vpack.c.bf16 %v1025_v47, %v1024_v44  ;;  %vm870_vm9 = vcmp.gt.f32.partialorder %v706_v39, 0.0  ;;  %v934_v49 = vmul.f32 0.2, %v706_v39  ;;  %v966_v50 = vmul.f32 0.2, %v834_v43 }
 0x134   : > { %1806 = vst [vmem:[%s2129_s8 + $0xe8] sm:$0xff] %v1766_v45   ;;  %1789 = vst [vmem:[%s2129_s8 + $0x60] sm:$0xff] %v1681_v46   ;;  %v698_v51 = vadd.f32 %v2112_v38, %v697_v16  ;;  %v826_v52 = vadd.f32 %v2112_v38, %v825_v17  ;;  %v709_v53 = vadd.f32 %v1890_v20, %v2112_v38  ;;  %vm902_vm10 = vcmp.gt.f32.partialorder %v834_v43, 0.0 }
 0x135   : > { %v837_v54 = vadd.f32 %v1922_v21, %v2112_v38  ;;  %1805 = vst [vmem:[%s2129_s8 + $0xe0] sm:$0xff] %v1761_v48   ;;  %v701_v55 = vadd.f32 %v2112_v38, %v700_v25  ;;  %v829_v56 = vadd.f32 %v2112_v38, %v828_v30  ;;  %v998_v57 = vsel %vm870_vm9, %v706_v39, %v934_v49 }
 0x136   : > { %vm868_vm11 = vcmp.gt.f32.partialorder %v698_v51, 0.0  ;;  %v932_v58 = vmul.f32 0.2, %v698_v51  ;;  %v964_v59 = vmul.f32 0.2, %v826_v52  ;;  %vm871_vm12 = vcmp.gt.f32.partialorder %v709_v53, 0.0 }
 0x137   : > { %v935_v60 = vmul.f32 0.2, %v709_v53  ;;  %vm903_vm13 = vcmp.gt.f32.partialorder %v837_v54, 0.0  ;;  %v967_v61 = vmul.f32 0.2, %v837_v54  ;;  %v1030_v62 = vsel %vm902_vm10, %v834_v43, %v966_v50 }
 0x138   : > { %vm900_vm14 = vcmp.gt.f32.partialorder %v826_v52, 0.0  ;;  %vm869_vm15 = vcmp.gt.f32.partialorder %v701_v55, 0.0  ;;  %v933_v63 = vmul.f32 0.2, %v701_v55  ;;  %vm901_vm0 = vcmp.gt.f32.partialorder %v829_v56, 0.0 }
 0x139   : > { %v999_v0 = vsel %vm871_vm12, %v709_v53, %v935_v60  ;;  %v1031_v1 = vsel %vm903_vm13, %v837_v54, %v967_v61  ;;  %v965_v38 = vmul.f32 0.2, %v829_v56  ;;  %v996_v2 = vsel %vm868_vm11, %v698_v51, %v932_v58 }
 0x13a   : > { %v1696_v3 = vpack.c.bf16 %v999_v0, %v998_v57  ;;  %v1776_v4 = vpack.c.bf16 %v1031_v1, %v1030_v62  ;;  %v997_v5 = vsel %vm869_vm15, %v701_v55, %v933_v63  ;;  %v1028_v6 = vsel %vm900_vm14, %v826_v52, %v964_v59 }
 0x13b   : > { %v1691_v7 = vpack.c.bf16 %v997_v5, %v996_v2  ;;  %v1029_v8 = vsel %vm901_vm0, %v829_v56, %v965_v38 }
 0x13c   : > { %1792 = vst [vmem:[%s2129_s8 + $0x78] sm:$0xff] %v1696_v3   ;;  %1808 = vst [vmem:[%s2129_s8 + $0xf8] sm:$0xff] %v1776_v4   ;;  %v1771_v9 = vpack.c.bf16 %v1029_v8, %v1028_v6 }
 0x13d   : > { %1791 = vst [vmem:[%s2129_s8 + $0x70] sm:$0xff] %v1691_v7  }
 0x13e   : > { %1807 = vst [vmem:[%s2129_s8 + $0xf0] sm:$0xff] %v1771_v9  }
 0x13f PF: > { %s13_s12 = sadd.s32 1, %s1987_s12  }
 0x140   : > { %p10_p4 = scmp.ge.s32.totalorder %s13_s12, 4  }
 0x142   :  { %12 = sbr.rel (!%p10_p4) target bundleno = 1 (0x1), region = 62 }

// kernel: discriminator_forward.4
= control target key start
LH: loop header
LB: loop body
LE: loop exit
PB: predicated region body
PF: predicated region fallthrough
CT: control target
= control target key end

     0   :  { %v5318_v0 = vmov 0   ;;  %s8351_s1 = inlined_call_operand.vmem [shape: bf16[1024,128], index: 1, kind: input, shape index: {}]   ;;  %s8352_s0 = inlined_call_operand.vmem [shape: bf16[512,1024], index: 0, kind: input, shape index: {}]   ;;  %s8353_s2 = inlined_call_operand.vmem [shape: f32[1,128], index: 2, kind: input, shape index: {}]   ;;  %s8354_s3 = inlined_call_operand.vmem [shape: f32[1,128], index: 3, kind: input, shape index: {}]   ;;  %s8355_s4 = inlined_call_operand.vmem [shape: f32[1,128], index: 4, kind: input, shape index: {}]   ;;  %s8356_s5 = inlined_call_operand.vmem [shape: bf16[512,128], index: 5, kind: output, shape index: {}]  }
   0x1   :  { %2076 = vmatprep.subr.bf16.mxu1 %v5318_v0  ;;  %2654 = vmatprep.subr.bf16.mxu0 %v5318_v0  ;;  %v5252_v1 = vld [vmem:[%s8351_s1] sm:$0xff]   ;;  %v5254_v3 = vld [vmem:[%s8351_s1 + $0x8] sm:$0xff]   ;;  %v5256_v5 = vld [vmem:[%s8351_s1 + $0x10] sm:$0xff]  }
   0x2   :  { %v5253_v2 = vld [vmem:[%s8351_s1 + $0x100] sm:$0xff]   ;;  %2077 = vmatpush1.bf16.msra.mxu1 %v5252_v1  ;;  %v5255_v4 = vld [vmem:[%s8351_s1 + $0x108] sm:$0xff]   ;;  %v5257_v6 = vld [vmem:[%s8351_s1 + $0x110] sm:$0xff]  }
   0x3   :  { %2655 = vmatpush1.bf16.msra.mxu0 %v5253_v2  ;;  %2078 = vmatprep.subr.bf16.mxu1 %v5318_v0  ;;  %v5258_v7 = vld [vmem:[%s8351_s1 + $0x18] sm:$0xff]   ;;  %v5260_v9 = vld [vmem:[%s8351_s1 + $0x20] sm:$0xff]   ;;  %v5262_v11 = vld [vmem:[%s8351_s1 + $0x28] sm:$0xff]  }
   0x4   :  { %2656 = vmatprep.subr.bf16.mxu0 %v5318_v0  ;;  %v5259_v8 = vld [vmem:[%s8351_s1 + $0x118] sm:$0xff]   ;;  %v5261_v10 = vld [vmem:[%s8351_s1 + $0x120] sm:$0xff]   ;;  %v5263_v12 = vld [vmem:[%s8351_s1 + $0x128] sm:$0xff]  }
   0x5   :  { %v5264_v13 = vld [vmem:[%s8351_s1 + $0x30] sm:$0xff]   ;;  %v5266_v15 = vld [vmem:[%s8351_s1 + $0x38] sm:$0xff]   ;;  %v5268_v17 = vld [vmem:[%s8351_s1 + $0x40] sm:$0xff]  }
   0x6   :  { %2079 = vmatpush1.bf16.msra.mxu1 %v5254_v3  ;;  %v5265_v14 = vld [vmem:[%s8351_s1 + $0x130] sm:$0xff]   ;;  %v5267_v16 = vld [vmem:[%s8351_s1 + $0x138] sm:$0xff]   ;;  %v5269_v18 = vld [vmem:[%s8351_s1 + $0x140] sm:$0xff]  }
   0x7   :  { %2657 = vmatpush1.bf16.msra.mxu0 %v5255_v4  ;;  %2080 = vmatprep.subr.bf16.mxu1 %v5318_v0  ;;  %v5424_v19 = vld [vmem:[%s8352_s0] sm:$0xff]  ;;  %v5434_v21 = vld [vmem:[%s8352_s0 + $0x10] sm:$0xff]  ;;  %v5270_v24 = vld [vmem:[%s8351_s1 + $0x48] sm:$0xff]  }
   0x8   :  { %2658 = vmatprep.subr.bf16.mxu0 %v5318_v0  ;;  %v5429_v20 = vld [vmem:[%s8352_s0 + $0x20] sm:$0xff]  ;;  %v5441_v23 = vld [vmem:[%s8352_s0 + $0x30] sm:$0xff]  ;;  %v5271_v26 = vld [vmem:[%s8351_s1 + $0x148] sm:$0xff]  }
   0x9   :  { %v4227_v22 = vcombine.high %v5424_v19, %v5429_v20  ;;  %v4231_v25 = vcombine.high %v5434_v21, %v5441_v23  ;;  %v5272_v27 = vld [vmem:[%s8351_s1 + $0x50] sm:$0xff]   ;;  %v5274_v29 = vld [vmem:[%s8351_s1 + $0x58] sm:$0xff]   ;;  %v5276_v31 = vld [vmem:[%s8351_s1 + $0x60] sm:$0xff]   ;;  %v4226_v42 = vcombine.low %v5424_v19, %v5429_v20  ;;  %v4230_v44 = vcombine.low %v5434_v21, %v5441_v23 }
   0xa   :  { %2081 = vmatpush1.bf16.msra.mxu1 %v5256_v5  ;;  %v5273_v28 = vld [vmem:[%s8351_s1 + $0x150] sm:$0xff]   ;;  %v5275_v30 = vld [vmem:[%s8351_s1 + $0x158] sm:$0xff]   ;;  %v5277_v32 = vld [vmem:[%s8351_s1 + $0x160] sm:$0xff]  }
   0xb   :  { %2659 = vmatpush1.bf16.msra.mxu0 %v5257_v6  ;;  %2082 = vmatprep.subr.bf16.mxu1 %v5318_v0  ;;  %v5278_v33 = vld [vmem:[%s8351_s1 + $0x68] sm:$0xff]   ;;  %v5280_v35 = vld [vmem:[%s8351_s1 + $0x70] sm:$0xff]   ;;  %v5282_v37 = vld [vmem:[%s8351_s1 + $0x78] sm:$0xff]  }
   0xc   :  { %2660 = vmatprep.subr.bf16.mxu0 %v5318_v0  ;;  %2108 = vmatprep.mubr.bf16.mxu1 %v4227_v22  ;;  %v5279_v34 = vld [vmem:[%s8351_s1 + $0x168] sm:$0xff]   ;;  %v5281_v36 = vld [vmem:[%s8351_s1 + $0x170] sm:$0xff]   ;;  %v5283_v38 = vld [vmem:[%s8351_s1 + $0x178] sm:$0xff]  }
   0xd   :  { %2686 = vmatprep.mubr.bf16.mxu0 %v4231_v25  ;;  %v29_v39 = vld [vmem:[%s8352_s0 + $0x40] sm:$0xff]  ;;  %v31_v41 = vld [vmem:[%s8352_s0 + $0x50] sm:$0xff]  ;;  %v5286_v51 = vld [vmem:[%s8351_s1 + $0x88] sm:$0xff]  }
   0xe   :  { %2083 = vmatpush1.bf16.msra.mxu1 %v5258_v7  ;;  %v33_v40 = vld [vmem:[%s8352_s0 + $0x60] sm:$0xff]  ;;  %v35_v43 = vld [vmem:[%s8352_s0 + $0x70] sm:$0xff]  ;;  %v5287_v52 = vld [vmem:[%s8351_s1 + $0x188] sm:$0xff]  }
   0xf   :  { %2661 = vmatpush1.bf16.msra.mxu0 %v5259_v8  ;;  %2084 = vmatprep.subr.bf16.mxu1 %v5318_v0  ;;  %v5284_v45 = vld [vmem:[%s8351_s1 + $0x80] sm:$0xff]   ;;  %v4235_v47 = vcombine.high %v29_v39, %v33_v40  ;;  %v4239_v48 = vcombine.high %v31_v41, %v35_v43  ;;  %v39_v53 = vld [vmem:[%s8352_s0 + $0x90] sm:$0xff]  ;;  %v4234_v55 = vcombine.low %v29_v39, %v33_v40  ;;  %v5290_v2 = vld [vmem:[%s8351_s1 + $0x98] sm:$0xff]  }
  0x10   :  { %2662 = vmatprep.subr.bf16.mxu0 %v5318_v0  ;;  %v5285_v46 = vld [vmem:[%s8351_s1 + $0x180] sm:$0xff]   ;;  %v43_v54 = vld [vmem:[%s8352_s0 + $0xb0] sm:$0xff]  ;;  %v4238_v56 = vcombine.low %v31_v41, %v35_v43  ;;  %v5291_v3 = vld [vmem:[%s8351_s1 + $0x198] sm:$0xff]  }
  0x11   :  { %v37_v49 = vld [vmem:[%s8352_s0 + $0x80] sm:$0xff]  ;;  %v4247_v58 = vcombine.high %v39_v53, %v43_v54  ;;  %v5288_v59 = vld [vmem:[%s8351_s1 + $0x90] sm:$0xff]   ;;  %v4246_v6 = vcombine.low %v39_v53, %v43_v54  ;;  %v5303_v39 = vld [vmem:[%s8351_s1 + $0x1c8] sm:$0xff]  }
  0x12   :  { %2085 = vmatpush1.bf16.msra.mxu1 %v5260_v9  ;;  %v41_v50 = vld [vmem:[%s8352_s0 + $0xa0] sm:$0xff]  ;;  %v5289_v60 = vld [vmem:[%s8351_s1 + $0x190] sm:$0xff]   ;;  %v5306_v54 = vld [vmem:[%s8351_s1 + $0xd8] sm:$0xff]  }
  0x13   :  { %2663 = vmatpush1.bf16.msra.mxu0 %v5261_v10  ;;  %2086 = vmatprep.subr.bf16.mxu1 %v5318_v0  ;;  %v4243_v57 = vcombine.high %v37_v49, %v41_v50  ;;  %v45_v61 = vld [vmem:[%s8352_s0 + $0xc0] sm:$0xff]  ;;  %v47_v63 = vld [vmem:[%s8352_s0 + $0xd0] sm:$0xff]  ;;  %v4242_v4 = vcombine.low %v37_v49, %v41_v50 }
  0x14   :  { %2664 = vmatprep.subr.bf16.mxu0 %v5318_v0  ;;  %v49_v62 = vld [vmem:[%s8352_s0 + $0xe0] sm:$0xff]  ;;  %v51_v1 = vld [vmem:[%s8352_s0 + $0xf0] sm:$0xff] }
  0x15   :  { %v5292_v5 = vld [vmem:[%s8351_s1 + $0xa0] sm:$0xff]   ;;  %v4251_v7 = vcombine.high %v45_v61, %v49_v62  ;;  %v4255_v9 = vcombine.high %v47_v63, %v51_v1  ;;  %v5296_v20 = vld [vmem:[%s8351_s1 + $0xb0] sm:$0xff]  }
  0x16   :  { %2087 = vmatpush1.bf16.msra.mxu1 %v5262_v11  ;;  %v5293_v8 = vld [vmem:[%s8351_s1 + $0x1a0] sm:$0xff]   ;;  %v5297_v21 = vld [vmem:[%s8351_s1 + $0x1b0] sm:$0xff]  }
  0x17   :  { %2665 = vmatpush1.bf16.msra.mxu0 %v5263_v12  ;;  %2088 = vmatprep.subr.bf16.mxu1 %v5318_v0  ;;  %v53_v10 = vld [vmem:[%s8352_s0 + $0x100] sm:$0xff]  ;;  %v55_v12 = vld [vmem:[%s8352_s0 + $0x110] sm:$0xff] }
  0x18   :  { %2666 = vmatprep.subr.bf16.mxu0 %v5318_v0  ;;  %v57_v11 = vld [vmem:[%s8352_s0 + $0x120] sm:$0xff]  ;;  %v63_v25 = vld [vmem:[%s8352_s0 + $0x150] sm:$0xff] }
  0x19   :  { %v61_v22 = vld [vmem:[%s8352_s0 + $0x140] sm:$0xff]  ;;  %v83_v49 = vld [vmem:[%s8352_s0 + $0x1f0] sm:$0xff] }
  0x1a   :  { %2089 = vmatpush1.bf16.msra.mxu1 %v5264_v13  ;;  %v59_v13 = vld [vmem:[%s8352_s0 + $0x130] sm:$0xff]  ;;  %v65_v23 = vld [vmem:[%s8352_s0 + $0x160] sm:$0xff] }
  0x1b   :  { %2667 = vmatpush1.bf16.msra.mxu0 %v5265_v14  ;;  %2090 = vmatprep.subr.bf16.mxu1 %v5318_v0  ;;  %v5294_v14 = vld [vmem:[%s8351_s1 + $0xa8] sm:$0xff]   ;;  %v4263_v19 = vcombine.high %v55_v12, %v59_v13  ;;  %v4266_v40 = vcombine.low %v61_v22, %v65_v23 }
  0x1c   :  { %2668 = vmatprep.subr.bf16.mxu0 %v5318_v0 }
  0x1e   :  { %2091 = vmatpush1.bf16.msra.mxu1 %v5266_v15  ;;  %v5295_v15 = vld [vmem:[%s8351_s1 + $0x1a8] sm:$0xff]  }
  0x1f   :  { %2669 = vmatpush1.bf16.msra.mxu0 %v5267_v16  ;;  %2092 = vmatprep.subr.bf16.mxu1 %v5318_v0  ;;  %v4250_v16 = vcombine.low %v45_v61, %v49_v62 }
  0x20   :  { %2670 = vmatprep.subr.bf16.mxu0 %v5318_v0 }
  0x22   :  { %2093 = vmatpush1.bf16.msra.mxu1 %v5268_v17  ;;  %v4254_v17 = vcombine.low %v47_v63, %v51_v1  ;;  %v93_v1 = vld [vmem:[%s8352_s0 + $0x240] sm:$0xff] }
  0x23   :  { %2671 = vmatpush1.bf16.msra.mxu0 %v5269_v18  ;;  %2094 = vmatprep.subr.bf16.mxu1 %v5318_v0  ;;  %v4259_v18 = vcombine.high %v53_v10, %v57_v11 }
  0x24   :  { %2672 = vmatprep.subr.bf16.mxu0 %v5318_v0 }
  0x26   :  { %2095 = vmatpush1.bf16.msra.mxu1 %v5270_v24  ;;  %v5298_v24 = vld [vmem:[%s8351_s1 + $0xb8] sm:$0xff]  }
  0x27   :  { %2673 = vmatpush1.bf16.msra.mxu0 %v5271_v26  ;;  %2096 = vmatprep.subr.bf16.mxu1 %v5318_v0  ;;  %v67_v26 = vld [vmem:[%s8352_s0 + $0x170] sm:$0xff] }
  0x28   :  { %2674 = vmatprep.subr.bf16.mxu0 %v5318_v0  ;;  %v4270_v41 = vcombine.low %v63_v25, %v67_v26 }
  0x2a   :  { %2097 = vmatpush1.bf16.msra.mxu1 %v5272_v27  ;;  %v5299_v27 = vld [vmem:[%s8351_s1 + $0x1b8] sm:$0xff]  }
  0x2b   :  { %2675 = vmatpush1.bf16.msra.mxu0 %v5273_v28  ;;  %2098 = vmatprep.subr.bf16.mxu1 %v5318_v0  ;;  %v4258_v28 = vcombine.low %v53_v10, %v57_v11  ;;  %v5309_v10 = vld [vmem:[%s8351_s1 + $0x1e0] sm:$0xff]  }
  0x2c   :  { %2676 = vmatprep.subr.bf16.mxu0 %v5318_v0  ;;  %v101_v11 = vld [vmem:[%s8352_s0 + $0x280] sm:$0xff] }
  0x2e   :  { %2099 = vmatpush1.bf16.msra.mxu1 %v5274_v29  ;;  %v4262_v29 = vcombine.low %v55_v12, %v59_v13  ;;  %v105_v12 = vld [vmem:[%s8352_s0 + $0x2a0] sm:$0xff]  ;;  %v103_v13 = vld [vmem:[%s8352_s0 + $0x290] sm:$0xff] }
  0x2f   :  { %2677 = vmatpush1.bf16.msra.mxu0 %v5275_v30  ;;  %2100 = vmatprep.subr.bf16.mxu1 %v5318_v0  ;;  %v4267_v30 = vcombine.high %v61_v22, %v65_v23  ;;  %v115_v22 = vld [vmem:[%s8352_s0 + $0x2f0] sm:$0xff]  ;;  %v4306_v23 = vcombine.low %v101_v11, %v105_v12 }
  0x30   :  { %2678 = vmatprep.subr.bf16.mxu0 %v5318_v0 }
  0x32   :  { %2101 = vmatpush1.bf16.msra.mxu1 %v5276_v31  ;;  %v4271_v31 = vcombine.high %v63_v25, %v67_v26 }
  0x33   :  { %2679 = vmatpush1.bf16.msra.mxu0 %v5277_v32  ;;  %2102 = vmatprep.subr.bf16.mxu1 %v5318_v0  ;;  %v5300_v32 = vld [vmem:[%s8351_s1 + $0xc0] sm:$0xff]  }
  0x34   :  { %2680 = vmatprep.subr.bf16.mxu0 %v5318_v0 }
  0x36   :  { %2103 = vmatpush1.bf16.msra.mxu1 %v5278_v33  ;;  %v5301_v33 = vld [vmem:[%s8351_s1 + $0x1c0] sm:$0xff]  }
  0x37   :  { %2681 = vmatpush1.bf16.msra.mxu0 %v5279_v34  ;;  %2104 = vmatprep.subr.bf16.mxu1 %v5318_v0  ;;  %v69_v34 = vld [vmem:[%s8352_s0 + $0x180] sm:$0xff] }
  0x38   :  { %2682 = vmatprep.subr.bf16.mxu0 %v5318_v0 }
  0x3a   :  { %2105 = vmatpush1.bf16.msra.mxu1 %v5280_v35  ;;  %v73_v35 = vld [vmem:[%s8352_s0 + $0x1a0] sm:$0xff] }
  0x3b   :  { %2683 = vmatpush1.bf16.msra.mxu0 %v5281_v36  ;;  %2106 = vmatprep.subr.bf16.mxu1 %v5318_v0  ;;  %v5302_v36 = vld [vmem:[%s8351_s1 + $0xc8] sm:$0xff]   ;;  %v4274_v50 = vcombine.low %v69_v34, %v73_v35 }
  0x3c   :  { %2684 = vmatprep.subr.bf16.mxu0 %v5318_v0 }
  0x3e   :  { %2107 = vmatpush1.bf16.msra.mxu1 %v5282_v37  ;;  %v71_v37 = vld [vmem:[%s8352_s0 + $0x190] sm:$0xff] }
  0x3f   :  { %2685 = vmatpush1.bf16.msra.mxu0 %v5283_v38  ;;  %2365 = vmatprep.subr.bf16.mxu1 %v5318_v0  ;;  %v75_v38 = vld [vmem:[%s8352_s0 + $0x1b0] sm:$0xff] }
  0x40   :  { %2943 = vmatprep.subr.bf16.mxu0 %v5318_v0  ;;  %v4279_v43 = vcombine.high %v71_v37, %v75_v38 }
  0x41   :  { %2109 = vmatmul.mubr.bf16.vlgmr.msra.gmra.mrb[0].mxu1 %v4226_v42  ;;  %v4275_v42 = vcombine.high %v69_v34, %v73_v35 }
  0x42   :  { %2687 = vmatmul.mubr.bf16.vlgmr.msra.gmra.mrb[0].mxu0 %v4230_v44  ;;  %2366 = vmatpush1.bf16.msra.mxu1 %v5284_v45  ;;  %v5304_v44 = vld [vmem:[%s8351_s1 + $0xd0] sm:$0xff]  }
  0x43   :  { %2944 = vmatpush1.bf16.msra.mxu0 %v5285_v46  ;;  %2116 = vmatprep.mubr.bf16.mxu1 %v4235_v47  ;;  %v5305_v45 = vld [vmem:[%s8351_s1 + $0x1d0] sm:$0xff]   ;;  %v77_v46 = vld [vmem:[%s8352_s0 + $0x1c0] sm:$0xff] }
  0x44   :  { %2694 = vmatprep.mubr.bf16.mxu0 %v4239_v48  ;;  %2367 = vmatprep.subr.bf16.mxu1 %v5318_v0  ;;  %v81_v47 = vld [vmem:[%s8352_s0 + $0x1e0] sm:$0xff]  ;;  %v79_v48 = vld [vmem:[%s8352_s0 + $0x1d0] sm:$0xff] }
  0x45   :  { %2945 = vmatprep.subr.bf16.mxu0 %v5318_v0  ;;  %v4287_v53 = vcombine.high %v79_v48, %v83_v49  ;;  %v4286_v61 = vcombine.low %v79_v48, %v83_v49  ;;  %v137_v48 = vld [vmem:[%s8352_s0 + $0x3a0] sm:$0xff]  ;;  %v135_v49 = vld [vmem:[%s8352_s0 + $0x390] sm:$0xff] }
  0x46   :  { %2368 = vmatpush1.bf16.msra.mxu1 %v5286_v51  ;;  %v4278_v51 = vcombine.low %v71_v37, %v75_v38  ;;  %v125_v37 = vld [vmem:[%s8352_s0 + $0x340] sm:$0xff] }
  0x47   :  { %2946 = vmatpush1.bf16.msra.mxu0 %v5287_v52  ;;  %2369 = vmatprep.subr.bf16.mxu1 %v5318_v0  ;;  %v4283_v52 = vcombine.high %v77_v46, %v81_v47  ;;  %v129_v38 = vld [vmem:[%s8352_s0 + $0x360] sm:$0xff] }
  0x48   :  { %2947 = vmatprep.subr.bf16.mxu0 %v5318_v0 }
  0x49   :  { %2117 = vmatmul.mubr.bf16.gmra.mrb[4].mxu1 %v4234_v55  ;;  %v5307_v55 = vld [vmem:[%s8351_s1 + $0x1d8] sm:$0xff]  }
  0x4a   :  { %2695 = vmatmul.mubr.bf16.gmra.mrb[4].mxu0 %v4238_v56  ;;  %2124 = vmatprep.mubr.bf16.mxu1 %v4243_v57  ;;  %v85_v56 = vld [vmem:[%s8352_s0 + $0x200] sm:$0xff] }
  0x4b   :  { %2702 = vmatprep.mubr.bf16.mxu0 %v4247_v58  ;;  %2370 = vmatpush1.bf16.msra.mxu1 %v5288_v59  ;;  %v89_v57 = vld [vmem:[%s8352_s0 + $0x220] sm:$0xff]  ;;  %v87_v58 = vld [vmem:[%s8352_s0 + $0x210] sm:$0xff] }
  0x4c   :  { %2948 = vmatpush1.bf16.msra.mxu0 %v5289_v60  ;;  %2371 = vmatprep.subr.bf16.mxu1 %v5318_v0  ;;  %v91_v59 = vld [vmem:[%s8352_s0 + $0x230] sm:$0xff]  ;;  %v4282_v60 = vcombine.low %v77_v46, %v81_v47  ;;  %v4291_v62 = vcombine.high %v85_v56, %v89_v57  ;;  %v133_v47 = vld [vmem:[%s8352_s0 + $0x380] sm:$0xff] }
  0x4d   :  { %2949 = vmatprep.subr.bf16.mxu0 %v5318_v0  ;;  %v4295_v63 = vcombine.high %v87_v58, %v91_v59  ;;  %v5313_v46 = vld [vmem:[%s8351_s1 + $0x1f0] sm:$0xff]  }
  0x4f   :  { %2372 = vmatpush1.bf16.msra.mxu1 %v5290_v2  ;;  %v97_v2 = vld [vmem:[%s8352_s0 + $0x260] sm:$0xff] }
  0x50   :  { %2950 = vmatpush1.bf16.msra.mxu0 %v5291_v3  ;;  %2373 = vmatprep.subr.bf16.mxu1 %v5318_v0  ;;  %v95_v3 = vld [vmem:[%s8352_s0 + $0x250] sm:$0xff] }
  0x51   :  { %2125 = vmatmul.mubr.bf16.gmra.mrb[8].mxu1 %v4242_v4  ;;  %2951 = vmatprep.subr.bf16.mxu0 %v5318_v0  ;;  %v99_v4 = vld [vmem:[%s8352_s0 + $0x270] sm:$0xff] }
  0x52   :  { %2703 = vmatmul.mubr.bf16.gmra.mrb[8].mxu0 %v4246_v6  ;;  %2132 = vmatprep.mubr.bf16.mxu1 %v4251_v7  ;;  %v4294_v6 = vcombine.low %v87_v58, %v91_v59  ;;  %v4299_v7 = vcombine.high %v93_v1, %v97_v2  ;;  %v4338_v58 = vcombine.low %v133_v47, %v137_v48 }
  0x53   :  { %2710 = vmatprep.mubr.bf16.mxu0 %v4255_v9  ;;  %2374 = vmatpush1.bf16.msra.mxu1 %v5292_v5  ;;  %v4290_v5 = vcombine.low %v85_v56, %v89_v57  ;;  %v5308_v9 = vld [vmem:[%s8351_s1 + $0xe0] sm:$0xff]   ;;  %v143_v57 = vld [vmem:[%s8352_s0 + $0x3d0] sm:$0xff] }
  0x54   :  { %2952 = vmatpush1.bf16.msra.mxu0 %v5293_v8  ;;  %2375 = vmatprep.subr.bf16.mxu1 %v5318_v0  ;;  %v4303_v8 = vcombine.high %v95_v3, %v99_v4  ;;  %v145_v56 = vld [vmem:[%s8352_s0 + $0x3e0] sm:$0xff] }
  0x55   :  { %2953 = vmatprep.subr.bf16.mxu0 %v5318_v0 }
  0x57   :  { %2376 = vmatpush1.bf16.msra.mxu1 %v5294_v14  ;;  %v107_v14 = vld [vmem:[%s8352_s0 + $0x2b0] sm:$0xff] }
  0x58   :  { %2954 = vmatpush1.bf16.msra.mxu0 %v5295_v15  ;;  %2377 = vmatprep.subr.bf16.mxu1 %v5318_v0  ;;  %v4298_v15 = vcombine.low %v93_v1, %v97_v2  ;;  %v149_v1 = vld [vmem:[%s8352_s0 + $0x400] sm:$0xff] }
  0x59   :  { %2133 = vmatmul.mubr.bf16.gmra.mrb[12].mxu1 %v4250_v16  ;;  %2955 = vmatprep.subr.bf16.mxu0 %v5318_v0  ;;  %v4302_v16 = vcombine.low %v95_v3, %v99_v4  ;;  %v153_v2 = vld [vmem:[%s8352_s0 + $0x420] sm:$0xff]  ;;  %v151_v3 = vld [vmem:[%s8352_s0 + $0x410] sm:$0xff] }
  0x5a   :  { %2711 = vmatmul.mubr.bf16.gmra.mrb[12].mxu0 %v4254_v17  ;;  %2140 = vmatprep.mubr.bf16.mxu1 %v4259_v18  ;;  %v4307_v17 = vcombine.high %v101_v11, %v105_v12  ;;  %v4311_v18 = vcombine.high %v103_v13, %v107_v14  ;;  %v155_v4 = vld [vmem:[%s8352_s0 + $0x430] sm:$0xff] }
  0x5b   :  { %2718 = vmatprep.mubr.bf16.mxu0 %v4263_v19  ;;  %2378 = vmatpush1.bf16.msra.mxu1 %v5296_v20  ;;  %v109_v19 = vld [vmem:[%s8352_s0 + $0x2c0] sm:$0xff]  ;;  %v159_v11 = vld [vmem:[%s8352_s0 + $0x450] sm:$0xff] }
  0x5c   :  { %2956 = vmatpush1.bf16.msra.mxu0 %v5297_v21  ;;  %2379 = vmatprep.subr.bf16.mxu1 %v5318_v0  ;;  %v113_v20 = vld [vmem:[%s8352_s0 + $0x2e0] sm:$0xff]  ;;  %v111_v21 = vld [vmem:[%s8352_s0 + $0x2d0] sm:$0xff] }
  0x5d   :  { %2957 = vmatprep.subr.bf16.mxu0 %v5318_v0  ;;  %v4315_v25 = vcombine.high %v109_v19, %v113_v20  ;;  %v4319_v26 = vcombine.high %v111_v21, %v115_v22  ;;  %v4318_v34 = vcombine.low %v111_v21, %v115_v22  ;;  %v163_v12 = vld [vmem:[%s8352_s0 + $0x470] sm:$0xff] }
  0x5e   :  { %v4366_v22 = vcombine.low %v159_v11, %v163_v12 }
  0x5f   :  { %2380 = vmatpush1.bf16.msra.mxu1 %v5298_v24  ;;  %v4310_v24 = vcombine.low %v103_v13, %v107_v14  ;;  %v4354_v13 = vcombine.low %v149_v1, %v153_v2  ;;  %v4358_v14 = vcombine.low %v151_v3, %v155_v4 }
  0x60   :  { %2958 = vmatpush1.bf16.msra.mxu0 %v5299_v27  ;;  %2381 = vmatprep.subr.bf16.mxu1 %v5318_v0  ;;  %v5310_v27 = vld [vmem:[%s8351_s1 + $0xe8] sm:$0xff]  }
  0x61   :  { %2141 = vmatmul.mubr.bf16.gmra.mrb[16].mxu1 %v4258_v28  ;;  %2959 = vmatprep.subr.bf16.mxu0 %v5318_v0  ;;  %v5311_v28 = vld [vmem:[%s8351_s1 + $0x1e8] sm:$0xff]  }
  0x62   :  { %2719 = vmatmul.mubr.bf16.gmra.mrb[16].mxu0 %v4262_v29  ;;  %2148 = vmatprep.mubr.bf16.mxu1 %v4267_v30  ;;  %v117_v29 = vld [vmem:[%s8352_s0 + $0x300] sm:$0xff] }
  0x63   :  { %2726 = vmatprep.mubr.bf16.mxu0 %v4271_v31  ;;  %2382 = vmatpush1.bf16.msra.mxu1 %v5300_v32  ;;  %v121_v30 = vld [vmem:[%s8352_s0 + $0x320] sm:$0xff]  ;;  %v119_v31 = vld [vmem:[%s8352_s0 + $0x310] sm:$0xff] }
  0x64   :  { %2960 = vmatpush1.bf16.msra.mxu0 %v5301_v33  ;;  %2383 = vmatprep.subr.bf16.mxu1 %v5318_v0  ;;  %v123_v32 = vld [vmem:[%s8352_s0 + $0x330] sm:$0xff]  ;;  %v4314_v33 = vcombine.low %v109_v19, %v113_v20  ;;  %v4323_v35 = vcombine.high %v117_v29, %v121_v30 }
  0x65   :  { %2961 = vmatprep.subr.bf16.mxu0 %v5318_v0  ;;  %v167_v19 = vld [vmem:[%s8352_s0 + $0x490] sm:$0xff] }
  0x66   :  { %v171_v20 = vld [vmem:[%s8352_s0 + $0x4b0] sm:$0xff] }
  0x67   :  { %2384 = vmatpush1.bf16.msra.mxu1 %v5302_v36  ;;  %v4327_v36 = vcombine.high %v119_v31, %v123_v32 }
  0x68   :  { %2962 = vmatpush1.bf16.msra.mxu0 %v5303_v39  ;;  %2385 = vmatprep.subr.bf16.mxu1 %v5318_v0  ;;  %v127_v39 = vld [vmem:[%s8352_s0 + $0x350] sm:$0xff] }
  0x69   :  { %2149 = vmatmul.mubr.bf16.gmra.mrb[20].mxu1 %v4266_v40  ;;  %2963 = vmatprep.subr.bf16.mxu0 %v5318_v0  ;;  %v131_v40 = vld [vmem:[%s8352_s0 + $0x370] sm:$0xff] }
  0x6a   :  { %2727 = vmatmul.mubr.bf16.gmra.mrb[20].mxu0 %v4270_v41  ;;  %2156 = vmatprep.mubr.bf16.mxu1 %v4275_v42  ;;  %v4322_v41 = vcombine.low %v117_v29, %v121_v30  ;;  %v4326_v42 = vcombine.low %v119_v31, %v123_v32  ;;  %v4374_v30 = vcombine.low %v167_v19, %v171_v20 }
  0x6b   :  { %2734 = vmatprep.mubr.bf16.mxu0 %v4279_v43  ;;  %2386 = vmatpush1.bf16.msra.mxu1 %v5304_v44  ;;  %v4331_v43 = vcombine.high %v125_v37, %v129_v38  ;;  %v4335_v44 = vcombine.high %v127_v39, %v131_v40 }
  0x6c   :  { %2964 = vmatpush1.bf16.msra.mxu0 %v5305_v45  ;;  %2387 = vmatprep.subr.bf16.mxu1 %v5318_v0  ;;  %v5312_v45 = vld [vmem:[%s8351_s1 + $0xf0] sm:$0xff]  }
  0x6d   :  { %2965 = vmatprep.subr.bf16.mxu0 %v5318_v0 }
  0x6f   :  { %2388 = vmatpush1.bf16.msra.mxu1 %v5306_v54 }
  0x70   :  { %2966 = vmatpush1.bf16.msra.mxu0 %v5307_v55  ;;  %2389 = vmatprep.subr.bf16.mxu1 %v5318_v0  ;;  %v141_v55 = vld [vmem:[%s8352_s0 + $0x3c0] sm:$0xff] }
  0x71   :  { %2157 = vmatmul.mubr.bf16.gmra.mrb[24].mxu1 %v4274_v50  ;;  %2967 = vmatprep.subr.bf16.mxu0 %v5318_v0  ;;  %v139_v50 = vld [vmem:[%s8352_s0 + $0x3b0] sm:$0xff] }
  0x72   :  { %2735 = vmatmul.mubr.bf16.gmra.mrb[24].mxu0 %v4278_v51  ;;  %2164 = vmatprep.mubr.bf16.mxu1 %v4283_v52  ;;  %v4330_v51 = vcombine.low %v125_v37, %v129_v38  ;;  %v4334_v52 = vcombine.low %v127_v39, %v131_v40  ;;  %v4343_v54 = vcombine.high %v135_v49, %v139_v50 }
  0x73   :  { %2742 = vmatprep.mubr.bf16.mxu0 %v4287_v53  ;;  %2390 = vmatpush1.bf16.msra.mxu1 %v5308_v9  ;;  %v4339_v53 = vcombine.high %v133_v47, %v137_v48  ;;  %v4342_v59 = vcombine.low %v135_v49, %v139_v50  ;;  %v157_v9 = vld [vmem:[%s8352_s0 + $0x440] sm:$0xff] }
  0x74   :  { %2968 = vmatpush1.bf16.msra.mxu0 %v5309_v10  ;;  %2391 = vmatprep.subr.bf16.mxu1 %v5318_v0  ;;  %v161_v10 = vld [vmem:[%s8352_s0 + $0x460] sm:$0xff] }
  0x75   :  { %2969 = vmatprep.subr.bf16.mxu0 %v5318_v0  ;;  %v4362_v21 = vcombine.low %v157_v9, %v161_v10  ;;  %v197_v49 = vld [vmem:[%s8352_s0 + $0x580] sm:$0xff] }
  0x76   :  { %v201_v50 = vld [vmem:[%s8352_s0 + $0x5a0] sm:$0xff] }
  0x77   :  { %2392 = vmatpush1.bf16.msra.mxu1 %v5310_v27  ;;  %v175_v27 = vld [vmem:[%s8352_s0 + $0x4d0] sm:$0xff] }
  0x78   :  { %2970 = vmatpush1.bf16.msra.mxu0 %v5311_v28  ;;  %2393 = vmatprep.subr.bf16.mxu1 %v5318_v0  ;;  %v179_v28 = vld [vmem:[%s8352_s0 + $0x4f0] sm:$0xff] }
  0x79   :  { %2165 = vmatmul.mubr.bf16.gmra.mrb[28].mxu1 %v4282_v60  ;;  %2971 = vmatprep.subr.bf16.mxu0 %v5318_v0  ;;  %v4347_v60 = vcombine.high %v141_v55, %v145_v56  ;;  %v4383_v32 = vcombine.high %v175_v27, %v179_v28  ;;  %v4382_v38 = vcombine.low %v175_v27, %v179_v28  ;;  %v239_v27 = vld [vmem:[%s8352_s0 + $0x6d0] sm:$0xff] }
  0x7a   :  { %2743 = vmatmul.mubr.bf16.gmra.mrb[28].mxu0 %v4286_v61  ;;  %2172 = vmatprep.mubr.bf16.mxu1 %v4291_v62  ;;  %v5314_v62 = vld [vmem:[%s8351_s1 + $0xf8] sm:$0xff]   ;;  %v243_v28 = vld [vmem:[%s8352_s0 + $0x6f0] sm:$0xff] }
  0x7b   :  { %2750 = vmatprep.mubr.bf16.mxu0 %v4295_v63  ;;  %2394 = vmatpush1.bf16.msra.mxu1 %v5312_v45  ;;  %v5315_v63 = vld [vmem:[%s8351_s1 + $0x1f8] sm:$0xff]  }
  0x7c   :  { %2972 = vmatpush1.bf16.msra.mxu0 %v5313_v46  ;;  %2395 = vmatprep.subr.bf16.mxu1 %v5318_v0 }
  0x7d   :  { %2973 = vmatprep.subr.bf16.mxu0 %v5318_v0  ;;  %v147_v0 = vld [vmem:[%s8352_s0 + $0x3f0] sm:$0xff] }
  0x7e   :  { %v4351_v61 = vcombine.high %v143_v57, %v147_v0 }
  0x7f   :  { %2396 = vmatpush1.bf16.msra.mxu1 %v5314_v62 }
  0x80   :  { %2974 = vmatpush1.bf16.msra.mxu0 %v5315_v63 }
  0x81   :  { %2173 = vmatmul.mubr.bf16.gmra.mrb[32].mxu1 %v4290_v5  ;;  %v4346_v5 = vcombine.low %v141_v55, %v145_v56  ;;  %v4403_v55 = vcombine.high %v197_v49, %v201_v50 }
  0x82   :  { %2751 = vmatmul.mubr.bf16.gmra.mrb[32].mxu0 %v4294_v6  ;;  %2180 = vmatprep.mubr.bf16.mxu1 %v4299_v7  ;;  %v4350_v6 = vcombine.low %v143_v57, %v147_v0  ;;  %v4355_v7 = vcombine.high %v149_v1, %v153_v2  ;;  %v205_v57 = vld [vmem:[%s8352_s0 + $0x5c0] sm:$0xff] }
  0x83   :  { %2758 = vmatprep.mubr.bf16.mxu0 %v4303_v8  ;;  %v4359_v8 = vcombine.high %v151_v3, %v155_v4  ;;  %v209_v0 = vld [vmem:[%s8352_s0 + $0x5e0] sm:$0xff]  ;;  %v215_v3 = vld [vmem:[%s8352_s0 + $0x610] sm:$0xff] }
  0x84   :  { %v4411_v62 = vcombine.high %v205_v57, %v209_v0  ;;  %v213_v1 = vld [vmem:[%s8352_s0 + $0x600] sm:$0xff]  ;;  %v219_v4 = vld [vmem:[%s8352_s0 + $0x630] sm:$0xff] }
  0x85   :  { %v217_v2 = vld [vmem:[%s8352_s0 + $0x620] sm:$0xff] }
  0x89   :  { %2181 = vmatmul.mubr.bf16.gmra.mrb[36].mxu1 %v4298_v15  ;;  %v4363_v15 = vcombine.high %v157_v9, %v161_v10  ;;  %v221_v9 = vld [vmem:[%s8352_s0 + $0x640] sm:$0xff] }
  0x8a   :  { %2759 = vmatmul.mubr.bf16.gmra.mrb[36].mxu0 %v4302_v16  ;;  %2188 = vmatprep.mubr.bf16.mxu1 %v4307_v17  ;;  %v4367_v16 = vcombine.high %v159_v11, %v163_v12  ;;  %v165_v17 = vld [vmem:[%s8352_s0 + $0x480] sm:$0xff]  ;;  %v223_v11 = vld [vmem:[%s8352_s0 + $0x650] sm:$0xff] }
  0x8b   :  { %2766 = vmatprep.mubr.bf16.mxu0 %v4311_v18  ;;  %v169_v18 = vld [vmem:[%s8352_s0 + $0x4a0] sm:$0xff]  ;;  %v227_v12 = vld [vmem:[%s8352_s0 + $0x670] sm:$0xff] }
  0x8c   :  { %v4370_v29 = vcombine.low %v165_v17, %v169_v18  ;;  %v225_v10 = vld [vmem:[%s8352_s0 + $0x660] sm:$0xff] }
  0x91   :  { %2189 = vmatmul.mubr.bf16.gmra.mrb[40].mxu1 %v4306_v23  ;;  %v4371_v23 = vcombine.high %v165_v17, %v169_v18  ;;  %v229_v17 = vld [vmem:[%s8352_s0 + $0x680] sm:$0xff] }
  0x92   :  { %2767 = vmatmul.mubr.bf16.gmra.mrb[40].mxu0 %v4310_v24  ;;  %2196 = vmatprep.mubr.bf16.mxu1 %v4315_v25  ;;  %v4375_v24 = vcombine.high %v167_v19, %v171_v20  ;;  %v173_v25 = vld [vmem:[%s8352_s0 + $0x4c0] sm:$0xff]  ;;  %v231_v19 = vld [vmem:[%s8352_s0 + $0x690] sm:$0xff] }
  0x93   :  { %2774 = vmatprep.mubr.bf16.mxu0 %v4319_v26  ;;  %v177_v26 = vld [vmem:[%s8352_s0 + $0x4e0] sm:$0xff]  ;;  %v235_v20 = vld [vmem:[%s8352_s0 + $0x6b0] sm:$0xff] }
  0x94   :  { %v4379_v31 = vcombine.high %v173_v25, %v177_v26  ;;  %v4378_v37 = vcombine.low %v173_v25, %v177_v26  ;;  %v233_v18 = vld [vmem:[%s8352_s0 + $0x6a0] sm:$0xff] }
  0x95   :  { %v237_v25 = vld [vmem:[%s8352_s0 + $0x6c0] sm:$0xff] }
  0x96   :  { %v241_v26 = vld [vmem:[%s8352_s0 + $0x6e0] sm:$0xff] }
  0x99   :  { %2197 = vmatmul.mubr.bf16.gmra.mrb[44].mxu1 %v4314_v33  ;;  %v181_v33 = vld [vmem:[%s8352_s0 + $0x500] sm:$0xff] }
  0x9a   :  { %2775 = vmatmul.mubr.bf16.gmra.mrb[44].mxu0 %v4318_v34  ;;  %2204 = vmatprep.mubr.bf16.mxu1 %v4323_v35  ;;  %v185_v34 = vld [vmem:[%s8352_s0 + $0x520] sm:$0xff]  ;;  %v183_v35 = vld [vmem:[%s8352_s0 + $0x510] sm:$0xff] }
  0x9b   :  { %2782 = vmatprep.mubr.bf16.mxu0 %v4327_v36  ;;  %v187_v36 = vld [vmem:[%s8352_s0 + $0x530] sm:$0xff]  ;;  %v4387_v39 = vcombine.high %v181_v33, %v185_v34  ;;  %v4386_v45 = vcombine.low %v181_v33, %v185_v34  ;;  %v245_v33 = vld [vmem:[%s8352_s0 + $0x700] sm:$0xff] }
  0x9c   :  { %v4391_v40 = vcombine.high %v183_v35, %v187_v36  ;;  %v4390_v46 = vcombine.low %v183_v35, %v187_v36  ;;  %v249_v34 = vld [vmem:[%s8352_s0 + $0x720] sm:$0xff]  ;;  %v247_v35 = vld [vmem:[%s8352_s0 + $0x710] sm:$0xff] }
  0x9d   :  { %v251_v36 = vld [vmem:[%s8352_s0 + $0x730] sm:$0xff] }
  0xa1   :  { %2205 = vmatmul.mubr.bf16.gmra.mrb[48].mxu1 %v4322_v41  ;;  %v189_v41 = vld [vmem:[%s8352_s0 + $0x540] sm:$0xff] }
  0xa2   :  { %2783 = vmatmul.mubr.bf16.gmra.mrb[48].mxu0 %v4326_v42  ;;  %2212 = vmatprep.mubr.bf16.mxu1 %v4331_v43  ;;  %v193_v42 = vld [vmem:[%s8352_s0 + $0x560] sm:$0xff]  ;;  %v191_v43 = vld [vmem:[%s8352_s0 + $0x550] sm:$0xff] }
  0xa3   :  { %2790 = vmatprep.mubr.bf16.mxu0 %v4335_v44  ;;  %v195_v44 = vld [vmem:[%s8352_s0 + $0x570] sm:$0xff]  ;;  %v4395_v47 = vcombine.high %v189_v41, %v193_v42 }
  0xa4   :  { %v4399_v48 = vcombine.high %v191_v43, %v195_v44 }
  0xa9   :  { %2213 = vmatmul.mubr.bf16.gmra.mrb[52].mxu1 %v4330_v51  ;;  %v199_v51 = vld [vmem:[%s8352_s0 + $0x590] sm:$0xff] }
  0xaa   :  { %2791 = vmatmul.mubr.bf16.gmra.mrb[52].mxu0 %v4334_v52  ;;  %2220 = vmatprep.mubr.bf16.mxu1 %v4339_v53  ;;  %v203_v52 = vld [vmem:[%s8352_s0 + $0x5b0] sm:$0xff]  ;;  %v4394_v53 = vcombine.low %v189_v41, %v193_v42  ;;  %v253_v41 = vld [vmem:[%s8352_s0 + $0x740] sm:$0xff] }
  0xab   :  { %2798 = vmatprep.mubr.bf16.mxu0 %v4343_v54  ;;  %v4398_v54 = vcombine.low %v191_v43, %v195_v44  ;;  %v4407_v56 = vcombine.high %v199_v51, %v203_v52  ;;  %v257_v42 = vld [vmem:[%s8352_s0 + $0x760] sm:$0xff]  ;;  %v255_v43 = vld [vmem:[%s8352_s0 + $0x750] sm:$0xff] }
  0xac   :  { %v259_v44 = vld [vmem:[%s8352_s0 + $0x770] sm:$0xff] }
  0xb1   :  { %2221 = vmatmul.mubr.bf16.gmra.mrb[56].mxu1 %v4338_v58  ;;  %v207_v58 = vld [vmem:[%s8352_s0 + $0x5d0] sm:$0xff] }
  0xb2   :  { %2799 = vmatmul.mubr.bf16.gmra.mrb[56].mxu0 %v4342_v59  ;;  %2228 = vmatprep.mubr.bf16.mxu1 %v4347_v60  ;;  %v211_v59 = vld [vmem:[%s8352_s0 + $0x5f0] sm:$0xff]  ;;  %v4402_v60 = vcombine.low %v197_v49, %v201_v50  ;;  %v261_v49 = vld [vmem:[%s8352_s0 + $0x780] sm:$0xff] }
  0xb3   :  { %2806 = vmatprep.mubr.bf16.mxu0 %v4351_v61  ;;  %v4406_v61 = vcombine.low %v199_v51, %v203_v52  ;;  %v4415_v63 = vcombine.high %v207_v58, %v211_v59  ;;  %v265_v50 = vld [vmem:[%s8352_s0 + $0x7a0] sm:$0xff]  ;;  %v263_v51 = vld [vmem:[%s8352_s0 + $0x790] sm:$0xff] }
  0xb4   :  { %v267_v52 = vld [vmem:[%s8352_s0 + $0x7b0] sm:$0xff] }
  0xb9   :  { %2229 = vmatmul.mubr.bf16.gmra.mrb[60].mxu1 %v4346_v5  ;;  %v4410_v5 = vcombine.low %v205_v57, %v209_v0  ;;  %v269_v57 = vld [vmem:[%s8352_s0 + $0x7c0] sm:$0xff] }
  0xba   :  { %2807 = vmatmul.mubr.bf16.gmra.mrb[60].mxu0 %v4350_v6  ;;  %2236 = vmatprep.mubr.bf16.mxu1 %v4355_v7  ;;  %v4414_v6 = vcombine.low %v207_v58, %v211_v59  ;;  %v4419_v7 = vcombine.high %v213_v1, %v217_v2  ;;  %v273_v0 = vld [vmem:[%s8352_s0 + $0x7e0] sm:$0xff]  ;;  %v271_v58 = vld [vmem:[%s8352_s0 + $0x7d0] sm:$0xff] }
  0xbb   :  { %2814 = vmatprep.mubr.bf16.mxu0 %v4359_v8  ;;  %v4423_v8 = vcombine.high %v215_v3, %v219_v4  ;;  %v275_v59 = vld [vmem:[%s8352_s0 + $0x7f0] sm:$0xff] }
  0xc1   :  { %2237 = vmatmul.mubr.bf16.gmra.mrb[64].mxu1 %v4354_v13  ;;  %v4418_v13 = vcombine.low %v213_v1, %v217_v2  ;;  %v22_v1 = vld [vmem:[%s8352_s0 + $0x8] sm:$0xff] }
  0xc2   :  { %2815 = vmatmul.mubr.bf16.gmra.mrb[64].mxu0 %v4358_v14  ;;  %2244 = vmatprep.mubr.bf16.mxu1 %v4363_v15  ;;  %v4422_v14 = vcombine.low %v215_v3, %v219_v4  ;;  %v4427_v15 = vcombine.high %v221_v9, %v225_v10  ;;  %v26_v2 = vld [vmem:[%s8352_s0 + $0x28] sm:$0xff]  ;;  %v24_v3 = vld [vmem:[%s8352_s0 + $0x18] sm:$0xff] }
  0xc3   :  { %2822 = vmatprep.mubr.bf16.mxu0 %v4367_v16  ;;  %v4431_v16 = vcombine.high %v223_v11, %v227_v12  ;;  %v28_v4 = vld [vmem:[%s8352_s0 + $0x38] sm:$0xff] }
  0xc9   :  { %2245 = vmatmul.mubr.bf16.gmra.mrb[68].mxu1 %v4362_v21  ;;  %v4426_v21 = vcombine.low %v221_v9, %v225_v10  ;;  %v30_v9 = vld [vmem:[%s8352_s0 + $0x48] sm:$0xff] }
  0xca   :  { %2823 = vmatmul.mubr.bf16.gmra.mrb[68].mxu0 %v4366_v22  ;;  %2252 = vmatprep.mubr.bf16.mxu1 %v4371_v23  ;;  %v4430_v22 = vcombine.low %v223_v11, %v227_v12  ;;  %v4435_v23 = vcombine.high %v229_v17, %v233_v18  ;;  %v34_v10 = vld [vmem:[%s8352_s0 + $0x68] sm:$0xff]  ;;  %v32_v11 = vld [vmem:[%s8352_s0 + $0x58] sm:$0xff] }
  0xcb   :  { %2830 = vmatprep.mubr.bf16.mxu0 %v4375_v24  ;;  %v4439_v24 = vcombine.high %v231_v19, %v235_v20  ;;  %v36_v12 = vld [vmem:[%s8352_s0 + $0x78] sm:$0xff] }
  0xd1   :  { %2253 = vmatmul.mubr.bf16.gmra.mrb[72].mxu1 %v4370_v29  ;;  %v4434_v29 = vcombine.low %v229_v17, %v233_v18  ;;  %v38_v17 = vld [vmem:[%s8352_s0 + $0x88] sm:$0xff] }
  0xd2   :  { %2831 = vmatmul.mubr.bf16.gmra.mrb[72].mxu0 %v4374_v30  ;;  %2260 = vmatprep.mubr.bf16.mxu1 %v4379_v31  ;;  %v4438_v30 = vcombine.low %v231_v19, %v235_v20  ;;  %v4443_v31 = vcombine.high %v237_v25, %v241_v26  ;;  %v42_v18 = vld [vmem:[%s8352_s0 + $0xa8] sm:$0xff]  ;;  %v40_v19 = vld [vmem:[%s8352_s0 + $0x98] sm:$0xff] }
  0xd3   :  { %2838 = vmatprep.mubr.bf16.mxu0 %v4383_v32  ;;  %v4447_v32 = vcombine.high %v239_v27, %v243_v28  ;;  %v44_v20 = vld [vmem:[%s8352_s0 + $0xb8] sm:$0xff] }
  0xd9   :  { %2261 = vmatmul.mubr.bf16.gmra.mrb[76].mxu1 %v4378_v37  ;;  %v4442_v37 = vcombine.low %v237_v25, %v241_v26  ;;  %v46_v25 = vld [vmem:[%s8352_s0 + $0xc8] sm:$0xff] }
  0xda   :  { %2839 = vmatmul.mubr.bf16.gmra.mrb[76].mxu0 %v4382_v38  ;;  %2268 = vmatprep.mubr.bf16.mxu1 %v4387_v39  ;;  %v4446_v38 = vcombine.low %v239_v27, %v243_v28  ;;  %v4451_v39 = vcombine.high %v245_v33, %v249_v34  ;;  %v50_v26 = vld [vmem:[%s8352_s0 + $0xe8] sm:$0xff]  ;;  %v48_v27 = vld [vmem:[%s8352_s0 + $0xd8] sm:$0xff] }
  0xdb   :  { %2846 = vmatprep.mubr.bf16.mxu0 %v4391_v40  ;;  %v4455_v40 = vcombine.high %v247_v35, %v251_v36  ;;  %v52_v28 = vld [vmem:[%s8352_s0 + $0xf8] sm:$0xff] }
  0xe1   :  { %2269 = vmatmul.mubr.bf16.gmra.mrb[80].mxu1 %v4386_v45  ;;  %v4450_v45 = vcombine.low %v245_v33, %v249_v34  ;;  %v54_v33 = vld [vmem:[%s8352_s0 + $0x108] sm:$0xff] }
  0xe2   :  { %2847 = vmatmul.mubr.bf16.gmra.mrb[80].mxu0 %v4390_v46  ;;  %2276 = vmatprep.mubr.bf16.mxu1 %v4395_v47  ;;  %v4454_v46 = vcombine.low %v247_v35, %v251_v36  ;;  %v4459_v47 = vcombine.high %v253_v41, %v257_v42  ;;  %v58_v34 = vld [vmem:[%s8352_s0 + $0x128] sm:$0xff]  ;;  %v56_v35 = vld [vmem:[%s8352_s0 + $0x118] sm:$0xff] }
  0xe3   :  { %2854 = vmatprep.mubr.bf16.mxu0 %v4399_v48  ;;  %v4463_v48 = vcombine.high %v255_v43, %v259_v44  ;;  %v60_v36 = vld [vmem:[%s8352_s0 + $0x138] sm:$0xff] }
  0xe9   :  { %2277 = vmatmul.mubr.bf16.gmra.mrb[84].mxu1 %v4394_v53  ;;  %v4458_v53 = vcombine.low %v253_v41, %v257_v42  ;;  %v62_v41 = vld [vmem:[%s8352_s0 + $0x148] sm:$0xff] }
  0xea   :  { %2855 = vmatmul.mubr.bf16.gmra.mrb[84].mxu0 %v4398_v54  ;;  %2284 = vmatprep.mubr.bf16.mxu1 %v4403_v55  ;;  %v4462_v54 = vcombine.low %v255_v43, %v259_v44  ;;  %v4467_v55 = vcombine.high %v261_v49, %v265_v50  ;;  %v66_v42 = vld [vmem:[%s8352_s0 + $0x168] sm:$0xff]  ;;  %v64_v43 = vld [vmem:[%s8352_s0 + $0x158] sm:$0xff] }
  0xeb   :  { %2862 = vmatprep.mubr.bf16.mxu0 %v4407_v56  ;;  %v4471_v56 = vcombine.high %v263_v51, %v267_v52  ;;  %v68_v44 = vld [vmem:[%s8352_s0 + $0x178] sm:$0xff] }
  0xf1   :  { %2285 = vmatmul.mubr.bf16.gmra.mrb[88].mxu1 %v4402_v60  ;;  %v4466_v60 = vcombine.low %v261_v49, %v265_v50  ;;  %v70_v49 = vld [vmem:[%s8352_s0 + $0x188] sm:$0xff] }
  0xf2   :  { %2863 = vmatmul.mubr.bf16.gmra.mrb[88].mxu0 %v4406_v61  ;;  %2292 = vmatprep.mubr.bf16.mxu1 %v4411_v62  ;;  %v4470_v61 = vcombine.low %v263_v51, %v267_v52  ;;  %v4475_v62 = vcombine.high %v269_v57, %v273_v0  ;;  %v74_v50 = vld [vmem:[%s8352_s0 + $0x1a8] sm:$0xff]  ;;  %v72_v51 = vld [vmem:[%s8352_s0 + $0x198] sm:$0xff] }
  0xf3   :  { %2870 = vmatprep.mubr.bf16.mxu0 %v4415_v63  ;;  %v4479_v63 = vcombine.high %v271_v58, %v275_v59  ;;  %v76_v52 = vld [vmem:[%s8352_s0 + $0x1b8] sm:$0xff] }
  0xf9   :  { %2293 = vmatmul.mubr.bf16.gmra.mrb[92].mxu1 %v4410_v5  ;;  %v4474_v5 = vcombine.low %v269_v57, %v273_v0  ;;  %v78_v57 = vld [vmem:[%s8352_s0 + $0x1c8] sm:$0xff] }
  0xfa   :  { %2871 = vmatmul.mubr.bf16.gmra.mrb[92].mxu0 %v4414_v6  ;;  %2300 = vmatprep.mubr.bf16.mxu1 %v4419_v7  ;;  %v4478_v6 = vcombine.low %v271_v58, %v275_v59  ;;  %v4229_v7 = vcombine.high %v22_v1, %v26_v2  ;;  %v82_v0 = vld [vmem:[%s8352_s0 + $0x1e8] sm:$0xff]  ;;  %v80_v58 = vld [vmem:[%s8352_s0 + $0x1d8] sm:$0xff] }
  0xfb   :  { %2878 = vmatprep.mubr.bf16.mxu0 %v4423_v8  ;;  %v4233_v8 = vcombine.high %v24_v3, %v28_v4  ;;  %v84_v59 = vld [vmem:[%s8352_s0 + $0x1f8] sm:$0xff] }
 0x101   :  { %2301 = vmatmul.mubr.bf16.gmra.mrb[96].mxu1 %v4418_v13  ;;  %v4228_v13 = vcombine.low %v22_v1, %v26_v2  ;;  %v86_v1 = vld [vmem:[%s8352_s0 + $0x208] sm:$0xff] }
 0x102   :  { %2879 = vmatmul.mubr.bf16.gmra.mrb[96].mxu0 %v4422_v14  ;;  %2308 = vmatprep.mubr.bf16.mxu1 %v4427_v15  ;;  %v4232_v14 = vcombine.low %v24_v3, %v28_v4  ;;  %v4237_v15 = vcombine.high %v30_v9, %v34_v10  ;;  %v90_v2 = vld [vmem:[%s8352_s0 + $0x228] sm:$0xff]  ;;  %v88_v3 = vld [vmem:[%s8352_s0 + $0x218] sm:$0xff] }
 0x103   :  { %2886 = vmatprep.mubr.bf16.mxu0 %v4431_v16  ;;  %v4241_v16 = vcombine.high %v32_v11, %v36_v12  ;;  %v92_v4 = vld [vmem:[%s8352_s0 + $0x238] sm:$0xff] }
 0x109   :  { %2309 = vmatmul.mubr.bf16.gmra.mrb[100].mxu1 %v4426_v21  ;;  %v4236_v21 = vcombine.low %v30_v9, %v34_v10  ;;  %v94_v9 = vld [vmem:[%s8352_s0 + $0x248] sm:$0xff] }
 0x10a   :  { %2887 = vmatmul.mubr.bf16.gmra.mrb[100].mxu0 %v4430_v22  ;;  %2316 = vmatprep.mubr.bf16.mxu1 %v4435_v23  ;;  %v4240_v22 = vcombine.low %v32_v11, %v36_v12  ;;  %v4245_v23 = vcombine.high %v38_v17, %v42_v18  ;;  %v98_v10 = vld [vmem:[%s8352_s0 + $0x268] sm:$0xff]  ;;  %v96_v11 = vld [vmem:[%s8352_s0 + $0x258] sm:$0xff] }
 0x10b   :  { %2894 = vmatprep.mubr.bf16.mxu0 %v4439_v24  ;;  %v4249_v24 = vcombine.high %v40_v19, %v44_v20  ;;  %v100_v12 = vld [vmem:[%s8352_s0 + $0x278] sm:$0xff] }
 0x111   :  { %2317 = vmatmul.mubr.bf16.gmra.mrb[104].mxu1 %v4434_v29  ;;  %v4244_v29 = vcombine.low %v38_v17, %v42_v18  ;;  %v102_v17 = vld [vmem:[%s8352_s0 + $0x288] sm:$0xff] }
 0x112   :  { %2895 = vmatmul.mubr.bf16.gmra.mrb[104].mxu0 %v4438_v30  ;;  %2324 = vmatprep.mubr.bf16.mxu1 %v4443_v31  ;;  %v4248_v30 = vcombine.low %v40_v19, %v44_v20  ;;  %v4253_v31 = vcombine.high %v46_v25, %v50_v26  ;;  %v106_v18 = vld [vmem:[%s8352_s0 + $0x2a8] sm:$0xff]  ;;  %v104_v19 = vld [vmem:[%s8352_s0 + $0x298] sm:$0xff] }
 0x113   :  { %2902 = vmatprep.mubr.bf16.mxu0 %v4447_v32  ;;  %v4257_v32 = vcombine.high %v48_v27, %v52_v28  ;;  %v108_v20 = vld [vmem:[%s8352_s0 + $0x2b8] sm:$0xff] }
 0x119   :  { %2325 = vmatmul.mubr.bf16.gmra.mrb[108].mxu1 %v4442_v37  ;;  %v4252_v37 = vcombine.low %v46_v25, %v50_v26  ;;  %v110_v25 = vld [vmem:[%s8352_s0 + $0x2c8] sm:$0xff] }
 0x11a   :  { %2903 = vmatmul.mubr.bf16.gmra.mrb[108].mxu0 %v4446_v38  ;;  %2332 = vmatprep.mubr.bf16.mxu1 %v4451_v39  ;;  %v4256_v38 = vcombine.low %v48_v27, %v52_v28  ;;  %v4261_v39 = vcombine.high %v54_v33, %v58_v34  ;;  %v114_v26 = vld [vmem:[%s8352_s0 + $0x2e8] sm:$0xff]  ;;  %v112_v27 = vld [vmem:[%s8352_s0 + $0x2d8] sm:$0xff] }
 0x11b   :  { %2910 = vmatprep.mubr.bf16.mxu0 %v4455_v40  ;;  %v4265_v40 = vcombine.high %v56_v35, %v60_v36  ;;  %v116_v28 = vld [vmem:[%s8352_s0 + $0x2f8] sm:$0xff] }
 0x121   :  { %2333 = vmatmul.mubr.bf16.gmra.mrb[112].mxu1 %v4450_v45  ;;  %v4260_v45 = vcombine.low %v54_v33, %v58_v34  ;;  %v118_v33 = vld [vmem:[%s8352_s0 + $0x308] sm:$0xff] }
 0x122   :  { %2911 = vmatmul.mubr.bf16.gmra.mrb[112].mxu0 %v4454_v46  ;;  %2340 = vmatprep.mubr.bf16.mxu1 %v4459_v47  ;;  %v4264_v46 = vcombine.low %v56_v35, %v60_v36  ;;  %v4269_v47 = vcombine.high %v62_v41, %v66_v42  ;;  %v122_v34 = vld [vmem:[%s8352_s0 + $0x328] sm:$0xff]  ;;  %v120_v35 = vld [vmem:[%s8352_s0 + $0x318] sm:$0xff] }
 0x123   :  { %2918 = vmatprep.mubr.bf16.mxu0 %v4463_v48  ;;  %v4273_v48 = vcombine.high %v64_v43, %v68_v44  ;;  %v124_v36 = vld [vmem:[%s8352_s0 + $0x338] sm:$0xff] }
 0x129   :  { %2341 = vmatmul.mubr.bf16.gmra.mrb[116].mxu1 %v4458_v53  ;;  %v4268_v53 = vcombine.low %v62_v41, %v66_v42  ;;  %v126_v41 = vld [vmem:[%s8352_s0 + $0x348] sm:$0xff] }
 0x12a   :  { %2919 = vmatmul.mubr.bf16.gmra.mrb[116].mxu0 %v4462_v54  ;;  %2348 = vmatprep.mubr.bf16.mxu1 %v4467_v55  ;;  %v4272_v54 = vcombine.low %v64_v43, %v68_v44  ;;  %v4277_v55 = vcombine.high %v70_v49, %v74_v50  ;;  %v130_v42 = vld [vmem:[%s8352_s0 + $0x368] sm:$0xff]  ;;  %v128_v43 = vld [vmem:[%s8352_s0 + $0x358] sm:$0xff] }
 0x12b   :  { %2926 = vmatprep.mubr.bf16.mxu0 %v4471_v56  ;;  %v4281_v56 = vcombine.high %v72_v51, %v76_v52  ;;  %v132_v44 = vld [vmem:[%s8352_s0 + $0x378] sm:$0xff] }
 0x131   :  { %2349 = vmatmul.mubr.bf16.gmra.mrb[120].mxu1 %v4466_v60  ;;  %v4276_v60 = vcombine.low %v70_v49, %v74_v50  ;;  %v134_v49 = vld [vmem:[%s8352_s0 + $0x388] sm:$0xff] }
 0x132   :  { %2927 = vmatmul.mubr.bf16.gmra.mrb[120].mxu0 %v4470_v61  ;;  %2356 = vmatprep.mubr.bf16.mxu1 %v4475_v62  ;;  %v4280_v61 = vcombine.low %v72_v51, %v76_v52  ;;  %v4285_v62 = vcombine.high %v78_v57, %v82_v0  ;;  %v138_v50 = vld [vmem:[%s8352_s0 + $0x3a8] sm:$0xff]  ;;  %v136_v51 = vld [vmem:[%s8352_s0 + $0x398] sm:$0xff] }
 0x133   :  { %2934 = vmatprep.mubr.bf16.mxu0 %v4479_v63  ;;  %v4289_v63 = vcombine.high %v80_v58, %v84_v59  ;;  %v140_v52 = vld [vmem:[%s8352_s0 + $0x3b8] sm:$0xff] }
 0x139   :  { %2357 = vmatmul.mubr.bf16.gmra.mrb[124].mxu1 %v4474_v5  ;;  %v4284_v5 = vcombine.low %v78_v57, %v82_v0  ;;  %v142_v57 = vld [vmem:[%s8352_s0 + $0x3c8] sm:$0xff] }
 0x13a   :  { %2935 = vmatmul.mubr.bf16.gmra.mrb[124].mxu0 %v4478_v6  ;;  %2397 = vmatprep.mubr.bf16.mxu1 %v4229_v7  ;;  %v4288_v6 = vcombine.low %v80_v58, %v84_v59  ;;  %v4293_v7 = vcombine.high %v86_v1, %v90_v2  ;;  %v146_v0 = vld [vmem:[%s8352_s0 + $0x3e8] sm:$0xff]  ;;  %v144_v58 = vld [vmem:[%s8352_s0 + $0x3d8] sm:$0xff] }
 0x13b   :  { %2975 = vmatprep.mubr.bf16.mxu0 %v4233_v8  ;;  %v4297_v8 = vcombine.high %v88_v3, %v92_v4  ;;  %v148_v59 = vld [vmem:[%s8352_s0 + $0x3f8] sm:$0xff] }
 0x141   :  { %2398 = vmatmul.mubr.bf16.vlgmr.msra.gmra.mrb[0].mxu1 %v4228_v13  ;;  %v4292_v13 = vcombine.low %v86_v1, %v90_v2  ;;  %v150_v1 = vld [vmem:[%s8352_s0 + $0x408] sm:$0xff] }
 0x142   :  { %2976 = vmatmul.mubr.bf16.vlgmr.msra.gmra.mrb[0].mxu0 %v4232_v14  ;;  %2405 = vmatprep.mubr.bf16.mxu1 %v4237_v15  ;;  %v4296_v14 = vcombine.low %v88_v3, %v92_v4  ;;  %v4301_v15 = vcombine.high %v94_v9, %v98_v10  ;;  %v154_v2 = vld [vmem:[%s8352_s0 + $0x428] sm:$0xff]  ;;  %v152_v3 = vld [vmem:[%s8352_s0 + $0x418] sm:$0xff] }
 0x143   :  { %2983 = vmatprep.mubr.bf16.mxu0 %v4241_v16  ;;  %v4305_v16 = vcombine.high %v96_v11, %v100_v12  ;;  %v156_v4 = vld [vmem:[%s8352_s0 + $0x438] sm:$0xff] }
 0x149   :  { %2406 = vmatmul.mubr.bf16.gmra.mrb[4].mxu1 %v4236_v21  ;;  %v4300_v21 = vcombine.low %v94_v9, %v98_v10  ;;  %v158_v9 = vld [vmem:[%s8352_s0 + $0x448] sm:$0xff] }
 0x14a   :  { %2984 = vmatmul.mubr.bf16.gmra.mrb[4].mxu0 %v4240_v22  ;;  %2413 = vmatprep.mubr.bf16.mxu1 %v4245_v23  ;;  %v4304_v22 = vcombine.low %v96_v11, %v100_v12  ;;  %v4309_v23 = vcombine.high %v102_v17, %v106_v18  ;;  %v162_v10 = vld [vmem:[%s8352_s0 + $0x468] sm:$0xff]  ;;  %v160_v11 = vld [vmem:[%s8352_s0 + $0x458] sm:$0xff] }
 0x14b   :  { %2991 = vmatprep.mubr.bf16.mxu0 %v4249_v24  ;;  %v4313_v24 = vcombine.high %v104_v19, %v108_v20  ;;  %v164_v12 = vld [vmem:[%s8352_s0 + $0x478] sm:$0xff] }
 0x151   :  { %2414 = vmatmul.mubr.bf16.gmra.mrb[8].mxu1 %v4244_v29  ;;  %v4308_v29 = vcombine.low %v102_v17, %v106_v18  ;;  %v166_v17 = vld [vmem:[%s8352_s0 + $0x488] sm:$0xff] }
 0x152   :  { %2992 = vmatmul.mubr.bf16.gmra.mrb[8].mxu0 %v4248_v30  ;;  %2421 = vmatprep.mubr.bf16.mxu1 %v4253_v31  ;;  %v4312_v30 = vcombine.low %v104_v19, %v108_v20  ;;  %v4317_v31 = vcombine.high %v110_v25, %v114_v26  ;;  %v170_v18 = vld [vmem:[%s8352_s0 + $0x4a8] sm:$0xff]  ;;  %v168_v19 = vld [vmem:[%s8352_s0 + $0x498] sm:$0xff] }
 0x153   :  { %2999 = vmatprep.mubr.bf16.mxu0 %v4257_v32  ;;  %v4321_v32 = vcombine.high %v112_v27, %v116_v28  ;;  %v172_v20 = vld [vmem:[%s8352_s0 + $0x4b8] sm:$0xff] }
 0x159   :  { %2422 = vmatmul.mubr.bf16.gmra.mrb[12].mxu1 %v4252_v37  ;;  %v4316_v37 = vcombine.low %v110_v25, %v114_v26  ;;  %v174_v25 = vld [vmem:[%s8352_s0 + $0x4c8] sm:$0xff] }
 0x15a   :  { %3000 = vmatmul.mubr.bf16.gmra.mrb[12].mxu0 %v4256_v38  ;;  %2429 = vmatprep.mubr.bf16.mxu1 %v4261_v39  ;;  %v4320_v38 = vcombine.low %v112_v27, %v116_v28  ;;  %v4325_v39 = vcombine.high %v118_v33, %v122_v34  ;;  %v178_v26 = vld [vmem:[%s8352_s0 + $0x4e8] sm:$0xff]  ;;  %v176_v27 = vld [vmem:[%s8352_s0 + $0x4d8] sm:$0xff] }
 0x15b   :  { %3007 = vmatprep.mubr.bf16.mxu0 %v4265_v40  ;;  %v4329_v40 = vcombine.high %v120_v35, %v124_v36  ;;  %v180_v28 = vld [vmem:[%s8352_s0 + $0x4f8] sm:$0xff] }
 0x161   :  { %2430 = vmatmul.mubr.bf16.gmra.mrb[16].mxu1 %v4260_v45  ;;  %v4324_v45 = vcombine.low %v118_v33, %v122_v34  ;;  %v182_v33 = vld [vmem:[%s8352_s0 + $0x508] sm:$0xff] }
 0x162   :  { %3008 = vmatmul.mubr.bf16.gmra.mrb[16].mxu0 %v4264_v46  ;;  %2437 = vmatprep.mubr.bf16.mxu1 %v4269_v47  ;;  %v4328_v46 = vcombine.low %v120_v35, %v124_v36  ;;  %v4333_v47 = vcombine.high %v126_v41, %v130_v42  ;;  %v186_v34 = vld [vmem:[%s8352_s0 + $0x528] sm:$0xff]  ;;  %v184_v35 = vld [vmem:[%s8352_s0 + $0x518] sm:$0xff] }
 0x163   :  { %3015 = vmatprep.mubr.bf16.mxu0 %v4273_v48  ;;  %v4337_v48 = vcombine.high %v128_v43, %v132_v44  ;;  %v188_v36 = vld [vmem:[%s8352_s0 + $0x538] sm:$0xff] }
 0x169   :  { %2438 = vmatmul.mubr.bf16.gmra.mrb[20].mxu1 %v4268_v53  ;;  %v4332_v53 = vcombine.low %v126_v41, %v130_v42  ;;  %v190_v41 = vld [vmem:[%s8352_s0 + $0x548] sm:$0xff] }
 0x16a   :  { %3016 = vmatmul.mubr.bf16.gmra.mrb[20].mxu0 %v4272_v54  ;;  %2445 = vmatprep.mubr.bf16.mxu1 %v4277_v55  ;;  %v4336_v54 = vcombine.low %v128_v43, %v132_v44  ;;  %v4341_v55 = vcombine.high %v134_v49, %v138_v50  ;;  %v194_v42 = vld [vmem:[%s8352_s0 + $0x568] sm:$0xff]  ;;  %v192_v43 = vld [vmem:[%s8352_s0 + $0x558] sm:$0xff] }
 0x16b   :  { %3023 = vmatprep.mubr.bf16.mxu0 %v4281_v56  ;;  %v4345_v56 = vcombine.high %v136_v51, %v140_v52  ;;  %v196_v44 = vld [vmem:[%s8352_s0 + $0x578] sm:$0xff] }
 0x171   :  { %2446 = vmatmul.mubr.bf16.gmra.mrb[24].mxu1 %v4276_v60  ;;  %v4340_v60 = vcombine.low %v134_v49, %v138_v50  ;;  %v198_v49 = vld [vmem:[%s8352_s0 + $0x588] sm:$0xff] }
 0x172   :  { %3024 = vmatmul.mubr.bf16.gmra.mrb[24].mxu0 %v4280_v61  ;;  %2453 = vmatprep.mubr.bf16.mxu1 %v4285_v62  ;;  %v4344_v61 = vcombine.low %v136_v51, %v140_v52  ;;  %v4349_v62 = vcombine.high %v142_v57, %v146_v0  ;;  %v202_v50 = vld [vmem:[%s8352_s0 + $0x5a8] sm:$0xff]  ;;  %v200_v51 = vld [vmem:[%s8352_s0 + $0x598] sm:$0xff] }
 0x173   :  { %3031 = vmatprep.mubr.bf16.mxu0 %v4289_v63  ;;  %v4353_v63 = vcombine.high %v144_v58, %v148_v59  ;;  %v204_v52 = vld [vmem:[%s8352_s0 + $0x5b8] sm:$0xff] }
 0x179   :  { %2454 = vmatmul.mubr.bf16.gmra.mrb[28].mxu1 %v4284_v5  ;;  %v4348_v5 = vcombine.low %v142_v57, %v146_v0  ;;  %v206_v57 = vld [vmem:[%s8352_s0 + $0x5c8] sm:$0xff] }
 0x17a   :  { %3032 = vmatmul.mubr.bf16.gmra.mrb[28].mxu0 %v4288_v6  ;;  %2461 = vmatprep.mubr.bf16.mxu1 %v4293_v7  ;;  %v4352_v6 = vcombine.low %v144_v58, %v148_v59  ;;  %v4357_v7 = vcombine.high %v150_v1, %v154_v2  ;;  %v210_v0 = vld [vmem:[%s8352_s0 + $0x5e8] sm:$0xff]  ;;  %v208_v58 = vld [vmem:[%s8352_s0 + $0x5d8] sm:$0xff] }
 0x17b   :  { %3039 = vmatprep.mubr.bf16.mxu0 %v4297_v8  ;;  %v4361_v8 = vcombine.high %v152_v3, %v156_v4  ;;  %v212_v59 = vld [vmem:[%s8352_s0 + $0x5f8] sm:$0xff] }
 0x181   :  { %2462 = vmatmul.mubr.bf16.gmra.mrb[32].mxu1 %v4292_v13  ;;  %v4356_v13 = vcombine.low %v150_v1, %v154_v2  ;;  %v214_v1 = vld [vmem:[%s8352_s0 + $0x608] sm:$0xff] }
 0x182   :  { %3040 = vmatmul.mubr.bf16.gmra.mrb[32].mxu0 %v4296_v14  ;;  %2469 = vmatprep.mubr.bf16.mxu1 %v4301_v15  ;;  %v4360_v14 = vcombine.low %v152_v3, %v156_v4  ;;  %v4365_v15 = vcombine.high %v158_v9, %v162_v10  ;;  %v218_v2 = vld [vmem:[%s8352_s0 + $0x628] sm:$0xff]  ;;  %v216_v3 = vld [vmem:[%s8352_s0 + $0x618] sm:$0xff] }
 0x183   :  { %3047 = vmatprep.mubr.bf16.mxu0 %v4305_v16  ;;  %v4369_v16 = vcombine.high %v160_v11, %v164_v12  ;;  %v220_v4 = vld [vmem:[%s8352_s0 + $0x638] sm:$0xff] }
 0x189   :  { %2470 = vmatmul.mubr.bf16.gmra.mrb[36].mxu1 %v4300_v21  ;;  %v4364_v21 = vcombine.low %v158_v9, %v162_v10  ;;  %v222_v9 = vld [vmem:[%s8352_s0 + $0x648] sm:$0xff] }
 0x18a   :  { %3048 = vmatmul.mubr.bf16.gmra.mrb[36].mxu0 %v4304_v22  ;;  %2477 = vmatprep.mubr.bf16.mxu1 %v4309_v23  ;;  %v4368_v22 = vcombine.low %v160_v11, %v164_v12  ;;  %v4373_v23 = vcombine.high %v166_v17, %v170_v18  ;;  %v226_v10 = vld [vmem:[%s8352_s0 + $0x668] sm:$0xff]  ;;  %v224_v11 = vld [vmem:[%s8352_s0 + $0x658] sm:$0xff] }
 0x18b   :  { %3055 = vmatprep.mubr.bf16.mxu0 %v4313_v24  ;;  %v4377_v24 = vcombine.high %v168_v19, %v172_v20  ;;  %v228_v12 = vld [vmem:[%s8352_s0 + $0x678] sm:$0xff] }
 0x191   :  { %2478 = vmatmul.mubr.bf16.gmra.mrb[40].mxu1 %v4308_v29  ;;  %v4372_v29 = vcombine.low %v166_v17, %v170_v18  ;;  %v230_v17 = vld [vmem:[%s8352_s0 + $0x688] sm:$0xff] }
 0x192   :  { %3056 = vmatmul.mubr.bf16.gmra.mrb[40].mxu0 %v4312_v30  ;;  %2485 = vmatprep.mubr.bf16.mxu1 %v4317_v31  ;;  %v4376_v30 = vcombine.low %v168_v19, %v172_v20  ;;  %v4381_v31 = vcombine.high %v174_v25, %v178_v26  ;;  %v234_v18 = vld [vmem:[%s8352_s0 + $0x6a8] sm:$0xff]  ;;  %v232_v19 = vld [vmem:[%s8352_s0 + $0x698] sm:$0xff] }
 0x193   :  { %3063 = vmatprep.mubr.bf16.mxu0 %v4321_v32  ;;  %v4385_v32 = vcombine.high %v176_v27, %v180_v28  ;;  %v236_v20 = vld [vmem:[%s8352_s0 + $0x6b8] sm:$0xff] }
 0x199   :  { %2486 = vmatmul.mubr.bf16.gmra.mrb[44].mxu1 %v4316_v37  ;;  %v4380_v37 = vcombine.low %v174_v25, %v178_v26  ;;  %v238_v25 = vld [vmem:[%s8352_s0 + $0x6c8] sm:$0xff] }
 0x19a   :  { %3064 = vmatmul.mubr.bf16.gmra.mrb[44].mxu0 %v4320_v38  ;;  %2493 = vmatprep.mubr.bf16.mxu1 %v4325_v39  ;;  %v4384_v38 = vcombine.low %v176_v27, %v180_v28  ;;  %v4389_v39 = vcombine.high %v182_v33, %v186_v34  ;;  %v242_v26 = vld [vmem:[%s8352_s0 + $0x6e8] sm:$0xff]  ;;  %v240_v27 = vld [vmem:[%s8352_s0 + $0x6d8] sm:$0xff] }
 0x19b   :  { %3071 = vmatprep.mubr.bf16.mxu0 %v4329_v40  ;;  %v4393_v40 = vcombine.high %v184_v35, %v188_v36  ;;  %v244_v28 = vld [vmem:[%s8352_s0 + $0x6f8] sm:$0xff] }
 0x1a1   :  { %2494 = vmatmul.mubr.bf16.gmra.mrb[48].mxu1 %v4324_v45  ;;  %v4388_v45 = vcombine.low %v182_v33, %v186_v34  ;;  %v6344_v33 = vld [vmem:[%s8353_s2] ss:$0 sm:$0xff]  ;;  %v246_v34 = vld [vmem:[%s8352_s0 + $0x708] sm:$0xff] }
 0x1a2   :  { %3072 = vmatmul.mubr.bf16.gmra.mrb[48].mxu0 %v4328_v46  ;;  %2501 = vmatprep.mubr.bf16.mxu1 %v4333_v47  ;;  %v4392_v46 = vcombine.low %v184_v35, %v188_v36  ;;  %v4397_v47 = vcombine.high %v190_v41, %v194_v42  ;;  %v250_v35 = vld [vmem:[%s8352_s0 + $0x728] sm:$0xff] }
 0x1a3   :  { %3079 = vmatprep.mubr.bf16.mxu0 %v4337_v48  ;;  %v4401_v48 = vcombine.high %v192_v43, %v196_v44 }
 0x1a9   :  { %2502 = vmatmul.mubr.bf16.gmra.mrb[52].mxu1 %v4332_v53  ;;  %v4396_v53 = vcombine.low %v190_v41, %v194_v42  ;;  %v4444_v42 = vcombine.low %v238_v25, %v242_v26 }
 0x1aa   :  { %3080 = vmatmul.mubr.bf16.gmra.mrb[52].mxu0 %v4336_v54  ;;  %2509 = vmatprep.mubr.bf16.mxu1 %v4341_v55  ;;  %v4400_v54 = vcombine.low %v192_v43, %v196_v44  ;;  %v4405_v55 = vcombine.high %v198_v49, %v202_v50 }
 0x1ab   :  { %3087 = vmatprep.mubr.bf16.mxu0 %v4345_v56  ;;  %v4409_v56 = vcombine.high %v200_v51, %v204_v52 }
 0x1b1   :  { %2510 = vmatmul.mubr.bf16.gmra.mrb[56].mxu1 %v4340_v60  ;;  %v4404_v60 = vcombine.low %v198_v49, %v202_v50 }
 0x1b2   :  { %3088 = vmatmul.mubr.bf16.gmra.mrb[56].mxu0 %v4344_v61  ;;  %2517 = vmatprep.mubr.bf16.mxu1 %v4349_v62  ;;  %v4408_v61 = vcombine.low %v200_v51, %v204_v52  ;;  %v4413_v62 = vcombine.high %v206_v57, %v210_v0 }
 0x1b3   :  { %3095 = vmatprep.mubr.bf16.mxu0 %v4353_v63  ;;  %v4417_v63 = vcombine.high %v208_v58, %v212_v59 }
 0x1b9   :  { %2518 = vmatmul.mubr.bf16.gmra.mrb[60].mxu1 %v4348_v5  ;;  %v4412_v5 = vcombine.low %v206_v57, %v210_v0  ;;  %v256_v57 = vld [vmem:[%s8352_s0 + $0x758] sm:$0xff] }
 0x1ba   :  { %3096 = vmatmul.mubr.bf16.gmra.mrb[60].mxu0 %v4352_v6  ;;  %2525 = vmatprep.mubr.bf16.mxu1 %v4357_v7  ;;  %v4416_v6 = vcombine.low %v208_v58, %v212_v59  ;;  %v4421_v7 = vcombine.high %v214_v1, %v218_v2  ;;  %v260_v0 = vld [vmem:[%s8352_s0 + $0x778] sm:$0xff] }
 0x1bb   :  { %3103 = vmatprep.mubr.bf16.mxu0 %v4361_v8  ;;  %v4425_v8 = vcombine.high %v216_v3, %v220_v4 }
 0x1c1   :  { %2526 = vmatmul.mubr.bf16.gmra.mrb[64].mxu1 %v4356_v13  ;;  %v4420_v13 = vcombine.low %v214_v1, %v218_v2 }
 0x1c2   :  { %3104 = vmatmul.mubr.bf16.gmra.mrb[64].mxu0 %v4360_v14  ;;  %2533 = vmatprep.mubr.bf16.mxu1 %v4365_v15  ;;  %v4424_v14 = vcombine.low %v216_v3, %v220_v4  ;;  %v4429_v15 = vcombine.high %v222_v9, %v226_v10 }
 0x1c3   :  { %3111 = vmatprep.mubr.bf16.mxu0 %v4369_v16  ;;  %v4433_v16 = vcombine.high %v224_v11, %v228_v12 }
 0x1c9   :  { %2534 = vmatmul.mubr.bf16.gmra.mrb[68].mxu1 %v4364_v21  ;;  %v4428_v21 = vcombine.low %v222_v9, %v226_v10  ;;  %v262_v10 = vld [vmem:[%s8352_s0 + $0x788] sm:$0xff] }
 0x1ca   :  { %3112 = vmatmul.mubr.bf16.gmra.mrb[68].mxu0 %v4368_v22  ;;  %2541 = vmatprep.mubr.bf16.mxu1 %v4373_v23  ;;  %v4432_v22 = vcombine.low %v224_v11, %v228_v12  ;;  %v4437_v23 = vcombine.high %v230_v17, %v234_v18  ;;  %v266_v11 = vld [vmem:[%s8352_s0 + $0x7a8] sm:$0xff] }
 0x1cb   :  { %3119 = vmatprep.mubr.bf16.mxu0 %v4377_v24  ;;  %v4441_v24 = vcombine.high %v232_v19, %v236_v20 }
 0x1d1   :  { %2542 = vmatmul.mubr.bf16.gmra.mrb[72].mxu1 %v4372_v29  ;;  %v4436_v29 = vcombine.low %v230_v17, %v234_v18 }
 0x1d2   :  { %3120 = vmatmul.mubr.bf16.gmra.mrb[72].mxu0 %v4376_v30  ;;  %2549 = vmatprep.mubr.bf16.mxu1 %v4381_v31  ;;  %v4440_v30 = vcombine.low %v232_v19, %v236_v20  ;;  %v4445_v31 = vcombine.high %v238_v25, %v242_v26 }
 0x1d3   :  { %3127 = vmatprep.mubr.bf16.mxu0 %v4385_v32  ;;  %v4449_v32 = vcombine.high %v240_v27, %v244_v28 }
 0x1d9   :  { %2550 = vmatmul.mubr.bf16.gmra.mrb[76].mxu1 %v4380_v37  ;;  %v248_v37 = vld [vmem:[%s8352_s0 + $0x718] sm:$0xff] }
 0x1da   :  { %3128 = vmatmul.mubr.bf16.gmra.mrb[76].mxu0 %v4384_v38  ;;  %2557 = vmatprep.mubr.bf16.mxu1 %v4389_v39  ;;  %v252_v38 = vld [vmem:[%s8352_s0 + $0x738] sm:$0xff] }
 0x1db   :  { %3135 = vmatprep.mubr.bf16.mxu0 %v4393_v40  ;;  %v4457_v51 = vcombine.high %v248_v37, %v252_v38  ;;  %v4456_v1 = vcombine.low %v248_v37, %v252_v38 }
 0x1e1   :  { %2558 = vmatmul.mubr.bf16.gmra.mrb[80].mxu1 %v4388_v45  ;;  %v4448_v45 = vcombine.low %v240_v27, %v244_v28 }
 0x1e2   :  { %3136 = vmatmul.mubr.bf16.gmra.mrb[80].mxu0 %v4392_v46  ;;  %2565 = vmatprep.mubr.bf16.mxu1 %v4397_v47  ;;  %v4453_v46 = vcombine.high %v246_v34, %v250_v35 }
 0x1e3   :  { %3143 = vmatprep.mubr.bf16.mxu0 %v4401_v48 }
 0x1e9   :  { %2566 = vmatmul.mubr.bf16.gmra.mrb[84].mxu1 %v4396_v53 }
 0x1ea   :  { %3144 = vmatmul.mubr.bf16.gmra.mrb[84].mxu0 %v4400_v54  ;;  %2573 = vmatprep.mubr.bf16.mxu1 %v4405_v55  ;;  %v254_v54 = vld [vmem:[%s8352_s0 + $0x748] sm:$0xff] }
 0x1eb   :  { %3151 = vmatprep.mubr.bf16.mxu0 %v4409_v56  ;;  %v258_v55 = vld [vmem:[%s8352_s0 + $0x768] sm:$0xff] }
 0x1ec   :  { %v4461_v2 = vcombine.high %v254_v54, %v258_v55  ;;  %v4460_v18 = vcombine.low %v254_v54, %v258_v55 }
 0x1f1   :  { %2574 = vmatmul.mubr.bf16.gmra.mrb[88].mxu1 %v4404_v60 }
 0x1f2   :  { %3152 = vmatmul.mubr.bf16.gmra.mrb[88].mxu0 %v4408_v61  ;;  %2581 = vmatprep.mubr.bf16.mxu1 %v4413_v62  ;;  %v4452_v61 = vcombine.low %v246_v34, %v250_v35  ;;  %v272_v34 = vld [vmem:[%s8352_s0 + $0x7d8] sm:$0xff] }
 0x1f3   :  { %3159 = vmatprep.mubr.bf16.mxu0 %v4417_v63  ;;  %v276_v35 = vld [vmem:[%s8352_s0 + $0x7f8] sm:$0xff] }
 0x1f9   :  { %2582 = vmatmul.mubr.bf16.gmra.mrb[92].mxu1 %v4412_v5 }
 0x1fa   :  { %3160 = vmatmul.mubr.bf16.gmra.mrb[92].mxu0 %v4416_v6  ;;  %2589 = vmatprep.mubr.bf16.mxu1 %v4421_v7  ;;  %v4465_v7 = vcombine.high %v256_v57, %v260_v0 }
 0x1fb   :  { %3167 = vmatprep.mubr.bf16.mxu0 %v4425_v8 }
 0x201   :  { %2590 = vmatmul.mubr.bf16.gmra.mrb[96].mxu1 %v4420_v13  ;;  %v264_v13 = vld [vmem:[%s8352_s0 + $0x798] sm:$0xff] }
 0x202   :  { %3168 = vmatmul.mubr.bf16.gmra.mrb[96].mxu0 %v4424_v14  ;;  %2597 = vmatprep.mubr.bf16.mxu1 %v4429_v15  ;;  %v268_v14 = vld [vmem:[%s8352_s0 + $0x7b8] sm:$0xff] }
 0x203   :  { %3175 = vmatprep.mubr.bf16.mxu0 %v4433_v16  ;;  %v4473_v27 = vcombine.high %v264_v13, %v268_v14 }
 0x209   :  { %2598 = vmatmul.mubr.bf16.gmra.mrb[100].mxu1 %v4428_v21  ;;  %v4464_v21 = vcombine.low %v256_v57, %v260_v0 }
 0x20a   :  { %3176 = vmatmul.mubr.bf16.gmra.mrb[100].mxu0 %v4432_v22  ;;  %2605 = vmatprep.mubr.bf16.mxu1 %v4437_v23  ;;  %v4469_v22 = vcombine.high %v262_v10, %v266_v11 }
 0x20b   :  { %3183 = vmatprep.mubr.bf16.mxu0 %v4441_v24 }
 0x211   :  { %2606 = vmatmul.mubr.bf16.gmra.mrb[104].mxu1 %v4436_v29 }
 0x212   :  { %3184 = vmatmul.mubr.bf16.gmra.mrb[104].mxu0 %v4440_v30  ;;  %2613 = vmatprep.mubr.bf16.mxu1 %v4445_v31  ;;  %v270_v30 = vld [vmem:[%s8352_s0 + $0x7c8] sm:$0xff] }
 0x213   :  { %3191 = vmatprep.mubr.bf16.mxu0 %v4449_v32  ;;  %v274_v31 = vld [vmem:[%s8352_s0 + $0x7e8] sm:$0xff] }
 0x214   :  { %v2399_v36 = vpop.f32.mrb[0].mxu1  ;;  %v4476_v57 = vcombine.low %v270_v30, %v274_v31 }
 0x215   :  { %v4867_v39 = vadd.f32 %v6344_v33, %v2399_v36  ;;  %v2977_v40 = vpop.f32.mrb[0].mxu0  ;;  %v2401_v41 = vpop.f32.mrb[1].mxu1 }
 0x216   :  { %v2979_v43 = vpop.f32.mrb[1].mxu0  ;;  %v2402_v44 = vpop.f32.mrb[2].mxu1 }
 0x217   :  { %v6359_v47 = vadd.f32 %v4867_v39, %v2977_v40  ;;  %v4869_v48 = vadd.f32 %v6344_v33, %v2402_v44  ;;  %v2980_v49 = vpop.f32.mrb[2].mxu0  ;;  %v2404_v50 = vpop.f32.mrb[3].mxu1  ;;  %v4468_v39 = vcombine.low %v262_v10, %v266_v11  ;;  %v4477_v43 = vcombine.high %v270_v30, %v274_v31 }
 0x218   :  { %v2982_v52 = vpop.f32.mrb[3].mxu0 }
 0x219   :  { %v6362_v53 = vadd.f32 %v4869_v48, %v2980_v49  ;;  %2614 = vmatmul.mubr.bf16.gmra.mrb[108].mxu1 %v4444_v42  ;;  %v4472_v42 = vcombine.low %v264_v13, %v268_v14  ;;  %v4481_v49 = vcombine.high %v272_v34, %v276_v35 }
 0x21a   :  { %3192 = vmatmul.mubr.bf16.gmra.mrb[108].mxu0 %v4448_v45  ;;  %2621 = vmatprep.mubr.bf16.mxu1 %v4453_v46 }
 0x21b   :  { %3199 = vmatprep.mubr.bf16.mxu0 %v4457_v51 }
 0x21c   :  { %v2407_v56 = vpop.f32.mrb[4].mxu1 }
 0x21d   :  { %v4871_v58 = vadd.f32 %v6344_v33, %v2407_v56  ;;  %v2985_v59 = vpop.f32.mrb[4].mxu0  ;;  %v2409_v60 = vpop.f32.mrb[5].mxu1 }
 0x21e   :  { %v2987_v62 = vpop.f32.mrb[5].mxu0  ;;  %v2410_v63 = vpop.f32.mrb[6].mxu1 }
 0x21f   :  { %v6377_v3 = vadd.f32 %v4871_v58, %v2985_v59  ;;  %v4873_v4 = vadd.f32 %v6344_v33, %v2410_v63  ;;  %v2988_v5 = vpop.f32.mrb[6].mxu0  ;;  %v2412_v6 = vpop.f32.mrb[7].mxu1  ;;  %v4480_v59 = vcombine.low %v272_v34, %v276_v35 }
 0x220   :  { %v2990_v8 = vpop.f32.mrb[7].mxu0 }
 0x221   :  { %v6380_v9 = vadd.f32 %v4873_v4, %v2988_v5  ;;  %2622 = vmatmul.mubr.bf16.gmra.mrb[112].mxu1 %v4452_v61 }
 0x222   :  { %3200 = vmatmul.mubr.bf16.gmra.mrb[112].mxu0 %v4456_v1  ;;  %2629 = vmatprep.mubr.bf16.mxu1 %v4461_v2 }
 0x223   :  { %3207 = vmatprep.mubr.bf16.mxu0 %v4465_v7 }
 0x224   :  { %v2415_v12 = vpop.f32.mrb[8].mxu1 }
 0x225   :  { %v4875_v15 = vadd.f32 %v6344_v33, %v2415_v12  ;;  %v2993_v16 = vpop.f32.mrb[8].mxu0  ;;  %v2417_v17 = vpop.f32.mrb[9].mxu1 }
 0x226   :  { %v2995_v19 = vpop.f32.mrb[9].mxu0  ;;  %v2418_v20 = vpop.f32.mrb[10].mxu1 }
 0x227   :  { %v6395_v23 = vadd.f32 %v4875_v15, %v2993_v16  ;;  %v4877_v24 = vadd.f32 %v6344_v33, %v2418_v20  ;;  %v2996_v25 = vpop.f32.mrb[10].mxu0  ;;  %v2420_v26 = vpop.f32.mrb[11].mxu1 }
 0x228   :  { %v2998_v28 = vpop.f32.mrb[11].mxu0 }
 0x229   :  { %v6398_v29 = vadd.f32 %v4877_v24, %v2996_v25  ;;  %2630 = vmatmul.mubr.bf16.gmra.mrb[116].mxu1 %v4460_v18 }
 0x22a   :  { %3208 = vmatmul.mubr.bf16.gmra.mrb[116].mxu0 %v4464_v21  ;;  %2637 = vmatprep.mubr.bf16.mxu1 %v4469_v22 }
 0x22b   :  { %3215 = vmatprep.mubr.bf16.mxu0 %v4473_v27 }
 0x22c   :  { %v2423_v32 = vpop.f32.mrb[12].mxu1 }
 0x22d   :  { %v4879_v36 = vadd.f32 %v6344_v33, %v2423_v32  ;;  %v3001_v37 = vpop.f32.mrb[12].mxu0  ;;  %v2425_v38 = vpop.f32.mrb[13].mxu1 }
 0x22e   :  { %v3003_v40 = vpop.f32.mrb[13].mxu0  ;;  %v2426_v41 = vpop.f32.mrb[14].mxu1 }
 0x22f   :  { %v6413_v44 = vadd.f32 %v4879_v36, %v3001_v37  ;;  %v4881_v45 = vadd.f32 %v6344_v33, %v2426_v41  ;;  %v3004_v46 = vpop.f32.mrb[14].mxu0  ;;  %v2428_v48 = vpop.f32.mrb[15].mxu1 }
 0x230   :  { %v3006_v50 = vpop.f32.mrb[15].mxu0 }
 0x231   :  { %v6416_v51 = vadd.f32 %v4881_v45, %v3004_v46  ;;  %2638 = vmatmul.mubr.bf16.gmra.mrb[120].mxu1 %v4468_v39  ;;  %v3232_v45 = vadd.f32 %v6362_v53, %v6359_v47 }
 0x232   :  { %3216 = vmatmul.mubr.bf16.gmra.mrb[120].mxu0 %v4472_v42  ;;  %2645 = vmatprep.mubr.bf16.mxu1 %v4477_v43 }
 0x233   :  { %3223 = vmatprep.mubr.bf16.mxu0 %v4481_v49  ;;  %v3233_v48 = vadd.f32 %v6377_v3, %v3232_v45 }
 0x234   :  { %v2431_v52 = vpop.f32.mrb[16].mxu1 }
 0x235   :  { %v4883_v54 = vadd.f32 %v6344_v33, %v2431_v52  ;;  %v3009_v55 = vpop.f32.mrb[16].mxu0  ;;  %v2433_v56 = vpop.f32.mrb[17].mxu1 }
 0x236   :  { %v3011_v0 = vpop.f32.mrb[17].mxu0  ;;  %v2434_v58 = vpop.f32.mrb[18].mxu1 }
 0x237   :  { %v6419_v60 = vadd.f32 %v4883_v54, %v3009_v55  ;;  %v4885_v61 = vadd.f32 %v6344_v33, %v2434_v58  ;;  %v3012_v62 = vpop.f32.mrb[18].mxu0  ;;  %v2436_v63 = vpop.f32.mrb[19].mxu1 }
 0x238   :  { %v3014_v1 = vpop.f32.mrb[19].mxu0 }
 0x239   :  { %v6422_v2 = vadd.f32 %v4885_v61, %v3012_v62  ;;  %2646 = vmatmul.mubr.bf16.gmra.mrb[124].mxu1 %v4476_v57  ;;  %v3234_v61 = vadd.f32 %v6380_v9, %v3233_v48 }
 0x23a   :  { %3224 = vmatmul.mubr.bf16.gmra.mrb[124].mxu0 %v4480_v59 }
 0x23b   :  { %v3235_v63 = vadd.f32 %v6395_v23, %v3234_v61 }
 0x23c   :  { %v2439_v4 = vpop.f32.mrb[20].mxu1 }
 0x23d   :  { %v4887_v5 = vadd.f32 %v6344_v33, %v2439_v4  ;;  %v3017_v6 = vpop.f32.mrb[20].mxu0  ;;  %v2441_v7 = vpop.f32.mrb[21].mxu1 }
 0x23e   :  { %v3019_v8 = vpop.f32.mrb[21].mxu0  ;;  %v2442_v10 = vpop.f32.mrb[22].mxu1 }
 0x23f   :  { %v6425_v11 = vadd.f32 %v4887_v5, %v3017_v6  ;;  %v4889_v12 = vadd.f32 %v6344_v33, %v2442_v10  ;;  %v3020_v13 = vpop.f32.mrb[22].mxu0  ;;  %v2444_v14 = vpop.f32.mrb[23].mxu1  ;;  %v3236_v10 = vadd.f32 %v6398_v29, %v3235_v63 }
 0x240   :  { %v3022_v15 = vpop.f32.mrb[23].mxu0 }
 0x241   :  { %v6428_v16 = vadd.f32 %v4889_v12, %v3020_v13 }
 0x244   :  { %v2447_v17 = vpop.f32.mrb[24].mxu1 }
 0x245   :  { %v4891_v18 = vadd.f32 %v6344_v33, %v2447_v17  ;;  %v3025_v19 = vpop.f32.mrb[24].mxu0  ;;  %v2449_v20 = vpop.f32.mrb[25].mxu1 }
 0x246   :  { %v3027_v21 = vpop.f32.mrb[25].mxu0  ;;  %v2450_v22 = vpop.f32.mrb[26].mxu1 }
 0x247   :  { %v6431_v24 = vadd.f32 %v4891_v18, %v3025_v19  ;;  %v4893_v25 = vadd.f32 %v6344_v33, %v2450_v22  ;;  %v3028_v26 = vpop.f32.mrb[26].mxu0  ;;  %v2452_v27 = vpop.f32.mrb[27].mxu1  ;;  %v3237_v18 = vadd.f32 %v6413_v44, %v3236_v10 }
 0x248   :  { %v3030_v28 = vpop.f32.mrb[27].mxu0 }
 0x249   :  { %v6434_v30 = vadd.f32 %v4893_v25, %v3028_v26  ;;  %v3238_v21 = vadd.f32 %v6416_v51, %v3237_v18 }
 0x24c   :  { %v2455_v31 = vpop.f32.mrb[28].mxu1 }
 0x24d   :  { %v4895_v32 = vadd.f32 %v6344_v33, %v2455_v31  ;;  %v3033_v34 = vpop.f32.mrb[28].mxu0  ;;  %v2457_v35 = vpop.f32.mrb[29].mxu1  ;;  %v3239_v31 = vadd.f32 %v6419_v60, %v3238_v21 }
 0x24e   :  { %v3035_v36 = vpop.f32.mrb[29].mxu0  ;;  %v2458_v37 = vpop.f32.mrb[30].mxu1 }
 0x24f   :  { %v6437_v38 = vadd.f32 %v4895_v32, %v3033_v34  ;;  %v4897_v39 = vadd.f32 %v6344_v33, %v2458_v37  ;;  %v3036_v40 = vpop.f32.mrb[30].mxu0  ;;  %v2460_v41 = vpop.f32.mrb[31].mxu1 }
 0x250   :  { %v3038_v42 = vpop.f32.mrb[31].mxu0 }
 0x251   :  { %v6440_v43 = vadd.f32 %v4897_v39, %v3036_v40  ;;  %v3240_v40 = vadd.f32 %v6422_v2, %v3239_v31 }
 0x253   :  { %v3241_v42 = vadd.f32 %v6425_v11, %v3240_v40 }
 0x254   :  { %v2463_v46 = vpop.f32.mrb[32].mxu1 }
 0x255   :  { %v4899_v49 = vadd.f32 %v6344_v33, %v2463_v46  ;;  %v3041_v50 = vpop.f32.mrb[32].mxu0  ;;  %v2465_v52 = vpop.f32.mrb[33].mxu1 }
 0x256   :  { %v3043_v54 = vpop.f32.mrb[33].mxu0  ;;  %v2466_v55 = vpop.f32.mrb[34].mxu1 }
 0x257   :  { %v6446_v56 = vadd.f32 %v4899_v49, %v3041_v50  ;;  %v4901_v57 = vadd.f32 %v6344_v33, %v2466_v55  ;;  %v3044_v0 = vpop.f32.mrb[34].mxu0  ;;  %v2468_v58 = vpop.f32.mrb[35].mxu1 }
 0x258   :  { %v3046_v59 = vpop.f32.mrb[35].mxu0  ;;  %v3242_v58 = vadd.f32 %v6428_v16, %v3241_v42 }
 0x259   :  { %v6450_v62 = vadd.f32 %v4901_v57, %v3044_v0 }
 0x25a   :  { %v3243_v61 = vadd.f32 %v6431_v24, %v3242_v58 }
 0x25c   :  { %v2471_v1 = vpop.f32.mrb[36].mxu1 }
 0x25d   :  { %v4903_v4 = vadd.f32 %v6344_v33, %v2471_v1  ;;  %v3049_v5 = vpop.f32.mrb[36].mxu0  ;;  %v2473_v6 = vpop.f32.mrb[37].mxu1 }
 0x25e   :  { %v3051_v7 = vpop.f32.mrb[37].mxu0  ;;  %v2474_v8 = vpop.f32.mrb[38].mxu1 }
 0x25f   :  { %v6455_v12 = vadd.f32 %v4903_v4, %v3049_v5  ;;  %v4905_v13 = vadd.f32 %v6344_v33, %v2474_v8  ;;  %v3052_v14 = vpop.f32.mrb[38].mxu0  ;;  %v2476_v15 = vpop.f32.mrb[39].mxu1  ;;  %v3244_v8 = vadd.f32 %v6434_v30, %v3243_v61 }
 0x260   :  { %v3054_v17 = vpop.f32.mrb[39].mxu0 }
 0x261   :  { %v6459_v19 = vadd.f32 %v4905_v13, %v3052_v14  ;;  %v3245_v18 = vadd.f32 %v6437_v38, %v3244_v8 }
 0x264   :  { %v2479_v20 = vpop.f32.mrb[40].mxu1 }
 0x265   :  { %v4907_v22 = vadd.f32 %v6344_v33, %v2479_v20  ;;  %v3057_v25 = vpop.f32.mrb[40].mxu0  ;;  %v2481_v26 = vpop.f32.mrb[41].mxu1 }
 0x266   :  { %v3059_v27 = vpop.f32.mrb[41].mxu0  ;;  %v2482_v28 = vpop.f32.mrb[42].mxu1 }
 0x267   :  { %v6464_v32 = vadd.f32 %v4907_v22, %v3057_v25  ;;  %v4909_v34 = vadd.f32 %v6344_v33, %v2482_v28  ;;  %v3060_v35 = vpop.f32.mrb[42].mxu0  ;;  %v2484_v36 = vpop.f32.mrb[43].mxu1  ;;  %v3246_v22 = vadd.f32 %v6440_v43, %v3245_v18 }
 0x268   :  { %v3062_v37 = vpop.f32.mrb[43].mxu0 }
 0x269   :  { %v6467_v39 = vadd.f32 %v4909_v34, %v3060_v35  ;;  %v3247_v34 = vadd.f32 %v6446_v56, %v3246_v22 }
 0x26c   :  { %v2487_v41 = vpop.f32.mrb[44].mxu1 }
 0x26d   :  { %v4911_v45 = vadd.f32 %v6344_v33, %v2487_v41  ;;  %v3065_v46 = vpop.f32.mrb[44].mxu0  ;;  %v2489_v48 = vpop.f32.mrb[45].mxu1 }
 0x26e   :  { %v3067_v49 = vpop.f32.mrb[45].mxu0  ;;  %v2490_v50 = vpop.f32.mrb[46].mxu1 }
 0x26f   :  { %v6472_v52 = vadd.f32 %v4911_v45, %v3065_v46  ;;  %v4913_v54 = vadd.f32 %v6344_v33, %v2490_v50  ;;  %v3068_v55 = vpop.f32.mrb[46].mxu0  ;;  %v2492_v57 = vpop.f32.mrb[47].mxu1  ;;  %v3248_v45 = vadd.f32 %v6450_v62, %v3247_v34 }
 0x270   :  { %v3070_v0 = vpop.f32.mrb[47].mxu0 }
 0x271   :  { %v6476_v59 = vadd.f32 %v4913_v54, %v3068_v55  ;;  %v3249_v48 = vadd.f32 %v6455_v12, %v3248_v45 }
 0x274   :  { %v2495_v63 = vpop.f32.mrb[48].mxu1 }
 0x275   :  { %v4915_v1 = vadd.f32 %v6344_v33, %v2495_v63  ;;  %v3073_v4 = vpop.f32.mrb[48].mxu0  ;;  %v2497_v5 = vpop.f32.mrb[49].mxu1 }
 0x276   :  { %v3075_v6 = vpop.f32.mrb[49].mxu0  ;;  %v2498_v7 = vpop.f32.mrb[50].mxu1 }
 0x277   :  { %v6481_v10 = vadd.f32 %v4915_v1, %v3073_v4  ;;  %v4917_v13 = vadd.f32 %v6344_v33, %v2498_v7  ;;  %v3076_v14 = vpop.f32.mrb[50].mxu0  ;;  %v2500_v15 = vpop.f32.mrb[51].mxu1  ;;  %v3250_v4 = vadd.f32 %v6459_v19, %v3249_v48 }
 0x278   :  { %v3078_v17 = vpop.f32.mrb[51].mxu0 }
 0x279   :  { %v6485_v20 = vadd.f32 %v4917_v13, %v3076_v14  ;;  %v3251_v6 = vadd.f32 %v6464_v32, %v3250_v4 }
 0x27b   :  { %v3252_v18 = vadd.f32 %v6467_v39, %v3251_v6 }
 0x27c   :  { %v2503_v21 = vpop.f32.mrb[52].mxu1 }
 0x27d   :  { %v4919_v25 = vadd.f32 %v6344_v33, %v2503_v21  ;;  %v3081_v26 = vpop.f32.mrb[52].mxu0  ;;  %v2505_v27 = vpop.f32.mrb[53].mxu1 }
 0x27e   :  { %v3083_v28 = vpop.f32.mrb[53].mxu0  ;;  %v2506_v31 = vpop.f32.mrb[54].mxu1 }
 0x27f   :  { %v6490_v35 = vadd.f32 %v4919_v25, %v3081_v26  ;;  %v4921_v36 = vadd.f32 %v6344_v33, %v2506_v31  ;;  %v3084_v37 = vpop.f32.mrb[54].mxu0  ;;  %v2508_v40 = vpop.f32.mrb[55].mxu1  ;;  %v3253_v28 = vadd.f32 %v6472_v52, %v3252_v18 }
 0x280   :  { %v3086_v41 = vpop.f32.mrb[55].mxu0 }
 0x281   :  { %v6493_v42 = vadd.f32 %v4921_v36, %v3084_v37  ;;  %v3254_v36 = vadd.f32 %v6476_v59, %v3253_v28 }
 0x283   :  { %v3255_v48 = vadd.f32 %v6481_v10, %v3254_v36 }
 0x284   :  { %v2511_v46 = vpop.f32.mrb[56].mxu1 }
 0x285   :  { %v4923_v49 = vadd.f32 %v6344_v33, %v2511_v46  ;;  %v3089_v50 = vpop.f32.mrb[56].mxu0  ;;  %v2513_v54 = vpop.f32.mrb[57].mxu1 }
 0x286   :  { %v3091_v55 = vpop.f32.mrb[57].mxu0  ;;  %v2514_v57 = vpop.f32.mrb[58].mxu1 }
 0x287   :  { %v6498_v0 = vadd.f32 %v4923_v49, %v3089_v50  ;;  %v4925_v58 = vadd.f32 %v6344_v33, %v2514_v57  ;;  %v3092_v61 = vpop.f32.mrb[58].mxu0  ;;  %v2516_v63 = vpop.f32.mrb[59].mxu1 }
 0x288   :  { %v3094_v1 = vpop.f32.mrb[59].mxu0 }
 0x289   :  { %v6502_v5 = vadd.f32 %v4925_v58, %v3092_v61  ;;  %v3256_v61 = vadd.f32 %v6485_v20, %v3255_v48 }
 0x28b   :  { %v3257_v1 = vadd.f32 %v6490_v35, %v3256_v61 }
 0x28c   :  { %v2519_v7 = vpop.f32.mrb[60].mxu1 }
 0x28d   :  { %v4927_v8 = vadd.f32 %v6344_v33, %v2519_v7  ;;  %v3097_v13 = vpop.f32.mrb[60].mxu0  ;;  %v2521_v14 = vpop.f32.mrb[61].mxu1 }
 0x28e   :  { %v3099_v15 = vpop.f32.mrb[61].mxu0  ;;  %v2522_v17 = vpop.f32.mrb[62].mxu1 }
 0x28f   :  { %v6507_v21 = vadd.f32 %v4927_v8, %v3097_v13  ;;  %v4929_v22 = vadd.f32 %v6344_v33, %v2522_v17  ;;  %v3100_v25 = vpop.f32.mrb[62].mxu0  ;;  %v2524_v26 = vpop.f32.mrb[63].mxu1 }
 0x290   :  { %v3102_v27 = vpop.f32.mrb[63].mxu0 }
 0x291   :  { %v6511_v31 = vadd.f32 %v4929_v22, %v3100_v25  ;;  %v3258_v25 = vadd.f32 %v6493_v42, %v3257_v1 }
 0x293   :  { %v3259_v27 = vadd.f32 %v6498_v0, %v3258_v25 }
 0x294   :  { %v2527_v34 = vpop.f32.mrb[64].mxu1 }
 0x295   :  { %v4931_v37 = vadd.f32 %v6344_v33, %v2527_v34  ;;  %v3105_v40 = vpop.f32.mrb[64].mxu0  ;;  %v2529_v41 = vpop.f32.mrb[65].mxu1 }
 0x296   :  { %v3107_v45 = vpop.f32.mrb[65].mxu0  ;;  %v2530_v46 = vpop.f32.mrb[66].mxu1 }
 0x297   :  { %v6516_v49 = vadd.f32 %v4931_v37, %v3105_v40  ;;  %v4933_v50 = vadd.f32 %v6344_v33, %v2530_v46  ;;  %v3108_v54 = vpop.f32.mrb[66].mxu0  ;;  %v2532_v55 = vpop.f32.mrb[67].mxu1  ;;  %v3260_v45 = vadd.f32 %v6502_v5, %v3259_v27 }
 0x298   :  { %v3110_v57 = vpop.f32.mrb[67].mxu0 }
 0x299   :  { %v6519_v58 = vadd.f32 %v4933_v50, %v3108_v54  ;;  %v3261_v57 = vadd.f32 %v6507_v21, %v3260_v45 }
 0x29b   :  { %v3262_v1 = vadd.f32 %v6511_v31, %v3261_v57 }
 0x29c   :  { %v2535_v63 = vpop.f32.mrb[68].mxu1 }
 0x29d   :  { %v4935_v4 = vadd.f32 %v6344_v33, %v2535_v63  ;;  %v3113_v6 = vpop.f32.mrb[68].mxu0  ;;  %v2537_v7 = vpop.f32.mrb[69].mxu1 }
 0x29e   :  { %v3115_v8 = vpop.f32.mrb[69].mxu0  ;;  %v2538_v13 = vpop.f32.mrb[70].mxu1 }
 0x29f   :  { %v6524_v14 = vadd.f32 %v4935_v4, %v3113_v6  ;;  %v4937_v15 = vadd.f32 %v6344_v33, %v2538_v13  ;;  %v3116_v17 = vpop.f32.mrb[70].mxu0  ;;  %v2540_v18 = vpop.f32.mrb[71].mxu1 }
 0x2a0   :  { %v3118_v22 = vpop.f32.mrb[71].mxu0 }
 0x2a1   :  { %8428 = vst [vmem:[#allocation2_spill] sm:$0xff] %v6524_v14  ;;  %v6528_v26 = vadd.f32 %v4937_v15, %v3116_v17  ;;  %v3263_v15 = vadd.f32 %v6516_v49, %v3262_v1 }
 0x2a3   :  { %8429 = vst [vmem:[#allocation3_spill] sm:$0xff] %v6528_v26 }
 0x2a4   :  { %v2543_v28 = vpop.f32.mrb[72].mxu1 }
 0x2a5   :  { %v4939_v34 = vadd.f32 %v6344_v33, %v2543_v28  ;;  %v3121_v36 = vpop.f32.mrb[72].mxu0  ;;  %v2545_v37 = vpop.f32.mrb[73].mxu1 }
 0x2a6   :  { %v3123_v40 = vpop.f32.mrb[73].mxu0  ;;  %v2546_v41 = vpop.f32.mrb[74].mxu1 }
 0x2a7   :  { %v6533_v46 = vadd.f32 %v4939_v34, %v3121_v36  ;;  %v4941_v48 = vadd.f32 %v6344_v33, %v2546_v41  ;;  %v3124_v50 = vpop.f32.mrb[74].mxu0  ;;  %v2548_v54 = vpop.f32.mrb[75].mxu1  ;;  %v3264_v34 = vadd.f32 %v6519_v58, %v3263_v15 }
 0x2a8   :  { %v3126_v55 = vpop.f32.mrb[75].mxu0 }
 0x2a9   :  { %8430 = vst [vmem:[#allocation4_spill] sm:$0xff] %v6533_v46  ;;  %v6537_v61 = vadd.f32 %v4941_v48, %v3124_v50  ;;  %v3265_v37 = vadd.f32 %v6524_v14, %v3264_v34 }
 0x2ab   :  { %8431 = vst [vmem:[#allocation5_spill] sm:$0xff] %v6537_v61 }
 0x2ac   :  { %v2551_v63 = vpop.f32.mrb[76].mxu1 }
 0x2ad   :  { %v4943_v4 = vadd.f32 %v6344_v33, %v2551_v63  ;;  %v3129_v6 = vpop.f32.mrb[76].mxu0  ;;  %v2553_v7 = vpop.f32.mrb[77].mxu1 }
 0x2ae   :  { %v3131_v8 = vpop.f32.mrb[77].mxu0  ;;  %v2554_v13 = vpop.f32.mrb[78].mxu1 }
 0x2af   :  { %v6542_v17 = vadd.f32 %v4943_v4, %v3129_v6  ;;  %v4945_v18 = vadd.f32 %v6344_v33, %v2554_v13  ;;  %v3132_v22 = vpop.f32.mrb[78].mxu0  ;;  %v2556_v25 = vpop.f32.mrb[79].mxu1  ;;  %v3266_v4 = vadd.f32 %v6528_v26, %v3265_v37 }
 0x2b0   :  { %v3134_v27 = vpop.f32.mrb[79].mxu0 }
 0x2b1   :  { %8432 = vst [vmem:[#allocation6_spill] sm:$0xff] %v6542_v17  ;;  %v6545_v28 = vadd.f32 %v4945_v18, %v3132_v22  ;;  %v3267_v7 = vadd.f32 %v6533_v46, %v3266_v4 }
 0x2b3   :  { %8433 = vst [vmem:[#allocation7_spill] sm:$0xff] %v6545_v28  ;;  %v3268_v27 = vadd.f32 %v6537_v61, %v3267_v7 }
 0x2b4   :  { %v2559_v36 = vpop.f32.mrb[80].mxu1 }
 0x2b5   :  { %v4947_v40 = vadd.f32 %v6344_v33, %v2559_v36  ;;  %v3137_v41 = vpop.f32.mrb[80].mxu0  ;;  %v2561_v45 = vpop.f32.mrb[81].mxu1 }
 0x2b6   :  { %v3139_v48 = vpop.f32.mrb[81].mxu0  ;;  %v2562_v50 = vpop.f32.mrb[82].mxu1  ;;  %v3269_v45 = vadd.f32 %v6542_v17, %v3268_v27 }
 0x2b7   :  { %v6550_v54 = vadd.f32 %v4947_v40, %v3137_v41  ;;  %v4949_v55 = vadd.f32 %v6344_v33, %v2562_v50  ;;  %v3140_v57 = vpop.f32.mrb[82].mxu0  ;;  %v2564_v63 = vpop.f32.mrb[83].mxu1 }
 0x2b8   :  { %v3142_v1 = vpop.f32.mrb[83].mxu0 }
 0x2b9   :  { %8434 = vst [vmem:[#allocation8_spill] sm:$0xff] %v6550_v54  ;;  %v6554_v6 = vadd.f32 %v4949_v55, %v3140_v57  ;;  %v3270_v55 = vadd.f32 %v6545_v28, %v3269_v45 }
 0x2bb   :  { %8435 = vst [vmem:[#allocation9_spill] sm:$0xff] %v6554_v6 }
 0x2bc   :  { %v2567_v8 = vpop.f32.mrb[84].mxu1 }
 0x2bd   :  { %v4951_v13 = vadd.f32 %v6344_v33, %v2567_v8  ;;  %v3145_v15 = vpop.f32.mrb[84].mxu0  ;;  %v2569_v18 = vpop.f32.mrb[85].mxu1  ;;  %v3271_v8 = vadd.f32 %v6550_v54, %v3270_v55 }
 0x2be   :  { %v3147_v22 = vpop.f32.mrb[85].mxu0  ;;  %v2570_v25 = vpop.f32.mrb[86].mxu1 }
 0x2bf   :  { %v6559_v34 = vadd.f32 %v4951_v13, %v3145_v15  ;;  %v4953_v36 = vadd.f32 %v6344_v33, %v2570_v25  ;;  %v3148_v40 = vpop.f32.mrb[86].mxu0  ;;  %v2572_v41 = vpop.f32.mrb[87].mxu1 }
 0x2c0   :  { %v3150_v37 = vpop.f32.mrb[87].mxu0 }
 0x2c1   :  { %8436 = vst [vmem:[#allocation10_spill] sm:$0xff] %v6559_v34  ;;  %v6563_v48 = vadd.f32 %v4953_v36, %v3148_v40  ;;  %v3272_v36 = vadd.f32 %v6554_v6, %v3271_v8 }
 0x2c3   :  { %8437 = vst [vmem:[#allocation11_spill] sm:$0xff] %v6563_v48  ;;  %v3273_v41 = vadd.f32 %v6559_v34, %v3272_v36 }
 0x2c4   :  { %v2575_v50 = vpop.f32.mrb[88].mxu1 }
 0x2c5   :  { %v4955_v57 = vadd.f32 %v6344_v33, %v2575_v50  ;;  %v3153_v63 = vpop.f32.mrb[88].mxu0  ;;  %v2577_v1 = vpop.f32.mrb[89].mxu1 }
 0x2c6   :  { %v3155_v4 = vpop.f32.mrb[89].mxu0  ;;  %v2578_v7 = vpop.f32.mrb[90].mxu1 }
 0x2c7   :  { %v6568_v13 = vadd.f32 %v4955_v57, %v3153_v63  ;;  %v4957_v15 = vadd.f32 %v6344_v33, %v2578_v7  ;;  %v3156_v18 = vpop.f32.mrb[90].mxu0  ;;  %v2580_v22 = vpop.f32.mrb[91].mxu1 }
 0x2c8   :  { %v3158_v25 = vpop.f32.mrb[91].mxu0 }
 0x2c9   :  { %8438 = vst [vmem:[#allocation12_spill] sm:$0xff] %v6568_v13  ;;  %v6571_v27 = vadd.f32 %v4957_v15, %v3156_v18  ;;  %v3274_v15 = vadd.f32 %v6563_v48, %v3273_v41 }
 0x2cb   :  { %8439 = vst [vmem:[#allocation13_spill] sm:$0xff] %v6571_v27  ;;  %v3275_v8 = vadd.f32 %v6568_v13, %v3274_v15 }
 0x2cc   :  { %v2583_v40 = vpop.f32.mrb[92].mxu1 }
 0x2cd   :  { %v4959_v37 = vadd.f32 %v6344_v33, %v2583_v40  ;;  %v3161_v45 = vpop.f32.mrb[92].mxu0  ;;  %v2585_v50 = vpop.f32.mrb[93].mxu1 }
 0x2ce   :  { %v3163_v1 = vpop.f32.mrb[93].mxu0  ;;  %v2586_v55 = vpop.f32.mrb[94].mxu1 }
 0x2cf   :  { %v6576_v57 = vadd.f32 %v4959_v37, %v3161_v45  ;;  %v4961_v63 = vadd.f32 %v6344_v33, %v2586_v55  ;;  %v3164_v4 = vpop.f32.mrb[94].mxu0  ;;  %v2588_v7 = vpop.f32.mrb[95].mxu1  ;;  %v3276_v37 = vadd.f32 %v6571_v27, %v3275_v8 }
 0x2d0   :  { %v3166_v22 = vpop.f32.mrb[95].mxu0 }
 0x2d1   :  { %8440 = vst [vmem:[#allocation14_spill] sm:$0xff] %v6576_v57  ;;  %v6580_v18 = vadd.f32 %v4961_v63, %v3164_v4  ;;  %v3277_v63 = vadd.f32 %v6576_v57, %v3276_v37 }
 0x2d3   :  { %8441 = vst [vmem:[#allocation15_spill] sm:$0xff] %v6580_v18 }
 0x2d4   :  { %v2591_v25 = vpop.f32.mrb[96].mxu1 }
 0x2d5   :  { %v4963_v36 = vadd.f32 %v6344_v33, %v2591_v25  ;;  %v3169_v40 = vpop.f32.mrb[96].mxu0  ;;  %v2593_v50 = vpop.f32.mrb[97].mxu1  ;;  %v3278_v25 = vadd.f32 %v6580_v18, %v3277_v63 }
 0x2d6   :  { %v3171_v1 = vpop.f32.mrb[97].mxu0  ;;  %v2594_v34 = vpop.f32.mrb[98].mxu1 }
 0x2d7   :  { %v6585_v45 = vadd.f32 %v4963_v36, %v3169_v40  ;;  %v4965_v55 = vadd.f32 %v6344_v33, %v2594_v34  ;;  %v3172_v7 = vpop.f32.mrb[98].mxu0  ;;  %v2596_v22 = vpop.f32.mrb[99].mxu1 }
 0x2d8   :  { %v3174_v41 = vpop.f32.mrb[99].mxu0 }
 0x2d9   :  { %8442 = vst [vmem:[#allocation16_spill] sm:$0xff] %v6585_v45  ;;  %v6589_v4 = vadd.f32 %v4965_v55, %v3172_v7  ;;  %v3279_v36 = vadd.f32 %v6585_v45, %v3278_v25 }
 0x2db   :  { %8443 = vst [vmem:[#allocation17_spill] sm:$0xff] %v6589_v4  ;;  %v3280_v7 = vadd.f32 %v6589_v4, %v3279_v36 }
 0x2dc   :  { %v2599_v15 = vpop.f32.mrb[100].mxu1 }
 0x2dd   :  { %v4967_v50 = vadd.f32 %v6344_v33, %v2599_v15  ;;  %v3177_v1 = vpop.f32.mrb[100].mxu0  ;;  %v2601_v13 = vpop.f32.mrb[101].mxu1 }
 0x2de   :  { %v3179_v48 = vpop.f32.mrb[101].mxu0  ;;  %v2602_v8 = vpop.f32.mrb[102].mxu1 }
 0x2df   :  { %v6594_v40 = vadd.f32 %v4967_v50, %v3177_v1  ;;  %v4969_v34 = vadd.f32 %v6344_v33, %v2602_v8  ;;  %v3180_v22 = vpop.f32.mrb[102].mxu0  ;;  %v2604_v41 = vpop.f32.mrb[103].mxu1 }
 0x2e0   :  { %v3182_v37 = vpop.f32.mrb[103].mxu0 }
 0x2e1   :  { %8444 = vst [vmem:[#allocation18_spill] sm:$0xff] %v6594_v40  ;;  %v6597_v55 = vadd.f32 %v4969_v34, %v3180_v22  ;;  %v3281_v15 = vadd.f32 %v6594_v40, %v3280_v7 }
 0x2e3   :  { %8445 = vst [vmem:[#allocation19_spill] sm:$0xff] %v6597_v55  ;;  %v3282_v34 = vadd.f32 %v6597_v55, %v3281_v15 }
 0x2e4   :  { %v2607_v63 = vpop.f32.mrb[104].mxu1 }
 0x2e5   :  { %v4971_v13 = vadd.f32 %v6344_v33, %v2607_v63  ;;  %v3185_v48 = vpop.f32.mrb[104].mxu0  ;;  %v2609_v18 = vpop.f32.mrb[105].mxu1 }
 0x2e6   :  { %v3187_v57 = vpop.f32.mrb[105].mxu0  ;;  %v2610_v25 = vpop.f32.mrb[106].mxu1 }
 0x2e7   :  { %v6602_v50 = vadd.f32 %v4971_v13, %v3185_v48  ;;  %v4973_v1 = vadd.f32 %v6344_v33, %v2610_v25  ;;  %v3188_v8 = vpop.f32.mrb[106].mxu0  ;;  %v2612_v41 = vpop.f32.mrb[107].mxu1 }
 0x2e8   :  { %v3190_v37 = vpop.f32.mrb[107].mxu0 }
 0x2e9   :  { %8446 = vst [vmem:[#allocation20_spill] sm:$0xff] %v6602_v50  ;;  %v6606_v22 = vadd.f32 %v4973_v1, %v3188_v8  ;;  %v3283_v36 = vadd.f32 %v6602_v50, %v3282_v34 }
 0x2eb   :  { %8447 = vst [vmem:[#allocation21_spill] sm:$0xff] %v6606_v22  ;;  %v3284_v13 = vadd.f32 %v6606_v22, %v3283_v36 }
 0x2ec   :  { %v2615_v7 = vpop.f32.mrb[108].mxu1 }
 0x2ed   :  { %v4975_v63 = vadd.f32 %v6344_v33, %v2615_v7  ;;  %v3193_v40 = vpop.f32.mrb[108].mxu0  ;;  %v2617_v18 = vpop.f32.mrb[109].mxu1 }
 0x2ee   :  { %v3195_v57 = vpop.f32.mrb[109].mxu0  ;;  %v2618_v4 = vpop.f32.mrb[110].mxu1 }
 0x2ef   :  { %v6611_v48 = vadd.f32 %v4975_v63, %v3193_v40  ;;  %v4977_v25 = vadd.f32 %v6344_v33, %v2618_v4  ;;  %v3196_v41 = vpop.f32.mrb[110].mxu0  ;;  %v2620_v37 = vpop.f32.mrb[111].mxu1 }
 0x2f0   :  { %v3198_v15 = vpop.f32.mrb[111].mxu0 }
 0x2f1   :  { %v3285_v1 = vadd.f32 %v6611_v48, %v3284_v13  ;;  %v6615_v8 = vadd.f32 %v4977_v25, %v3196_v41 }
 0x2f3   :  { %v3286_v34 = vadd.f32 %v6615_v8, %v3285_v1 }
 0x2f4   :  { %v2623_v7 = vpop.f32.mrb[112].mxu1 }
 0x2f5   :  { %v4979_v18 = vadd.f32 %v6344_v33, %v2623_v7  ;;  %v3201_v57 = vpop.f32.mrb[112].mxu0  ;;  %v2625_v50 = vpop.f32.mrb[113].mxu1 }
 0x2f6   :  { %v3203_v55 = vpop.f32.mrb[113].mxu0  ;;  %v2626_v36 = vpop.f32.mrb[114].mxu1 }
 0x2f7   :  { %v4980_v40 = vadd.f32 %v4979_v18, %v3201_v57  ;;  %v4981_v63 = vadd.f32 %v6344_v33, %v2626_v36  ;;  %v3204_v4 = vpop.f32.mrb[114].mxu0  ;;  %v2628_v22 = vpop.f32.mrb[115].mxu1 }
 0x2f8   :  { %v3206_v37 = vpop.f32.mrb[115].mxu0 }
 0x2f9   :  { %v3287_v15 = vadd.f32 %v4980_v40, %v3286_v34  ;;  %v4982_v45 = vadd.f32 %v4981_v63, %v3204_v4 }
 0x2fb   :  { %v3288_v13 = vadd.f32 %v4982_v45, %v3287_v15 }
 0x2fc   :  { %v2631_v25 = vpop.f32.mrb[116].mxu1 }
 0x2fd   :  { %v4983_v41 = vadd.f32 %v6344_v33, %v2631_v25  ;;  %v3209_v1 = vpop.f32.mrb[116].mxu0  ;;  %v2633_v27 = vpop.f32.mrb[117].mxu1 }
 0x2fe   :  { %v3211_v6 = vpop.f32.mrb[117].mxu0  ;;  %v2634_v7 = vpop.f32.mrb[118].mxu1 }
 0x2ff   :  { %v4984_v54 = vadd.f32 %v4983_v41, %v3209_v1  ;;  %v4985_v55 = vadd.f32 %v6344_v33, %v2634_v7  ;;  %v3212_v50 = vpop.f32.mrb[118].mxu0  ;;  %v2636_v18 = vpop.f32.mrb[119].mxu1 }
 0x300   :  { %v3214_v57 = vpop.f32.mrb[119].mxu0 }
 0x301   :  { %v3289_v36 = vadd.f32 %v4984_v54, %v3288_v13  ;;  %v4986_v28 = vadd.f32 %v4985_v55, %v3212_v50 }
 0x303   :  { %v3290_v22 = vadd.f32 %v4986_v28, %v3289_v36 }
 0x304   :  { %v2639_v37 = vpop.f32.mrb[120].mxu1 }
 0x305   :  { %v4987_v34 = vadd.f32 %v6344_v33, %v2639_v37  ;;  %v3217_v63 = vpop.f32.mrb[120].mxu0  ;;  %v2641_v4 = vpop.f32.mrb[121].mxu1 }
 0x306   :  { %v3219_v15 = vpop.f32.mrb[121].mxu0  ;;  %v2642_v25 = vpop.f32.mrb[122].mxu1 }
 0x307   :  { %v4988_v17 = vadd.f32 %v4987_v34, %v3217_v63  ;;  %v4989_v6 = vadd.f32 %v6344_v33, %v2642_v25  ;;  %v3220_v27 = vpop.f32.mrb[122].mxu0  ;;  %v2644_v41 = vpop.f32.mrb[123].mxu1 }
 0x308   :  { %v3222_v1 = vpop.f32.mrb[123].mxu0 }
 0x309   :  { %v3291_v7 = vadd.f32 %v4988_v17, %v3290_v22  ;;  %v4990_v61 = vadd.f32 %v4989_v6, %v3220_v27 }
 0x30b   :  { %v3292_v18 = vadd.f32 %v4990_v61, %v3291_v7 }
 0x30c   :  { %v2647_v57 = vpop.f32.mrb[124].mxu1 }
 0x30d   :  { %v4991_v13 = vadd.f32 %v6344_v33, %v2647_v57  ;;  %v3225_v55 = vpop.f32.mrb[124].mxu0  ;;  %v2649_v50 = vpop.f32.mrb[125].mxu1 }
 0x30e   :  { %v3227_v36 = vpop.f32.mrb[125].mxu0  ;;  %v2650_v37 = vpop.f32.mrb[126].mxu1 }
 0x30f   :  { %v4992_v46 = vadd.f32 %v4991_v13, %v3225_v55  ;;  %v4993_v4 = vadd.f32 %v6344_v33, %v2650_v37  ;;  %v3228_v15 = vpop.f32.mrb[126].mxu0  ;;  %v2652_v34 = vpop.f32.mrb[127].mxu1 }
 0x310   :  { %v3230_v63 = vpop.f32.mrb[127].mxu0 }
 0x311   :  { %v3293_v25 = vadd.f32 %v4992_v46, %v3292_v18  ;;  %v4994_v26 = vadd.f32 %v4993_v4, %v3228_v15 }
 0x313   :  { %v3294_v41 = vadd.f32 %v4994_v26, %v3293_v25 }
 0x315   :  { %v3295_v1 = vrot.slane %v3294_v41, 4 }
 0x317   :  { %v3296_v22 = vadd.f32 %v3295_v1, %v3294_v41 }
 0x319   :  { %v3297_v6 = vrot.slane %v3296_v22, 2 }
 0x31b   :  { %v3298_v27 = vadd.f32 %v3297_v6, %v3296_v22 }
 0x31d   :  { %v3299_v7 = vrot.slane %v3298_v27, 1 }
 0x31f   :  { %v3300_v14 = vadd.f32 %v3299_v7, %v3298_v27 }
 0x321   :  { %v6626_v57 = vmul.f32 0.001953125, %v3300_v14 }
 0x323   :  { %v6630_v50 = vsub.f32 %v6611_v48, %v6626_v57  ;;  %v6634_v33 = vsub.f32 %v6615_v8, %v6626_v57  ;;  %v6637_v18 = vsub.f32 %v4980_v40, %v6626_v57  ;;  %v6640_v13 = vsub.f32 %v4982_v45, %v6626_v57 }
 0x324   :  { %v6643_v55 = vsub.f32 %v4984_v54, %v6626_v57  ;;  %v6646_v14 = vsub.f32 %v4986_v28, %v6626_v57  ;;  %v6649_v36 = vsub.f32 %v4988_v17, %v6626_v57  ;;  %v6652_v48 = vsub.f32 %v4990_v61, %v6626_v57 }
 0x325   :  { %v6655_v8 = vsub.f32 %v4992_v46, %v6626_v57  ;;  %v6658_v40 = vsub.f32 %v4994_v26, %v6626_v57  ;;  %v6662_v45 = vsub.f32 %v6359_v47, %v6626_v57  ;;  %v6666_v28 = vsub.f32 %v6362_v53, %v6626_v57 }
 0x326   :  { %v6670_v17 = vsub.f32 %v6377_v3, %v6626_v57  ;;  %v6678_v26 = vsub.f32 %v6380_v9, %v6626_v57  ;;  %v6682_v47 = vsub.f32 %v6395_v23, %v6626_v57  ;;  %v6688_v3 = vsub.f32 %v6398_v29, %v6626_v57 }
 0x327   :  { %v3367_v61 = vmul.f32 %v6662_v45, %v6662_v45  ;;  %v3368_v46 = vmul.f32 %v6666_v28, %v6666_v28  ;;  %v6694_v9 = vsub.f32 %v6413_v44, %v6626_v57  ;;  %v6700_v34 = vsub.f32 %v6416_v51, %v6626_v57 }
 0x328   :  { %v3369_v53 = vmul.f32 %v6670_v17, %v6670_v17  ;;  %v3370_v37 = vmul.f32 %v6678_v26, %v6678_v26  ;;  %v3371_v23 = vmul.f32 %v6682_v47, %v6682_v47  ;;  %v3372_v29 = vmul.f32 %v6688_v3, %v6688_v3 }
 0x329   :  { %v3431_v54 = vadd.f32 %v3368_v46, %v3367_v61  ;;  %v6706_v25 = vsub.f32 %v6419_v60, %v6626_v57  ;;  %v3373_v44 = vmul.f32 %v6694_v9, %v6694_v9  ;;  %v6712_v1 = vsub.f32 %v6422_v2, %v6626_v57 }
 0x32a   :  { %v3374_v51 = vmul.f32 %v6700_v34, %v6700_v34  ;;  %v6718_v6 = vsub.f32 %v6425_v11, %v6626_v57  ;;  %v6724_v7 = vsub.f32 %v6428_v16, %v6626_v57  ;;  %v6730_v46 = vsub.f32 %v6431_v24, %v6626_v57 }
 0x32b   :  { %v3432_v4 = vadd.f32 %v3431_v54, %v3369_v53  ;;  %v3375_v60 = vmul.f32 %v6706_v25, %v6706_v25  ;;  %v3376_v2 = vmul.f32 %v6712_v1, %v6712_v1  ;;  %v6736_v54 = vsub.f32 %v6434_v30, %v6626_v57 }
 0x32c   :  { %v3377_v11 = vmul.f32 %v6718_v6, %v6718_v6  ;;  %v3378_v16 = vmul.f32 %v6724_v7, %v6724_v7  ;;  %v3379_v24 = vmul.f32 %v6730_v46, %v6730_v46 }
 0x32d   :  { %v3433_v15 = vadd.f32 %v3432_v4, %v3370_v37  ;;  %v6742_v4 = vsub.f32 %v6437_v38, %v6626_v57  ;;  %v3380_v30 = vmul.f32 %v6736_v54, %v6736_v54 }
 0x32f   :  { %v3434_v63 = vadd.f32 %v3433_v15, %v3371_v23  ;;  %v6748_v15 = vsub.f32 %v6440_v43, %v6626_v57  ;;  %v3381_v38 = vmul.f32 %v6742_v4, %v6742_v4 }
 0x331   :  { %v3435_v41 = vadd.f32 %v3434_v63, %v3372_v29  ;;  %v6754_v63 = vsub.f32 %v6446_v56, %v6626_v57  ;;  %v3382_v43 = vmul.f32 %v6748_v15, %v6748_v15 }
 0x333   :  { %v3436_v22 = vadd.f32 %v3435_v41, %v3373_v44  ;;  %v6760_v41 = vsub.f32 %v6450_v62, %v6626_v57  ;;  %v3383_v56 = vmul.f32 %v6754_v63, %v6754_v63 }
 0x335   :  { %v3437_v27 = vadd.f32 %v3436_v22, %v3374_v51  ;;  %v6766_v22 = vsub.f32 %v6455_v12, %v6626_v57  ;;  %v3384_v62 = vmul.f32 %v6760_v41, %v6760_v41 }
 0x337   :  { %v3438_v61 = vadd.f32 %v3437_v27, %v3375_v60  ;;  %v6772_v27 = vsub.f32 %v6459_v19, %v6626_v57  ;;  %v3385_v12 = vmul.f32 %v6766_v22, %v6766_v22 }
 0x339   :  { %v3439_v53 = vadd.f32 %v3438_v61, %v3376_v2  ;;  %v6778_v61 = vsub.f32 %v6464_v32, %v6626_v57  ;;  %v3386_v19 = vmul.f32 %v6772_v27, %v6772_v27 }
 0x33b   :  { %v3440_v37 = vadd.f32 %v3439_v53, %v3377_v11  ;;  %v6784_v53 = vsub.f32 %v6467_v39, %v6626_v57  ;;  %v3387_v32 = vmul.f32 %v6778_v61, %v6778_v61 }
 0x33d   :  { %v3441_v23 = vadd.f32 %v3440_v37, %v3378_v16  ;;  %v6790_v37 = vsub.f32 %v6472_v52, %v6626_v57  ;;  %v3388_v39 = vmul.f32 %v6784_v53, %v6784_v53 }
 0x33f   :  { %v3442_v29 = vadd.f32 %v3441_v23, %v3379_v24  ;;  %v6796_v23 = vsub.f32 %v6476_v59, %v6626_v57  ;;  %v3389_v52 = vmul.f32 %v6790_v37, %v6790_v37 }
 0x341   :  { %v3443_v44 = vadd.f32 %v3442_v29, %v3380_v30  ;;  %v6802_v29 = vsub.f32 %v6481_v10, %v6626_v57  ;;  %v3390_v59 = vmul.f32 %v6796_v23, %v6796_v23 }
 0x343   :  { %v3444_v51 = vadd.f32 %v3443_v44, %v3381_v38  ;;  %v6808_v44 = vsub.f32 %v6485_v20, %v6626_v57  ;;  %v3391_v10 = vmul.f32 %v6802_v29, %v6802_v29 }
 0x345   :  { %v3445_v60 = vadd.f32 %v3444_v51, %v3382_v43  ;;  %v6814_v51 = vsub.f32 %v6490_v35, %v6626_v57  ;;  %v3392_v20 = vmul.f32 %v6808_v44, %v6808_v44 }
 0x347   :  { %v3446_v2 = vadd.f32 %v3445_v60, %v3383_v56  ;;  %v6820_v60 = vsub.f32 %v6493_v42, %v6626_v57  ;;  %v3393_v35 = vmul.f32 %v6814_v51, %v6814_v51 }
 0x349   :  { %v3447_v11 = vadd.f32 %v3446_v2, %v3384_v62  ;;  %v6826_v2 = vsub.f32 %v6498_v0, %v6626_v57  ;;  %v3394_v42 = vmul.f32 %v6820_v60, %v6820_v60 }
 0x34b   :  { %v3448_v16 = vadd.f32 %v3447_v11, %v3385_v12  ;;  %v6832_v11 = vsub.f32 %v6502_v5, %v6626_v57  ;;  %v3395_v0 = vmul.f32 %v6826_v2, %v6826_v2 }
 0x34d   :  { %v3449_v24 = vadd.f32 %v3448_v16, %v3386_v19  ;;  %v6838_v16 = vsub.f32 %v6507_v21, %v6626_v57  ;;  %v3396_v5 = vmul.f32 %v6832_v11, %v6832_v11 }
 0x34f   :  { %v3450_v30 = vadd.f32 %v3449_v24, %v3387_v32  ;;  %v6844_v24 = vsub.f32 %v6511_v31, %v6626_v57  ;;  %v3397_v21 = vmul.f32 %v6838_v16, %v6838_v16 }
 0x351   :  { %v3451_v38 = vadd.f32 %v3450_v30, %v3388_v39  ;;  %v6850_v30 = vsub.f32 %v6516_v49, %v6626_v57  ;;  %v3398_v31 = vmul.f32 %v6844_v24, %v6844_v24 }
 0x353   :  { %v3452_v43 = vadd.f32 %v3451_v38, %v3389_v52  ;;  %8448 = vst [vmem:[#allocation22_spill] sm:$0xff] %v6850_v30  ;;  %v6856_v38 = vsub.f32 %v6519_v58, %v6626_v57  ;;  %v3399_v49 = vmul.f32 %v6850_v30, %v6850_v30 }
 0x355   :  { %v3453_v56 = vadd.f32 %v3452_v43, %v3390_v59  ;;  %8449 = vst [vmem:[#allocation23_spill] sm:$0xff] %v6856_v38  ;;  %v8450_v43 = vld [vmem:[#allocation2_spill] sm:$0xff]  ;;  %v3400_v58 = vmul.f32 %v6856_v38, %v6856_v38 }
 0x357   :  { %v3454_v62 = vadd.f32 %v3453_v56, %v3391_v10  ;;  %v6862_v10 = vsub.f32 %v8450_v43, %v6626_v57 }
 0x359   :  { %v3455_v12 = vadd.f32 %v3454_v62, %v3392_v20  ;;  %8451 = vst [vmem:[#allocation2_spill] sm:$0xff] %v6862_v10  ;;  %v8452_v20 = vld [vmem:[#allocation3_spill] sm:$0xff] }
 0x35a   :  { %v6868_v62 = vsub.f32 %v8452_v20, %v6626_v57 }
 0x35b   :  { %v3456_v19 = vadd.f32 %v3455_v12, %v3393_v35  ;;  %v8454_v12 = vld [vmem:[#allocation4_spill] sm:$0xff] }
 0x35c   :  { %8453 = vst [vmem:[#allocation3_spill] sm:$0xff] %v6868_v62 }
 0x35d   :  { %v3457_v32 = vadd.f32 %v3456_v19, %v3394_v42  ;;  %v6874_v42 = vsub.f32 %v8454_v12, %v6626_v57  ;;  %v3401_v19 = vmul.f32 %v6862_v10, %v6862_v10 }
 0x35f   :  { %v3458_v39 = vadd.f32 %v3457_v32, %v3395_v0  ;;  %8455 = vst [vmem:[#allocation4_spill] sm:$0xff] %v6874_v42  ;;  %v8456_v32 = vld [vmem:[#allocation5_spill] sm:$0xff] }
 0x361   :  { %v3459_v52 = vadd.f32 %v3458_v39, %v3396_v5  ;;  %v6880_v5 = vsub.f32 %v8456_v32, %v6626_v57  ;;  %v3402_v39 = vmul.f32 %v6868_v62, %v6868_v62  ;;  %v8464_v32 = vld [vmem:[#allocation9_spill] sm:$0xff] }
 0x363   :  { %v3460_v59 = vadd.f32 %v3459_v52, %v3397_v21  ;;  %8457 = vst [vmem:[#allocation5_spill] sm:$0xff] %v6880_v5  ;;  %v8458_v52 = vld [vmem:[#allocation6_spill] sm:$0xff]  ;;  %v3404_v20 = vmul.f32 %v6880_v5, %v6880_v5 }
 0x365   :  { %v3461_v56 = vadd.f32 %v3460_v59, %v3398_v31  ;;  %v6886_v31 = vsub.f32 %v8458_v52, %v6626_v57  ;;  %v3403_v59 = vmul.f32 %v6874_v42, %v6874_v42  ;;  %v6904_v52 = vsub.f32 %v8464_v32, %v6626_v57  ;;  %v8470_v32 = vld [vmem:[#allocation12_spill] sm:$0xff] }
 0x367   :  { %v3462_v35 = vadd.f32 %v3461_v56, %v3399_v49  ;;  %8459 = vst [vmem:[#allocation6_spill] sm:$0xff] %v6886_v31  ;;  %v8460_v49 = vld [vmem:[#allocation7_spill] sm:$0xff]  ;;  %8465 = vst [vmem:[#allocation9_spill] sm:$0xff] %v6904_v52 }
 0x368   :  { %v6892_v56 = vsub.f32 %v8460_v49, %v6626_v57  ;;  %v8466_v49 = vld [vmem:[#allocation10_spill] sm:$0xff] }
 0x369   :  { %v3463_v0 = vadd.f32 %v3462_v35, %v3400_v58  ;;  %v8462_v35 = vld [vmem:[#allocation8_spill] sm:$0xff]  ;;  %v6910_v5 = vsub.f32 %v8466_v49, %v6626_v57  ;;  %v8472_v49 = vld [vmem:[#allocation13_spill] sm:$0xff] }
 0x36a   :  { %8461 = vst [vmem:[#allocation7_spill] sm:$0xff] %v6892_v56  ;;  %v6898_v12 = vsub.f32 %v8462_v35, %v6626_v57  ;;  %v8468_v35 = vld [vmem:[#allocation11_spill] sm:$0xff] }
 0x36b   :  { %v3464_v21 = vadd.f32 %v3463_v0, %v3401_v19  ;;  %v3405_v19 = vmul.f32 %v6886_v31, %v6886_v31  ;;  %8467 = vst [vmem:[#allocation10_spill] sm:$0xff] %v6910_v5  ;;  %v6916_v31 = vsub.f32 %v8468_v35, %v6626_v57  ;;  %v8474_v35 = vld [vmem:[#allocation14_spill] sm:$0xff] }
 0x36c   :  { %8463 = vst [vmem:[#allocation8_spill] sm:$0xff] %v6898_v12 }
 0x36d   :  { %v3465_v43 = vadd.f32 %v3464_v21, %v3402_v39  ;;  %v3406_v39 = vmul.f32 %v6892_v56, %v6892_v56  ;;  %8469 = vst [vmem:[#allocation11_spill] sm:$0xff] %v6916_v31  ;;  %v6922_v56 = vsub.f32 %v8470_v32, %v6626_v57  ;;  %v8476_v32 = vld [vmem:[#allocation15_spill] sm:$0xff] }
 0x36f   :  { %v3466_v58 = vadd.f32 %v3465_v43, %v3403_v59  ;;  %v3407_v59 = vmul.f32 %v6898_v12, %v6898_v12  ;;  %8471 = vst [vmem:[#allocation12_spill] sm:$0xff] %v6922_v56  ;;  %v6928_v12 = vsub.f32 %v8472_v49, %v6626_v57  ;;  %v8478_v49 = vld [vmem:[#allocation16_spill] sm:$0xff] }
 0x371   :  { %v3467_v0 = vadd.f32 %v3466_v58, %v3404_v20  ;;  %v3408_v20 = vmul.f32 %v6904_v52, %v6904_v52  ;;  %8473 = vst [vmem:[#allocation13_spill] sm:$0xff] %v6928_v12  ;;  %v6934_v52 = vsub.f32 %v8474_v35, %v6626_v57  ;;  %v8480_v35 = vld [vmem:[#allocation17_spill] sm:$0xff] }
 0x373   :  { %v3468_v21 = vadd.f32 %v3467_v0, %v3405_v19  ;;  %v3409_v19 = vmul.f32 %v6910_v5, %v6910_v5  ;;  %8475 = vst [vmem:[#allocation14_spill] sm:$0xff] %v6934_v52  ;;  %v6940_v5 = vsub.f32 %v8476_v32, %v6626_v57  ;;  %v8482_v32 = vld [vmem:[#allocation18_spill] sm:$0xff] }
 0x375   :  { %v3469_v43 = vadd.f32 %v3468_v21, %v3406_v39  ;;  %v3410_v39 = vmul.f32 %v6916_v31, %v6916_v31  ;;  %8477 = vst [vmem:[#allocation15_spill] sm:$0xff] %v6940_v5  ;;  %v6946_v31 = vsub.f32 %v8478_v49, %v6626_v57  ;;  %v8483_v49 = vld [vmem:[#allocation19_spill] sm:$0xff] }
 0x376   :  { %v3354_v42 = vsub.f32 %v8483_v49, %v6626_v57  ;;  %v3421_v49 = vmul.f32 %v6630_v50, %v6630_v50 }
 0x377   :  { %v3470_v58 = vadd.f32 %v3469_v43, %v3407_v59  ;;  %v3411_v59 = vmul.f32 %v6922_v56, %v6922_v56  ;;  %8479 = vst [vmem:[#allocation16_spill] sm:$0xff] %v6946_v31  ;;  %v6952_v56 = vsub.f32 %v8480_v35, %v6626_v57  ;;  %v8484_v35 = vld [vmem:[#allocation20_spill] sm:$0xff] }
 0x379   :  { %v3471_v0 = vadd.f32 %v3470_v58, %v3408_v20  ;;  %v3412_v20 = vmul.f32 %v6928_v12, %v6928_v12  ;;  %8481 = vst [vmem:[#allocation17_spill] sm:$0xff] %v6952_v56  ;;  %v3353_v12 = vsub.f32 %v8482_v32, %v6626_v57  ;;  %v3418_v32 = vmul.f32 %v3354_v42, %v3354_v42 }
 0x37b   :  { %v3472_v21 = vadd.f32 %v3471_v0, %v3409_v19  ;;  %v3413_v19 = vmul.f32 %v6934_v52, %v6934_v52  ;;  %v3355_v52 = vsub.f32 %v8484_v35, %v6626_v57  ;;  %v3417_v62 = vmul.f32 %v3353_v12, %v3353_v12 }
 0x37c   :  { %v3427_v35 = vmul.f32 %v6649_v36, %v6649_v36 }
 0x37d   :  { %v3473_v43 = vadd.f32 %v3472_v21, %v3410_v39  ;;  %v3414_v39 = vmul.f32 %v6940_v5, %v6940_v5  ;;  %v3419_v38 = vmul.f32 %v3355_v52, %v3355_v52 }
 0x37f   :  { %v3474_v58 = vadd.f32 %v3473_v43, %v3411_v59  ;;  %v3415_v59 = vmul.f32 %v6946_v31, %v6946_v31 }
 0x381   :  { %v3475_v0 = vadd.f32 %v3474_v58, %v3412_v20  ;;  %v3416_v20 = vmul.f32 %v6952_v56, %v6952_v56 }
 0x383   :  { %v3476_v21 = vadd.f32 %v3475_v0, %v3413_v19  ;;  %v8485_v19 = vld [vmem:[#allocation21_spill] sm:$0xff] }
 0x384   :  { %v3356_v0 = vsub.f32 %v8485_v19, %v6626_v57  ;;  %v3424_v57 = vmul.f32 %v6640_v13, %v6640_v13  ;;  %v3428_v19 = vmul.f32 %v6652_v48, %v6652_v48 }
 0x385   :  { %v3477_v43 = vadd.f32 %v3476_v21, %v3414_v39 }
 0x386   :  { %v3420_v39 = vmul.f32 %v3356_v0, %v3356_v0 }
 0x387   :  { %v3478_v58 = vadd.f32 %v3477_v43, %v3415_v59  ;;  %v3422_v59 = vmul.f32 %v6634_v33, %v6634_v33 }
 0x389   :  { %v3479_v5 = vadd.f32 %v3478_v58, %v3416_v20  ;;  %v3423_v20 = vmul.f32 %v6637_v18, %v6637_v18 }
 0x38b   :  { %v3480_v10 = vadd.f32 %v3479_v5, %v3417_v62  ;;  %v3426_v5 = vmul.f32 %v6646_v14, %v6646_v14 }
 0x38d   :  { %v3481_v31 = vadd.f32 %v3480_v10, %v3418_v32  ;;  %v3425_v10 = vmul.f32 %v6643_v55, %v6643_v55 }
 0x38f   :  { %v3482_v21 = vadd.f32 %v3481_v31, %v3419_v38 }
 0x391   :  { %v3483_v30 = vadd.f32 %v3482_v21, %v3420_v39  ;;  %v3429_v39 = vmul.f32 %v6655_v8, %v6655_v8 }
 0x393   :  { %v3484_v43 = vadd.f32 %v3483_v30, %v3421_v49  ;;  %v3430_v49 = vmul.f32 %v6658_v40, %v6658_v40 }
 0x395   :  { %v3485_v58 = vadd.f32 %v3484_v43, %v3422_v59 }
 0x397   :  { %v3486_v62 = vadd.f32 %v3485_v58, %v3423_v20 }
 0x399   :  { %v3487_v38 = vadd.f32 %v3486_v62, %v3424_v57 }
 0x39b   :  { %v3488_v31 = vadd.f32 %v3487_v38, %v3425_v10 }
 0x39d   :  { %v3489_v30 = vadd.f32 %v3488_v31, %v3426_v5 }
 0x39f   :  { %v3490_v32 = vadd.f32 %v3489_v30, %v3427_v35 }
 0x3a1   :  { %v3491_v21 = vadd.f32 %v3490_v32, %v3428_v19 }
 0x3a3   :  { %v3492_v59 = vadd.f32 %v3491_v21, %v3429_v39 }
 0x3a5   :  { %v3493_v43 = vadd.f32 %v3492_v59, %v3430_v49  ;;  %v8495_v59 = vld [vmem:[#allocation22_spill] sm:$0xff] }
 0x3a7   :  { %v3494_v20 = vrot.slane %v3493_v43, 4 }
 0x3a9   :  { %v3495_v58 = vadd.f32 %v3494_v20, %v3493_v43  ;;  %v8496_v43 = vld [vmem:[#allocation23_spill] sm:$0xff]  ;;  %v8497_v20 = vld [vmem:[#allocation2_spill] sm:$0xff] }
 0x3ab   :  { %v3496_v57 = vrot.slane %v3495_v58, 2 }
 0x3ad   :  { %v3497_v62 = vadd.f32 %v3496_v57, %v3495_v58  ;;  %v8498_v58 = vld [vmem:[#allocation3_spill] sm:$0xff]  ;;  %v8499_v57 = vld [vmem:[#allocation4_spill] sm:$0xff] }
 0x3af   :  { %v3498_v10 = vrot.slane %v3497_v62, 1 }
 0x3b1   :  { %v3499_v38 = vadd.f32 %v3498_v10, %v3497_v62  ;;  %v8500_v62 = vld [vmem:[#allocation5_spill] sm:$0xff]  ;;  %v8501_v10 = vld [vmem:[#allocation6_spill] sm:$0xff] }
 0x3b3   :  { %v3500_v5 = vmul.f32 0.001953125, %v3499_v38  ;;  %v8502_v38 = vld [vmem:[#allocation7_spill] sm:$0xff] }
 0x3b5   :  { %v3501_v31 = vadd.f32 1e-05, %v3500_v5 }
 0x3b7   :  { %5316 = vrsqrt.f32 %v3501_v31  ;;  %v8503_v31 = vld [vmem:[#allocation8_spill] sm:$0xff] }
 0x3c1   :  { %v6988_v56 = vpop.eup %5316 }
 0x3c2   :  { %v6991_v35 = vmul.f32 %v6988_v56, %v3353_v12  ;;  %v6994_v30 = vmul.f32 %v6988_v56, %v3354_v42  ;;  %v6997_v19 = vmul.f32 %v6988_v56, %v3355_v52  ;;  %v7000_v32 = vmul.f32 %v6988_v56, %v3356_v0 }
 0x3c3   :  { %v7004_v39 = vmul.f32 %v6988_v56, %v6630_v50  ;;  %v7008_v21 = vmul.f32 %v6988_v56, %v6634_v33  ;;  %v7012_v12 = vmul.f32 %v6988_v56, %v6637_v18  ;;  %v7016_v42 = vmul.f32 %v6988_v56, %v6640_v13 }
 0x3c4   :  { %v7020_v52 = vmul.f32 %v6988_v56, %v6643_v55  ;;  %v7024_v50 = vmul.f32 %v6988_v56, %v6646_v14  ;;  %v7028_v33 = vmul.f32 %v6988_v56, %v6649_v36  ;;  %v7032_v18 = vmul.f32 %v6988_v56, %v6652_v48 }
 0x3c5   :  { %8486 = vst [vmem:[#allocation18_spill] sm:$0xff] %v7008_v21  ;;  %8487 = vst [vmem:[#allocation19_spill] sm:$0xff] %v7012_v12  ;;  %v7036_v13 = vmul.f32 %v6988_v56, %v6655_v8  ;;  %v7040_v55 = vmul.f32 %v6988_v56, %v6658_v40  ;;  %v3503_v14 = vmul.f32 %v6988_v56, %v6662_v45  ;;  %v8511_v12 = vld [vmem:[#allocation16_spill] sm:$0xff]  ;;  %v8512_v21 = vld [vmem:[#allocation17_spill] sm:$0xff] }
 0x3c6   :  { %8488 = vst [vmem:[#allocation20_spill] sm:$0xff] %v7016_v42  ;;  %8489 = vst [vmem:[#allocation21_spill] sm:$0xff] %v7020_v52  ;;  %v3504_v0 = vmul.f32 %v6988_v56, %v6666_v28  ;;  %v3505_v36 = vmul.f32 %v6988_v56, %v6670_v17  ;;  %v3506_v48 = vmul.f32 %v6988_v56, %v6678_v26  ;;  %v8510_v52 = vld [vmem:[#allocation15_spill] sm:$0xff] }
 0x3c7   :  { %8490 = vst [vmem:[#allocation24_spill] sm:$0xff] %v7024_v50  ;;  %8491 = vst [vmem:[#allocation25_spill] sm:$0xff] %v7028_v33  ;;  %v3507_v8 = vmul.f32 %v6988_v56, %v6682_v47  ;;  %v3508_v49 = vmul.f32 %v6988_v56, %v6688_v3  ;;  %v3509_v40 = vmul.f32 %v6988_v56, %v6694_v9  ;;  %v8509_v33 = vld [vmem:[#allocation14_spill] sm:$0xff] }
 0x3c8   :  { %8492 = vst [vmem:[#allocation26_spill] sm:$0xff] %v7032_v18  ;;  %8493 = vst [vmem:[#allocation27_spill] sm:$0xff] %v7036_v13  ;;  %v3510_v45 = vmul.f32 %v6988_v56, %v6700_v34  ;;  %v3511_v28 = vmul.f32 %v6988_v56, %v6706_v25  ;;  %v3512_v17 = vmul.f32 %v6988_v56, %v6712_v1  ;;  %v8507_v13 = vld [vmem:[#allocation12_spill] sm:$0xff]  ;;  %v8508_v18 = vld [vmem:[#allocation13_spill] sm:$0xff] }
 0x3c9   :  { %8494 = vst [vmem:[#allocation28_spill] sm:$0xff] %v7040_v55  ;;  %v3513_v26 = vmul.f32 %v6988_v56, %v6718_v6  ;;  %v3514_v47 = vmul.f32 %v6988_v56, %v6724_v7  ;;  %v3515_v3 = vmul.f32 %v6988_v56, %v6730_v46  ;;  %v3516_v9 = vmul.f32 %v6988_v56, %v6736_v54  ;;  %v8506_v55 = vld [vmem:[#allocation11_spill] sm:$0xff] }
 0x3ca   :  { %v3517_v34 = vmul.f32 %v6988_v56, %v6742_v4  ;;  %v3518_v25 = vmul.f32 %v6988_v56, %v6748_v15  ;;  %v3519_v1 = vmul.f32 %v6988_v56, %v6754_v63  ;;  %v3520_v6 = vmul.f32 %v6988_v56, %v6760_v41 }
 0x3cb   :  { %v3521_v7 = vmul.f32 %v6988_v56, %v6766_v22  ;;  %v3522_v46 = vmul.f32 %v6988_v56, %v6772_v27  ;;  %v3523_v54 = vmul.f32 %v6988_v56, %v6778_v61  ;;  %v3524_v4 = vmul.f32 %v6988_v56, %v6784_v53 }
 0x3cc   :  { %v3525_v15 = vmul.f32 %v6988_v56, %v6790_v37  ;;  %v3526_v63 = vmul.f32 %v6988_v56, %v6796_v23  ;;  %v3527_v41 = vmul.f32 %v6988_v56, %v6802_v29  ;;  %v3528_v22 = vmul.f32 %v6988_v56, %v6808_v44 }
 0x3cd   :  { %v3529_v27 = vmul.f32 %v6988_v56, %v6814_v51  ;;  %v3530_v61 = vmul.f32 %v6988_v56, %v6820_v60  ;;  %v3531_v53 = vmul.f32 %v6988_v56, %v6826_v2  ;;  %v3532_v37 = vmul.f32 %v6988_v56, %v6832_v11 }
 0x3ce   :  { %v3533_v23 = vmul.f32 %v6988_v56, %v6838_v16  ;;  %v3534_v29 = vmul.f32 %v6988_v56, %v6844_v24  ;;  %v3535_v44 = vmul.f32 %v6988_v56, %v8495_v59  ;;  %v3536_v51 = vmul.f32 %v6988_v56, %v8496_v43  ;;  %v7127_v43 = vld [vmem:[%s8354_s3] ss:$0 sm:$0xff] }
 0x3cf   :  { %v3537_v60 = vmul.f32 %v6988_v56, %v8497_v20  ;;  %v3538_v2 = vmul.f32 %v6988_v56, %v8498_v58  ;;  %v3539_v11 = vmul.f32 %v6988_v56, %v8499_v57  ;;  %v3540_v16 = vmul.f32 %v6988_v56, %v8500_v62  ;;  %v8504_v20 = vld [vmem:[#allocation9_spill] sm:$0xff]  ;;  %v8505_v57 = vld [vmem:[#allocation10_spill] sm:$0xff] }
 0x3d0   :  { %v3541_v24 = vmul.f32 %v6988_v56, %v8501_v10  ;;  %v3542_v5 = vmul.f32 %v6988_v56, %v8502_v38  ;;  %v3543_v59 = vmul.f32 %v6988_v56, %v8503_v31  ;;  %v3544_v58 = vmul.f32 %v6988_v56, %v8504_v20 }
 0x3d1   :  { %v3545_v62 = vmul.f32 %v6988_v56, %v8505_v57  ;;  %v3546_v10 = vmul.f32 %v6988_v56, %v8506_v55  ;;  %v3547_v38 = vmul.f32 %v6988_v56, %v8507_v13  ;;  %v3548_v31 = vmul.f32 %v6988_v56, %v8508_v18 }
 0x3d2   :  { %v3549_v50 = vmul.f32 %v6988_v56, %v8509_v33  ;;  %v3550_v42 = vmul.f32 %v6988_v56, %v8510_v52  ;;  %v3551_v20 = vmul.f32 %v6988_v56, %v8511_v12  ;;  %v3552_v57 = vmul.f32 %v6988_v56, %v8512_v21 }
 0x3d3   :  { %v7148_v55 = vmul.f32 %v7127_v43, %v3503_v14  ;;  %v7151_v13 = vmul.f32 %v7127_v43, %v3504_v0  ;;  %v7154_v18 = vmul.f32 %v7127_v43, %v3505_v36  ;;  %v7157_v33 = vmul.f32 %v7127_v43, %v3506_v48 }
 0x3d4   :  { %v7160_v52 = vmul.f32 %v7127_v43, %v3507_v8  ;;  %v7163_v12 = vmul.f32 %v7127_v43, %v3508_v49  ;;  %v7166_v56 = vmul.f32 %v7127_v43, %v3509_v40  ;;  %v7169_v21 = vmul.f32 %v7127_v43, %v3510_v45 }
 0x3d5   :  { %v7172_v14 = vmul.f32 %v7127_v43, %v3511_v28  ;;  %v7175_v0 = vmul.f32 %v7127_v43, %v3512_v17  ;;  %v7178_v36 = vmul.f32 %v7127_v43, %v3513_v26  ;;  %v7181_v48 = vmul.f32 %v7127_v43, %v3514_v47 }
 0x3d6   :  { %v7184_v8 = vmul.f32 %v7127_v43, %v3515_v3  ;;  %v7187_v49 = vmul.f32 %v7127_v43, %v3516_v9  ;;  %v7190_v40 = vmul.f32 %v7127_v43, %v3517_v34  ;;  %v7193_v45 = vmul.f32 %v7127_v43, %v3518_v25 }
 0x3d7   :  { %v7196_v28 = vmul.f32 %v7127_v43, %v3519_v1  ;;  %v7199_v17 = vmul.f32 %v7127_v43, %v3520_v6  ;;  %v7202_v26 = vmul.f32 %v7127_v43, %v3521_v7  ;;  %v7205_v47 = vmul.f32 %v7127_v43, %v3522_v46 }
 0x3d8   :  { %v7208_v3 = vmul.f32 %v7127_v43, %v3523_v54  ;;  %v7211_v9 = vmul.f32 %v7127_v43, %v3524_v4  ;;  %v7214_v34 = vmul.f32 %v7127_v43, %v3525_v15  ;;  %v7217_v25 = vmul.f32 %v7127_v43, %v3526_v63 }
 0x3d9   :  { %v7220_v1 = vmul.f32 %v7127_v43, %v3527_v41  ;;  %v7223_v6 = vmul.f32 %v7127_v43, %v3528_v22  ;;  %v7226_v7 = vmul.f32 %v7127_v43, %v3529_v27  ;;  %v7229_v46 = vmul.f32 %v7127_v43, %v3530_v61 }
 0x3da   :  { %v7232_v54 = vmul.f32 %v7127_v43, %v3531_v53  ;;  %v7235_v4 = vmul.f32 %v7127_v43, %v3532_v37  ;;  %v7238_v15 = vmul.f32 %v7127_v43, %v3533_v23  ;;  %v7241_v63 = vmul.f32 %v7127_v43, %v3534_v29 }
 0x3db   :  { %v7244_v41 = vmul.f32 %v7127_v43, %v3535_v44  ;;  %v7247_v22 = vmul.f32 %v7127_v43, %v3536_v51  ;;  %v7250_v27 = vmul.f32 %v7127_v43, %v3537_v60  ;;  %v7253_v61 = vmul.f32 %v7127_v43, %v3538_v2 }
 0x3dc   :  { %v7256_v53 = vmul.f32 %v7127_v43, %v3539_v11  ;;  %v7259_v37 = vmul.f32 %v7127_v43, %v3540_v16  ;;  %v7262_v23 = vmul.f32 %v7127_v43, %v3541_v24  ;;  %v7265_v29 = vmul.f32 %v7127_v43, %v3542_v5 }
 0x3dd   :  { %v7268_v44 = vmul.f32 %v7127_v43, %v3543_v59  ;;  %v7271_v51 = vmul.f32 %v7127_v43, %v3544_v58  ;;  %v7274_v60 = vmul.f32 %v7127_v43, %v3545_v62  ;;  %v7277_v2 = vmul.f32 %v7127_v43, %v3546_v10 }
 0x3de   :  { %v7280_v11 = vmul.f32 %v7127_v43, %v3547_v38  ;;  %v7283_v16 = vmul.f32 %v7127_v43, %v3548_v31  ;;  %v7286_v24 = vmul.f32 %v7127_v43, %v3549_v50  ;;  %v7289_v5 = vmul.f32 %v7127_v43, %v3550_v42  ;;  %v8517_v31 = vld [vmem:[#allocation18_spill] sm:$0xff] }
 0x3df   :  { %v7292_v59 = vmul.f32 %v7127_v43, %v3551_v20  ;;  %v7295_v58 = vmul.f32 %v7127_v43, %v3552_v57  ;;  %v7299_v62 = vmul.f32 %v7127_v43, %v6991_v35  ;;  %v7303_v10 = vmul.f32 %v7127_v43, %v6994_v30  ;;  %v7320_v35 = vld [vmem:[%s8355_s4] ss:$0 sm:$0xff]  ;;  %v8519_v20 = vld [vmem:[#allocation19_spill] sm:$0xff]  ;;  %v8521_v57 = vld [vmem:[#allocation20_spill] sm:$0xff] }
 0x3e0   :  { %v7307_v50 = vmul.f32 %v7127_v43, %v6997_v19  ;;  %v7311_v42 = vmul.f32 %v7127_v43, %v7000_v32  ;;  %v7315_v38 = vmul.f32 %v7127_v43, %v7004_v39  ;;  %v7324_v30 = vmul.f32 %v7127_v43, %v8517_v31 }
 0x3e1   :  { %8513 = vst [vmem:[#allocation22_spill] sm:$0xff] %v7303_v10  ;;  %v7328_v19 = vmul.f32 %v7127_v43, %v8519_v20  ;;  %v7332_v32 = vmul.f32 %v7127_v43, %v8521_v57  ;;  %v8525_v10 = vld [vmem:[#allocation25_spill] sm:$0xff] }
 0x3e2   :  { %8514 = vst [vmem:[#allocation23_spill] sm:$0xff] %v7307_v50  ;;  %8515 = vst [vmem:[#allocation2_spill] sm:$0xff] %v7311_v42  ;;  %v8523_v42 = vld [vmem:[#allocation21_spill] sm:$0xff]  ;;  %v7344_v31 = vmul.f32 %v7127_v43, %v8525_v10  ;;  %v7364_v10 = vadd.f32 %v7320_v35, %v7151_v13  ;;  %v7384_v13 = vadd.f32 %v7320_v35, %v7166_v56 }
 0x3e3   :  { %8516 = vst [vmem:[#allocation3_spill] sm:$0xff] %v7315_v38  ;;  %8518 = vst [vmem:[#allocation4_spill] sm:$0xff] %v7324_v30  ;;  %v7336_v39 = vmul.f32 %v7127_v43, %v8523_v42  ;;  %v8524_v38 = vld [vmem:[#allocation24_spill] sm:$0xff]  ;;  %v8526_v30 = vld [vmem:[#allocation26_spill] sm:$0xff]  ;;  %v7404_v56 = vadd.f32 %v7320_v35, %v7181_v48  ;;  %v7424_v48 = vadd.f32 %v7320_v35, %v7196_v28 }
 0x3e4   :  { %8520 = vst [vmem:[#allocation5_spill] sm:$0xff] %v7328_v19  ;;  %8522 = vst [vmem:[#allocation6_spill] sm:$0xff] %v7332_v32  ;;  %v7340_v50 = vmul.f32 %v7127_v43, %v8524_v38  ;;  %v7348_v20 = vmul.f32 %v7127_v43, %v8526_v30  ;;  %v8527_v19 = vld [vmem:[#allocation27_spill] sm:$0xff]  ;;  %v8528_v32 = vld [vmem:[#allocation28_spill] sm:$0xff]  ;;  %v7360_v38 = vadd.f32 %v7320_v35, %v7148_v55  ;;  %vm3710_vm1 = vcmp.gt.f32.partialorder %v7364_v10, 0.0 }
 0x3e5   :  { %v7352_v57 = vmul.f32 %v7127_v43, %v8527_v19  ;;  %v7356_v42 = vmul.f32 %v7127_v43, %v8528_v32  ;;  %v7368_v30 = vadd.f32 %v7320_v35, %v7154_v18  ;;  %v7372_v19 = vadd.f32 %v7320_v35, %v7157_v33 }
 0x3e6   :  { %v7376_v43 = vadd.f32 %v7320_v35, %v7160_v52  ;;  %v7380_v55 = vadd.f32 %v7320_v35, %v7163_v12  ;;  %v7388_v18 = vadd.f32 %v7320_v35, %v7169_v21  ;;  %v7392_v33 = vadd.f32 %v7320_v35, %v7172_v14 }
 0x3e7   :  { %v7396_v52 = vadd.f32 %v7320_v35, %v7175_v0  ;;  %v7400_v12 = vadd.f32 %v7320_v35, %v7178_v36  ;;  %v7408_v21 = vadd.f32 %v7320_v35, %v7184_v8  ;;  %v7412_v14 = vadd.f32 %v7320_v35, %v7187_v49 }
 0x3e8   :  { %v7416_v0 = vadd.f32 %v7320_v35, %v7190_v40  ;;  %v7420_v36 = vadd.f32 %v7320_v35, %v7193_v45  ;;  %v7428_v8 = vadd.f32 %v7320_v35, %v7199_v17  ;;  %v7432_v49 = vadd.f32 %v7320_v35, %v7202_v26  ;;  %v8535_v32 = vld [vmem:[#allocation22_spill] sm:$0xff] }
 0x3e9   :  { %v7436_v40 = vadd.f32 %v7320_v35, %v7205_v47  ;;  %v7440_v45 = vadd.f32 %v7320_v35, %v7208_v3  ;;  %v7444_v28 = vadd.f32 %v7320_v35, %v7211_v9  ;;  %v7448_v17 = vadd.f32 %v7320_v35, %v7214_v34 }
 0x3ea   :  { %v7452_v26 = vadd.f32 %v7320_v35, %v7217_v25  ;;  %v7456_v47 = vadd.f32 %v7320_v35, %v7220_v1  ;;  %v7460_v3 = vadd.f32 %v7320_v35, %v7223_v6  ;;  %v7464_v9 = vadd.f32 %v7320_v35, %v7226_v7 }
 0x3eb   :  { %v7468_v34 = vadd.f32 %v7320_v35, %v7229_v46  ;;  %v7472_v25 = vadd.f32 %v7320_v35, %v7232_v54  ;;  %v7476_v1 = vadd.f32 %v7320_v35, %v7235_v4  ;;  %v7480_v6 = vadd.f32 %v7320_v35, %v7238_v15 }
 0x3ec   :  { %v7484_v7 = vadd.f32 %v7320_v35, %v7241_v63  ;;  %v7488_v46 = vadd.f32 %v7320_v35, %v7244_v41  ;;  %v7492_v54 = vadd.f32 %v7320_v35, %v7247_v22  ;;  %v7496_v4 = vadd.f32 %v7320_v35, %v7250_v27 }
 0x3ed   :  { %v7500_v15 = vadd.f32 %v7320_v35, %v7253_v61  ;;  %v7504_v63 = vadd.f32 %v7320_v35, %v7256_v53  ;;  %v7508_v41 = vadd.f32 %v7320_v35, %v7259_v37  ;;  %v7512_v22 = vadd.f32 %v7320_v35, %v7262_v23 }
 0x3ee   :  { %v7516_v27 = vadd.f32 %v7320_v35, %v7265_v29  ;;  %v7520_v61 = vadd.f32 %v7320_v35, %v7268_v44  ;;  %v7524_v53 = vadd.f32 %v7320_v35, %v7271_v51  ;;  %v7528_v37 = vadd.f32 %v7320_v35, %v7274_v60 }
 0x3ef   :  { %v7532_v23 = vadd.f32 %v7320_v35, %v7277_v2  ;;  %v7536_v29 = vadd.f32 %v7320_v35, %v7280_v11  ;;  %v7540_v44 = vadd.f32 %v7320_v35, %v7283_v16  ;;  %v7544_v51 = vadd.f32 %v7320_v35, %v7286_v24 }
 0x3f0   :  { %8529 = vst [vmem:[#allocation7_spill] sm:$0xff] %v7524_v53  ;;  %v7548_v60 = vadd.f32 %v7320_v35, %v7289_v5  ;;  %v7552_v2 = vadd.f32 %v7320_v35, %v7292_v59  ;;  %v7556_v11 = vadd.f32 %v7320_v35, %v7295_v58  ;;  %v7560_v16 = vadd.f32 %v7320_v35, %v7299_v62 }
 0x3f1   :  { %8530 = vst [vmem:[#allocation8_spill] sm:$0xff] %v7544_v51  ;;  %v7564_v24 = vadd.f32 %v7320_v35, %v8535_v32  ;;  %v8537_v51 = vld [vmem:[#allocation23_spill] sm:$0xff]  ;;  %vm3709_vm0 = vcmp.gt.f32.partialorder %v7360_v38, 0.0  ;;  %vm3711_vm2 = vcmp.gt.f32.partialorder %v7368_v30, 0.0  ;;  %vm3712_vm3 = vcmp.gt.f32.partialorder %v7372_v19, 0.0 }
 0x3f2   :  { %8531 = vst [vmem:[#allocation9_spill] sm:$0xff] %v7548_v60  ;;  %8532 = vst [vmem:[#allocation10_spill] sm:$0xff] %v7552_v2  ;;  %v7568_v5 = vadd.f32 %v7320_v35, %v8537_v51  ;;  %v8539_v60 = vld [vmem:[#allocation2_spill] sm:$0xff]  ;;  %v8541_v2 = vld [vmem:[#allocation3_spill] sm:$0xff]  ;;  %vm3713_vm4 = vcmp.gt.f32.partialorder %v7376_v43, 0.0  ;;  %vm3714_vm5 = vcmp.gt.f32.partialorder %v7380_v55, 0.0 }
 0x3f3   :  { %8533 = vst [vmem:[#allocation11_spill] sm:$0xff] %v7556_v11  ;;  %8534 = vst [vmem:[#allocation12_spill] sm:$0xff] %v7560_v16  ;;  %v7572_v59 = vadd.f32 %v7320_v35, %v8539_v60  ;;  %v7576_v58 = vadd.f32 %v7320_v35, %v8541_v2  ;;  %v8543_v11 = vld [vmem:[#allocation4_spill] sm:$0xff]  ;;  %v8545_v16 = vld [vmem:[#allocation5_spill] sm:$0xff]  ;;  %v7592_v60 = vadd.f32 %v7320_v35, %v7336_v39  ;;  %vm3715_vm6 = vcmp.gt.f32.partialorder %v7384_v13, 0.0 }
 0x3f4   :  { %8536 = vst [vmem:[#allocation13_spill] sm:$0xff] %v7564_v24  ;;  %8538 = vst [vmem:[#allocation14_spill] sm:$0xff] %v7568_v5  ;;  %v7580_v62 = vadd.f32 %v7320_v35, %v8543_v11  ;;  %v7584_v32 = vadd.f32 %v7320_v35, %v8545_v16  ;;  %v8547_v24 = vld [vmem:[#allocation6_spill] sm:$0xff]  ;;  %v7596_v2 = vadd.f32 %v7320_v35, %v7340_v50  ;;  %vm3716_vm7 = vcmp.gt.f32.partialorder %v7388_v18, 0.0 }
 0x3f5   :  { %8540 = vst [vmem:[#allocation15_spill] sm:$0xff] %v7572_v59  ;;  %8542 = vst [vmem:[#allocation16_spill] sm:$0xff] %v7576_v58  ;;  %v7588_v51 = vadd.f32 %v7320_v35, %v8547_v24  ;;  %v7600_v11 = vadd.f32 %v7320_v35, %v7344_v31  ;;  %v7604_v16 = vadd.f32 %v7320_v35, %v7348_v20  ;;  %vm3717_vm8 = vcmp.gt.f32.partialorder %v7392_v33, 0.0 }
 0x3f6   :  { %8544 = vst [vmem:[#allocation17_spill] sm:$0xff] %v7580_v62  ;;  %8546 = vst [vmem:[#allocation18_spill] sm:$0xff] %v7584_v32  ;;  %v7617_v50 = vadd.f32 %v7320_v35, %v7352_v57  ;;  %vm3718_vm9 = vcmp.gt.f32.partialorder %v7396_v52, 0.0  ;;  %v3773_v39 = vmul.f32 0.2, %v7360_v38  ;;  %v7625_v24 = vadd.f32 %v7320_v35, %v7356_v42 }
 0x3f7   :  { %8548 = vst [vmem:[#allocation19_spill] sm:$0xff] %v7588_v51  ;;  %8549 = vst [vmem:[#allocation20_spill] sm:$0xff] %v7592_v60  ;;  %v3774_v31 = vmul.f32 0.2, %v7364_v10  ;;  %v3775_v20 = vmul.f32 0.2, %v7368_v30 }
 0x3f8   :  { %8550 = vst [vmem:[#allocation21_spill] sm:$0xff] %v7596_v2  ;;  %8551 = vst [vmem:[#allocation24_spill] sm:$0xff] %v7600_v11  ;;  %vm3719_vm10 = vcmp.gt.f32.partialorder %v7400_v12, 0.0  ;;  %v3777_v11 = vmul.f32 0.2, %v7376_v43  ;;  %vm3720_vm11 = vcmp.gt.f32.partialorder %v7404_v56, 0.0  ;;  %v7638_v35 = vsel %vm3709_vm0, %v7360_v38, %v3773_v39 }
 0x3f9   :  { %8552 = vst [vmem:[#allocation25_spill] sm:$0xff] %v7604_v16  ;;  %8553 = vst [vmem:[#allocation26_spill] sm:$0xff] %v7617_v50  ;;  %v3776_v16 = vmul.f32 0.2, %v7372_v19  ;;  %v3778_v57 = vmul.f32 0.2, %v7380_v55  ;;  %v7649_v32 = vsel %vm3710_vm1, %v7364_v10, %v3774_v31 }
 0x3fa   :  { %8554 = vst [vmem:[#allocation27_spill] sm:$0xff] %v7625_v24  ;;  %v3779_v50 = vmul.f32 0.2, %v7384_v13  ;;  %v3780_v2 = vmul.f32 0.2, %v7388_v18  ;;  %8555 = vst [vmem:[#allocation28_spill] sm:$0xff] %v7638_v35  ;;  %v7664_v35 = vsel %vm3711_vm2, %v7368_v30, %v3775_v20 }
 0x3fb   :  { %v3781_v60 = vmul.f32 0.2, %v7392_v33  ;;  %vm3721_vm12 = vcmp.gt.f32.partialorder %v7408_v21, 0.0  ;;  %v3782_v42 = vmul.f32 0.2, %v7396_v52  ;;  %8556 = vst [vmem:[#allocation22_spill] sm:$0xff] %v7649_v32  ;;  %v7679_v58 = vsel %vm3712_vm3, %v7372_v19, %v3776_v16 }
 0x3fc   :  { %v3783_v24 = vmul.f32 0.2, %v7400_v12  ;;  %v7644_v51 = vmul.f32 0.2, %v7404_v56  ;;  %vm3722_vm13 = vcmp.gt.f32.partialorder %v7412_v14, 0.0  ;;  %8557 = vst [vmem:[#allocation23_spill] sm:$0xff] %v7664_v35 }
 0x3fd   :  { %v7653_v62 = vmul.f32 0.2, %v7408_v21  ;;  %v7656_v38 = vmul.f32 0.2, %v7412_v14  ;;  %v7659_v39 = vmul.f32 0.2, %v7416_v0 }
 0x3fe   :  { %vm3723_vm14 = vcmp.gt.f32.partialorder %v7416_v0, 0.0  ;;  %v7668_v10 = vmul.f32 0.2, %v7420_v36  ;;  %v7671_v31 = vmul.f32 0.2, %v7424_v48  ;;  %8559 = vst [vmem:[#allocation3_spill] sm:$0xff] %v7679_v58 }
 0x3ff   :  { %v7674_v32 = vmul.f32 0.2, %v7428_v8  ;;  %vm3724_vm15 = vcmp.gt.f32.partialorder %v7420_v36, 0.0  ;;  %v7683_v30 = vmul.f32 0.2, %v7432_v49  ;;  %vm3725_vm0 = vcmp.gt.f32.partialorder %v7424_v48, 0.0 }
 0x400   :  { %v7686_v20 = vmul.f32 0.2, %v7436_v40  ;;  %v7689_v35 = vmul.f32 0.2, %v7440_v45  ;;  %v7698_v19 = vmul.f32 0.2, %v7444_v28 }
 0x401   :  { %8558 = vst [vmem:[#allocation2_spill] sm:$0xff] %v7674_v32  ;;  %v7694_v32 = vsel %vm3713_vm4, %v7376_v43, %v3777_v11  ;;  %v7701_v16 = vmul.f32 0.2, %v7448_v17  ;;  %v7704_v58 = vmul.f32 0.2, %v7452_v26  ;;  %vm3726_vm1 = vcmp.gt.f32.partialorder %v7428_v8, 0.0 }
 0x402   :  { %8560 = vst [vmem:[#allocation4_spill] sm:$0xff] %v7689_v35  ;;  %8561 = vst [vmem:[#allocation5_spill] sm:$0xff] %v7694_v32  ;;  %v7709_v35 = vsel %vm3714_vm5, %v7380_v55, %v3778_v57  ;;  %v7713_v43 = vmul.f32 0.2, %v7456_v47  ;;  %v7716_v11 = vmul.f32 0.2, %v7460_v3 }
 0x403   :  { %8562 = vst [vmem:[#allocation6_spill] sm:$0xff] %v7704_v58  ;;  %8563 = vst [vmem:[#allocation29_spill] sm:$0xff] %v7709_v35  ;;  %v7719_v32 = vmul.f32 0.2, %v7464_v9  ;;  %v7724_v58 = vsel %vm3715_vm6, %v7384_v13, %v3779_v50  ;;  %vm3727_vm2 = vcmp.gt.f32.partialorder %v7432_v49, 0.0  ;;  %vm3728_vm3 = vcmp.gt.f32.partialorder %v7436_v40, 0.0 }
 0x404   :  { %8565 = vst [vmem:[#allocation31_spill] sm:$0xff] %v7724_v58  ;;  %v7728_v55 = vmul.f32 0.2, %v7468_v34  ;;  %v7731_v57 = vmul.f32 0.2, %v7472_v25  ;;  %vm3731_vm6 = vcmp.gt.f32.partialorder %v7448_v17, 0.0 }
 0x405   :  { %8564 = vst [vmem:[#allocation30_spill] sm:$0xff] %v7719_v32  ;;  %v7734_v35 = vmul.f32 0.2, %v7476_v1  ;;  %v7739_v32 = vsel %vm3716_vm7, %v7388_v18, %v3780_v2  ;;  %v7745_v13 = vmul.f32 0.2, %v7480_v6  ;;  %v7756_v18 = vsel %vm3717_vm8, %v7392_v33, %v3781_v60 }
 0x406   :  { %8566 = vst [vmem:[#allocation32_spill] sm:$0xff] %v7739_v32  ;;  %v7748_v50 = vmul.f32 0.2, %v7484_v7  ;;  %v7751_v58 = vmul.f32 0.2, %v7488_v46  ;;  %8568 = vst [vmem:[#allocation34_spill] sm:$0xff] %v7756_v18  ;;  %v7774_v33 = vsel %vm3718_vm9, %v7396_v52, %v3782_v42  ;;  %v7792_v52 = vsel %vm3719_vm10, %v7400_v12, %v3783_v24 }
 0x407   :  { %v7763_v2 = vmul.f32 0.2, %v7492_v54  ;;  %v7766_v32 = vmul.f32 0.2, %v7496_v4  ;;  %8570 = vst [vmem:[#allocation36_spill] sm:$0xff] %v7774_v33  ;;  %vm3735_vm8 = vcmp.gt.f32.partialorder %v7464_v9, 0.0  ;;  %v7811_v12 = vsel %vm3720_vm11, %v7404_v56, %v7644_v51 }
 0x408   :  { %8567 = vst [vmem:[#allocation33_spill] sm:$0xff] %v7751_v58  ;;  %v7769_v58 = vmul.f32 0.2, %v7500_v15  ;;  %v7781_v60 = vmul.f32 0.2, %v7504_v63  ;;  %8572 = vst [vmem:[#allocation38_spill] sm:$0xff] %v7792_v52  ;;  %v7830_v56 = vsel %vm3721_vm12, %v7408_v21, %v7653_v62  ;;  %v7849_v21 = vsel %vm3722_vm13, %v7412_v14, %v7656_v38 }
 0x409   :  { %v7784_v18 = vmul.f32 0.2, %v7508_v41  ;;  %vm3739_vm9 = vcmp.gt.f32.partialorder %v7480_v6, 0.0  ;;  %v7799_v42 = vmul.f32 0.2, %v7516_v27  ;;  %8574 = vst [vmem:[#allocation40_spill] sm:$0xff] %v7811_v12  ;;  %v7868_v14 = vsel %vm3723_vm14, %v7416_v0, %v7659_v39 }
 0x40a   :  { %8569 = vst [vmem:[#allocation35_spill] sm:$0xff] %v7769_v58  ;;  %v7787_v58 = vmul.f32 0.2, %v7512_v22  ;;  %v7802_v33 = vmul.f32 0.2, %v7520_v61  ;;  %vm3743_vm10 = vcmp.gt.f32.partialorder %v7496_v4, 0.0  ;;  %v7887_v0 = vsel %vm3724_vm15, %v7420_v36, %v7668_v10 }
 0x40b   :  { %v7818_v24 = vmul.f32 0.2, %v7528_v37  ;;  %v7821_v52 = vmul.f32 0.2, %v7532_v23  ;;  %8578 = vst [vmem:[#allocation44_spill] sm:$0xff] %v7830_v56  ;;  %vm3747_vm11 = vcmp.gt.f32.partialorder %v7512_v22, 0.0  ;;  %v7900_v36 = vsel %vm3725_vm0, %v7424_v48, %v7671_v31 }
 0x40c   :  { %8571 = vst [vmem:[#allocation37_spill] sm:$0xff] %v7787_v58  ;;  %v7805_v58 = vmul.f32 0.2, %v7524_v53  ;;  %v7837_v51 = vmul.f32 0.2, %v7540_v44  ;;  %v8580_v12 = vld [vmem:[#allocation8_spill] sm:$0xff] }
 0x40d   :  { %8575 = vst [vmem:[#allocation41_spill] sm:$0xff] %v7818_v24  ;;  %8576 = vst [vmem:[#allocation42_spill] sm:$0xff] %v7821_v52  ;;  %v7840_v52 = vmul.f32 0.2, %v8580_v12  ;;  %vm3751_vm12 = vcmp.gt.f32.partialorder %v7528_v37, 0.0  ;;  %v8585_v62 = vld [vmem:[#allocation10_spill] sm:$0xff] }
 0x40e   :  { %8573 = vst [vmem:[#allocation39_spill] sm:$0xff] %v7805_v58  ;;  %v7824_v58 = vmul.f32 0.2, %v7536_v29  ;;  %8579 = vst [vmem:[#allocation45_spill] sm:$0xff] %v7837_v51  ;;  %v7856_v56 = vmul.f32 0.2, %v8585_v62 }
 0x40f   :  { %8581 = vst [vmem:[#allocation8_spill] sm:$0xff] %v7840_v52  ;;  %8584 = vst [vmem:[#allocation46_spill] sm:$0xff] %v7849_v21  ;;  %v8586_v52 = vld [vmem:[#allocation11_spill] sm:$0xff]  ;;  %vm3755_vm13 = vcmp.gt.f32.partialorder %v8580_v12, 0.0  ;;  %v8591_v38 = vld [vmem:[#allocation13_spill] sm:$0xff]  ;;  %vm8610_vm7 = vcmp.gt.f32.partialorder %v7440_v45, 0.0 }
 0x410   :  { %8577 = vst [vmem:[#allocation43_spill] sm:$0xff] %v7824_v58  ;;  %v8582_v58 = vld [vmem:[#allocation9_spill] sm:$0xff]  ;;  %v7859_v51 = vmul.f32 0.2, %v8586_v52  ;;  %8590 = vst [vmem:[#allocation49_spill] sm:$0xff] %v7868_v14  ;;  %v8596_v39 = vld [vmem:[#allocation16_spill] sm:$0xff] }
 0x411   :  { %v7843_v24 = vmul.f32 0.2, %v8582_v58  ;;  %v7875_v21 = vmul.f32 0.2, %v8591_v38  ;;  %8595 = vst [vmem:[#allocation53_spill] sm:$0xff] %v7887_v0  ;;  %v8598_v52 = vld [vmem:[#allocation18_spill] sm:$0xff] }
 0x412   :  { %8587 = vst [vmem:[#allocation47_spill] sm:$0xff] %v7859_v51  ;;  %v7878_v51 = vmul.f32 0.2, %v7568_v5  ;;  %v3827_v14 = vmul.f32 0.2, %v8596_v39  ;;  %8599 = vst [vmem:[#allocation54_spill] sm:$0xff] %v7900_v36 }
 0x413   :  { %8583 = vst [vmem:[#allocation9_spill] sm:$0xff] %v7843_v24  ;;  %v8588_v24 = vld [vmem:[#allocation12_spill] sm:$0xff]  ;;  %8592 = vst [vmem:[#allocation50_spill] sm:$0xff] %v7875_v21  ;;  %vm3763_vm15 = vcmp.gt.f32.partialorder %v8596_v39, 0.0  ;;  %v8600_v10 = vld [vmem:[#allocation19_spill] sm:$0xff] }
 0x414   :  { %v7862_v53 = vmul.f32 0.2, %v8588_v24  ;;  %8593 = vst [vmem:[#allocation51_spill] sm:$0xff] %v7878_v51  ;;  %vm3759_vm14 = vcmp.gt.f32.partialorder %v8588_v24, 0.0  ;;  %v8597_v51 = vld [vmem:[#allocation17_spill] sm:$0xff]  ;;  %v8603_v62 = vld [vmem:[#allocation2_spill] sm:$0xff] }
 0x415   :  { %v3828_v21 = vmul.f32 0.2, %v8597_v51  ;;  %v3830_v0 = vmul.f32 0.2, %v8600_v10  ;;  %v8602_v38 = vld [vmem:[#allocation21_spill] sm:$0xff]  ;;  %v7913_v48 = vsel %vm3726_vm1, %v7428_v8, %v8603_v62  ;;  %v8605_v31 = vld [vmem:[#allocation24_spill] sm:$0xff]  ;;  %v7926_v8 = vsel %vm3727_vm2, %v7432_v49, %v7683_v30 }
 0x416   :  { %8589 = vst [vmem:[#allocation48_spill] sm:$0xff] %v7862_v53  ;;  %v7881_v53 = vmul.f32 0.2, %v7572_v59  ;;  %v8601_v59 = vld [vmem:[#allocation20_spill] sm:$0xff]  ;;  %v3832_v24 = vmul.f32 0.2, %v8602_v38  ;;  %v7953_v30 = vsel %vm3731_vm6, %v7448_v17, %v7701_v16 }
 0x417   :  { %v3831_v5 = vmul.f32 0.2, %v8601_v59  ;;  %8604 = vst [vmem:[#allocation20_spill] sm:$0xff] %v7913_v48  ;;  %vm3767_vm0 = vcmp.gt.f32.partialorder %v8601_v59, 0.0  ;;  %vm3769_vm4 = vcmp.gt.f32.partialorder %v8605_v31, 0.0  ;;  %v8606_v36 = vld [vmem:[#allocation25_spill] sm:$0xff] }
 0x418   :  { %8594 = vst [vmem:[#allocation52_spill] sm:$0xff] %v7881_v53  ;;  %v3829_v53 = vmul.f32 0.2, %v8598_v52  ;;  %v3833_v10 = vmul.f32 0.2, %v8605_v31  ;;  %v8607_v51 = vld [vmem:[#allocation26_spill] sm:$0xff]  ;;  %v7935_v31 = vsel %vm3728_vm3, %v7436_v40, %v7686_v20 }
 0x419   :  { %v3834_v52 = vmul.f32 0.2, %v8606_v36  ;;  %v3835_v39 = vmul.f32 0.2, %v8607_v51  ;;  %vm3771_vm1 = vcmp.gt.f32.partialorder %v8607_v51, 0.0  ;;  %v8608_v62 = vld [vmem:[#allocation27_spill] sm:$0xff] }
 0x41a   :  { %vm3772_vm5 = vcmp.gt.f32.partialorder %v8608_v62, 0.0  ;;  %v3836_v48 = vmul.f32 0.2, %v8608_v62  ;;  %v8609_v36 = vld [vmem:[#allocation4_spill] sm:$0xff]  ;;  %vm8611_vm2 = vcmp.gt.f32.partialorder %v7444_v28, 0.0  ;;  %v8612_v40 = vld [vmem:[#allocation6_spill] sm:$0xff] }
 0x41b   :  { %v7941_v38 = vsel %vm8610_vm7, %v7440_v45, %v8609_v36  ;;  %v7947_v49 = vsel %vm8611_vm2, %v7444_v28, %v7698_v19  ;;  %vm8613_vm3 = vcmp.gt.f32.partialorder %v7452_v26, 0.0  ;;  %vm8614_vm7 = vcmp.gt.f32.partialorder %v7456_v47, 0.0  ;;  %v8616_v17 = vld [vmem:[#allocation30_spill] sm:$0xff] }
 0x41c   :  { %v7959_v20 = vsel %vm8613_vm3, %v7452_v26, %v8612_v40  ;;  %v7965_v45 = vsel %vm8614_vm7, %v7456_v47, %v7713_v43  ;;  %vm8615_vm2 = vcmp.gt.f32.partialorder %v7460_v3, 0.0  ;;  %v7977_v19 = vsel %vm3735_vm8, %v7464_v9, %v8616_v17  ;;  %v8632_v43 = vld [vmem:[#allocation7_spill] sm:$0xff]  ;;  %v8650_v40 = vld [vmem:[#allocation12_spill] sm:$0xff] }
 0x41d   :  { %v7971_v28 = vsel %vm8615_vm2, %v7460_v3, %v7716_v11  ;;  %vm8617_vm6 = vcmp.gt.f32.partialorder %v7468_v34, 0.0  ;;  %vm8618_vm3 = vcmp.gt.f32.partialorder %v7472_v25, 0.0  ;;  %vm8619_vm7 = vcmp.gt.f32.partialorder %v7476_v1, 0.0 }
 0x41e   :  { %v7983_v26 = vsel %vm8617_vm6, %v7468_v34, %v7728_v55  ;;  %v7989_v47 = vsel %vm8618_vm3, %v7472_v25, %v7731_v57  ;;  %v7995_v3 = vsel %vm8619_vm7, %v7476_v1, %v7734_v35  ;;  %v8001_v9 = vsel %vm3739_vm9, %v7480_v6, %v7745_v13  ;;  %v8621_v25 = vld [vmem:[#allocation33_spill] sm:$0xff] }
 0x41f   :  { %vm8620_vm8 = vcmp.gt.f32.partialorder %v7484_v7, 0.0  ;;  %vm8622_vm2 = vcmp.gt.f32.partialorder %v7488_v46, 0.0  ;;  %vm8623_vm6 = vcmp.gt.f32.partialorder %v7492_v54, 0.0  ;;  %v8025_v6 = vsel %vm3743_vm10, %v7496_v4, %v7766_v32  ;;  %v8628_v4 = vld [vmem:[#allocation37_spill] sm:$0xff] }
 0x420   :  { %v8007_v34 = vsel %vm8620_vm8, %v7484_v7, %v7748_v50  ;;  %v8013_v16 = vsel %vm8622_vm2, %v7488_v46, %v8621_v25  ;;  %v8019_v1 = vsel %vm8623_vm6, %v7492_v54, %v7763_v2  ;;  %v8624_v7 = vld [vmem:[#allocation35_spill] sm:$0xff]  ;;  %vm8625_vm9 = vcmp.gt.f32.partialorder %v7500_v15, 0.0  ;;  %v8639_v50 = vld [vmem:[#allocation45_spill] sm:$0xff] }
 0x421   :  { %v8031_v35 = vsel %vm8625_vm9, %v7500_v15, %v8624_v7  ;;  %vm8626_vm3 = vcmp.gt.f32.partialorder %v7504_v63, 0.0  ;;  %vm8627_vm7 = vcmp.gt.f32.partialorder %v7508_v41, 0.0  ;;  %v8049_v32 = vsel %vm3747_vm11, %v7512_v22, %v8628_v4  ;;  %v8634_v22 = vld [vmem:[#allocation41_spill] sm:$0xff]  ;;  %v8655_v4 = vld [vmem:[#allocation14_spill] sm:$0xff] }
 0x422   :  { %v8037_v46 = vsel %vm8626_vm3, %v7504_v63, %v7781_v60  ;;  %v8043_v54 = vsel %vm8627_vm7, %v7508_v41, %v7784_v18  ;;  %vm8629_vm10 = vcmp.gt.f32.partialorder %v7516_v27, 0.0  ;;  %vm8630_vm8 = vcmp.gt.f32.partialorder %v7520_v61, 0.0  ;;  %v8631_v41 = vld [vmem:[#allocation39_spill] sm:$0xff]  ;;  %v8652_v25 = vld [vmem:[#allocation13_spill] sm:$0xff] }
 0x423   :  { %v8055_v15 = vsel %vm8629_vm10, %v7516_v27, %v7799_v42  ;;  %v8061_v63 = vsel %vm8630_vm8, %v7520_v61, %v7802_v33  ;;  %vm8633_vm2 = vcmp.gt.f32.partialorder %v8632_v43, 0.0  ;;  %v8073_v55 = vsel %vm3751_vm12, %v7528_v37, %v8634_v22  ;;  %v8635_v27 = vld [vmem:[#allocation42_spill] sm:$0xff]  ;;  %v8637_v61 = vld [vmem:[#allocation43_spill] sm:$0xff]  ;;  %v8641_v37 = vld [vmem:[#allocation8_spill] sm:$0xff] }
 0x424   :  { %v8067_v11 = vsel %vm8633_vm2, %v8632_v43, %v8631_v41  ;;  %vm8636_vm11 = vcmp.gt.f32.partialorder %v7532_v23, 0.0  ;;  %vm8638_vm6 = vcmp.gt.f32.partialorder %v7536_v29, 0.0  ;;  %vm8640_vm9 = vcmp.gt.f32.partialorder %v7540_v44, 0.0  ;;  %v8647_v42 = vld [vmem:[#allocation11_spill] sm:$0xff]  ;;  %v8657_v43 = vld [vmem:[#allocation52_spill] sm:$0xff] }
 0x425   :  { %v8079_v57 = vsel %vm8636_vm11, %v7532_v23, %v8635_v27  ;;  %v8085_v13 = vsel %vm8638_vm6, %v7536_v29, %v8637_v61  ;;  %v8091_v18 = vsel %vm8640_vm9, %v7540_v44, %v8639_v50  ;;  %v8097_v2 = vsel %vm3755_vm13, %v8580_v12, %v8641_v37  ;;  %v8642_v23 = vld [vmem:[#allocation9_spill] sm:$0xff]  ;;  %v8644_v29 = vld [vmem:[#allocation10_spill] sm:$0xff]  ;;  %v8646_v44 = vld [vmem:[#allocation47_spill] sm:$0xff] }
 0x426   :  { %vm8643_vm12 = vcmp.gt.f32.partialorder %v8582_v58, 0.0  ;;  %vm8645_vm3 = vcmp.gt.f32.partialorder %v8644_v29, 0.0  ;;  %vm8648_vm7 = vcmp.gt.f32.partialorder %v8647_v42, 0.0  ;;  %v8649_v12 = vld [vmem:[#allocation48_spill] sm:$0xff]  ;;  %vm8653_vm13 = vcmp.gt.f32.partialorder %v8652_v25, 0.0  ;;  %v8658_v22 = vld [vmem:[#allocation15_spill] sm:$0xff] }
 0x427   :  { %v8103_v33 = vsel %vm8643_vm12, %v8582_v58, %v8642_v23  ;;  %v8109_v60 = vsel %vm8645_vm3, %v8644_v29, %v7856_v56  ;;  %v8115_v36 = vsel %vm8648_vm7, %v8647_v42, %v8646_v44  ;;  %v8121_v17 = vsel %vm3759_vm14, %v8650_v40, %v8649_v12  ;;  %v8651_v58 = vld [vmem:[#allocation50_spill] sm:$0xff]  ;;  %v8654_v56 = vld [vmem:[#allocation51_spill] sm:$0xff]  ;;  %v8660_v61 = vld [vmem:[#allocation16_spill] sm:$0xff] }
 0x428   :  { %v8127_v7 = vsel %vm8653_vm13, %v8652_v25, %v8651_v58  ;;  %vm8656_vm10 = vcmp.gt.f32.partialorder %v8655_v4, 0.0  ;;  %vm8659_vm8 = vcmp.gt.f32.partialorder %v8658_v22, 0.0  ;;  %v8144_v50 = vsel %vm3763_vm15, %v8660_v61, %v3827_v14  ;;  %v8661_v37 = vld [vmem:[#allocation17_spill] sm:$0xff]  ;;  %v8663_v29 = vld [vmem:[#allocation18_spill] sm:$0xff]  ;;  %v8665_v42 = vld [vmem:[#allocation19_spill] sm:$0xff] }
 0x429   :  { %v8133_v41 = vsel %vm8656_vm10, %v8655_v4, %v8654_v56  ;;  %v8139_v27 = vsel %vm8659_vm8, %v8658_v22, %v8657_v43  ;;  %vm8662_vm14 = vcmp.gt.f32.partialorder %v8661_v37, 0.0  ;;  %vm8664_vm2 = vcmp.gt.f32.partialorder %v8663_v29, 0.0  ;;  %v8667_v40 = vld [vmem:[#allocation21_spill] sm:$0xff]  ;;  %v8669_v58 = vld [vmem:[#allocation24_spill] sm:$0xff]  ;;  %v8675_v56 = vld [vmem:[#allocation22_spill] sm:$0xff] }
 0x42a   :  { %v8149_v23 = vsel %vm8662_vm14, %v8661_v37, %v3828_v21  ;;  %v8154_v44 = vsel %vm8664_vm2, %v8663_v29, %v3829_v53  ;;  %vm8666_vm11 = vcmp.gt.f32.partialorder %v8665_v42, 0.0  ;;  %v8164_v14 = vsel %vm3767_vm0, %v8601_v59, %v3831_v5  ;;  %v8670_v25 = vld [vmem:[#allocation25_spill] sm:$0xff]  ;;  %v8677_v43 = vld [vmem:[#allocation3_spill] sm:$0xff] }
 0x42b   :  { %v8159_v12 = vsel %vm8666_vm11, %v8665_v42, %v3830_v0  ;;  %vm8668_vm15 = vcmp.gt.f32.partialorder %v8667_v40, 0.0  ;;  %v8174_v53 = vsel %vm3769_vm4, %v8669_v58, %v3833_v10  ;;  %vm8671_vm6 = vcmp.gt.f32.partialorder %v8670_v25, 0.0  ;;  %v8676_v10 = vld [vmem:[#allocation23_spill] sm:$0xff]  ;;  %v8678_v61 = vld [vmem:[#allocation5_spill] sm:$0xff]  ;;  %v8681_v42 = vld [vmem:[#allocation32_spill] sm:$0xff] }
 0x42c   :  { %v8169_v21 = vsel %vm8668_vm15, %v8667_v40, %v3832_v24  ;;  %v8179_v0 = vsel %vm8671_vm6, %v8670_v25, %v3834_v52  ;;  %v8184_v5 = vsel %vm3771_vm1, %v8607_v51, %v3835_v39  ;;  %v8189_v59 = vsel %vm3772_vm5, %v8608_v62, %v3836_v48  ;;  %v8674_v24 = vld [vmem:[#allocation28_spill] sm:$0xff]  ;;  %v8679_v37 = vld [vmem:[#allocation29_spill] sm:$0xff]  ;;  %v8680_v29 = vld [vmem:[#allocation31_spill] sm:$0xff] }
 0x42d   :  { %8672 = vst [vmem:[#allocation2_spill] sm:$0xff] %v8179_v0  ;;  %8673 = vst [vmem:[#allocation26_spill] sm:$0xff] %v8184_v5  ;;  %v4679_v4 = vpack.c.bf16 %v8675_v56, %v8674_v24  ;;  %v4684_v22 = vpack.c.bf16 %v8677_v43, %v8676_v10  ;;  %v4689_v52 = vpack.c.bf16 %v8679_v37, %v8678_v61  ;;  %v8682_v58 = vld [vmem:[#allocation34_spill] sm:$0xff]  ;;  %v8683_v51 = vld [vmem:[#allocation36_spill] sm:$0xff] }
 0x42e   :  { %v4694_v40 = vpack.c.bf16 %v8681_v42, %v8680_v29  ;;  %v4699_v39 = vpack.c.bf16 %v8683_v51, %v8682_v58  ;;  %v8684_v25 = vld [vmem:[#allocation38_spill] sm:$0xff]  ;;  %v8685_v5 = vld [vmem:[#allocation40_spill] sm:$0xff]  ;;  %v8688_v56 = vld [vmem:[#allocation49_spill] sm:$0xff] }
 0x42f   :  { %v4704_v0 = vpack.c.bf16 %v8685_v5, %v8684_v25  ;;  %4680 = vst [vmem:[%s8356_s5] sm:$0xff] %v4679_v4   ;;  %4836 = vst [vmem:[%s8356_s5 + $0x8] sm:$0xff] %v4684_v22   ;;  %v8686_v48 = vld [vmem:[#allocation44_spill] sm:$0xff]  ;;  %v8687_v62 = vld [vmem:[#allocation46_spill] sm:$0xff]  ;;  %v4724_v5 = vpack.c.bf16 %v7935_v31, %v7926_v8  ;;  %v4729_v4 = vpack.c.bf16 %v7947_v49, %v7941_v38 }
 0x430   :  { %v4709_v24 = vpack.c.bf16 %v8687_v62, %v8686_v48  ;;  %v8689_v10 = vld [vmem:[#allocation53_spill] sm:$0xff]  ;;  %v8690_v61 = vld [vmem:[#allocation54_spill] sm:$0xff]  ;;  %v8691_v37 = vld [vmem:[#allocation20_spill] sm:$0xff]  ;;  %4837 = vst [vmem:[%s8356_s5 + $0x10] sm:$0xff] %v4689_v52   ;;  %v4734_v31 = vpack.c.bf16 %v7959_v20, %v7953_v30  ;;  %v4739_v8 = vpack.c.bf16 %v7971_v28, %v7965_v45  ;;  %v4744_v22 = vpack.c.bf16 %v7983_v26, %v7977_v19 }
 0x431   :  { %v4714_v43 = vpack.c.bf16 %v8689_v10, %v8688_v56  ;;  %v4719_v29 = vpack.c.bf16 %v8691_v37, %v8690_v61  ;;  %4838 = vst [vmem:[%s8356_s5 + $0x18] sm:$0xff] %v4694_v40   ;;  %4839 = vst [vmem:[%s8356_s5 + $0x20] sm:$0xff] %v4699_v39   ;;  %v4749_v38 = vpack.c.bf16 %v7995_v3, %v7989_v47 }
 0x432   :  { %4840 = vst [vmem:[%s8356_s5 + $0x28] sm:$0xff] %v4704_v0   ;;  %4841 = vst [vmem:[%s8356_s5 + $0x30] sm:$0xff] %v4709_v24   ;;  %v4754_v49 = vpack.c.bf16 %v8007_v34, %v8001_v9  ;;  %v4759_v30 = vpack.c.bf16 %v8019_v1, %v8013_v16  ;;  %v4764_v20 = vpack.c.bf16 %v8031_v35, %v8025_v6 }
 0x433   :  { %4842 = vst [vmem:[%s8356_s5 + $0x38] sm:$0xff] %v4714_v43   ;;  %4843 = vst [vmem:[%s8356_s5 + $0x40] sm:$0xff] %v4719_v29   ;;  %v4769_v45 = vpack.c.bf16 %v8043_v54, %v8037_v46  ;;  %v4774_v28 = vpack.c.bf16 %v8055_v15, %v8049_v32  ;;  %v4779_v19 = vpack.c.bf16 %v8067_v11, %v8061_v63 }
 0x434   :  { %4844 = vst [vmem:[%s8356_s5 + $0x48] sm:$0xff] %v4724_v5   ;;  %4845 = vst [vmem:[%s8356_s5 + $0x50] sm:$0xff] %v4729_v4   ;;  %v4784_v26 = vpack.c.bf16 %v8079_v57, %v8073_v55  ;;  %v4789_v47 = vpack.c.bf16 %v8091_v18, %v8085_v13  ;;  %v4794_v3 = vpack.c.bf16 %v8103_v33, %v8097_v2  ;;  %v8692_v46 = vld [vmem:[#allocation2_spill] sm:$0xff] }
 0x435   :  { %4846 = vst [vmem:[%s8356_s5 + $0x58] sm:$0xff] %v4734_v31   ;;  %4847 = vst [vmem:[%s8356_s5 + $0x60] sm:$0xff] %v4739_v8   ;;  %v4799_v9 = vpack.c.bf16 %v8115_v36, %v8109_v60  ;;  %v4804_v34 = vpack.c.bf16 %v8127_v7, %v8121_v17  ;;  %v4809_v16 = vpack.c.bf16 %v8139_v27, %v8133_v41  ;;  %v8693_v32 = vld [vmem:[#allocation26_spill] sm:$0xff] }
 0x436   :  { %4848 = vst [vmem:[%s8356_s5 + $0x68] sm:$0xff] %v4744_v22   ;;  %4849 = vst [vmem:[%s8356_s5 + $0x70] sm:$0xff] %v4749_v38   ;;  %v4814_v1 = vpack.c.bf16 %v8149_v23, %v8144_v50  ;;  %v4819_v6 = vpack.c.bf16 %v8159_v12, %v8154_v44  ;;  %v4824_v35 = vpack.c.bf16 %v8169_v21, %v8164_v14 }
 0x437   :  { %4850 = vst [vmem:[%s8356_s5 + $0x78] sm:$0xff] %v4754_v49   ;;  %4851 = vst [vmem:[%s8356_s5 + $0x80] sm:$0xff] %v4759_v30   ;;  %v4829_v54 = vpack.c.bf16 %v8692_v46, %v8174_v53  ;;  %v4834_v15 = vpack.c.bf16 %v8189_v59, %v8693_v32 }
 0x438   :  { %4852 = vst [vmem:[%s8356_s5 + $0x88] sm:$0xff] %v4764_v20   ;;  %4853 = vst [vmem:[%s8356_s5 + $0x90] sm:$0xff] %v4769_v45  }
 0x439   :  { %4854 = vst [vmem:[%s8356_s5 + $0x98] sm:$0xff] %v4774_v28   ;;  %4855 = vst [vmem:[%s8356_s5 + $0xa0] sm:$0xff] %v4779_v19  }
 0x43a   :  { %4856 = vst [vmem:[%s8356_s5 + $0xa8] sm:$0xff] %v4784_v26   ;;  %4857 = vst [vmem:[%s8356_s5 + $0xb0] sm:$0xff] %v4789_v47  }
 0x43b   :  { %4858 = vst [vmem:[%s8356_s5 + $0xb8] sm:$0xff] %v4794_v3   ;;  %4859 = vst [vmem:[%s8356_s5 + $0xc0] sm:$0xff] %v4799_v9  }
 0x43c   :  { %4860 = vst [vmem:[%s8356_s5 + $0xc8] sm:$0xff] %v4804_v34   ;;  %4861 = vst [vmem:[%s8356_s5 + $0xd0] sm:$0xff] %v4809_v16  }
 0x43d   :  { %4862 = vst [vmem:[%s8356_s5 + $0xd8] sm:$0xff] %v4814_v1   ;;  %4863 = vst [vmem:[%s8356_s5 + $0xe0] sm:$0xff] %v4819_v6  }
 0x43e   :  { %4864 = vst [vmem:[%s8356_s5 + $0xe8] sm:$0xff] %v4824_v35   ;;  %4865 = vst [vmem:[%s8356_s5 + $0xf0] sm:$0xff] %v4829_v54  }
 0x43f   :  { %4866 = vst [vmem:[%s8356_s5 + $0xf8] sm:$0xff] %v4834_v15  }

// kernel: discriminator_forward.5
= control target key start
LH: loop header
LB: loop body
LE: loop exit
PB: predicated region body
PF: predicated region fallthrough
CT: control target
= control target key end

     0   :  { %s6504_s1 = inlined_call_operand.vmem [shape: bf16[2048,256], index: 1, kind: input, shape index: {}]   ;;  %s6505_s0 = inlined_call_operand.vmem [shape: bf16[128,2048], index: 0, kind: input, shape index: {}]   ;;  %s6506_s2 = inlined_call_operand.vmem [shape: f32[1,256], index: 2, kind: input, shape index: {}]   ;;  %s6507_s3 = inlined_call_operand.vmem [shape: f32[1,256], index: 3, kind: input, shape index: {}]   ;;  %s6508_s4 = inlined_call_operand.vmem [shape: f32[1,256], index: 4, kind: input, shape index: {}]   ;;  %s6509_s5 = inlined_call_operand.vmem [shape: f32[64,256], index: 5, kind: input, shape index: {}]   ;;  %s6510_s6 = inlined_call_operand.<no memory space> [shape: f32[1,1], index: 6, kind: input, shape index: {}]   ;;  %s6511_s7 = inlined_call_operand.vmem [shape: f32[2,1,1], index: 7, kind: output, shape index: {}]  }
   0x1   :  { %v4405_v0 = vld [vmem:[%s6504_s1 + $0x4] ss:$8 sps:$4 sm:$0xff]   ;;  %v4409_v2 = vld [vmem:[%s6504_s1] ss:$8 sps:$4 sm:$0xff]   ;;  %v4411_v4 = vld [vmem:[%s6504_s1 + $0x14] ss:$8 sps:$4 sm:$0xff]  }
   0x2   :  { %v4407_v1 = vld [vmem:[%s6504_s1 + $0x404] ss:$8 sps:$4 sm:$0xff]   ;;  %2344 = vmatprep.subr.bf16.mxu1 %v4405_v0  ;;  %v4410_v3 = vld [vmem:[%s6504_s1 + $0x400] ss:$8 sps:$4 sm:$0xff]   ;;  %v4413_v5 = vld [vmem:[%s6504_s1 + $0x414] ss:$8 sps:$4 sm:$0xff]  }
   0x3   :  { %2796 = vmatprep.subr.bf16.mxu0 %v4407_v1  ;;  %2345 = vmatpush1.bf16.msra.mxu1 %v4409_v2  ;;  %v4415_v6 = vld [vmem:[%s6504_s1 + $0x10] ss:$8 sps:$4 sm:$0xff]   ;;  %v4417_v8 = vld [vmem:[%s6504_s1 + $0x24] ss:$8 sps:$4 sm:$0xff]   ;;  %v4421_v10 = vld [vmem:[%s6504_s1 + $0x20] ss:$8 sps:$4 sm:$0xff]  }
   0x4   :  { %2797 = vmatpush1.bf16.msra.mxu0 %v4410_v3  ;;  %2346 = vmatprep.subr.bf16.mxu1 %v4411_v4  ;;  %v4416_v7 = vld [vmem:[%s6504_s1 + $0x410] ss:$8 sps:$4 sm:$0xff]   ;;  %v4419_v9 = vld [vmem:[%s6504_s1 + $0x424] ss:$8 sps:$4 sm:$0xff]   ;;  %v4422_v11 = vld [vmem:[%s6504_s1 + $0x420] ss:$8 sps:$4 sm:$0xff]  }
   0x5   :  { %2798 = vmatprep.subr.bf16.mxu0 %v4413_v5  ;;  %v4423_v12 = vld [vmem:[%s6504_s1 + $0x34] ss:$8 sps:$4 sm:$0xff]   ;;  %v4427_v14 = vld [vmem:[%s6504_s1 + $0x30] ss:$8 sps:$4 sm:$0xff]   ;;  %v4429_v16 = vld [vmem:[%s6504_s1 + $0x44] ss:$8 sps:$4 sm:$0xff]  }
   0x6   :  { %v4425_v13 = vld [vmem:[%s6504_s1 + $0x434] ss:$8 sps:$4 sm:$0xff]   ;;  %v4428_v15 = vld [vmem:[%s6504_s1 + $0x430] ss:$8 sps:$4 sm:$0xff]   ;;  %v4431_v17 = vld [vmem:[%s6504_s1 + $0x444] ss:$8 sps:$4 sm:$0xff]  }
   0x7   :  { %2347 = vmatpush1.bf16.msra.mxu1 %v4415_v6  ;;  %v4433_v18 = vld [vmem:[%s6504_s1 + $0x40] ss:$8 sps:$4 sm:$0xff]   ;;  %v4435_v20 = vld [vmem:[%s6504_s1 + $0x54] ss:$8 sps:$4 sm:$0xff]   ;;  %v4439_v22 = vld [vmem:[%s6504_s1 + $0x50] ss:$8 sps:$4 sm:$0xff]  }
   0x8   :  { %2799 = vmatpush1.bf16.msra.mxu0 %v4416_v7  ;;  %2348 = vmatprep.subr.bf16.mxu1 %v4417_v8  ;;  %v4434_v19 = vld [vmem:[%s6504_s1 + $0x440] ss:$8 sps:$4 sm:$0xff]   ;;  %v4437_v21 = vld [vmem:[%s6504_s1 + $0x454] ss:$8 sps:$4 sm:$0xff]   ;;  %v4440_v23 = vld [vmem:[%s6504_s1 + $0x450] ss:$8 sps:$4 sm:$0xff]  }
   0x9   :  { %2800 = vmatprep.subr.bf16.mxu0 %v4419_v9  ;;  %v4441_v24 = vld [vmem:[%s6504_s1 + $0x64] ss:$8 sps:$4 sm:$0xff]   ;;  %v4445_v26 = vld [vmem:[%s6504_s1 + $0x60] ss:$8 sps:$4 sm:$0xff]   ;;  %v4447_v28 = vld [vmem:[%s6504_s1 + $0x74] ss:$8 sps:$4 sm:$0xff]  }
   0xa   :  { %v4443_v25 = vld [vmem:[%s6504_s1 + $0x464] ss:$8 sps:$4 sm:$0xff]   ;;  %v4446_v27 = vld [vmem:[%s6504_s1 + $0x460] ss:$8 sps:$4 sm:$0xff]   ;;  %v4449_v29 = vld [vmem:[%s6504_s1 + $0x474] ss:$8 sps:$4 sm:$0xff]  }
   0xb   :  { %2349 = vmatpush1.bf16.msra.mxu1 %v4421_v10  ;;  %v4451_v30 = vld [vmem:[%s6504_s1 + $0x70] ss:$8 sps:$4 sm:$0xff]   ;;  %v4453_v32 = vld [vmem:[%s6504_s1 + $0x84] ss:$8 sps:$4 sm:$0xff]   ;;  %v4457_v34 = vld [vmem:[%s6504_s1 + $0x80] ss:$8 sps:$4 sm:$0xff]  }
   0xc   :  { %2801 = vmatpush1.bf16.msra.mxu0 %v4422_v11  ;;  %2350 = vmatprep.subr.bf16.mxu1 %v4423_v12  ;;  %v4452_v31 = vld [vmem:[%s6504_s1 + $0x470] ss:$8 sps:$4 sm:$0xff]   ;;  %v4455_v33 = vld [vmem:[%s6504_s1 + $0x484] ss:$8 sps:$4 sm:$0xff]   ;;  %v4458_v35 = vld [vmem:[%s6504_s1 + $0x480] ss:$8 sps:$4 sm:$0xff]  }
   0xd   :  { %2802 = vmatprep.subr.bf16.mxu0 %v4425_v13  ;;  %v4459_v36 = vld [vmem:[%s6504_s1 + $0x94] ss:$8 sps:$4 sm:$0xff]   ;;  %v4463_v38 = vld [vmem:[%s6504_s1 + $0x90] ss:$8 sps:$4 sm:$0xff]   ;;  %v4465_v40 = vld [vmem:[%s6504_s1 + $0xa4] ss:$8 sps:$4 sm:$0xff]  }
   0xe   :  { %v4461_v37 = vld [vmem:[%s6504_s1 + $0x494] ss:$8 sps:$4 sm:$0xff]   ;;  %v4464_v39 = vld [vmem:[%s6504_s1 + $0x490] ss:$8 sps:$4 sm:$0xff]   ;;  %v4467_v41 = vld [vmem:[%s6504_s1 + $0x4a4] ss:$8 sps:$4 sm:$0xff]  }
   0xf   :  { %2351 = vmatpush1.bf16.msra.mxu1 %v4427_v14  ;;  %v4469_v42 = vld [vmem:[%s6504_s1 + $0xa0] ss:$8 sps:$4 sm:$0xff]   ;;  %v4471_v44 = vld [vmem:[%s6504_s1 + $0xb4] ss:$8 sps:$4 sm:$0xff]   ;;  %v4475_v46 = vld [vmem:[%s6504_s1 + $0xb0] ss:$8 sps:$4 sm:$0xff]  }
  0x10   :  { %2803 = vmatpush1.bf16.msra.mxu0 %v4428_v15  ;;  %2352 = vmatprep.subr.bf16.mxu1 %v4429_v16  ;;  %v4470_v43 = vld [vmem:[%s6504_s1 + $0x4a0] ss:$8 sps:$4 sm:$0xff]   ;;  %v4473_v45 = vld [vmem:[%s6504_s1 + $0x4b4] ss:$8 sps:$4 sm:$0xff]   ;;  %v4476_v47 = vld [vmem:[%s6504_s1 + $0x4b0] ss:$8 sps:$4 sm:$0xff]  }
  0x11   :  { %2804 = vmatprep.subr.bf16.mxu0 %v4431_v17  ;;  %v28_v48 = vld [vmem:[%s6505_s0] sm:$0xff]  ;;  %v4483_v58 = vld [vmem:[%s6504_s1 + $0xd4] ss:$8 sps:$4 sm:$0xff]   ;;  %v4487_v60 = vld [vmem:[%s6504_s1 + $0xd0] ss:$8 sps:$4 sm:$0xff]  }
  0x12   :  { %v36_v49 = vld [vmem:[%s6505_s0 + $0x40] sm:$0xff]  ;;  %v4485_v59 = vld [vmem:[%s6504_s1 + $0x4d4] ss:$8 sps:$4 sm:$0xff]   ;;  %v4488_v61 = vld [vmem:[%s6504_s1 + $0x4d0] ss:$8 sps:$4 sm:$0xff]  }
  0x13   :  { %2353 = vmatpush1.bf16.msra.mxu1 %v4433_v18  ;;  %v32_v50 = vld [vmem:[%s6505_s0 + $0x20] sm:$0xff]  ;;  %v3766_v53 = vcombine.high %v28_v48, %v36_v49  ;;  %v4495_v2 = vld [vmem:[%s6504_s1 + $0xf4] ss:$8 sps:$4 sm:$0xff]   ;;  %v4499_v4 = vld [vmem:[%s6504_s1 + $0xf0] ss:$8 sps:$4 sm:$0xff]   ;;  %v3765_v11 = vcombine.low %v28_v48, %v36_v49 }
  0x14   :  { %2805 = vmatpush1.bf16.msra.mxu0 %v4434_v19  ;;  %2354 = vmatprep.subr.bf16.mxu1 %v4435_v20  ;;  %v40_v51 = vld [vmem:[%s6505_s0 + $0x60] sm:$0xff]  ;;  %v4497_v3 = vld [vmem:[%s6504_s1 + $0x4f4] ss:$8 sps:$4 sm:$0xff]   ;;  %v4500_v5 = vld [vmem:[%s6504_s1 + $0x4f0] ss:$8 sps:$4 sm:$0xff]  }
  0x15   :  { %2806 = vmatprep.subr.bf16.mxu0 %v4437_v21  ;;  %v4477_v52 = vld [vmem:[%s6504_s1 + $0xc4] ss:$8 sps:$4 sm:$0xff]   ;;  %v3774_v55 = vcombine.high %v32_v50, %v40_v51  ;;  %2376 = vmatprep.mubr.bf16.mxu1 %v3766_v53  ;;  %v4481_v56 = vld [vmem:[%s6504_s1 + $0xc0] ss:$8 sps:$4 sm:$0xff]   ;;  %v3773_v12 = vcombine.low %v32_v50, %v40_v51  ;;  %v4509_v16 = vld [vmem:[%s6504_s1 + $0x114] ss:$8 sps:$4 sm:$0xff]  }
  0x16   :  { %v4479_v54 = vld [vmem:[%s6504_s1 + $0x4c4] ss:$8 sps:$4 sm:$0xff]   ;;  %v4482_v57 = vld [vmem:[%s6504_s1 + $0x4c0] ss:$8 sps:$4 sm:$0xff]   ;;  %v4512_v17 = vld [vmem:[%s6504_s1 + $0x514] ss:$8 sps:$4 sm:$0xff]  }
  0x17   :  { %2355 = vmatpush1.bf16.msra.mxu1 %v4439_v22  ;;  %2828 = vmatprep.mubr.bf16.mxu0 %v3774_v55  ;;  %v4489_v62 = vld [vmem:[%s6504_s1 + $0xe4] ss:$8 sps:$4 sm:$0xff]   ;;  %v4493_v0 = vld [vmem:[%s6504_s1 + $0xe0] ss:$8 sps:$4 sm:$0xff]   ;;  %v4507_v20 = vld [vmem:[%s6504_s1 + $0x110] ss:$8 sps:$4 sm:$0xff]  }
  0x18   :  { %2807 = vmatpush1.bf16.msra.mxu0 %v4440_v23  ;;  %2356 = vmatprep.subr.bf16.mxu1 %v4441_v24  ;;  %v4491_v63 = vld [vmem:[%s6504_s1 + $0x4e4] ss:$8 sps:$4 sm:$0xff]   ;;  %v4494_v1 = vld [vmem:[%s6504_s1 + $0x4e0] ss:$8 sps:$4 sm:$0xff]   ;;  %v4510_v21 = vld [vmem:[%s6504_s1 + $0x510] ss:$8 sps:$4 sm:$0xff]  }
  0x19   :  { %2808 = vmatprep.subr.bf16.mxu0 %v4443_v25  ;;  %v4503_v6 = vld [vmem:[%s6504_s1 + $0x104] ss:$8 sps:$4 sm:$0xff]   ;;  %v4501_v8 = vld [vmem:[%s6504_s1 + $0x100] ss:$8 sps:$4 sm:$0xff]   ;;  %v4533_v48 = vld [vmem:[%s6504_s1 + $0x154] ss:$8 sps:$4 sm:$0xff]  }
  0x1a   :  { %v4506_v7 = vld [vmem:[%s6504_s1 + $0x504] ss:$8 sps:$4 sm:$0xff]   ;;  %v4504_v9 = vld [vmem:[%s6504_s1 + $0x500] ss:$8 sps:$4 sm:$0xff]   ;;  %v4536_v49 = vld [vmem:[%s6504_s1 + $0x554] ss:$8 sps:$4 sm:$0xff]  }
  0x1b   :  { %2357 = vmatpush1.bf16.msra.mxu1 %v4445_v26  ;;  %v44_v10 = vld [vmem:[%s6505_s0 + $0x80] sm:$0xff]  ;;  %v4534_v53 = vld [vmem:[%s6504_s1 + $0x550] ss:$8 sps:$4 sm:$0xff]  }
  0x1c   :  { %2809 = vmatpush1.bf16.msra.mxu0 %v4446_v27  ;;  %2358 = vmatprep.subr.bf16.mxu1 %v4447_v28  ;;  %v52_v13 = vld [vmem:[%s6505_s0 + $0xc0] sm:$0xff] }
  0x1d   :  { %2810 = vmatprep.subr.bf16.mxu0 %v4449_v29  ;;  %v48_v14 = vld [vmem:[%s6505_s0 + $0xa0] sm:$0xff]  ;;  %v3782_v18 = vcombine.high %v44_v10, %v52_v13  ;;  %v3781_v28 = vcombine.low %v44_v10, %v52_v13 }
  0x1e   :  { %v56_v15 = vld [vmem:[%s6505_s0 + $0xe0] sm:$0xff] }
  0x1f   :  { %2359 = vmatpush1.bf16.msra.mxu1 %v4451_v30  ;;  %v3790_v19 = vcombine.high %v48_v14, %v56_v15  ;;  %v4515_v22 = vld [vmem:[%s6504_s1 + $0x124] ss:$8 sps:$4 sm:$0xff]   ;;  %v4513_v24 = vld [vmem:[%s6504_s1 + $0x120] ss:$8 sps:$4 sm:$0xff]   ;;  %v3789_v29 = vcombine.low %v48_v14, %v56_v15 }
  0x20   :  { %2811 = vmatpush1.bf16.msra.mxu0 %v4452_v31  ;;  %2360 = vmatprep.subr.bf16.mxu1 %v4453_v32  ;;  %v4518_v23 = vld [vmem:[%s6504_s1 + $0x524] ss:$8 sps:$4 sm:$0xff]   ;;  %v4516_v25 = vld [vmem:[%s6504_s1 + $0x520] ss:$8 sps:$4 sm:$0xff]   ;;  %v4521_v32 = vld [vmem:[%s6504_s1 + $0x134] ss:$8 sps:$4 sm:$0xff]  }
  0x21   :  { %2812 = vmatprep.subr.bf16.mxu0 %v4455_v33  ;;  %v60_v26 = vld [vmem:[%s6505_s0 + $0x100] sm:$0xff]  ;;  %v4524_v33 = vld [vmem:[%s6504_s1 + $0x534] ss:$8 sps:$4 sm:$0xff]  }
  0x22   :  { %v68_v27 = vld [vmem:[%s6505_s0 + $0x140] sm:$0xff] }
  0x23   :  { %2361 = vmatpush1.bf16.msra.mxu1 %v4457_v34  ;;  %v64_v30 = vld [vmem:[%s6505_s0 + $0x120] sm:$0xff]  ;;  %v3798_v34 = vcombine.high %v60_v26, %v68_v27 }
  0x24   :  { %2813 = vmatpush1.bf16.msra.mxu0 %v4458_v35  ;;  %2362 = vmatprep.subr.bf16.mxu1 %v4459_v36  ;;  %v72_v31 = vld [vmem:[%s6505_s0 + $0x160] sm:$0xff]  ;;  %v4519_v36 = vld [vmem:[%s6504_s1 + $0x130] ss:$8 sps:$4 sm:$0xff]  }
  0x25   :  { %2814 = vmatprep.subr.bf16.mxu0 %v4461_v37  ;;  %v3806_v35 = vcombine.high %v64_v30, %v72_v31  ;;  %v4522_v37 = vld [vmem:[%s6504_s1 + $0x530] ss:$8 sps:$4 sm:$0xff]   ;;  %v4542_v55 = vld [vmem:[%s6504_s1 + $0x564] ss:$8 sps:$4 sm:$0xff]   ;;  %v4549_v14 = vld [vmem:[%s6504_s1 + $0x180] ss:$8 sps:$4 sm:$0xff]  }
  0x26   :  { %v120_v13 = vld [vmem:[%s6505_s0 + $0x2e0] sm:$0xff] }
  0x27   :  { %2363 = vmatpush1.bf16.msra.mxu1 %v4463_v38  ;;  %v4527_v38 = vld [vmem:[%s6504_s1 + $0x144] ss:$8 sps:$4 sm:$0xff]   ;;  %v4552_v15 = vld [vmem:[%s6504_s1 + $0x580] ss:$8 sps:$4 sm:$0xff]  }
  0x28   :  { %2815 = vmatpush1.bf16.msra.mxu0 %v4464_v39  ;;  %2364 = vmatprep.subr.bf16.mxu1 %v4465_v40  ;;  %v4530_v39 = vld [vmem:[%s6504_s1 + $0x544] ss:$8 sps:$4 sm:$0xff]   ;;  %v4525_v40 = vld [vmem:[%s6504_s1 + $0x140] ss:$8 sps:$4 sm:$0xff]  }
  0x29   :  { %2816 = vmatprep.subr.bf16.mxu0 %v4467_v41  ;;  %v4528_v41 = vld [vmem:[%s6504_s1 + $0x540] ss:$8 sps:$4 sm:$0xff]  }
  0x2b   :  { %2365 = vmatpush1.bf16.msra.mxu1 %v4469_v42  ;;  %v76_v42 = vld [vmem:[%s6505_s0 + $0x180] sm:$0xff] }
  0x2c   :  { %2817 = vmatpush1.bf16.msra.mxu0 %v4470_v43  ;;  %2366 = vmatprep.subr.bf16.mxu1 %v4471_v44  ;;  %v84_v43 = vld [vmem:[%s6505_s0 + $0x1c0] sm:$0xff]  ;;  %v3797_v44 = vcombine.low %v60_v26, %v68_v27 }
  0x2d   :  { %2818 = vmatprep.subr.bf16.mxu0 %v4473_v45  ;;  %v3805_v45 = vcombine.low %v64_v30, %v72_v31  ;;  %v3814_v50 = vcombine.high %v76_v42, %v84_v43  ;;  %v124_v26 = vld [vmem:[%s6505_s0 + $0x300] sm:$0xff] }
  0x2e   :  { %v128_v30 = vld [vmem:[%s6505_s0 + $0x320] sm:$0xff] }
  0x2f   :  { %2367 = vmatpush1.bf16.msra.mxu1 %v4475_v46  ;;  %v80_v46 = vld [vmem:[%s6505_s0 + $0x1a0] sm:$0xff] }
  0x30   :  { %2819 = vmatpush1.bf16.msra.mxu0 %v4476_v47  ;;  %2368 = vmatprep.subr.bf16.mxu1 %v4477_v52  ;;  %v88_v47 = vld [vmem:[%s6505_s0 + $0x1e0] sm:$0xff]  ;;  %v4531_v52 = vld [vmem:[%s6504_s1 + $0x150] ss:$8 sps:$4 sm:$0xff]  }
  0x31   :  { %2820 = vmatprep.subr.bf16.mxu0 %v4479_v54  ;;  %v3822_v51 = vcombine.high %v80_v46, %v88_v47  ;;  %v4539_v54 = vld [vmem:[%s6504_s1 + $0x164] ss:$8 sps:$4 sm:$0xff]  }
  0x32   :  { %v136_v31 = vld [vmem:[%s6505_s0 + $0x360] sm:$0xff] }
  0x33   :  { %2369 = vmatpush1.bf16.msra.mxu1 %v4481_v56  ;;  %v4537_v56 = vld [vmem:[%s6504_s1 + $0x160] ss:$8 sps:$4 sm:$0xff]  }
  0x34   :  { %2821 = vmatpush1.bf16.msra.mxu0 %v4482_v57  ;;  %2370 = vmatprep.subr.bf16.mxu1 %v4483_v58  ;;  %v92_v57 = vld [vmem:[%s6505_s0 + $0x200] sm:$0xff] }
  0x35   :  { %2822 = vmatprep.subr.bf16.mxu0 %v4485_v59  ;;  %v100_v58 = vld [vmem:[%s6505_s0 + $0x240] sm:$0xff]  ;;  %v3813_v59 = vcombine.low %v76_v42, %v84_v43 }
  0x36   :  { %v3829_v10 = vcombine.low %v92_v57, %v100_v58  ;;  %v140_v42 = vld [vmem:[%s6505_s0 + $0x380] sm:$0xff] }
  0x37   :  { %2371 = vmatpush1.bf16.msra.mxu1 %v4487_v60  ;;  %v3821_v60 = vcombine.low %v80_v46, %v88_v47  ;;  %v148_v43 = vld [vmem:[%s6505_s0 + $0x3c0] sm:$0xff] }
  0x38   :  { %2823 = vmatpush1.bf16.msra.mxu0 %v4488_v61  ;;  %2372 = vmatprep.subr.bf16.mxu1 %v4489_v62  ;;  %v96_v61 = vld [vmem:[%s6505_s0 + $0x220] sm:$0xff] }
  0x39   :  { %2824 = vmatprep.subr.bf16.mxu0 %v4491_v63  ;;  %v104_v62 = vld [vmem:[%s6505_s0 + $0x260] sm:$0xff] }
  0x3a   :  { %v4540_v63 = vld [vmem:[%s6504_s1 + $0x560] ss:$8 sps:$4 sm:$0xff]  }
  0x3b   :  { %2373 = vmatpush1.bf16.msra.mxu1 %v4493_v0  ;;  %v4545_v0 = vld [vmem:[%s6504_s1 + $0x174] ss:$8 sps:$4 sm:$0xff]   ;;  %v144_v46 = vld [vmem:[%s6505_s0 + $0x3a0] sm:$0xff] }
  0x3c   :  { %2825 = vmatpush1.bf16.msra.mxu0 %v4494_v1  ;;  %2374 = vmatprep.subr.bf16.mxu1 %v4495_v2  ;;  %v4548_v1 = vld [vmem:[%s6504_s1 + $0x574] ss:$8 sps:$4 sm:$0xff]   ;;  %v3830_v2 = vcombine.high %v92_v57, %v100_v58  ;;  %v152_v47 = vld [vmem:[%s6505_s0 + $0x3e0] sm:$0xff]  ;;  %v29_v58 = vld [vmem:[%s6505_s0 + $0x8] sm:$0xff] }
  0x3d   :  { %2826 = vmatprep.subr.bf16.mxu0 %v4497_v3  ;;  %v3838_v3 = vcombine.high %v96_v61, %v104_v62  ;;  %v4588_v57 = vld [vmem:[%s6504_s1 + $0x5e0] ss:$8 sps:$4 sm:$0xff]  }
  0x3f   :  { %2375 = vmatpush1.bf16.msra.mxu1 %v4499_v4  ;;  %v4543_v4 = vld [vmem:[%s6504_s1 + $0x170] ss:$8 sps:$4 sm:$0xff]  }
  0x40   :  { %2827 = vmatpush1.bf16.msra.mxu0 %v4500_v5  ;;  %2457 = vmatprep.subr.bf16.mxu1 %v4503_v6  ;;  %v4546_v5 = vld [vmem:[%s6504_s1 + $0x570] ss:$8 sps:$4 sm:$0xff]   ;;  %v4551_v6 = vld [vmem:[%s6504_s1 + $0x184] ss:$8 sps:$4 sm:$0xff]  }
  0x41   :  { %2909 = vmatprep.subr.bf16.mxu0 %v4506_v7  ;;  %v4554_v7 = vld [vmem:[%s6504_s1 + $0x584] ss:$8 sps:$4 sm:$0xff]  }
  0x42   :  { %2377 = vmatmul.mubr.bf16.vlgmr.msra.gmra.mrb[0].mxu1 %v3765_v11  ;;  %v3837_v11 = vcombine.low %v96_v61, %v104_v62  ;;  %v3885_v61 = vcombine.low %v144_v46, %v152_v47  ;;  %v33_v62 = vld [vmem:[%s6505_s0 + $0x28] sm:$0xff] }
  0x43   :  { %2829 = vmatmul.mubr.bf16.vlgmr.msra.gmra.mrb[0].mxu0 %v3773_v12  ;;  %2458 = vmatpush1.bf16.msra.mxu1 %v4501_v8  ;;  %v108_v8 = vld [vmem:[%s6505_s0 + $0x280] sm:$0xff] }
  0x44   :  { %2910 = vmatpush1.bf16.msra.mxu0 %v4504_v9  ;;  %2459 = vmatprep.subr.bf16.mxu1 %v4509_v16  ;;  %v116_v9 = vld [vmem:[%s6505_s0 + $0x2c0] sm:$0xff]  ;;  %v4557_v16 = vld [vmem:[%s6504_s1 + $0x194] ss:$8 sps:$4 sm:$0xff]  }
  0x45   :  { %2911 = vmatprep.subr.bf16.mxu0 %v4512_v17  ;;  %2386 = vmatprep.mubr.bf16.mxu1 %v3782_v18  ;;  %v112_v12 = vld [vmem:[%s6505_s0 + $0x2a0] sm:$0xff]  ;;  %v4560_v17 = vld [vmem:[%s6504_s1 + $0x594] ss:$8 sps:$4 sm:$0xff]   ;;  %v3846_v18 = vcombine.high %v108_v8, %v116_v9  ;;  %v3845_v27 = vcombine.low %v108_v8, %v116_v9  ;;  %v45_v9 = vld [vmem:[%s6505_s0 + $0x88] sm:$0xff] }
  0x46   :  { %2838 = vmatprep.mubr.bf16.mxu0 %v3790_v19  ;;  %v3854_v19 = vcombine.high %v112_v12, %v120_v13  ;;  %v4597_v8 = vld [vmem:[%s6504_s1 + $0x200] ss:$8 sps:$4 sm:$0xff]  }
  0x47   :  { %2460 = vmatpush1.bf16.msra.mxu1 %v4507_v20  ;;  %v4555_v20 = vld [vmem:[%s6504_s1 + $0x190] ss:$8 sps:$4 sm:$0xff]  }
  0x48   :  { %2912 = vmatpush1.bf16.msra.mxu0 %v4510_v21  ;;  %2461 = vmatprep.subr.bf16.mxu1 %v4515_v22  ;;  %v4558_v21 = vld [vmem:[%s6504_s1 + $0x590] ss:$8 sps:$4 sm:$0xff]   ;;  %v4563_v22 = vld [vmem:[%s6504_s1 + $0x1a4] ss:$8 sps:$4 sm:$0xff]  }
  0x49   :  { %2913 = vmatprep.subr.bf16.mxu0 %v4518_v23  ;;  %v4566_v23 = vld [vmem:[%s6504_s1 + $0x5a4] ss:$8 sps:$4 sm:$0xff]  }
  0x4a   :  { %2387 = vmatmul.mubr.bf16.gmra.mrb[4].mxu1 %v3781_v28  ;;  %v3853_v28 = vcombine.low %v112_v12, %v120_v13  ;;  %v49_v13 = vld [vmem:[%s6505_s0 + $0xa8] sm:$0xff] }
  0x4b   :  { %2839 = vmatmul.mubr.bf16.gmra.mrb[4].mxu0 %v3789_v29  ;;  %2462 = vmatpush1.bf16.msra.mxu1 %v4513_v24  ;;  %v4561_v24 = vld [vmem:[%s6504_s1 + $0x1a0] ss:$8 sps:$4 sm:$0xff]  }
  0x4c   :  { %2914 = vmatpush1.bf16.msra.mxu0 %v4516_v25  ;;  %2463 = vmatprep.subr.bf16.mxu1 %v4521_v32  ;;  %v4564_v25 = vld [vmem:[%s6504_s1 + $0x5a0] ss:$8 sps:$4 sm:$0xff]   ;;  %v4569_v32 = vld [vmem:[%s6504_s1 + $0x1b4] ss:$8 sps:$4 sm:$0xff]  }
  0x4d   :  { %2915 = vmatprep.subr.bf16.mxu0 %v4524_v33  ;;  %2396 = vmatprep.mubr.bf16.mxu1 %v3798_v34  ;;  %v132_v29 = vld [vmem:[%s6505_s0 + $0x340] sm:$0xff]  ;;  %v4572_v33 = vld [vmem:[%s6504_s1 + $0x5b4] ss:$8 sps:$4 sm:$0xff]  }
  0x4e   :  { %2848 = vmatprep.mubr.bf16.mxu0 %v3806_v35  ;;  %v3862_v34 = vcombine.high %v124_v26, %v132_v29  ;;  %v3870_v35 = vcombine.high %v128_v30, %v136_v31 }
  0x4f   :  { %2464 = vmatpush1.bf16.msra.mxu1 %v4519_v36  ;;  %v4567_v36 = vld [vmem:[%s6504_s1 + $0x1b0] ss:$8 sps:$4 sm:$0xff]  }
  0x50   :  { %2916 = vmatpush1.bf16.msra.mxu0 %v4522_v37  ;;  %2465 = vmatprep.subr.bf16.mxu1 %v4527_v38  ;;  %v4570_v37 = vld [vmem:[%s6504_s1 + $0x5b0] ss:$8 sps:$4 sm:$0xff]   ;;  %v4575_v38 = vld [vmem:[%s6504_s1 + $0x1c4] ss:$8 sps:$4 sm:$0xff]  }
  0x51   :  { %2917 = vmatprep.subr.bf16.mxu0 %v4530_v39  ;;  %v4578_v39 = vld [vmem:[%s6504_s1 + $0x5c4] ss:$8 sps:$4 sm:$0xff]  }
  0x52   :  { %2397 = vmatmul.mubr.bf16.gmra.mrb[8].mxu1 %v3797_v44  ;;  %v3861_v44 = vcombine.low %v124_v26, %v132_v29  ;;  %v73_v29 = vld [vmem:[%s6505_s0 + $0x168] sm:$0xff] }
  0x53   :  { %2849 = vmatmul.mubr.bf16.gmra.mrb[8].mxu0 %v3805_v45  ;;  %2466 = vmatpush1.bf16.msra.mxu1 %v4525_v40  ;;  %v4573_v40 = vld [vmem:[%s6504_s1 + $0x1c0] ss:$8 sps:$4 sm:$0xff]   ;;  %v3869_v45 = vcombine.low %v128_v30, %v136_v31 }
  0x54   :  { %2918 = vmatpush1.bf16.msra.mxu0 %v4528_v41  ;;  %2467 = vmatprep.subr.bf16.mxu1 %v4533_v48  ;;  %v4576_v41 = vld [vmem:[%s6504_s1 + $0x5c0] ss:$8 sps:$4 sm:$0xff]   ;;  %v4581_v48 = vld [vmem:[%s6504_s1 + $0x1d4] ss:$8 sps:$4 sm:$0xff]  }
  0x55   :  { %2919 = vmatprep.subr.bf16.mxu0 %v4536_v49  ;;  %2406 = vmatprep.mubr.bf16.mxu1 %v3814_v50  ;;  %v4584_v49 = vld [vmem:[%s6504_s1 + $0x5d4] ss:$8 sps:$4 sm:$0xff]   ;;  %v3878_v50 = vcombine.high %v140_v42, %v148_v43  ;;  %v4609_v30 = vld [vmem:[%s6504_s1 + $0x220] ss:$8 sps:$4 sm:$0xff]  }
  0x56   :  { %2858 = vmatprep.mubr.bf16.mxu0 %v3822_v51  ;;  %v3886_v51 = vcombine.high %v144_v46, %v152_v47  ;;  %v4612_v31 = vld [vmem:[%s6504_s1 + $0x620] ss:$8 sps:$4 sm:$0xff]  }
  0x57   :  { %2468 = vmatpush1.bf16.msra.mxu1 %v4531_v52  ;;  %v4579_v52 = vld [vmem:[%s6504_s1 + $0x1d0] ss:$8 sps:$4 sm:$0xff]   ;;  %v81_v46 = vld [vmem:[%s6505_s0 + $0x1a8] sm:$0xff] }
  0x58   :  { %2920 = vmatpush1.bf16.msra.mxu0 %v4534_v53  ;;  %2469 = vmatprep.subr.bf16.mxu1 %v4539_v54  ;;  %v4582_v53 = vld [vmem:[%s6504_s1 + $0x5d0] ss:$8 sps:$4 sm:$0xff]   ;;  %v4587_v54 = vld [vmem:[%s6504_s1 + $0x1e4] ss:$8 sps:$4 sm:$0xff]  }
  0x59   :  { %2921 = vmatprep.subr.bf16.mxu0 %v4542_v55  ;;  %v4590_v55 = vld [vmem:[%s6504_s1 + $0x5e4] ss:$8 sps:$4 sm:$0xff]  }
  0x5a   :  { %2407 = vmatmul.mubr.bf16.gmra.mrb[12].mxu1 %v3813_v59  ;;  %v37_v59 = vld [vmem:[%s6505_s0 + $0x48] sm:$0xff] }
  0x5b   :  { %2859 = vmatmul.mubr.bf16.gmra.mrb[12].mxu0 %v3821_v60  ;;  %2470 = vmatpush1.bf16.msra.mxu1 %v4537_v56  ;;  %v4585_v56 = vld [vmem:[%s6504_s1 + $0x1e0] ss:$8 sps:$4 sm:$0xff]   ;;  %v3877_v60 = vcombine.low %v140_v42, %v148_v43 }
  0x5c   :  { %2922 = vmatpush1.bf16.msra.mxu0 %v4540_v63  ;;  %2471 = vmatprep.subr.bf16.mxu1 %v4545_v0  ;;  %v41_v63 = vld [vmem:[%s6505_s0 + $0x68] sm:$0xff]  ;;  %v4593_v0 = vld [vmem:[%s6504_s1 + $0x1f4] ss:$8 sps:$4 sm:$0xff]  }
  0x5d   :  { %2923 = vmatprep.subr.bf16.mxu0 %v4548_v1  ;;  %2416 = vmatprep.mubr.bf16.mxu1 %v3830_v2  ;;  %v4596_v1 = vld [vmem:[%s6504_s1 + $0x5f4] ss:$8 sps:$4 sm:$0xff]   ;;  %v3768_v2 = vcombine.high %v29_v58, %v37_v59  ;;  %v3775_v12 = vcombine.low %v33_v62, %v41_v63  ;;  %v77_v42 = vld [vmem:[%s6505_s0 + $0x188] sm:$0xff] }
  0x5e   :  { %2868 = vmatprep.mubr.bf16.mxu0 %v3838_v3  ;;  %v3776_v3 = vcombine.high %v33_v62, %v41_v63  ;;  %v89_v47 = vld [vmem:[%s6505_s0 + $0x1e8] sm:$0xff] }
  0x5f   :  { %2472 = vmatpush1.bf16.msra.mxu1 %v4543_v4  ;;  %v4591_v4 = vld [vmem:[%s6504_s1 + $0x1f0] ss:$8 sps:$4 sm:$0xff]   ;;  %v97_v62 = vld [vmem:[%s6505_s0 + $0x228] sm:$0xff] }
  0x60   :  { %2924 = vmatpush1.bf16.msra.mxu0 %v4546_v5  ;;  %2473 = vmatprep.subr.bf16.mxu1 %v4551_v6  ;;  %v4594_v5 = vld [vmem:[%s6504_s1 + $0x5f0] ss:$8 sps:$4 sm:$0xff]   ;;  %v4599_v6 = vld [vmem:[%s6504_s1 + $0x204] ss:$8 sps:$4 sm:$0xff]  }
  0x61   :  { %2925 = vmatprep.subr.bf16.mxu0 %v4554_v7  ;;  %v4602_v7 = vld [vmem:[%s6504_s1 + $0x604] ss:$8 sps:$4 sm:$0xff]  }
  0x62   :  { %2417 = vmatmul.mubr.bf16.gmra.mrb[16].mxu1 %v3829_v10  ;;  %v53_v10 = vld [vmem:[%s6505_s0 + $0xc8] sm:$0xff] }
  0x63   :  { %2869 = vmatmul.mubr.bf16.gmra.mrb[16].mxu0 %v3837_v11  ;;  %2474 = vmatpush1.bf16.msra.mxu1 %v4549_v14  ;;  %v3767_v11 = vcombine.low %v29_v58, %v37_v59  ;;  %v57_v14 = vld [vmem:[%s6505_s0 + $0xe8] sm:$0xff]  ;;  %v3783_v26 = vcombine.low %v45_v9, %v53_v10 }
  0x64   :  { %2926 = vmatpush1.bf16.msra.mxu0 %v4552_v15  ;;  %2475 = vmatprep.subr.bf16.mxu1 %v4557_v16  ;;  %v4600_v15 = vld [vmem:[%s6504_s1 + $0x600] ss:$8 sps:$4 sm:$0xff]   ;;  %v4605_v16 = vld [vmem:[%s6504_s1 + $0x214] ss:$8 sps:$4 sm:$0xff]  }
  0x65   :  { %2927 = vmatprep.subr.bf16.mxu0 %v4560_v17  ;;  %2426 = vmatprep.mubr.bf16.mxu1 %v3846_v18  ;;  %v4608_v17 = vld [vmem:[%s6504_s1 + $0x614] ss:$8 sps:$4 sm:$0xff]   ;;  %v3784_v18 = vcombine.high %v45_v9, %v53_v10  ;;  %v93_v58 = vld [vmem:[%s6505_s0 + $0x208] sm:$0xff] }
  0x66   :  { %2878 = vmatprep.mubr.bf16.mxu0 %v3854_v19  ;;  %v3792_v19 = vcombine.high %v49_v13, %v57_v14  ;;  %v101_v59 = vld [vmem:[%s6505_s0 + $0x248] sm:$0xff] }
  0x67   :  { %2476 = vmatpush1.bf16.msra.mxu1 %v4555_v20  ;;  %v4603_v20 = vld [vmem:[%s6504_s1 + $0x210] ss:$8 sps:$4 sm:$0xff]   ;;  %v105_v63 = vld [vmem:[%s6505_s0 + $0x268] sm:$0xff] }
  0x68   :  { %2928 = vmatpush1.bf16.msra.mxu0 %v4558_v21  ;;  %2477 = vmatprep.subr.bf16.mxu1 %v4563_v22  ;;  %v4606_v21 = vld [vmem:[%s6504_s1 + $0x610] ss:$8 sps:$4 sm:$0xff]   ;;  %v4611_v22 = vld [vmem:[%s6504_s1 + $0x224] ss:$8 sps:$4 sm:$0xff]   ;;  %v4648_v9 = vld [vmem:[%s6504_s1 + $0x680] ss:$8 sps:$4 sm:$0xff]  }
  0x69   :  { %2929 = vmatprep.subr.bf16.mxu0 %v4566_v23  ;;  %v4614_v23 = vld [vmem:[%s6504_s1 + $0x624] ss:$8 sps:$4 sm:$0xff]  }
  0x6a   :  { %2427 = vmatmul.mubr.bf16.gmra.mrb[20].mxu1 %v3845_v27  ;;  %v3791_v27 = vcombine.low %v49_v13, %v57_v14  ;;  %v109_v10 = vld [vmem:[%s6505_s0 + $0x288] sm:$0xff]  ;;  %v3839_v13 = vcombine.low %v97_v62, %v105_v63 }
  0x6b   :  { %2879 = vmatmul.mubr.bf16.gmra.mrb[20].mxu0 %v3853_v28  ;;  %2478 = vmatpush1.bf16.msra.mxu1 %v4561_v24  ;;  %v61_v24 = vld [vmem:[%s6505_s0 + $0x108] sm:$0xff] }
  0x6c   :  { %2930 = vmatpush1.bf16.msra.mxu0 %v4564_v25  ;;  %2479 = vmatprep.subr.bf16.mxu1 %v4569_v32  ;;  %v69_v25 = vld [vmem:[%s6505_s0 + $0x148] sm:$0xff]  ;;  %v4617_v32 = vld [vmem:[%s6504_s1 + $0x234] ss:$8 sps:$4 sm:$0xff]  }
  0x6d   :  { %2931 = vmatprep.subr.bf16.mxu0 %v4572_v33  ;;  %2436 = vmatprep.mubr.bf16.mxu1 %v3862_v34  ;;  %v65_v28 = vld [vmem:[%s6505_s0 + $0x128] sm:$0xff]  ;;  %v4620_v33 = vld [vmem:[%s6504_s1 + $0x634] ss:$8 sps:$4 sm:$0xff]   ;;  %v3800_v34 = vcombine.high %v61_v24, %v69_v25  ;;  %v3799_v43 = vcombine.low %v61_v24, %v69_v25 }
  0x6e   :  { %2888 = vmatprep.mubr.bf16.mxu0 %v3870_v35  ;;  %v3808_v35 = vcombine.high %v65_v28, %v73_v29  ;;  %v113_v14 = vld [vmem:[%s6505_s0 + $0x2a8] sm:$0xff] }
  0x6f   :  { %2480 = vmatpush1.bf16.msra.mxu1 %v4567_v36  ;;  %v4615_v36 = vld [vmem:[%s6504_s1 + $0x230] ss:$8 sps:$4 sm:$0xff]   ;;  %v4657_v24 = vld [vmem:[%s6504_s1 + $0x2a0] ss:$8 sps:$4 sm:$0xff]  }
  0x70   :  { %2932 = vmatpush1.bf16.msra.mxu0 %v4570_v37  ;;  %2481 = vmatprep.subr.bf16.mxu1 %v4575_v38  ;;  %v4618_v37 = vld [vmem:[%s6504_s1 + $0x630] ss:$8 sps:$4 sm:$0xff]   ;;  %v4623_v38 = vld [vmem:[%s6504_s1 + $0x244] ss:$8 sps:$4 sm:$0xff]  }
  0x71   :  { %2933 = vmatprep.subr.bf16.mxu0 %v4578_v39  ;;  %v4626_v39 = vld [vmem:[%s6504_s1 + $0x644] ss:$8 sps:$4 sm:$0xff]  }
  0x72   :  { %2437 = vmatmul.mubr.bf16.gmra.mrb[24].mxu1 %v3861_v44  ;;  %v3807_v44 = vcombine.low %v65_v28, %v73_v29  ;;  %v125_v25 = vld [vmem:[%s6505_s0 + $0x308] sm:$0xff] }
  0x73   :  { %2889 = vmatmul.mubr.bf16.gmra.mrb[24].mxu0 %v3869_v45  ;;  %2482 = vmatpush1.bf16.msra.mxu1 %v4573_v40  ;;  %v4621_v40 = vld [vmem:[%s6504_s1 + $0x240] ss:$8 sps:$4 sm:$0xff]  }
  0x74   :  { %2934 = vmatpush1.bf16.msra.mxu0 %v4576_v41  ;;  %2483 = vmatprep.subr.bf16.mxu1 %v4581_v48  ;;  %v4624_v41 = vld [vmem:[%s6504_s1 + $0x640] ss:$8 sps:$4 sm:$0xff]   ;;  %v4629_v48 = vld [vmem:[%s6504_s1 + $0x254] ss:$8 sps:$4 sm:$0xff]  }
  0x75   :  { %2935 = vmatprep.subr.bf16.mxu0 %v4584_v49  ;;  %2446 = vmatprep.mubr.bf16.mxu1 %v3878_v50  ;;  %v85_v45 = vld [vmem:[%s6505_s0 + $0x1c8] sm:$0xff]  ;;  %v4632_v49 = vld [vmem:[%s6504_s1 + $0x654] ss:$8 sps:$4 sm:$0xff]  }
  0x76   :  { %2898 = vmatprep.mubr.bf16.mxu0 %v3886_v51  ;;  %v3816_v50 = vcombine.high %v77_v42, %v85_v45  ;;  %v3824_v51 = vcombine.high %v81_v46, %v89_v47  ;;  %v129_v29 = vld [vmem:[%s6505_s0 + $0x328] sm:$0xff] }
  0x77   :  { %2484 = vmatpush1.bf16.msra.mxu1 %v4579_v52  ;;  %v4627_v52 = vld [vmem:[%s6504_s1 + $0x250] ss:$8 sps:$4 sm:$0xff]  }
  0x78   :  { %2936 = vmatpush1.bf16.msra.mxu0 %v4582_v53  ;;  %2485 = vmatprep.subr.bf16.mxu1 %v4587_v54  ;;  %v4630_v53 = vld [vmem:[%s6504_s1 + $0x650] ss:$8 sps:$4 sm:$0xff]   ;;  %v4635_v54 = vld [vmem:[%s6504_s1 + $0x264] ss:$8 sps:$4 sm:$0xff]  }
  0x79   :  { %2937 = vmatprep.subr.bf16.mxu0 %v4590_v55  ;;  %v4638_v55 = vld [vmem:[%s6504_s1 + $0x664] ss:$8 sps:$4 sm:$0xff]  }
  0x7a   :  { %2447 = vmatmul.mubr.bf16.gmra.mrb[28].mxu1 %v3877_v60  ;;  %v3815_v60 = vcombine.low %v77_v42, %v85_v45  ;;  %v153_v45 = vld [vmem:[%s6505_s0 + $0x3e8] sm:$0xff] }
  0x7b   :  { %2899 = vmatmul.mubr.bf16.gmra.mrb[28].mxu0 %v3885_v61  ;;  %2486 = vmatpush1.bf16.msra.mxu1 %v4585_v56  ;;  %v4633_v56 = vld [vmem:[%s6504_s1 + $0x260] ss:$8 sps:$4 sm:$0xff]   ;;  %v3823_v61 = vcombine.low %v81_v46, %v89_v47 }
  0x7c   :  { %2938 = vmatpush1.bf16.msra.mxu0 %v4588_v57  ;;  %2487 = vmatprep.subr.bf16.mxu1 %v4593_v0  ;;  %v4636_v57 = vld [vmem:[%s6504_s1 + $0x660] ss:$8 sps:$4 sm:$0xff]   ;;  %v4641_v0 = vld [vmem:[%s6504_s1 + $0x274] ss:$8 sps:$4 sm:$0xff]  }
  0x7d   :  { %2939 = vmatprep.subr.bf16.mxu0 %v4596_v1  ;;  %2489 = vmatprep.mubr.bf16.mxu1 %v3768_v2  ;;  %v4644_v1 = vld [vmem:[%s6504_s1 + $0x674] ss:$8 sps:$4 sm:$0xff]   ;;  %v3832_v2 = vcombine.high %v93_v58, %v101_v59  ;;  %v4669_v46 = vld [vmem:[%s6504_s1 + $0x2c0] ss:$8 sps:$4 sm:$0xff]  }
  0x7e   :  { %2941 = vmatprep.mubr.bf16.mxu0 %v3776_v3  ;;  %v3840_v3 = vcombine.high %v97_v62, %v105_v63  ;;  %v4672_v47 = vld [vmem:[%s6504_s1 + $0x6c0] ss:$8 sps:$4 sm:$0xff]   ;;  %v34_v62 = vld [vmem:[%s6505_s0 + $0x30] sm:$0xff] }
  0x7f   :  { %2488 = vmatpush1.bf16.msra.mxu1 %v4591_v4  ;;  %v4639_v4 = vld [vmem:[%s6504_s1 + $0x270] ss:$8 sps:$4 sm:$0xff]  }
  0x80   :  { %2940 = vmatpush1.bf16.msra.mxu0 %v4594_v5  ;;  %2570 = vmatprep.subr.bf16.mxu1 %v4599_v6  ;;  %v4642_v5 = vld [vmem:[%s6504_s1 + $0x670] ss:$8 sps:$4 sm:$0xff]   ;;  %v4647_v6 = vld [vmem:[%s6504_s1 + $0x284] ss:$8 sps:$4 sm:$0xff]  }
  0x81   :  { %3022 = vmatprep.subr.bf16.mxu0 %v4602_v7  ;;  %v4650_v7 = vld [vmem:[%s6504_s1 + $0x684] ss:$8 sps:$4 sm:$0xff]   ;;  %v42_v63 = vld [vmem:[%s6505_s0 + $0x70] sm:$0xff] }
  0x82   :  { %2490 = vmatmul.mubr.bf16.vlgmr.msra.gmra.mrb[0].mxu1 %v3767_v11  ;;  %v117_v11 = vld [vmem:[%s6505_s0 + $0x2c8] sm:$0xff] }
  0x83   :  { %2942 = vmatmul.mubr.bf16.vlgmr.msra.gmra.mrb[0].mxu0 %v3775_v12  ;;  %2571 = vmatpush1.bf16.msra.mxu1 %v4597_v8  ;;  %v4645_v8 = vld [vmem:[%s6504_s1 + $0x280] ss:$8 sps:$4 sm:$0xff]   ;;  %v3831_v12 = vcombine.low %v93_v58, %v101_v59  ;;  %v30_v58 = vld [vmem:[%s6505_s0 + $0x10] sm:$0xff] }
  0x84   :  { %3023 = vmatpush1.bf16.msra.mxu0 %v4600_v15  ;;  %2572 = vmatprep.subr.bf16.mxu1 %v4605_v16  ;;  %v121_v15 = vld [vmem:[%s6505_s0 + $0x2e8] sm:$0xff]  ;;  %v4653_v16 = vld [vmem:[%s6504_s1 + $0x294] ss:$8 sps:$4 sm:$0xff]  }
  0x85   :  { %3024 = vmatprep.subr.bf16.mxu0 %v4608_v17  ;;  %2499 = vmatprep.mubr.bf16.mxu1 %v3784_v18  ;;  %v4656_v17 = vld [vmem:[%s6504_s1 + $0x694] ss:$8 sps:$4 sm:$0xff]   ;;  %v3848_v18 = vcombine.high %v109_v10, %v117_v11  ;;  %v3855_v28 = vcombine.low %v113_v14, %v121_v15 }
  0x86   :  { %2951 = vmatprep.mubr.bf16.mxu0 %v3792_v19  ;;  %v3856_v19 = vcombine.high %v113_v14, %v121_v15  ;;  %v50_v14 = vld [vmem:[%s6505_s0 + $0xb0] sm:$0xff] }
  0x87   :  { %2573 = vmatpush1.bf16.msra.mxu1 %v4603_v20  ;;  %v4651_v20 = vld [vmem:[%s6504_s1 + $0x290] ss:$8 sps:$4 sm:$0xff]  }
  0x88   :  { %3025 = vmatpush1.bf16.msra.mxu0 %v4606_v21  ;;  %2574 = vmatprep.subr.bf16.mxu1 %v4611_v22  ;;  %v4654_v21 = vld [vmem:[%s6504_s1 + $0x690] ss:$8 sps:$4 sm:$0xff]   ;;  %v4659_v22 = vld [vmem:[%s6504_s1 + $0x2a4] ss:$8 sps:$4 sm:$0xff]  }
  0x89   :  { %3026 = vmatprep.subr.bf16.mxu0 %v4614_v23  ;;  %v4662_v23 = vld [vmem:[%s6504_s1 + $0x6a4] ss:$8 sps:$4 sm:$0xff]   ;;  %v58_v15 = vld [vmem:[%s6505_s0 + $0xf0] sm:$0xff] }
  0x8a   :  { %2500 = vmatmul.mubr.bf16.gmra.mrb[4].mxu1 %v3783_v26  ;;  %v133_v26 = vld [vmem:[%s6505_s0 + $0x348] sm:$0xff] }
  0x8b   :  { %2952 = vmatmul.mubr.bf16.gmra.mrb[4].mxu0 %v3791_v27  ;;  %2575 = vmatpush1.bf16.msra.mxu1 %v4609_v30  ;;  %v3847_v27 = vcombine.low %v109_v10, %v117_v11  ;;  %v137_v30 = vld [vmem:[%s6505_s0 + $0x368] sm:$0xff]  ;;  %v3863_v42 = vcombine.low %v125_v25, %v133_v26  ;;  %v46_v10 = vld [vmem:[%s6505_s0 + $0x90] sm:$0xff] }
  0x8c   :  { %3027 = vmatpush1.bf16.msra.mxu0 %v4612_v31  ;;  %2576 = vmatprep.subr.bf16.mxu1 %v4617_v32  ;;  %v4660_v31 = vld [vmem:[%s6504_s1 + $0x6a0] ss:$8 sps:$4 sm:$0xff]   ;;  %v4665_v32 = vld [vmem:[%s6504_s1 + $0x2b4] ss:$8 sps:$4 sm:$0xff]  }
  0x8d   :  { %3028 = vmatprep.subr.bf16.mxu0 %v4620_v33  ;;  %2509 = vmatprep.mubr.bf16.mxu1 %v3800_v34  ;;  %v4668_v33 = vld [vmem:[%s6504_s1 + $0x6b4] ss:$8 sps:$4 sm:$0xff]   ;;  %v3864_v34 = vcombine.high %v125_v25, %v133_v26  ;;  %v4708_v25 = vld [vmem:[%s6504_s1 + $0x720] ss:$8 sps:$4 sm:$0xff]  }
  0x8e   :  { %2961 = vmatprep.mubr.bf16.mxu0 %v3808_v35  ;;  %v3872_v35 = vcombine.high %v129_v29, %v137_v30  ;;  %v54_v11 = vld [vmem:[%s6505_s0 + $0xd0] sm:$0xff] }
  0x8f   :  { %2577 = vmatpush1.bf16.msra.mxu1 %v4615_v36  ;;  %v4663_v36 = vld [vmem:[%s6504_s1 + $0x2b0] ss:$8 sps:$4 sm:$0xff]  }
  0x90   :  { %3029 = vmatpush1.bf16.msra.mxu0 %v4618_v37  ;;  %2578 = vmatprep.subr.bf16.mxu1 %v4623_v38  ;;  %v4666_v37 = vld [vmem:[%s6504_s1 + $0x6b0] ss:$8 sps:$4 sm:$0xff]   ;;  %v4671_v38 = vld [vmem:[%s6504_s1 + $0x2c4] ss:$8 sps:$4 sm:$0xff]  }
  0x91   :  { %3030 = vmatprep.subr.bf16.mxu0 %v4626_v39  ;;  %v4674_v39 = vld [vmem:[%s6504_s1 + $0x6c4] ss:$8 sps:$4 sm:$0xff]   ;;  %v62_v26 = vld [vmem:[%s6505_s0 + $0x110] sm:$0xff] }
  0x92   :  { %2510 = vmatmul.mubr.bf16.gmra.mrb[8].mxu1 %v3799_v43  ;;  %v3871_v43 = vcombine.low %v129_v29, %v137_v30  ;;  %v3793_v29 = vcombine.low %v50_v14, %v58_v15  ;;  %v66_v30 = vld [vmem:[%s6505_s0 + $0x130] sm:$0xff] }
  0x93   :  { %2962 = vmatmul.mubr.bf16.gmra.mrb[8].mxu0 %v3807_v44  ;;  %2579 = vmatpush1.bf16.msra.mxu1 %v4621_v40  ;;  %v141_v40 = vld [vmem:[%s6505_s0 + $0x388] sm:$0xff] }
  0x94   :  { %3031 = vmatpush1.bf16.msra.mxu0 %v4624_v41  ;;  %2580 = vmatprep.subr.bf16.mxu1 %v4629_v48  ;;  %v149_v41 = vld [vmem:[%s6505_s0 + $0x3c8] sm:$0xff]  ;;  %v4677_v48 = vld [vmem:[%s6504_s1 + $0x2d4] ss:$8 sps:$4 sm:$0xff]  }
  0x95   :  { %3032 = vmatprep.subr.bf16.mxu0 %v4632_v49  ;;  %2519 = vmatprep.mubr.bf16.mxu1 %v3816_v50  ;;  %v145_v44 = vld [vmem:[%s6505_s0 + $0x3a8] sm:$0xff]  ;;  %v4680_v49 = vld [vmem:[%s6504_s1 + $0x6d4] ss:$8 sps:$4 sm:$0xff]   ;;  %v3880_v50 = vcombine.high %v141_v40, %v149_v41  ;;  %v3879_v59 = vcombine.low %v141_v40, %v149_v41 }
  0x96   :  { %2971 = vmatprep.mubr.bf16.mxu0 %v3824_v51  ;;  %v3888_v51 = vcombine.high %v145_v44, %v153_v45  ;;  %v78_v40 = vld [vmem:[%s6505_s0 + $0x190] sm:$0xff] }
  0x97   :  { %2581 = vmatpush1.bf16.msra.mxu1 %v4627_v52  ;;  %v4675_v52 = vld [vmem:[%s6504_s1 + $0x2d0] ss:$8 sps:$4 sm:$0xff]  }
  0x98   :  { %3033 = vmatpush1.bf16.msra.mxu0 %v4630_v53  ;;  %2582 = vmatprep.subr.bf16.mxu1 %v4635_v54  ;;  %v4678_v53 = vld [vmem:[%s6504_s1 + $0x6d0] ss:$8 sps:$4 sm:$0xff]   ;;  %v4683_v54 = vld [vmem:[%s6504_s1 + $0x2e4] ss:$8 sps:$4 sm:$0xff]  }
  0x99   :  { %3034 = vmatprep.subr.bf16.mxu0 %v4638_v55  ;;  %v4686_v55 = vld [vmem:[%s6504_s1 + $0x6e4] ss:$8 sps:$4 sm:$0xff]  }
  0x9a   :  { %2520 = vmatmul.mubr.bf16.gmra.mrb[12].mxu1 %v3815_v60  ;;  %v3887_v60 = vcombine.low %v145_v44, %v153_v45  ;;  %v82_v44 = vld [vmem:[%s6505_s0 + $0x1b0] sm:$0xff] }
  0x9b   :  { %2972 = vmatmul.mubr.bf16.gmra.mrb[12].mxu0 %v3823_v61  ;;  %2583 = vmatpush1.bf16.msra.mxu1 %v4633_v56  ;;  %v4681_v56 = vld [vmem:[%s6504_s1 + $0x2e0] ss:$8 sps:$4 sm:$0xff]   ;;  %v38_v61 = vld [vmem:[%s6505_s0 + $0x50] sm:$0xff] }
  0x9c   :  { %3035 = vmatpush1.bf16.msra.mxu0 %v4636_v57  ;;  %2584 = vmatprep.subr.bf16.mxu1 %v4641_v0  ;;  %v4684_v57 = vld [vmem:[%s6504_s1 + $0x6e0] ss:$8 sps:$4 sm:$0xff]   ;;  %v4689_v0 = vld [vmem:[%s6504_s1 + $0x2f4] ss:$8 sps:$4 sm:$0xff]  }
  0x9d   :  { %3036 = vmatprep.subr.bf16.mxu0 %v4644_v1  ;;  %2529 = vmatprep.mubr.bf16.mxu1 %v3832_v2  ;;  %v4692_v1 = vld [vmem:[%s6504_s1 + $0x6f4] ss:$8 sps:$4 sm:$0xff]   ;;  %v3770_v2 = vcombine.high %v30_v58, %v38_v61 }
  0x9e   :  { %2981 = vmatprep.mubr.bf16.mxu0 %v3840_v3  ;;  %v3778_v3 = vcombine.high %v34_v62, %v42_v63  ;;  %v90_v45 = vld [vmem:[%s6505_s0 + $0x1f0] sm:$0xff] }
  0x9f   :  { %2585 = vmatpush1.bf16.msra.mxu1 %v4639_v4  ;;  %v4687_v4 = vld [vmem:[%s6504_s1 + $0x2f0] ss:$8 sps:$4 sm:$0xff]  }
  0xa0   :  { %3037 = vmatpush1.bf16.msra.mxu0 %v4642_v5  ;;  %2586 = vmatprep.subr.bf16.mxu1 %v4647_v6  ;;  %v4690_v5 = vld [vmem:[%s6504_s1 + $0x6f0] ss:$8 sps:$4 sm:$0xff]   ;;  %v4695_v6 = vld [vmem:[%s6504_s1 + $0x304] ss:$8 sps:$4 sm:$0xff]  }
  0xa1   :  { %3038 = vmatprep.subr.bf16.mxu0 %v4650_v7  ;;  %v4698_v7 = vld [vmem:[%s6504_s1 + $0x704] ss:$8 sps:$4 sm:$0xff]  }
  0xa2   :  { %2530 = vmatmul.mubr.bf16.gmra.mrb[16].mxu1 %v3831_v12  ;;  %v3769_v12 = vcombine.low %v30_v58, %v38_v61  ;;  %v3825_v58 = vcombine.low %v82_v44, %v90_v45  ;;  %v106_v61 = vld [vmem:[%s6505_s0 + $0x270] sm:$0xff] }
  0xa3   :  { %2982 = vmatmul.mubr.bf16.gmra.mrb[16].mxu0 %v3839_v13  ;;  %2587 = vmatpush1.bf16.msra.mxu1 %v4645_v8  ;;  %v4693_v8 = vld [vmem:[%s6504_s1 + $0x300] ss:$8 sps:$4 sm:$0xff]   ;;  %v3777_v13 = vcombine.low %v34_v62, %v42_v63 }
  0xa4   :  { %3039 = vmatpush1.bf16.msra.mxu0 %v4648_v9  ;;  %2588 = vmatprep.subr.bf16.mxu1 %v4653_v16  ;;  %v4696_v9 = vld [vmem:[%s6504_s1 + $0x700] ss:$8 sps:$4 sm:$0xff]   ;;  %v4701_v16 = vld [vmem:[%s6504_s1 + $0x314] ss:$8 sps:$4 sm:$0xff]  }
  0xa5   :  { %3040 = vmatprep.subr.bf16.mxu0 %v4656_v17  ;;  %2539 = vmatprep.mubr.bf16.mxu1 %v3848_v18  ;;  %v4704_v17 = vld [vmem:[%s6504_s1 + $0x714] ss:$8 sps:$4 sm:$0xff]   ;;  %v3786_v18 = vcombine.high %v46_v10, %v54_v11  ;;  %v4729_v62 = vld [vmem:[%s6504_s1 + $0x360] ss:$8 sps:$4 sm:$0xff]  }
  0xa6   :  { %2991 = vmatprep.mubr.bf16.mxu0 %v3856_v19  ;;  %v3794_v19 = vcombine.high %v50_v14, %v58_v15  ;;  %v4732_v63 = vld [vmem:[%s6504_s1 + $0x760] ss:$8 sps:$4 sm:$0xff]  }
  0xa7   :  { %2589 = vmatpush1.bf16.msra.mxu1 %v4651_v20  ;;  %v4699_v20 = vld [vmem:[%s6504_s1 + $0x310] ss:$8 sps:$4 sm:$0xff]   ;;  %v4741_v14 = vld [vmem:[%s6504_s1 + $0x380] ss:$8 sps:$4 sm:$0xff]  }
  0xa8   :  { %3041 = vmatpush1.bf16.msra.mxu0 %v4654_v21  ;;  %2590 = vmatprep.subr.bf16.mxu1 %v4659_v22  ;;  %v4702_v21 = vld [vmem:[%s6504_s1 + $0x710] ss:$8 sps:$4 sm:$0xff]   ;;  %v4707_v22 = vld [vmem:[%s6504_s1 + $0x324] ss:$8 sps:$4 sm:$0xff]   ;;  %v4744_v15 = vld [vmem:[%s6504_s1 + $0x780] ss:$8 sps:$4 sm:$0xff]  }
  0xa9   :  { %3042 = vmatprep.subr.bf16.mxu0 %v4662_v23  ;;  %v4710_v23 = vld [vmem:[%s6504_s1 + $0x724] ss:$8 sps:$4 sm:$0xff]  }
  0xaa   :  { %2540 = vmatmul.mubr.bf16.gmra.mrb[20].mxu1 %v3847_v27  ;;  %v70_v27 = vld [vmem:[%s6505_s0 + $0x150] sm:$0xff] }
  0xab   :  { %2992 = vmatmul.mubr.bf16.gmra.mrb[20].mxu0 %v3855_v28  ;;  %2591 = vmatpush1.bf16.msra.mxu1 %v4657_v24  ;;  %v4705_v24 = vld [vmem:[%s6504_s1 + $0x320] ss:$8 sps:$4 sm:$0xff]   ;;  %v3785_v28 = vcombine.low %v46_v10, %v54_v11  ;;  %v3801_v41 = vcombine.low %v62_v26, %v70_v27  ;;  %v118_v11 = vld [vmem:[%s6505_s0 + $0x2d0] sm:$0xff] }
  0xac   :  { %3043 = vmatpush1.bf16.msra.mxu0 %v4660_v31  ;;  %2592 = vmatprep.subr.bf16.mxu1 %v4665_v32  ;;  %v74_v31 = vld [vmem:[%s6505_s0 + $0x170] sm:$0xff] }
  0xad   :  { %3044 = vmatprep.subr.bf16.mxu0 %v4668_v33  ;;  %2549 = vmatprep.mubr.bf16.mxu1 %v3864_v34  ;;  %v4713_v32 = vld [vmem:[%s6504_s1 + $0x334] ss:$8 sps:$4 sm:$0xff]   ;;  %v3802_v34 = vcombine.high %v62_v26, %v70_v27 }
  0xae   :  { %3001 = vmatprep.mubr.bf16.mxu0 %v3872_v35  ;;  %v4716_v33 = vld [vmem:[%s6504_s1 + $0x734] ss:$8 sps:$4 sm:$0xff]   ;;  %v3810_v35 = vcombine.high %v66_v30, %v74_v31 }
  0xaf   :  { %2593 = vmatpush1.bf16.msra.mxu1 %v4663_v36  ;;  %v4711_v36 = vld [vmem:[%s6504_s1 + $0x330] ss:$8 sps:$4 sm:$0xff]  }
  0xb0   :  { %3045 = vmatpush1.bf16.msra.mxu0 %v4666_v37  ;;  %2594 = vmatprep.subr.bf16.mxu1 %v4671_v38  ;;  %v4714_v37 = vld [vmem:[%s6504_s1 + $0x730] ss:$8 sps:$4 sm:$0xff]   ;;  %v4719_v38 = vld [vmem:[%s6504_s1 + $0x344] ss:$8 sps:$4 sm:$0xff]  }
  0xb1   :  { %3046 = vmatprep.subr.bf16.mxu0 %v4674_v39  ;;  %v4722_v39 = vld [vmem:[%s6504_s1 + $0x744] ss:$8 sps:$4 sm:$0xff]   ;;  %v134_v27 = vld [vmem:[%s6505_s0 + $0x350] sm:$0xff] }
  0xb2   :  { %2550 = vmatmul.mubr.bf16.gmra.mrb[24].mxu1 %v3863_v42  ;;  %v3809_v42 = vcombine.low %v66_v30, %v74_v31  ;;  %v4753_v30 = vld [vmem:[%s6504_s1 + $0x3a0] ss:$8 sps:$4 sm:$0xff]  }
  0xb3   :  { %3002 = vmatmul.mubr.bf16.gmra.mrb[24].mxu0 %v3871_v43  ;;  %2595 = vmatpush1.bf16.msra.mxu1 %v4669_v46  ;;  %v86_v43 = vld [vmem:[%s6505_s0 + $0x1d0] sm:$0xff]  ;;  %v4717_v46 = vld [vmem:[%s6504_s1 + $0x340] ss:$8 sps:$4 sm:$0xff]  }
  0xb4   :  { %3047 = vmatpush1.bf16.msra.mxu0 %v4672_v47  ;;  %2596 = vmatprep.subr.bf16.mxu1 %v4677_v48  ;;  %v4720_v47 = vld [vmem:[%s6504_s1 + $0x740] ss:$8 sps:$4 sm:$0xff]   ;;  %v4725_v48 = vld [vmem:[%s6504_s1 + $0x354] ss:$8 sps:$4 sm:$0xff]  }
  0xb5   :  { %3048 = vmatprep.subr.bf16.mxu0 %v4680_v49  ;;  %2559 = vmatprep.mubr.bf16.mxu1 %v3880_v50  ;;  %v4728_v49 = vld [vmem:[%s6504_s1 + $0x754] ss:$8 sps:$4 sm:$0xff]   ;;  %v3818_v50 = vcombine.high %v78_v40, %v86_v43  ;;  %v4756_v31 = vld [vmem:[%s6504_s1 + $0x7a0] ss:$8 sps:$4 sm:$0xff]  }
  0xb6   :  { %3011 = vmatprep.mubr.bf16.mxu0 %v3888_v51  ;;  %v3826_v51 = vcombine.high %v82_v44, %v90_v45  ;;  %v146_v44 = vld [vmem:[%s6505_s0 + $0x3b0] sm:$0xff] }
  0xb7   :  { %2597 = vmatpush1.bf16.msra.mxu1 %v4675_v52  ;;  %v4723_v52 = vld [vmem:[%s6504_s1 + $0x350] ss:$8 sps:$4 sm:$0xff]  }
  0xb8   :  { %3049 = vmatpush1.bf16.msra.mxu0 %v4678_v53  ;;  %2598 = vmatprep.subr.bf16.mxu1 %v4683_v54  ;;  %v4726_v53 = vld [vmem:[%s6504_s1 + $0x750] ss:$8 sps:$4 sm:$0xff]   ;;  %v4731_v54 = vld [vmem:[%s6504_s1 + $0x364] ss:$8 sps:$4 sm:$0xff]  }
  0xb9   :  { %3050 = vmatprep.subr.bf16.mxu0 %v4686_v55  ;;  %v4734_v55 = vld [vmem:[%s6504_s1 + $0x764] ss:$8 sps:$4 sm:$0xff]   ;;  %v154_v45 = vld [vmem:[%s6505_s0 + $0x3f0] sm:$0xff] }
  0xba   :  { %2560 = vmatmul.mubr.bf16.gmra.mrb[28].mxu1 %v3879_v59  ;;  %v102_v59 = vld [vmem:[%s6505_s0 + $0x250] sm:$0xff] }
  0xbb   :  { %3012 = vmatmul.mubr.bf16.gmra.mrb[28].mxu0 %v3887_v60  ;;  %2599 = vmatpush1.bf16.msra.mxu1 %v4681_v56  ;;  %v94_v56 = vld [vmem:[%s6505_s0 + $0x210] sm:$0xff] }
  0xbc   :  { %3051 = vmatpush1.bf16.msra.mxu0 %v4684_v57  ;;  %2600 = vmatprep.subr.bf16.mxu1 %v4689_v0  ;;  %v3817_v57 = vcombine.low %v78_v40, %v86_v43  ;;  %v98_v60 = vld [vmem:[%s6505_s0 + $0x230] sm:$0xff] }
  0xbd   :  { %3052 = vmatprep.subr.bf16.mxu0 %v4692_v1  ;;  %2602 = vmatprep.mubr.bf16.mxu1 %v3770_v2  ;;  %v4737_v0 = vld [vmem:[%s6504_s1 + $0x374] ss:$8 sps:$4 sm:$0xff]   ;;  %v3834_v2 = vcombine.high %v94_v56, %v102_v59  ;;  %v3841_v10 = vcombine.low %v98_v60, %v106_v61 }
  0xbe   :  { %3054 = vmatprep.mubr.bf16.mxu0 %v3778_v3  ;;  %v4740_v1 = vld [vmem:[%s6504_s1 + $0x774] ss:$8 sps:$4 sm:$0xff]   ;;  %v3842_v3 = vcombine.high %v98_v60, %v106_v61 }
  0xbf   :  { %2601 = vmatpush1.bf16.msra.mxu1 %v4687_v4  ;;  %v4735_v4 = vld [vmem:[%s6504_s1 + $0x370] ss:$8 sps:$4 sm:$0xff]  }
  0xc0   :  { %3053 = vmatpush1.bf16.msra.mxu0 %v4690_v5  ;;  %2683 = vmatprep.subr.bf16.mxu1 %v4695_v6  ;;  %v4738_v5 = vld [vmem:[%s6504_s1 + $0x770] ss:$8 sps:$4 sm:$0xff]   ;;  %v4743_v6 = vld [vmem:[%s6504_s1 + $0x384] ss:$8 sps:$4 sm:$0xff]  }
  0xc1   :  { %3135 = vmatprep.subr.bf16.mxu0 %v4698_v7  ;;  %v4746_v7 = vld [vmem:[%s6504_s1 + $0x784] ss:$8 sps:$4 sm:$0xff]   ;;  %v142_v40 = vld [vmem:[%s6505_s0 + $0x390] sm:$0xff]  ;;  %v35_v60 = vld [vmem:[%s6505_s0 + $0x38] sm:$0xff] }
  0xc2   :  { %2603 = vmatmul.mubr.bf16.vlgmr.msra.gmra.mrb[0].mxu1 %v3769_v12  ;;  %v114_v12 = vld [vmem:[%s6505_s0 + $0x2b0] sm:$0xff]  ;;  %v43_v61 = vld [vmem:[%s6505_s0 + $0x78] sm:$0xff] }
  0xc3   :  { %3055 = vmatmul.mubr.bf16.vlgmr.msra.gmra.mrb[0].mxu0 %v3777_v13  ;;  %2684 = vmatpush1.bf16.msra.mxu1 %v4693_v8  ;;  %v110_v8 = vld [vmem:[%s6505_s0 + $0x290] sm:$0xff] }
  0xc4   :  { %3136 = vmatpush1.bf16.msra.mxu0 %v4696_v9  ;;  %2685 = vmatprep.subr.bf16.mxu1 %v4701_v16  ;;  %v3833_v9 = vcombine.low %v94_v56, %v102_v59  ;;  %v122_v13 = vld [vmem:[%s6505_s0 + $0x2f0] sm:$0xff]  ;;  %v31_v56 = vld [vmem:[%s6505_s0 + $0x18] sm:$0xff] }
  0xc5   :  { %3137 = vmatprep.subr.bf16.mxu0 %v4704_v17  ;;  %2612 = vmatprep.mubr.bf16.mxu1 %v3786_v18  ;;  %v4749_v16 = vld [vmem:[%s6504_s1 + $0x394] ss:$8 sps:$4 sm:$0xff]   ;;  %v3850_v18 = vcombine.high %v110_v8, %v118_v11  ;;  %v3857_v26 = vcombine.low %v114_v12, %v122_v13 }
  0xc6   :  { %3064 = vmatprep.mubr.bf16.mxu0 %v3794_v19  ;;  %v4752_v17 = vld [vmem:[%s6504_s1 + $0x794] ss:$8 sps:$4 sm:$0xff]   ;;  %v3858_v19 = vcombine.high %v114_v12, %v122_v13 }
  0xc7   :  { %2686 = vmatpush1.bf16.msra.mxu1 %v4699_v20  ;;  %v4747_v20 = vld [vmem:[%s6504_s1 + $0x390] ss:$8 sps:$4 sm:$0xff]  }
  0xc8   :  { %3138 = vmatpush1.bf16.msra.mxu0 %v4702_v21  ;;  %2687 = vmatprep.subr.bf16.mxu1 %v4707_v22  ;;  %v4750_v21 = vld [vmem:[%s6504_s1 + $0x790] ss:$8 sps:$4 sm:$0xff]   ;;  %v4755_v22 = vld [vmem:[%s6504_s1 + $0x3a4] ss:$8 sps:$4 sm:$0xff]  }
  0xc9   :  { %3139 = vmatprep.subr.bf16.mxu0 %v4710_v23  ;;  %v4758_v23 = vld [vmem:[%s6504_s1 + $0x7a4] ss:$8 sps:$4 sm:$0xff]   ;;  %v150_v43 = vld [vmem:[%s6505_s0 + $0x3d0] sm:$0xff]  ;;  %v39_v59 = vld [vmem:[%s6505_s0 + $0x58] sm:$0xff] }
  0xca   :  { %2613 = vmatmul.mubr.bf16.gmra.mrb[4].mxu1 %v3785_v28  ;;  %v130_v28 = vld [vmem:[%s6505_s0 + $0x330] sm:$0xff] }
  0xcb   :  { %3065 = vmatmul.mubr.bf16.gmra.mrb[4].mxu0 %v3793_v29  ;;  %2688 = vmatpush1.bf16.msra.mxu1 %v4705_v24  ;;  %v126_v24 = vld [vmem:[%s6505_s0 + $0x310] sm:$0xff] }
  0xcc   :  { %3140 = vmatpush1.bf16.msra.mxu0 %v4708_v25  ;;  %2689 = vmatprep.subr.bf16.mxu1 %v4713_v32  ;;  %v3849_v25 = vcombine.low %v110_v8, %v118_v11  ;;  %v138_v29 = vld [vmem:[%s6505_s0 + $0x370] sm:$0xff]  ;;  %v51_v8 = vld [vmem:[%s6505_s0 + $0xb8] sm:$0xff]  ;;  %v3779_v11 = vcombine.low %v35_v60, %v43_v61 }
  0xcd   :  { %3141 = vmatprep.subr.bf16.mxu0 %v4716_v33  ;;  %2622 = vmatprep.mubr.bf16.mxu1 %v3802_v34  ;;  %v4761_v32 = vld [vmem:[%s6504_s1 + $0x3b4] ss:$8 sps:$4 sm:$0xff]   ;;  %v3866_v34 = vcombine.high %v126_v24, %v134_v27 }
  0xce   :  { %3074 = vmatprep.mubr.bf16.mxu0 %v3810_v35  ;;  %v4764_v33 = vld [vmem:[%s6504_s1 + $0x7b4] ss:$8 sps:$4 sm:$0xff]   ;;  %v3874_v35 = vcombine.high %v130_v28, %v138_v29 }
  0xcf   :  { %2690 = vmatpush1.bf16.msra.mxu1 %v4711_v36  ;;  %v4759_v36 = vld [vmem:[%s6504_s1 + $0x3b0] ss:$8 sps:$4 sm:$0xff]  }
  0xd0   :  { %3142 = vmatpush1.bf16.msra.mxu0 %v4714_v37  ;;  %2691 = vmatprep.subr.bf16.mxu1 %v4719_v38  ;;  %v4762_v37 = vld [vmem:[%s6504_s1 + $0x7b0] ss:$8 sps:$4 sm:$0xff]   ;;  %v4767_v38 = vld [vmem:[%s6504_s1 + $0x3c4] ss:$8 sps:$4 sm:$0xff]  }
  0xd1   :  { %3143 = vmatprep.subr.bf16.mxu0 %v4722_v39  ;;  %v4770_v39 = vld [vmem:[%s6504_s1 + $0x7c4] ss:$8 sps:$4 sm:$0xff]  }
  0xd2   :  { %2623 = vmatmul.mubr.bf16.gmra.mrb[8].mxu1 %v3801_v41  ;;  %v3865_v41 = vcombine.low %v126_v24, %v134_v27  ;;  %v83_v24 = vld [vmem:[%s6505_s0 + $0x1b8] sm:$0xff] }
  0xd3   :  { %3075 = vmatmul.mubr.bf16.gmra.mrb[8].mxu0 %v3809_v42  ;;  %2692 = vmatpush1.bf16.msra.mxu1 %v4717_v46  ;;  %v3873_v42 = vcombine.low %v130_v28, %v138_v29  ;;  %v4765_v46 = vld [vmem:[%s6504_s1 + $0x3c0] ss:$8 sps:$4 sm:$0xff]  }
  0xd4   :  { %3144 = vmatpush1.bf16.msra.mxu0 %v4720_v47  ;;  %2693 = vmatprep.subr.bf16.mxu1 %v4725_v48  ;;  %v4768_v47 = vld [vmem:[%s6504_s1 + $0x7c0] ss:$8 sps:$4 sm:$0xff]   ;;  %v4773_v48 = vld [vmem:[%s6504_s1 + $0x3d4] ss:$8 sps:$4 sm:$0xff]  }
  0xd5   :  { %3145 = vmatprep.subr.bf16.mxu0 %v4728_v49  ;;  %2632 = vmatprep.mubr.bf16.mxu1 %v3818_v50  ;;  %v4776_v49 = vld [vmem:[%s6504_s1 + $0x7d4] ss:$8 sps:$4 sm:$0xff]   ;;  %v3882_v50 = vcombine.high %v142_v40, %v150_v43 }
  0xd6   :  { %3084 = vmatprep.mubr.bf16.mxu0 %v3826_v51  ;;  %v3890_v51 = vcombine.high %v146_v44, %v154_v45 }
  0xd7   :  { %2694 = vmatpush1.bf16.msra.mxu1 %v4723_v52  ;;  %v4771_v52 = vld [vmem:[%s6504_s1 + $0x3d0] ss:$8 sps:$4 sm:$0xff]  }
  0xd8   :  { %3146 = vmatpush1.bf16.msra.mxu0 %v4726_v53  ;;  %2695 = vmatprep.subr.bf16.mxu1 %v4731_v54  ;;  %v4774_v53 = vld [vmem:[%s6504_s1 + $0x7d0] ss:$8 sps:$4 sm:$0xff]   ;;  %v4779_v54 = vld [vmem:[%s6504_s1 + $0x3e4] ss:$8 sps:$4 sm:$0xff]  }
  0xd9   :  { %3147 = vmatprep.subr.bf16.mxu0 %v4734_v55  ;;  %v4782_v55 = vld [vmem:[%s6504_s1 + $0x7e4] ss:$8 sps:$4 sm:$0xff]  }
  0xda   :  { %2633 = vmatmul.mubr.bf16.gmra.mrb[12].mxu1 %v3817_v57  ;;  %v3881_v57 = vcombine.low %v142_v40, %v150_v43  ;;  %v115_v40 = vld [vmem:[%s6505_s0 + $0x2b8] sm:$0xff] }
  0xdb   :  { %3085 = vmatmul.mubr.bf16.gmra.mrb[12].mxu0 %v3825_v58  ;;  %2696 = vmatpush1.bf16.msra.mxu1 %v4729_v62  ;;  %v3889_v58 = vcombine.low %v146_v44, %v154_v45  ;;  %v4777_v62 = vld [vmem:[%s6504_s1 + $0x3e0] ss:$8 sps:$4 sm:$0xff]  }
  0xdc   :  { %3148 = vmatpush1.bf16.msra.mxu0 %v4732_v63  ;;  %2697 = vmatprep.subr.bf16.mxu1 %v4737_v0  ;;  %v4780_v63 = vld [vmem:[%s6504_s1 + $0x7e0] ss:$8 sps:$4 sm:$0xff]   ;;  %v4785_v0 = vld [vmem:[%s6504_s1 + $0x3f4] ss:$8 sps:$4 sm:$0xff]  }
  0xdd   :  { %3149 = vmatprep.subr.bf16.mxu0 %v4740_v1  ;;  %2642 = vmatprep.mubr.bf16.mxu1 %v3834_v2  ;;  %v4788_v1 = vld [vmem:[%s6504_s1 + $0x7f4] ss:$8 sps:$4 sm:$0xff]   ;;  %v3772_v2 = vcombine.high %v31_v56, %v39_v59 }
  0xde   :  { %3094 = vmatprep.mubr.bf16.mxu0 %v3842_v3  ;;  %v3780_v3 = vcombine.high %v35_v60, %v43_v61 }
  0xdf   :  { %2698 = vmatpush1.bf16.msra.mxu1 %v4735_v4  ;;  %v4783_v4 = vld [vmem:[%s6504_s1 + $0x3f0] ss:$8 sps:$4 sm:$0xff]  }
  0xe0   :  { %3150 = vmatpush1.bf16.msra.mxu0 %v4738_v5  ;;  %2699 = vmatprep.subr.bf16.mxu1 %v4743_v6  ;;  %v4786_v5 = vld [vmem:[%s6504_s1 + $0x7f0] ss:$8 sps:$4 sm:$0xff]  }
  0xe1   :  { %3151 = vmatprep.subr.bf16.mxu0 %v4746_v7  ;;  %v47_v6 = vld [vmem:[%s6505_s0 + $0x98] sm:$0xff] }
  0xe2   :  { %2643 = vmatmul.mubr.bf16.gmra.mrb[16].mxu1 %v3833_v9  ;;  %v55_v7 = vld [vmem:[%s6505_s0 + $0xd8] sm:$0xff] }
  0xe3   :  { %3095 = vmatmul.mubr.bf16.gmra.mrb[16].mxu0 %v3841_v10  ;;  %2700 = vmatpush1.bf16.msra.mxu1 %v4741_v14  ;;  %v59_v9 = vld [vmem:[%s6505_s0 + $0xf8] sm:$0xff]  ;;  %v3771_v10 = vcombine.low %v31_v56, %v39_v59  ;;  %v3788_v12 = vcombine.high %v47_v6, %v55_v7 }
  0xe4   :  { %3152 = vmatpush1.bf16.msra.mxu0 %v4744_v15  ;;  %2701 = vmatprep.subr.bf16.mxu1 %v4749_v16  ;;  %v3796_v13 = vcombine.high %v51_v8, %v59_v9  ;;  %v63_v14 = vld [vmem:[%s6505_s0 + $0x118] sm:$0xff] }
  0xe5   :  { %3153 = vmatprep.subr.bf16.mxu0 %v4752_v17  ;;  %2652 = vmatprep.mubr.bf16.mxu1 %v3850_v18  ;;  %v71_v15 = vld [vmem:[%s6505_s0 + $0x158] sm:$0xff]  ;;  %v3787_v18 = vcombine.low %v47_v6, %v55_v7 }
  0xe6   :  { %3104 = vmatprep.mubr.bf16.mxu0 %v3858_v19  ;;  %v67_v16 = vld [vmem:[%s6505_s0 + $0x138] sm:$0xff]  ;;  %v3795_v19 = vcombine.low %v51_v8, %v59_v9 }
  0xe7   :  { %2702 = vmatpush1.bf16.msra.mxu1 %v4747_v20  ;;  %v75_v17 = vld [vmem:[%s6505_s0 + $0x178] sm:$0xff]  ;;  %v3804_v20 = vcombine.high %v63_v14, %v71_v15 }
  0xe8   :  { %3154 = vmatpush1.bf16.msra.mxu0 %v4750_v21  ;;  %2703 = vmatprep.subr.bf16.mxu1 %v4755_v22  ;;  %v3812_v21 = vcombine.high %v67_v16, %v75_v17  ;;  %v79_v22 = vld [vmem:[%s6505_s0 + $0x198] sm:$0xff]  ;;  %v3811_v27 = vcombine.low %v67_v16, %v75_v17 }
  0xe9   :  { %3155 = vmatprep.subr.bf16.mxu0 %v4758_v23  ;;  %v87_v23 = vld [vmem:[%s6505_s0 + $0x1d8] sm:$0xff] }
  0xea   :  { %2653 = vmatmul.mubr.bf16.gmra.mrb[20].mxu1 %v3849_v25  ;;  %v91_v25 = vld [vmem:[%s6505_s0 + $0x1f8] sm:$0xff]  ;;  %v3820_v28 = vcombine.high %v79_v22, %v87_v23 }
  0xeb   :  { %3105 = vmatmul.mubr.bf16.gmra.mrb[20].mxu0 %v3857_v26  ;;  %2704 = vmatpush1.bf16.msra.mxu1 %v4753_v30  ;;  %v3803_v26 = vcombine.low %v63_v14, %v71_v15  ;;  %v3828_v29 = vcombine.high %v83_v24, %v91_v25  ;;  %v95_v30 = vld [vmem:[%s6505_s0 + $0x218] sm:$0xff] }
  0xec   :  { %3156 = vmatpush1.bf16.msra.mxu0 %v4756_v31  ;;  %2705 = vmatprep.subr.bf16.mxu1 %v4761_v32  ;;  %v103_v31 = vld [vmem:[%s6505_s0 + $0x258] sm:$0xff] }
  0xed   :  { %3157 = vmatprep.subr.bf16.mxu0 %v4764_v33  ;;  %2662 = vmatprep.mubr.bf16.mxu1 %v3866_v34  ;;  %v99_v32 = vld [vmem:[%s6505_s0 + $0x238] sm:$0xff]  ;;  %v3819_v34 = vcombine.low %v79_v22, %v87_v23 }
  0xee   :  { %3114 = vmatprep.mubr.bf16.mxu0 %v3874_v35  ;;  %v107_v33 = vld [vmem:[%s6505_s0 + $0x278] sm:$0xff]  ;;  %v3827_v35 = vcombine.low %v83_v24, %v91_v25 }
  0xef   :  { %2706 = vmatpush1.bf16.msra.mxu1 %v4759_v36  ;;  %v3836_v36 = vcombine.high %v95_v30, %v103_v31  ;;  %v3843_v43 = vcombine.low %v99_v32, %v107_v33  ;;  %v147_v56 = vld [vmem:[%s6505_s0 + $0x3b8] sm:$0xff] }
  0xf0   :  { %3158 = vmatpush1.bf16.msra.mxu0 %v4762_v37  ;;  %2707 = vmatprep.subr.bf16.mxu1 %v4767_v38  ;;  %v3844_v37 = vcombine.high %v99_v32, %v107_v33  ;;  %v111_v38 = vld [vmem:[%s6505_s0 + $0x298] sm:$0xff] }
  0xf1   :  { %3159 = vmatprep.subr.bf16.mxu0 %v4770_v39  ;;  %v119_v39 = vld [vmem:[%s6505_s0 + $0x2d8] sm:$0xff] }
  0xf2   :  { %2663 = vmatmul.mubr.bf16.gmra.mrb[24].mxu1 %v3865_v41  ;;  %v123_v41 = vld [vmem:[%s6505_s0 + $0x2f8] sm:$0xff]  ;;  %v3852_v44 = vcombine.high %v111_v38, %v119_v39 }
  0xf3   :  { %3115 = vmatmul.mubr.bf16.gmra.mrb[24].mxu0 %v3873_v42  ;;  %2708 = vmatpush1.bf16.msra.mxu1 %v4765_v46  ;;  %v3835_v42 = vcombine.low %v95_v30, %v103_v31  ;;  %v3860_v45 = vcombine.high %v115_v40, %v123_v41  ;;  %v127_v46 = vld [vmem:[%s6505_s0 + $0x318] sm:$0xff] }
  0xf4   :  { %3160 = vmatpush1.bf16.msra.mxu0 %v4768_v47  ;;  %2709 = vmatprep.subr.bf16.mxu1 %v4773_v48  ;;  %v135_v47 = vld [vmem:[%s6505_s0 + $0x358] sm:$0xff] }
  0xf5   :  { %3161 = vmatprep.subr.bf16.mxu0 %v4776_v49  ;;  %2672 = vmatprep.mubr.bf16.mxu1 %v3882_v50  ;;  %v131_v48 = vld [vmem:[%s6505_s0 + $0x338] sm:$0xff]  ;;  %v3851_v50 = vcombine.low %v111_v38, %v119_v39 }
  0xf6   :  { %3124 = vmatprep.mubr.bf16.mxu0 %v3890_v51  ;;  %v139_v49 = vld [vmem:[%s6505_s0 + $0x378] sm:$0xff]  ;;  %v3859_v51 = vcombine.low %v115_v40, %v123_v41 }
  0xf7   :  { %2710 = vmatpush1.bf16.msra.mxu1 %v4771_v52  ;;  %v3868_v52 = vcombine.high %v127_v46, %v135_v47  ;;  %v3875_v59 = vcombine.low %v131_v48, %v139_v49 }
  0xf8   :  { %3162 = vmatpush1.bf16.msra.mxu0 %v4774_v53  ;;  %2711 = vmatprep.subr.bf16.mxu1 %v4779_v54  ;;  %v3876_v53 = vcombine.high %v131_v48, %v139_v49  ;;  %v143_v54 = vld [vmem:[%s6505_s0 + $0x398] sm:$0xff] }
  0xf9   :  { %3163 = vmatprep.subr.bf16.mxu0 %v4782_v55  ;;  %v151_v55 = vld [vmem:[%s6505_s0 + $0x3d8] sm:$0xff] }
  0xfa   :  { %2673 = vmatmul.mubr.bf16.gmra.mrb[28].mxu1 %v3881_v57  ;;  %v155_v57 = vld [vmem:[%s6505_s0 + $0x3f8] sm:$0xff]  ;;  %v3884_v60 = vcombine.high %v143_v54, %v151_v55 }
  0xfb   :  { %3125 = vmatmul.mubr.bf16.gmra.mrb[28].mxu0 %v3889_v58  ;;  %2712 = vmatpush1.bf16.msra.mxu1 %v4777_v62  ;;  %v3867_v58 = vcombine.low %v127_v46, %v135_v47  ;;  %v3892_v61 = vcombine.high %v147_v56, %v155_v57  ;;  %v3883_v62 = vcombine.low %v143_v54, %v151_v55 }
  0xfc   :  { %3164 = vmatpush1.bf16.msra.mxu0 %v4780_v63  ;;  %2713 = vmatprep.subr.bf16.mxu1 %v4785_v0  ;;  %v3891_v63 = vcombine.low %v147_v56, %v155_v57  ;;  %v414_v0 = vlaneseq }
  0xfd   :  { %3165 = vmatprep.subr.bf16.mxu0 %v4788_v1  ;;  %2715 = vmatprep.mubr.bf16.mxu1 %v3772_v2 }
  0xfe   :  { %3167 = vmatprep.mubr.bf16.mxu0 %v3780_v3  ;;  %v415_v1 = vshrl.u32 %v414_v0, 7  ;;  %v412_v3 = vld [vmem:[%s6506_s2] sm:$0x3] }
  0xff   :  { %2714 = vmatpush1.bf16.msra.mxu1 %v4783_v4 }
 0x100   :  { %3166 = vmatpush1.bf16.msra.mxu0 %v4786_v5  ;;  %v5993_v2 = vsub.s32 0, %v415_v1  ;;  %v5998_v4 = vsub.s32 1, %v415_v1 }
 0x102   :  { %2716 = vmatmul.mubr.bf16.vlgmr.msra.gmra.mrb[0].mxu1 %v3771_v10  ;;  %v6001_v5 = vrot.slane %v412_v3, %v5993_v2  ;;  %v6004_v6 = vrot.slane %v412_v3, %v5998_v4 }
 0x103   :  { %3168 = vmatmul.mubr.bf16.vlgmr.msra.gmra.mrb[0].mxu0 %v3779_v11  ;;  %2725 = vmatprep.mubr.bf16.mxu1 %v3788_v12 }
 0x104   :  { %3177 = vmatprep.mubr.bf16.mxu0 %v3796_v13 }
 0x10a   :  { %2726 = vmatmul.mubr.bf16.gmra.mrb[4].mxu1 %v3787_v18 }
 0x10b   :  { %3178 = vmatmul.mubr.bf16.gmra.mrb[4].mxu0 %v3795_v19  ;;  %2735 = vmatprep.mubr.bf16.mxu1 %v3804_v20 }
 0x10c   :  { %3187 = vmatprep.mubr.bf16.mxu0 %v3812_v21 }
 0x112   :  { %2736 = vmatmul.mubr.bf16.gmra.mrb[8].mxu1 %v3803_v26 }
 0x113   :  { %3188 = vmatmul.mubr.bf16.gmra.mrb[8].mxu0 %v3811_v27  ;;  %2745 = vmatprep.mubr.bf16.mxu1 %v3820_v28 }
 0x114   :  { %3197 = vmatprep.mubr.bf16.mxu0 %v3828_v29 }
 0x11a   :  { %2746 = vmatmul.mubr.bf16.gmra.mrb[12].mxu1 %v3819_v34 }
 0x11b   :  { %3198 = vmatmul.mubr.bf16.gmra.mrb[12].mxu0 %v3827_v35  ;;  %2755 = vmatprep.mubr.bf16.mxu1 %v3836_v36 }
 0x11c   :  { %3207 = vmatprep.mubr.bf16.mxu0 %v3844_v37 }
 0x122   :  { %2756 = vmatmul.mubr.bf16.gmra.mrb[16].mxu1 %v3835_v42 }
 0x123   :  { %3208 = vmatmul.mubr.bf16.gmra.mrb[16].mxu0 %v3843_v43  ;;  %2765 = vmatprep.mubr.bf16.mxu1 %v3852_v44 }
 0x124   :  { %3217 = vmatprep.mubr.bf16.mxu0 %v3860_v45 }
 0x12a   :  { %2766 = vmatmul.mubr.bf16.gmra.mrb[20].mxu1 %v3851_v50 }
 0x12b   :  { %3218 = vmatmul.mubr.bf16.gmra.mrb[20].mxu0 %v3859_v51  ;;  %2775 = vmatprep.mubr.bf16.mxu1 %v3868_v52 }
 0x12c   :  { %3227 = vmatprep.mubr.bf16.mxu0 %v3876_v53 }
 0x132   :  { %2776 = vmatmul.mubr.bf16.gmra.mrb[24].mxu1 %v3867_v58 }
 0x133   :  { %3228 = vmatmul.mubr.bf16.gmra.mrb[24].mxu0 %v3875_v59  ;;  %2785 = vmatprep.mubr.bf16.mxu1 %v3884_v60 }
 0x134   :  { %3237 = vmatprep.mubr.bf16.mxu0 %v3892_v61 }
 0x13a   :  { %2786 = vmatmul.mubr.bf16.gmra.mrb[28].mxu1 %v3883_v62 }
 0x13b   :  { %3238 = vmatmul.mubr.bf16.gmra.mrb[28].mxu0 %v3891_v63 }
 0x1d5   :  { %v2717_v7 = vpop.f32.mrb[0].mxu1 }
 0x1d6   :  { %v3169_v8 = vpop.f32.mrb[0].mxu0  ;;  %v4149_v9 = vadd.f32 %v2717_v7, %v6001_v5  ;;  %v2719_v10 = vpop.f32.mrb[1].mxu1 }
 0x1d7   :  { %v3171_v11 = vpop.f32.mrb[1].mxu0  ;;  %v4151_v12 = vadd.f32 %v2719_v10, %v6004_v6  ;;  %v2721_v13 = vpop.f32.mrb[2].mxu1 }
 0x1d8   :  { %v3173_v14 = vpop.f32.mrb[2].mxu0  ;;  %v6008_v15 = vadd.f32 %v4149_v9, %v3169_v8  ;;  %v4153_v16 = vadd.f32 %v2721_v13, %v6001_v5  ;;  %v2723_v17 = vpop.f32.mrb[3].mxu1 }
 0x1d9   :  { %v3175_v18 = vpop.f32.mrb[3].mxu0  ;;  %v6011_v19 = vadd.f32 %v4151_v12, %v3171_v11  ;;  %v4155_v20 = vadd.f32 %v2723_v17, %v6004_v6 }
 0x1da   :  { %v6014_v21 = vadd.f32 %v4153_v16, %v3173_v14 }
 0x1db   :  { %v6016_v22 = vadd.f32 %v4155_v20, %v3175_v18 }
 0x1dc   :  { %v3248_v23 = vadd.f32 %v6014_v21, %v6008_v15 }
 0x1dd   :  { %v3269_v24 = vadd.f32 %v6016_v22, %v6011_v19  ;;  %v2727_v25 = vpop.f32.mrb[4].mxu1 }
 0x1de   :  { %v3179_v26 = vpop.f32.mrb[4].mxu0  ;;  %v4157_v27 = vadd.f32 %v2727_v25, %v6001_v5  ;;  %v2729_v28 = vpop.f32.mrb[5].mxu1 }
 0x1df   :  { %v3181_v29 = vpop.f32.mrb[5].mxu0  ;;  %v4159_v30 = vadd.f32 %v2729_v28, %v6004_v6  ;;  %v2731_v31 = vpop.f32.mrb[6].mxu1 }
 0x1e0   :  { %v3183_v32 = vpop.f32.mrb[6].mxu0  ;;  %v6024_v33 = vadd.f32 %v4157_v27, %v3179_v26  ;;  %v4161_v34 = vadd.f32 %v2731_v31, %v6001_v5  ;;  %v2733_v35 = vpop.f32.mrb[7].mxu1 }
 0x1e1   :  { %v3185_v36 = vpop.f32.mrb[7].mxu0  ;;  %v6027_v37 = vadd.f32 %v4159_v30, %v3181_v29  ;;  %v4163_v38 = vadd.f32 %v2733_v35, %v6004_v6 }
 0x1e2   :  { %v3249_v39 = vadd.f32 %v6024_v33, %v3248_v23  ;;  %v6031_v40 = vadd.f32 %v4161_v34, %v3183_v32 }
 0x1e3   :  { %v3270_v41 = vadd.f32 %v6027_v37, %v3269_v24  ;;  %v6034_v42 = vadd.f32 %v4163_v38, %v3185_v36 }
 0x1e4   :  { %v3250_v43 = vadd.f32 %v6031_v40, %v3249_v39 }
 0x1e5   :  { %v3271_v44 = vadd.f32 %v6034_v42, %v3270_v41  ;;  %v2737_v45 = vpop.f32.mrb[8].mxu1 }
 0x1e6   :  { %v3189_v46 = vpop.f32.mrb[8].mxu0  ;;  %v4165_v47 = vadd.f32 %v2737_v45, %v6001_v5  ;;  %v2739_v48 = vpop.f32.mrb[9].mxu1 }
 0x1e7   :  { %v3191_v49 = vpop.f32.mrb[9].mxu0  ;;  %v4167_v50 = vadd.f32 %v2739_v48, %v6004_v6  ;;  %v2741_v51 = vpop.f32.mrb[10].mxu1 }
 0x1e8   :  { %v3193_v52 = vpop.f32.mrb[10].mxu0  ;;  %v6040_v53 = vadd.f32 %v4165_v47, %v3189_v46  ;;  %v4169_v54 = vadd.f32 %v2741_v51, %v6001_v5  ;;  %v2743_v55 = vpop.f32.mrb[11].mxu1 }
 0x1e9   :  { %v3195_v56 = vpop.f32.mrb[11].mxu0  ;;  %v6043_v57 = vadd.f32 %v4167_v50, %v3191_v49  ;;  %v4171_v58 = vadd.f32 %v2743_v55, %v6004_v6 }
 0x1ea   :  { %v3251_v59 = vadd.f32 %v6040_v53, %v3250_v43  ;;  %v6047_v60 = vadd.f32 %v4169_v54, %v3193_v52 }
 0x1eb   :  { %v3272_v61 = vadd.f32 %v6043_v57, %v3271_v44  ;;  %v6050_v62 = vadd.f32 %v4171_v58, %v3195_v56 }
 0x1ec   :  { %v3252_v63 = vadd.f32 %v6047_v60, %v3251_v59 }
 0x1ed   :  { %v3273_v0 = vadd.f32 %v6050_v62, %v3272_v61  ;;  %v2747_v1 = vpop.f32.mrb[12].mxu1 }
 0x1ee   :  { %v3199_v3 = vpop.f32.mrb[12].mxu0  ;;  %v4173_v7 = vadd.f32 %v2747_v1, %v6001_v5  ;;  %v2749_v8 = vpop.f32.mrb[13].mxu1 }
 0x1ef   :  { %v3201_v9 = vpop.f32.mrb[13].mxu0  ;;  %v4175_v10 = vadd.f32 %v2749_v8, %v6004_v6  ;;  %v2751_v11 = vpop.f32.mrb[14].mxu1 }
 0x1f0   :  { %v3203_v12 = vpop.f32.mrb[14].mxu0  ;;  %v6056_v13 = vadd.f32 %v4173_v7, %v3199_v3  ;;  %v4177_v14 = vadd.f32 %v2751_v11, %v6001_v5  ;;  %v2753_v16 = vpop.f32.mrb[15].mxu1 }
 0x1f1   :  { %v3205_v17 = vpop.f32.mrb[15].mxu0  ;;  %v6059_v18 = vadd.f32 %v4175_v10, %v3201_v9  ;;  %v4179_v20 = vadd.f32 %v2753_v16, %v6004_v6 }
 0x1f2   :  { %v3253_v23 = vadd.f32 %v6056_v13, %v3252_v63  ;;  %v6063_v24 = vadd.f32 %v4177_v14, %v3203_v12 }
 0x1f3   :  { %v3274_v25 = vadd.f32 %v6059_v18, %v3273_v0  ;;  %v6066_v26 = vadd.f32 %v4179_v20, %v3205_v17 }
 0x1f4   :  { %v3254_v27 = vadd.f32 %v6063_v24, %v3253_v23 }
 0x1f5   :  { %v3275_v28 = vadd.f32 %v6066_v26, %v3274_v25  ;;  %v2757_v29 = vpop.f32.mrb[16].mxu1 }
 0x1f6   :  { %v3209_v30 = vpop.f32.mrb[16].mxu0  ;;  %v4181_v31 = vadd.f32 %v2757_v29, %v6001_v5  ;;  %v2759_v32 = vpop.f32.mrb[17].mxu1 }
 0x1f7   :  { %v3211_v34 = vpop.f32.mrb[17].mxu0  ;;  %v4183_v35 = vadd.f32 %v2759_v32, %v6004_v6  ;;  %v2761_v36 = vpop.f32.mrb[18].mxu1 }
 0x1f8   :  { %v3213_v38 = vpop.f32.mrb[18].mxu0  ;;  %v6072_v39 = vadd.f32 %v4181_v31, %v3209_v30  ;;  %v4185_v41 = vadd.f32 %v2761_v36, %v6001_v5  ;;  %v2763_v43 = vpop.f32.mrb[19].mxu1 }
 0x1f9   :  { %v3215_v44 = vpop.f32.mrb[19].mxu0  ;;  %v6075_v45 = vadd.f32 %v4183_v35, %v3211_v34  ;;  %v4187_v46 = vadd.f32 %v2763_v43, %v6004_v6 }
 0x1fa   :  { %v3255_v47 = vadd.f32 %v6072_v39, %v3254_v27  ;;  %v6079_v48 = vadd.f32 %v4185_v41, %v3213_v38 }
 0x1fb   :  { %v3276_v49 = vadd.f32 %v6075_v45, %v3275_v28  ;;  %v6082_v50 = vadd.f32 %v4187_v46, %v3215_v44 }
 0x1fc   :  { %v3256_v51 = vadd.f32 %v6079_v48, %v3255_v47 }
 0x1fd   :  { %v3277_v52 = vadd.f32 %v6082_v50, %v3276_v49  ;;  %v2767_v54 = vpop.f32.mrb[20].mxu1 }
 0x1fe   :  { %v3219_v55 = vpop.f32.mrb[20].mxu0  ;;  %v4189_v56 = vadd.f32 %v2767_v54, %v6001_v5  ;;  %v2769_v58 = vpop.f32.mrb[21].mxu1 }
 0x1ff   :  { %v3221_v59 = vpop.f32.mrb[21].mxu0  ;;  %v4191_v61 = vadd.f32 %v2769_v58, %v6004_v6  ;;  %v2771_v63 = vpop.f32.mrb[22].mxu1 }
 0x200   :  { %v3223_v0 = vpop.f32.mrb[22].mxu0  ;;  %v6088_v1 = vadd.f32 %v4189_v56, %v3219_v55  ;;  %v4193_v3 = vadd.f32 %v2771_v63, %v6001_v5  ;;  %v2773_v7 = vpop.f32.mrb[23].mxu1 }
 0x201   :  { %v3225_v8 = vpop.f32.mrb[23].mxu0  ;;  %v6091_v9 = vadd.f32 %v4191_v61, %v3221_v59  ;;  %v4195_v10 = vadd.f32 %v2773_v7, %v6004_v6 }
 0x202   :  { %v3257_v11 = vadd.f32 %v6088_v1, %v3256_v51  ;;  %v6095_v12 = vadd.f32 %v4193_v3, %v3223_v0 }
 0x203   :  { %v3278_v14 = vadd.f32 %v6091_v9, %v3277_v52  ;;  %v6098_v16 = vadd.f32 %v4195_v10, %v3225_v8 }
 0x204   :  { %v3258_v17 = vadd.f32 %v6095_v12, %v3257_v11 }
 0x205   :  { %v3279_v20 = vadd.f32 %v6098_v16, %v3278_v14  ;;  %v2777_v23 = vpop.f32.mrb[24].mxu1 }
 0x206   :  { %v3229_v25 = vpop.f32.mrb[24].mxu0  ;;  %v4197_v27 = vadd.f32 %v2777_v23, %v6001_v5  ;;  %v2779_v28 = vpop.f32.mrb[25].mxu1 }
 0x207   :  { %v3231_v29 = vpop.f32.mrb[25].mxu0  ;;  %v4199_v30 = vadd.f32 %v2779_v28, %v6004_v6  ;;  %v2781_v31 = vpop.f32.mrb[26].mxu1 }
 0x208   :  { %v3233_v32 = vpop.f32.mrb[26].mxu0  ;;  %v4198_v34 = vadd.f32 %v4197_v27, %v3229_v25  ;;  %v4201_v35 = vadd.f32 %v2781_v31, %v6001_v5  ;;  %v2783_v36 = vpop.f32.mrb[27].mxu1 }
 0x209   :  { %v3235_v38 = vpop.f32.mrb[27].mxu0  ;;  %v6105_v41 = vadd.f32 %v4199_v30, %v3231_v29  ;;  %v4203_v43 = vadd.f32 %v2783_v36, %v6004_v6 }
 0x20a   :  { %v3259_v44 = vadd.f32 %v4198_v34, %v3258_v17  ;;  %v4202_v46 = vadd.f32 %v4201_v35, %v3233_v32 }
 0x20b   :  { %v3280_v47 = vadd.f32 %v6105_v41, %v3279_v20  ;;  %v6109_v49 = vadd.f32 %v4203_v43, %v3235_v38 }
 0x20c   :  { %v3260_v51 = vadd.f32 %v4202_v46, %v3259_v44 }
 0x20d   :  { %v3281_v52 = vadd.f32 %v6109_v49, %v3280_v47  ;;  %v2787_v54 = vpop.f32.mrb[28].mxu1 }
 0x20e   :  { %v3239_v55 = vpop.f32.mrb[28].mxu0  ;;  %v4205_v56 = vadd.f32 %v2787_v54, %v6001_v5  ;;  %v2789_v58 = vpop.f32.mrb[29].mxu1 }
 0x20f   :  { %v3241_v59 = vpop.f32.mrb[29].mxu0  ;;  %v4207_v61 = vadd.f32 %v2789_v58, %v6004_v6  ;;  %v2791_v63 = vpop.f32.mrb[30].mxu1 }
 0x210   :  { %v3243_v0 = vpop.f32.mrb[30].mxu0  ;;  %v4206_v3 = vadd.f32 %v4205_v56, %v3239_v55  ;;  %v4209_v7 = vadd.f32 %v2791_v63, %v6001_v5  ;;  %v2793_v8 = vpop.f32.mrb[31].mxu1 }
 0x211   :  { %v3245_v10 = vpop.f32.mrb[31].mxu0  ;;  %v4208_v11 = vadd.f32 %v4207_v61, %v3241_v59  ;;  %v4211_v14 = vadd.f32 %v2793_v8, %v6004_v6 }
 0x212   :  { %v3261_v17 = vadd.f32 %v4206_v3, %v3260_v51  ;;  %v4210_v20 = vadd.f32 %v4209_v7, %v3243_v0 }
 0x213   :  { %v3282_v23 = vadd.f32 %v4208_v11, %v3281_v52  ;;  %v4212_v25 = vadd.f32 %v4211_v14, %v3245_v10 }
 0x214   :  { %v3262_v27 = vadd.f32 %v4210_v20, %v3261_v17 }
 0x215   :  { %v3283_v28 = vadd.f32 %v4212_v25, %v3282_v23 }
 0x216   :  { %v3263_v29 = vrot.slane %v3262_v27, 4 }
 0x217   :  { %v3284_v30 = vrot.slane %v3283_v28, 4 }
 0x218   :  { %v3264_v31 = vadd.f32 %v3263_v29, %v3262_v27 }
 0x219   :  { %v3285_v32 = vadd.f32 %v3284_v30, %v3283_v28 }
 0x21a   :  { %v3265_v35 = vrot.slane %v3264_v31, 2 }
 0x21b   :  { %v3286_v36 = vrot.slane %v3285_v32, 2 }
 0x21c   :  { %v3266_v38 = vadd.f32 %v3265_v35, %v3264_v31 }
 0x21d   :  { %v3287_v43 = vadd.f32 %v3286_v36, %v3285_v32 }
 0x21e   :  { %v3267_v5 = vrot.slane %v3266_v38, 1 }
 0x21f   :  { %v3288_v44 = vrot.slane %v3287_v43, 1 }
 0x220   :  { %v3268_v47 = vadd.f32 %v3267_v5, %v3266_v38 }
 0x221   :  { %v3289_v55 = vadd.f32 %v3288_v44, %v3287_v43 }
 0x222   :  { %v3291_v54 = vmul.f32 0.0078125, %v3268_v47 }
 0x223   :  { %v3292_v0 = vmul.f32 0.0078125, %v3289_v55 }
 0x224   :  { %v6117_v6 = vsub.f32 %v6008_v15, %v3291_v54  ;;  %v6120_v51 = vsub.f32 %v6014_v21, %v3291_v54  ;;  %v6123_v52 = vsub.f32 %v6024_v33, %v3291_v54  ;;  %v6126_v56 = vsub.f32 %v6031_v40, %v3291_v54 }
 0x225   :  { %v6129_v58 = vsub.f32 %v6040_v53, %v3291_v54  ;;  %v6132_v59 = vsub.f32 %v6047_v60, %v3291_v54  ;;  %v6135_v61 = vsub.f32 %v6056_v13, %v3291_v54  ;;  %v6138_v15 = vsub.f32 %v6063_v24, %v3291_v54 }
 0x226   :  { %v6141_v21 = vsub.f32 %v6072_v39, %v3291_v54  ;;  %v6144_v33 = vsub.f32 %v6079_v48, %v3291_v54  ;;  %v6147_v40 = vsub.f32 %v6088_v1, %v3291_v54  ;;  %v6150_v53 = vsub.f32 %v6095_v12, %v3291_v54 }
 0x227   :  { %v6152_v60 = vsub.f32 %v4198_v34, %v3291_v54  ;;  %v6154_v63 = vsub.f32 %v4202_v46, %v3291_v54  ;;  %v6156_v13 = vsub.f32 %v4206_v3, %v3291_v54  ;;  %v6158_v24 = vsub.f32 %v4210_v20, %v3291_v54 }
 0x228   :  { %v3325_v39 = vmul.f32 %v6117_v6, %v6117_v6  ;;  %v3327_v48 = vmul.f32 %v6120_v51, %v6120_v51  ;;  %v3329_v1 = vmul.f32 %v6123_v52, %v6123_v52  ;;  %v3331_v12 = vmul.f32 %v6126_v56, %v6126_v56 }
 0x229   :  { %v6169_v46 = vsub.f32 %v6011_v19, %v3292_v0  ;;  %v6172_v3 = vsub.f32 %v6016_v22, %v3292_v0  ;;  %v6175_v7 = vsub.f32 %v6027_v37, %v3292_v0  ;;  %v6178_v8 = vsub.f32 %v6034_v42, %v3292_v0 }
 0x22a   :  { %v3357_v34 = vadd.f32 %v3327_v48, %v3325_v39  ;;  %v6181_v10 = vsub.f32 %v6043_v57, %v3292_v0  ;;  %v6184_v14 = vsub.f32 %v6050_v62, %v3292_v0  ;;  %v6187_v17 = vsub.f32 %v6059_v18, %v3292_v0 }
 0x22b   :  { %v6190_v20 = vsub.f32 %v6066_v26, %v3292_v0  ;;  %v6193_v22 = vsub.f32 %v6075_v45, %v3292_v0  ;;  %v6196_v37 = vsub.f32 %v6082_v50, %v3292_v0  ;;  %v6199_v42 = vsub.f32 %v6091_v9, %v3292_v0 }
 0x22c   :  { %v3358_v19 = vadd.f32 %v3357_v34, %v3329_v1  ;;  %v6202_v57 = vsub.f32 %v6098_v16, %v3292_v0  ;;  %v6205_v62 = vsub.f32 %v6105_v41, %v3292_v0  ;;  %v6208_v18 = vsub.f32 %v6109_v49, %v3292_v0 }
 0x22d   :  { %v3333_v26 = vmul.f32 %v6129_v58, %v6129_v58  ;;  %v6212_v23 = vsub.f32 %v4208_v11, %v3292_v0  ;;  %v6214_v50 = vsub.f32 %v4212_v25, %v3292_v0  ;;  %v3326_v9 = vmul.f32 %v6169_v46, %v6169_v46 }
 0x22e   :  { %v3359_v45 = vadd.f32 %v3358_v19, %v3331_v12  ;;  %v3328_v16 = vmul.f32 %v6172_v3, %v6172_v3  ;;  %v3335_v41 = vmul.f32 %v6132_v59, %v6132_v59  ;;  %v3337_v49 = vmul.f32 %v6135_v61, %v6135_v61 }
 0x22f   :  { %v3330_v11 = vmul.f32 %v6175_v7, %v6175_v7  ;;  %v3339_v25 = vmul.f32 %v6138_v15, %v6138_v15  ;;  %v3332_v31 = vmul.f32 %v6178_v8, %v6178_v8  ;;  %v3341_v35 = vmul.f32 %v6141_v21, %v6141_v21 }
 0x230   :  { %v3360_v27 = vadd.f32 %v3359_v45, %v3333_v26  ;;  %v3378_v29 = vadd.f32 %v3328_v16, %v3326_v9  ;;  %v3334_v38 = vmul.f32 %v6181_v10, %v6181_v10  ;;  %v3343_v5 = vmul.f32 %v6144_v33, %v6144_v33 }
 0x231   :  { %v3336_v47 = vmul.f32 %v6184_v14, %v6184_v14  ;;  %v3345_v55 = vmul.f32 %v6147_v40, %v6147_v40  ;;  %v3338_v48 = vmul.f32 %v6187_v17, %v6187_v17  ;;  %v3347_v1 = vmul.f32 %v6150_v53, %v6150_v53 }
 0x232   :  { %v3361_v28 = vadd.f32 %v3360_v27, %v3335_v41  ;;  %v3379_v32 = vadd.f32 %v3378_v29, %v3330_v11  ;;  %v3340_v34 = vmul.f32 %v6190_v20, %v6190_v20  ;;  %v3349_v26 = vmul.f32 %v6152_v60, %v6152_v60 }
 0x233   :  { %v3342_v9 = vmul.f32 %v6193_v22, %v6193_v22  ;;  %v3351_v41 = vmul.f32 %v6154_v63, %v6154_v63  ;;  %v3353_v11 = vmul.f32 %v6156_v13, %v6156_v13 }
 0x234   :  { %v3362_v30 = vadd.f32 %v3361_v28, %v3337_v49  ;;  %v3380_v43 = vadd.f32 %v3379_v32, %v3332_v31  ;;  %v3344_v49 = vmul.f32 %v6196_v37, %v6196_v37  ;;  %v3355_v31 = vmul.f32 %v6158_v24, %v6158_v24 }
 0x236   :  { %v3363_v36 = vadd.f32 %v3362_v30, %v3339_v25  ;;  %v3381_v54 = vadd.f32 %v3380_v43, %v3334_v38  ;;  %v3346_v25 = vmul.f32 %v6199_v42, %v6199_v42  ;;  %v3350_v43 = vmul.f32 %v6205_v62, %v6205_v62 }
 0x238   :  { %v3364_v44 = vadd.f32 %v3363_v36, %v3341_v35  ;;  %v3382_v0 = vadd.f32 %v3381_v54, %v3336_v47  ;;  %v3348_v35 = vmul.f32 %v6202_v57, %v6202_v57  ;;  %v3352_v47 = vmul.f32 %v6208_v18, %v6208_v18 }
 0x23a   :  { %v3365_v39 = vadd.f32 %v3364_v44, %v3343_v5  ;;  %v3383_v19 = vadd.f32 %v3382_v0, %v3338_v48 }
 0x23c   :  { %v3366_v12 = vadd.f32 %v3365_v39, %v3345_v55  ;;  %v3384_v16 = vadd.f32 %v3383_v19, %v3340_v34  ;;  %v3354_v39 = vmul.f32 %v6212_v23, %v6212_v23 }
 0x23e   :  { %v3367_v45 = vadd.f32 %v3366_v12, %v3347_v1  ;;  %v3385_v28 = vadd.f32 %v3384_v16, %v3342_v9  ;;  %v3356_v1 = vmul.f32 %v6214_v50, %v6214_v50 }
 0x240   :  { %v3368_v27 = vadd.f32 %v3367_v45, %v3349_v26  ;;  %v3386_v30 = vadd.f32 %v3385_v28, %v3344_v49 }
 0x242   :  { %v3369_v29 = vadd.f32 %v3368_v27, %v3351_v41  ;;  %v3387_v36 = vadd.f32 %v3386_v30, %v3346_v25  ;;  %v3437_v30 = vld [vmem:[%s6507_s3] sm:$0x3] }
 0x244   :  { %v3370_v32 = vadd.f32 %v3369_v29, %v3353_v11  ;;  %v3388_v5 = vadd.f32 %v3387_v36, %v3348_v35  ;;  %v6277_v35 = vrot.slane %v3437_v30, %v5993_v2 }
 0x246   :  { %v3371_v38 = vadd.f32 %v3370_v32, %v3355_v31  ;;  %v3389_v54 = vadd.f32 %v3388_v5, %v3350_v43  ;;  %v3481_v31 = vld [vmem:[%s6508_s4] sm:$0x3]  ;;  %v6285_v43 = vrot.slane %v3437_v30, %v5998_v4  ;;  %v3623_v30 = vld [vmem:[%s6509_s5 + $0x10] sm:$0xff] }
 0x247   :  { %v6288_v5 = vrot.slane %v3481_v31, %v5998_v4 }
 0x248   :  { %v3372_v44 = vrot.slane %v3371_v38, 4  ;;  %v3390_v48 = vadd.f32 %v3389_v54, %v3352_v47 }
 0x24a   :  { %v3373_v55 = vadd.f32 %v3372_v44, %v3371_v38  ;;  %v3391_v12 = vadd.f32 %v3390_v48, %v3354_v39  ;;  %v6282_v38 = vrot.slane %v3481_v31, %v5993_v2 }
 0x24c   :  { %v3374_v0 = vrot.slane %v3373_v55, 2  ;;  %v3392_v19 = vadd.f32 %v3391_v12, %v3356_v1 }
 0x24e   :  { %v3375_v34 = vadd.f32 %v3374_v0, %v3373_v55  ;;  %v3393_v45 = vrot.slane %v3392_v19, 4 }
 0x250   :  { %v3376_v26 = vrot.slane %v3375_v34, 1  ;;  %v3394_v16 = vadd.f32 %v3393_v45, %v3392_v19  ;;  %v3621_v19 = vld [vmem:[%s6509_s5] sm:$0xff] }
 0x252   :  { %v3377_v9 = vadd.f32 %v3376_v26, %v3375_v34  ;;  %v3395_v27 = vrot.slane %v3394_v16, 2 }
 0x254   :  { %v3399_v41 = vmul.f32 0.0078125, %v3377_v9  ;;  %v3396_v28 = vadd.f32 %v3395_v27, %v3394_v16 }
 0x256   :  { %v3401_v49 = vadd.f32 1e-05, %v3399_v41  ;;  %v3397_v11 = vrot.slane %v3396_v28, 1 }
 0x258   :  { %4789 = vrsqrt.f32 %v3401_v49  ;;  %v3398_v29 = vadd.f32 %v3397_v11, %v3396_v28 }
 0x25a   :  { %v3400_v25 = vmul.f32 0.0078125, %v3398_v29 }
 0x25c   :  { %v3402_v32 = vadd.f32 1e-05, %v3400_v25 }
 0x25e   :  { %4791 = vrsqrt.f32 %v3402_v32 }
 0x262   :  { %v6279_v36 = vpop.eup %4789 }
 0x263   :  { %v3435_v44 = vmul.f32 %v6279_v36, %v6158_v24  ;;  %v3421_v47 = vmul.f32 %v6279_v36, %v6141_v21  ;;  %v3405_v54 = vmul.f32 %v6279_v36, %v6117_v6  ;;  %v3423_v55 = vmul.f32 %v6279_v36, %v6144_v33 }
 0x264   :  { %v3407_v2 = vmul.f32 %v6279_v36, %v6120_v51  ;;  %v3425_v39 = vmul.f32 %v6279_v36, %v6147_v40  ;;  %v3409_v4 = vmul.f32 %v6279_v36, %v6123_v52  ;;  %v3427_v24 = vmul.f32 %v6279_v36, %v6150_v53 }
 0x265   :  { %v3479_v21 = vmul.f32 %v6277_v35, %v3435_v44  ;;  %v3465_v48 = vmul.f32 %v6277_v35, %v3421_v47  ;;  %v3449_v6 = vmul.f32 %v6277_v35, %v3405_v54  ;;  %v3467_v33 = vmul.f32 %v6277_v35, %v3423_v55 }
 0x266   :  { %v3451_v0 = vmul.f32 %v6277_v35, %v3407_v2  ;;  %v3469_v51 = vmul.f32 %v6277_v35, %v3425_v39  ;;  %v3453_v40 = vmul.f32 %v6277_v35, %v3409_v4  ;;  %v3471_v1 = vmul.f32 %v6277_v35, %v3427_v24 }
 0x267   :  { %v6315_v52 = vadd.f32 %v6282_v38, %v3479_v21  ;;  %v3509_v53 = vadd.f32 %v6282_v38, %v3465_v48  ;;  %v3493_v12 = vadd.f32 %v6282_v38, %v3449_v6  ;;  %v3511_v34 = vadd.f32 %v6282_v38, %v3467_v33 }
 0x268   :  { %v3495_v26 = vadd.f32 %v6282_v38, %v3451_v0  ;;  %v3513_v45 = vadd.f32 %v6282_v38, %v3469_v51  ;;  %v6326_v9 = vadd.f32 %v6282_v38, %v3453_v40  ;;  %v6329_v16 = vadd.f32 %v6282_v38, %v3471_v1  ;;  %v6331_v11 = vpop.eup %4791  ;;  %v3622_v40 = vld [vmem:[%s6509_s5 + $0x8] sm:$0xff] }
 0x269   :  { %vm3541_vm0 = vcmp.gt.f32.partialorder %v3509_v53, 0.0  ;;  %v3573_v41 = vmul.f32 0.2, %v3509_v53  ;;  %vm3525_vm1 = vcmp.gt.f32.partialorder %v3493_v12, 0.0  ;;  %v3557_v27 = vmul.f32 0.2, %v3493_v12 }
 0x26a   :  { %vm3543_vm2 = vcmp.gt.f32.partialorder %v3511_v34, 0.0  ;;  %v3575_v49 = vmul.f32 0.2, %v3511_v34  ;;  %vm3527_vm3 = vcmp.gt.f32.partialorder %v3495_v26, 0.0  ;;  %v3559_v28 = vmul.f32 0.2, %v3495_v26 }
 0x26b   :  { %v3605_v29 = vsel %vm3541_vm0, %v3509_v53, %v3573_v41  ;;  %v3589_v25 = vsel %vm3525_vm1, %v3493_v12, %v3557_v27  ;;  %vm3545_vm4 = vcmp.gt.f32.partialorder %v3513_v45, 0.0  ;;  %v3577_v31 = vmul.f32 0.2, %v3513_v45  ;;  %v3624_v53 = vld [vmem:[%s6509_s5 + $0x18] sm:$0xff] }
 0x26c   :  { %v3436_v32 = vmul.f32 %v6331_v11, %v6214_v50  ;;  %v3422_v44 = vmul.f32 %v6331_v11, %v6193_v22  ;;  %v3653_v47 = vmul.f32 %v3621_v19, %v3605_v29  ;;  %v3406_v54 = vmul.f32 %v6331_v11, %v6169_v46 }
 0x26d   :  { %v3637_v55 = vmul.f32 %v3621_v19, %v3589_v25  ;;  %v3424_v2 = vmul.f32 %v6331_v11, %v6196_v37  ;;  %v3607_v39 = vsel %vm3543_vm2, %v3511_v34, %v3575_v49  ;;  %v3408_v4 = vmul.f32 %v6331_v11, %v6172_v3  ;;  %v3625_v19 = vld [vmem:[%s6509_s5 + $0x20] sm:$0xff] }
 0x26e   :  { %v3480_v24 = vmul.f32 %v6285_v43, %v3436_v32  ;;  %v3466_v50 = vmul.f32 %v6285_v43, %v3422_v44  ;;  %v3450_v21 = vmul.f32 %v6285_v43, %v3406_v54  ;;  %v3655_v22 = vmul.f32 %v3623_v30, %v3607_v39 }
 0x26f   :  { %v3468_v48 = vmul.f32 %v6285_v43, %v3424_v2  ;;  %v3452_v46 = vmul.f32 %v6285_v43, %v3408_v4  ;;  %v3591_v6 = vsel %vm3527_vm3, %v3495_v26, %v3559_v28  ;;  %v3426_v37 = vmul.f32 %v6331_v11, %v6199_v42  ;;  %v3626_v4 = vld [vmem:[%s6509_s5 + $0x28] sm:$0xff] }
 0x270   :  { %v6356_v33 = vadd.f32 %v6288_v5, %v3480_v24  ;;  %v3510_v3 = vadd.f32 %v6288_v5, %v3466_v50  ;;  %v3494_v0 = vadd.f32 %v6288_v5, %v3450_v21  ;;  %v3639_v51 = vmul.f32 %v3623_v30, %v3591_v6 }
 0x271   :  { %v3512_v1 = vadd.f32 %v6288_v5, %v3468_v48  ;;  %v3496_v42 = vadd.f32 %v6288_v5, %v3452_v46  ;;  %v3470_v12 = vmul.f32 %v6285_v43, %v3426_v37  ;;  %v3609_v34 = vsel %vm3545_vm4, %v3513_v45, %v3577_v31 }
 0x272   :  { %vm3542_vm5 = vcmp.gt.f32.partialorder %v3510_v3, 0.0  ;;  %v3574_v26 = vmul.f32 0.2, %v3510_v3  ;;  %vm3526_vm6 = vcmp.gt.f32.partialorder %v3494_v0, 0.0  ;;  %v3558_v41 = vmul.f32 0.2, %v3494_v0 }
 0x273   :  { %vm3544_vm7 = vcmp.gt.f32.partialorder %v3512_v1, 0.0  ;;  %v3576_v27 = vmul.f32 0.2, %v3512_v1  ;;  %vm3528_vm8 = vcmp.gt.f32.partialorder %v3496_v42, 0.0  ;;  %v3560_v49 = vmul.f32 0.2, %v3496_v42 }
 0x274   :  { %v3606_v28 = vsel %vm3542_vm5, %v3510_v3, %v3574_v26  ;;  %v3590_v29 = vsel %vm3526_vm6, %v3494_v0, %v3558_v41  ;;  %v3514_v25 = vadd.f32 %v6288_v5, %v3470_v12  ;;  %v3657_v30 = vmul.f32 %v3625_v19, %v3609_v34 }
 0x275   :  { %v3654_v32 = vmul.f32 %v3622_v40, %v3606_v28  ;;  %v3638_v44 = vmul.f32 %v3622_v40, %v3590_v29  ;;  %v3608_v45 = vsel %vm3544_vm7, %v3512_v1, %v3576_v27  ;;  %v3592_v31 = vsel %vm3528_vm8, %v3496_v42, %v3560_v49 }
 0x276   :  { %v3656_v54 = vmul.f32 %v3624_v53, %v3608_v45  ;;  %v3640_v2 = vmul.f32 %v3624_v53, %v3592_v31  ;;  %vm3546_vm9 = vcmp.gt.f32.partialorder %v3514_v25, 0.0  ;;  %v3578_v39 = vmul.f32 0.2, %v3514_v25 }
 0x277   :  { %v3693_v24 = vadd.f32 %v3654_v32, %v3653_v47  ;;  %v3669_v50 = vadd.f32 %v3638_v44, %v3637_v55  ;;  %v3410_v21 = vmul.f32 %v6331_v11, %v6175_v7  ;;  %vm3529_vm10 = vcmp.gt.f32.partialorder %v6326_v9, 0.0  ;;  %v3627_v55 = vld [vmem:[%s6509_s5 + $0x30] sm:$0xff] }
 0x278   :  { %v3696_v48 = vadd.f32 %v3656_v54, %v3655_v22  ;;  %v3672_v46 = vadd.f32 %v3640_v2, %v3639_v51  ;;  %v3610_v6 = vsel %vm3546_vm9, %v3514_v25, %v3578_v39  ;;  %v3561_v37 = vmul.f32 0.2, %v6326_v9 }
 0x279   :  { %3694 = vadd.xlane.f32.xlu1 %v3693_v24  ;;  %3670 = vadd.xlane.f32.xlu0 %v3669_v50  ;;  %v3658_v3 = vmul.f32 %v3626_v4, %v3610_v6  ;;  %v3454_v0 = vmul.f32 %v6285_v43, %v3410_v21  ;;  %v3428_v40 = vmul.f32 %v6331_v11, %v6202_v57  ;;  %vm3547_vm11 = vcmp.gt.f32.partialorder %v6329_v16, 0.0  ;;  %v3629_v6 = vld [vmem:[%s6509_s5 + $0x40] sm:$0xff] }
 0x27a   :  { %v3593_v47 = vsel %vm3529_vm10, %v6326_v9, %v3561_v37  ;;  %v3579_v7 = vmul.f32 0.2, %v6329_v16  ;;  %v3411_v22 = vmul.f32 %v6279_v36, %v6126_v56  ;;  %v3412_v51 = vmul.f32 %v6331_v11, %v6178_v8 }
 0x27b   :  { %v3699_v1 = vadd.f32 %v3658_v3, %v3657_v30  ;;  %v3498_v53 = vadd.f32 %v6288_v5, %v3454_v0  ;;  %v3641_v57 = vmul.f32 %v3625_v19, %v3593_v47  ;;  %v3472_v42 = vmul.f32 %v6285_v43, %v3428_v40 }
 0x27c   :  { %v3611_v9 = vsel %vm3547_vm11, %v6329_v16, %v3579_v7  ;;  %v3455_v12 = vmul.f32 %v6277_v35, %v3411_v22  ;;  %v3456_v34 = vmul.f32 %v6285_v43, %v3412_v51  ;;  %v3429_v26 = vmul.f32 %v6279_v36, %v6152_v60  ;;  %v3628_v60 = vld [vmem:[%s6509_s5 + $0x38] sm:$0xff] }
 0x27d   :  { %3697 = vadd.xlane.f32.xlu1 %v3696_v48  ;;  %3673 = vadd.xlane.f32.xlu0 %v3672_v46  ;;  %vm3530_vm12 = vcmp.gt.f32.partialorder %v3498_v53, 0.0  ;;  %v3562_v56 = vmul.f32 0.2, %v3498_v53  ;;  %v3516_v8 = vadd.f32 %v6288_v5, %v3472_v42  ;;  %v3659_v41 = vmul.f32 %v3627_v55, %v3611_v9 }
 0x27e   :  { %v3499_v19 = vadd.f32 %v6282_v38, %v3455_v12  ;;  %v3500_v27 = vadd.f32 %v6288_v5, %v3456_v34  ;;  %v3430_v16 = vmul.f32 %v6331_v11, %v6205_v62  ;;  %v3473_v49 = vmul.f32 %v6277_v35, %v3429_v26 }
 0x27f   :  { %v3594_v28 = vsel %vm3530_vm12, %v3498_v53, %v3562_v56  ;;  %vm3548_vm13 = vcmp.gt.f32.partialorder %v3516_v8, 0.0  ;;  %v3580_v29 = vmul.f32 0.2, %v3516_v8  ;;  %v3413_v25 = vmul.f32 %v6279_v36, %v6129_v58 }
 0x280   :  { %v3642_v30 = vmul.f32 %v3626_v4, %v3594_v28  ;;  %vm3531_vm14 = vcmp.gt.f32.partialorder %v3499_v19, 0.0  ;;  %vm3532_vm15 = vcmp.gt.f32.partialorder %v3500_v27, 0.0  ;;  %v3563_v32 = vmul.f32 0.2, %v3499_v19 }
 0x281   :  { %3700 = vadd.xlane.f32.xlu1 %v3699_v1  ;;  %v3612_v44 = vsel %vm3548_vm13, %v3516_v8, %v3580_v29  ;;  %v3564_v45 = vmul.f32 0.2, %v3500_v27  ;;  %v3474_v62 = vmul.f32 %v6285_v43, %v3430_v16  ;;  %v3517_v31 = vadd.f32 %v6282_v38, %v3473_v49  ;;  %v3631_v49 = vld [vmem:[%s6509_s5 + $0x50] sm:$0xff] }
 0x282   :  { %v3675_v54 = vadd.f32 %v3642_v30, %v3641_v57  ;;  %v3660_v2 = vmul.f32 %v3628_v60, %v3612_v44  ;;  %v3595_v39 = vsel %vm3531_vm14, %v3499_v19, %v3563_v32  ;;  %v3414_v24 = vmul.f32 %v6331_v11, %v6181_v10  ;;  %v3630_v10 = vld [vmem:[%s6509_s5 + $0x48] sm:$0xff] }
 0x283   :  { %v3596_v50 = vsel %vm3532_vm15, %v3500_v27, %v3564_v45  ;;  %v3643_v21 = vmul.f32 %v3627_v55, %v3595_v39  ;;  %v3518_v58 = vadd.f32 %v6288_v5, %v3474_v62  ;;  %vm3549_vm0 = vcmp.gt.f32.partialorder %v3517_v31, 0.0 }
 0x284   :  { %3676 = vadd.xlane.f32.xlu0 %v3675_v54  ;;  %v3702_v4 = vadd.f32 %v3660_v2, %v3659_v41  ;;  %v3644_v48 = vmul.f32 %v3628_v60, %v3596_v50  ;;  %v3581_v46 = vmul.f32 0.2, %v3517_v31  ;;  %v3457_v37 = vmul.f32 %v6277_v35, %v3413_v25 }
 0x285   :  { %vm3550_vm1 = vcmp.gt.f32.partialorder %v3518_v58, 0.0  ;;  %v3582_v3 = vmul.f32 0.2, %v3518_v58  ;;  %v3458_v0 = vmul.f32 %v6285_v43, %v3414_v24  ;;  %v3431_v40 = vmul.f32 %v6279_v36, %v6154_v63 }
 0x286   :  { %3703 = vadd.xlane.f32.xlu1 %v3702_v4  ;;  %v3678_v47 = vadd.f32 %v3644_v48, %v3643_v21  ;;  %v3613_v7 = vsel %vm3549_vm0, %v3517_v31, %v3581_v46  ;;  %v3501_v55 = vadd.f32 %v6282_v38, %v3457_v37  ;;  %v3432_v22 = vmul.f32 %v6331_v11, %v6208_v18 }
 0x287   :  { %v3614_v51 = vsel %vm3550_vm1, %v3518_v58, %v3582_v3  ;;  %v3661_v1 = vmul.f32 %v3629_v6, %v3613_v7  ;;  %v3502_v53 = vadd.f32 %v6288_v5, %v3458_v0  ;;  %v3475_v57 = vmul.f32 %v6277_v35, %v3431_v40 }
 0x288   :  { %3679 = vadd.xlane.f32.xlu0 %v3678_v47  ;;  %v3662_v42 = vmul.f32 %v3630_v10, %v3614_v51  ;;  %vm3533_vm2 = vcmp.gt.f32.partialorder %v3501_v55, 0.0  ;;  %v3565_v9 = vmul.f32 0.2, %v3501_v55  ;;  %v3476_v63 = vmul.f32 %v6285_v43, %v3432_v22  ;;  %v3634_v47 = vld [vmem:[%s6509_s5 + $0x68] sm:$0xff] }
 0x289   :  { %vm3534_vm3 = vcmp.gt.f32.partialorder %v3502_v53, 0.0  ;;  %v3566_v12 = vmul.f32 0.2, %v3502_v53  ;;  %v3519_v34 = vadd.f32 %v6282_v38, %v3475_v57  ;;  %v3415_v26 = vmul.f32 %v6279_v36, %v6132_v59  ;;  %v3632_v59 = vld [vmem:[%s6509_s5 + $0x58] sm:$0xff] }
 0x28a   :  { %v3705_v18 = vadd.f32 %v3662_v42, %v3661_v1  ;;  %v3597_v56 = vsel %vm3533_vm2, %v3501_v55, %v3565_v9  ;;  %v3520_v8 = vadd.f32 %v6288_v5, %v3476_v63  ;;  %v3416_v41 = vmul.f32 %v6331_v11, %v6184_v14 }
 0x28b   :  { %v3598_v19 = vsel %vm3534_vm3, %v3502_v53, %v3566_v12  ;;  %v3645_v27 = vmul.f32 %v3629_v6, %v3597_v56  ;;  %vm3551_vm4 = vcmp.gt.f32.partialorder %v3519_v34, 0.0  ;;  %v3583_v16 = vmul.f32 0.2, %v3519_v34 }
 0x28c   :  { %3706 = vadd.xlane.f32.xlu1 %v3705_v18  ;;  %v3646_v28 = vmul.f32 %v3630_v10, %v3598_v19  ;;  %vm3552_vm5 = vcmp.gt.f32.partialorder %v3520_v8, 0.0  ;;  %v3584_v29 = vmul.f32 0.2, %v3520_v8  ;;  %v3459_v60 = vmul.f32 %v6277_v35, %v3415_v26  ;;  %v3636_v26 = vld [vmem:[%s6509_s5 + $0x78] sm:$0xff] }
 0x28d   :  { %v3615_v25 = vsel %vm3551_vm4, %v3519_v34, %v3583_v16  ;;  %v3460_v14 = vmul.f32 %v6285_v43, %v3416_v41  ;;  %v3433_v30 = vmul.f32 %v6279_v36, %v6156_v13  ;;  %v3434_v32 = vmul.f32 %v6331_v11, %v6212_v23  ;;  %v3635_v34 = vld [vmem:[%s6509_s5 + $0x70] sm:$0xff] }
 0x28e   :  { %v3681_v44 = vadd.f32 %v3646_v28, %v3645_v27  ;;  %v3616_v45 = vsel %vm3552_vm5, %v3520_v8, %v3584_v29  ;;  %v3663_v62 = vmul.f32 %v3631_v49, %v3615_v25  ;;  %v3503_v31 = vadd.f32 %v6282_v38, %v3459_v60 }
 0x28f   :  { %v3664_v54 = vmul.f32 %v3632_v59, %v3616_v45  ;;  %v3504_v2 = vadd.f32 %v6288_v5, %v3460_v14  ;;  %v3477_v39 = vmul.f32 %v6277_v35, %v3433_v30  ;;  %v3478_v24 = vmul.f32 %v6285_v43, %v3434_v32 }
 0x290   :  { %3682 = vadd.xlane.f32.xlu0 %v3681_v44  ;;  %vm3535_vm6 = vcmp.gt.f32.partialorder %v3503_v31, 0.0  ;;  %v3567_v50 = vmul.f32 0.2, %v3503_v31  ;;  %v3417_v13 = vmul.f32 %v6279_v36, %v6135_v61  ;;  %v3418_v23 = vmul.f32 %v6331_v11, %v6187_v17  ;;  %v3633_v17 = vld [vmem:[%s6509_s5 + $0x60] sm:$0xff] }
 0x291   :  { %v3708_v21 = vadd.f32 %v3664_v54, %v3663_v62  ;;  %vm3536_vm7 = vcmp.gt.f32.partialorder %v3504_v2, 0.0  ;;  %v3568_v58 = vmul.f32 0.2, %v3504_v2  ;;  %v3521_v4 = vadd.f32 %v6282_v38, %v3477_v39 }
 0x292   :  { %v3599_v48 = vsel %vm3535_vm6, %v3503_v31, %v3567_v50  ;;  %v3522_v46 = vadd.f32 %v6288_v5, %v3478_v24  ;;  %v3461_v6 = vmul.f32 %v6277_v35, %v3417_v13  ;;  %v3462_v37 = vmul.f32 %v6285_v43, %v3418_v23 }
 0x293   :  { %3709 = vadd.xlane.f32.xlu1 %v3708_v21  ;;  %v3600_v3 = vsel %vm3536_vm7, %v3504_v2, %v3568_v58  ;;  %v3647_v10 = vmul.f32 %v3631_v49, %v3599_v48  ;;  %vm3553_vm8 = vcmp.gt.f32.partialorder %v3521_v4, 0.0  ;;  %v3585_v61 = vmul.f32 0.2, %v3521_v4 }
 0x294   :  { %v3648_v0 = vmul.f32 %v3632_v59, %v3600_v3  ;;  %vm3554_vm9 = vcmp.gt.f32.partialorder %v3522_v46, 0.0  ;;  %v3586_v40 = vmul.f32 0.2, %v3522_v46  ;;  %v3505_v7 = vadd.f32 %v6282_v38, %v3461_v6 }
 0x295   :  { %v3617_v55 = vsel %vm3553_vm8, %v3521_v4, %v3585_v61  ;;  %v3506_v22 = vadd.f32 %v6288_v5, %v3462_v37  ;;  %vm3555_vm10 = vcmp.gt.f32.partialorder %v6315_v52, 0.0  ;;  %vm3556_vm11 = vcmp.gt.f32.partialorder %v6356_v33, 0.0 }
 0x296   :  { %v3684_v51 = vadd.f32 %v3648_v0, %v3647_v10  ;;  %v3618_v1 = vsel %vm3554_vm9, %v3522_v46, %v3586_v40  ;;  %v3665_v53 = vmul.f32 %v3633_v17, %v3617_v55  ;;  %vm3537_vm12 = vcmp.gt.f32.partialorder %v3505_v7, 0.0 }
 0x297   :  { %v3666_v57 = vmul.f32 %v3634_v47, %v3618_v1  ;;  %vm3538_vm13 = vcmp.gt.f32.partialorder %v3506_v22, 0.0  ;;  %v3569_v42 = vmul.f32 0.2, %v3505_v7  ;;  %v3570_v9 = vmul.f32 0.2, %v3506_v22 }
 0x298   :  { %3685 = vadd.xlane.f32.xlu0 %v3684_v51  ;;  %v3587_v63 = vmul.f32 0.2, %v6315_v52  ;;  %v3588_v12 = vmul.f32 0.2, %v6356_v33  ;;  %v3419_v18 = vmul.f32 %v6279_v36, %v6138_v15  ;;  %v3420_v56 = vmul.f32 %v6331_v11, %v6190_v20 }
 0x299   :  { %v3711_v8 = vadd.f32 %v3666_v57, %v3665_v53  ;;  %v3601_v41 = vsel %vm3537_vm12, %v3505_v7, %v3569_v42  ;;  %v3602_v19 = vsel %vm3538_vm13, %v3506_v22, %v3570_v9  ;;  %vm3758_vm0 = vcmask 0  }
 0x29a   :  { %v3649_v27 = vmul.f32 %v3633_v17, %v3601_v41  ;;  %v3650_v16 = vmul.f32 %v3634_v47, %v3602_v19  ;;  %v3619_v49 = vsel %vm3555_vm10, %v6315_v52, %v3587_v63  ;;  %v3620_v28 = vsel %vm3556_vm11, %v6356_v33, %v3588_v12 }
 0x29b   :  { %3712 = vadd.xlane.f32.xlu1 %v3711_v8  ;;  %v3667_v29 = vmul.f32 %v3635_v34, %v3619_v49  ;;  %v3668_v59 = vmul.f32 %v3636_v26, %v3620_v28  ;;  %v3463_v15 = vmul.f32 %v6277_v35, %v3419_v18  ;;  %v3464_v20 = vmul.f32 %v6285_v43, %v3420_v56 }
 0x29c   :  { %v3687_v36 = vadd.f32 %v3650_v16, %v3649_v27  ;;  %v12_v35 = vstv %s6510_s6 }
 0x29d   :  { %v3714_v11 = vadd.f32 %v3668_v59, %v3667_v29  ;;  %v3507_v60 = vadd.f32 %v6282_v38, %v3463_v15  ;;  %v3508_v25 = vadd.f32 %v6288_v5, %v3464_v20  ;;  %13 = vst [vmem:[#allocation2] sm:$0x1] %v12_v35 }
 0x29e   :  { %3688 = vadd.xlane.f32.xlu0 %v3687_v36 }
 0x29f   :  { %3715 = vadd.xlane.f32.xlu1 %v3714_v11  ;;  %vm3539_vm14 = vcmp.gt.f32.partialorder %v3507_v60, 0.0  ;;  %vm3540_vm15 = vcmp.gt.f32.partialorder %v3508_v25, 0.0  ;;  %v3571_v52 = vmul.f32 0.2, %v3507_v60  ;;  %v3572_v14 = vmul.f32 0.2, %v3508_v25 }
 0x2a1   :  { %v3603_v33 = vsel %vm3539_vm14, %v3507_v60, %v3571_v52  ;;  %v3604_v30 = vsel %vm3540_vm15, %v3508_v25, %v3572_v14 }
 0x2a2   :  { %v3651_v32 = vmul.f32 %v3635_v34, %v3603_v33  ;;  %v3652_v44 = vmul.f32 %v3636_v26, %v3604_v30 }
 0x2a4   :  { %v3690_v45 = vadd.f32 %v3652_v44, %v3651_v32  ;;  %v3743_v12 = vld [vmem:[#allocation2] sm:$0x1] }
 0x2a6   :  { %3691 = vadd.xlane.f32.xlu0 %v3690_v45 }
 0x306   :  { %v3695_v38 = vpop.xlane.xlu1 %3694  ;;  %v3671_v43 = vpop.xlane.xlu0 %3670 }
 0x30a   :  { %v3698_v5 = vpop.xlane.xlu1 %3697  ;;  %v3674_v62 = vpop.xlane.xlu0 %3673 }
 0x30b   :  { %v3730_v50 = vadd.f32 %v3698_v5, %v3695_v38  ;;  %v3717_v46 = vadd.f32 %v3674_v62, %v3671_v43 }
 0x30e   :  { %v3701_v31 = vpop.xlane.xlu1 %3700 }
 0x30f   :  { %v3731_v21 = vadd.f32 %v3730_v50, %v3701_v31 }
 0x311   :  { %v3677_v54 = vpop.xlane.xlu0 %3676 }
 0x312   :  { %v3718_v3 = vadd.f32 %v3717_v46, %v3677_v54 }
 0x313   :  { %v3704_v2 = vpop.xlane.xlu1 %3703 }
 0x314   :  { %v3732_v58 = vadd.f32 %v3731_v21, %v3704_v2 }
 0x315   :  { %v3680_v39 = vpop.xlane.xlu0 %3679 }
 0x316   :  { %v3719_v61 = vadd.f32 %v3718_v3, %v3680_v39 }
 0x319   :  { %v3707_v24 = vpop.xlane.xlu1 %3706 }
 0x31a   :  { %v3733_v4 = vadd.f32 %v3732_v58, %v3707_v24 }
 0x31d   :  { %v3683_v13 = vpop.xlane.xlu0 %3682 }
 0x31e   :  { %v3720_v47 = vadd.f32 %v3719_v61, %v3683_v13 }
 0x320   :  { %v3710_v23 = vpop.xlane.xlu1 %3709 }
 0x321   :  { %v3734_v37 = vadd.f32 %v3733_v4, %v3710_v23 }
 0x325   :  { %v3686_v48 = vpop.xlane.xlu0 %3685 }
 0x326   :  { %v3721_v55 = vadd.f32 %v3720_v47, %v3686_v48 }
 0x328   :  { %v3713_v6 = vpop.xlane.xlu1 %3712 }
 0x329   :  { %v3735_v10 = vadd.f32 %v3734_v37, %v3713_v6 }
 0x32b   :  { %v3689_v0 = vpop.xlane.xlu0 %3688 }
 0x32c   :  { %v3716_v17 = vpop.xlane.xlu1 %3715  ;;  %v3722_v51 = vadd.f32 %v3721_v55, %v3689_v0 }
 0x32d   :  { %v3736_v40 = vadd.f32 %v3735_v10, %v3716_v17 }
 0x32f   :  { %v3737_v7 = vrot.slane %v3736_v40, 4 }
 0x331   :  { %v3738_v22 = vadd.f32 %v3737_v7, %v3736_v40 }
 0x333   :  { %v3739_v1 = vrot.slane %v3738_v22, 2  ;;  %v3692_v53 = vpop.xlane.xlu0 %3691 }
 0x334   :  { %v3723_v57 = vadd.f32 %v3722_v51, %v3692_v53 }
 0x335   :  { %v3740_v42 = vadd.f32 %v3739_v1, %v3738_v22 }
 0x336   :  { %v3724_v9 = vrot.slane %v3723_v57, 4 }
 0x337   :  { %v3741_v63 = vrot.slane %v3740_v42, 1 }
 0x338   :  { %v3725_v34 = vadd.f32 %v3724_v9, %v3723_v57 }
 0x339   :  { %v3742_v26 = vadd.f32 %v3741_v63, %v3740_v42 }
 0x33a   :  { %v3726_v18 = vrot.slane %v3725_v34, 2 }
 0x33b   :  { %v3745_v56 = vadd.f32 %v3743_v12, %v3742_v26 }
 0x33c   :  { %v3727_v8 = vadd.f32 %v3726_v18, %v3725_v34 }
 0x33d   :  { %v3747_v41 = vsub.f32 0.0, %v3745_v56 }
 0x33e   :  { %v3728_v19 = vrot.slane %v3727_v8, 1 }
 0x33f   :  { %v3750_v27 = vmul.f32 1.442695, %v3747_v41 }
 0x340   :  { %v3729_v16 = vadd.f32 %v3728_v19, %v3727_v8 }
 0x341   :  { %4793 = vpow2.f32 %v3750_v27 }
 0x342   :  { %v3744_v49 = vadd.f32 %v3743_v12, %v3729_v16 }
 0x344   :  { %v3746_v28 = vsub.f32 0.0, %v3744_v49 }
 0x346   :  { %v3748_v29 = vmul.f32 1.442695, %v3746_v28 }
 0x348   :  { %4795 = vpow2.f32 %v3748_v29 }
 0x34b   :  { %v4794_v59 = vpop.eup %4793 }
 0x34c   :  { %v3753_v15 = vadd.f32 1.0, %v4794_v59 }
 0x34e   :  { %4797 = vrcp.f32 %v3753_v15 }
 0x352   :  { %v4796_v20 = vpop.eup %4795 }
 0x353   :  { %v3752_v36 = vadd.f32 1.0, %v4796_v20 }
 0x355   :  { %4799 = vrcp.f32 %v3752_v36 }
 0x358   :  { %v4798_v11 = vpop.eup %4797 }
 0x359   :  { %3760 = vst.msk [vmem:[%s6511_s7 + $0x1] sm:$0x1] %vm3758_vm0, %v4798_v11 }
 0x35f   :  { %v4800_v60 = vpop.eup %4799 }
 0x360   :  { %3759 = vst.msk [vmem:[%s6511_s7] sm:$0x1] %vm3758_vm0, %v4800_v60 }

</bundles_post_ra>
